<compile_context>
chip_gen: v6e
topology: v6e:2x2x1
jax: 0.10.0
libtpu: 0.0.40
codegen_flags: <defaults>
</compile_context>

<pallas_src>
import jax
import jax.numpy as jnp
from jax.experimental import pallas as pl
from jax.experimental.pallas import tpu as pltpu


HIDDEN_DIM = 128      # hard-coded in the PyTorch module
NUM_LAYERS = 3        # hard-coded in the PyTorch module


def _round_up(x, m):
    return (x + m - 1) // m * m


def _pick_tile_v(vp):
    """Largest lane-dense fc output tile that divides the padded vocab."""
    for t in (1024, 512, 256, 128):
        if vp % t == 0:
            return t
    return vp


# ---------------------------------------------------------------------------
# Fused kernel: 3 LSTM layers (grid step 0 only) + V-tiled final Linear.
# PyTorch gate order is (i, f, g, o); bias = b_ih + b_hh pre-combined and
# folded into the hoisted input projection.
# ---------------------------------------------------------------------------
def fused_lstm_fc_kernel(
    x_ref,                          # (T, Bp, Ep)  f32 time-major embedded input
    wih0_ref, whh0_ref, b0_ref,     # layer 0: (Ep,4H) bf16, (H,4H) bf16, (1,4H) f32
    wih1_ref, whh1_ref, b1_ref,     # layer 1: (H,4H)  bf16, (H,4H) bf16, (1,4H) f32
    wih2_ref, whh2_ref, b2_ref,     # layer 2: (H,4H)  bf16, (H,4H) bf16, (1,4H) f32
    h0_ref, c0_ref,                 # (L, Bp, H) f32
    fcw_ref, fcb_ref,               # (H, TILE_V) bf16, (1, TILE_V) f32   [V-tiled]
    out_ref,                        # (T, Bp, TILE_V) f32 time-major logits tile
    hN_ref, cN_ref,                 # (L, Bp, H) f32
    xw_ref,                         # scratch (T, Bp, 4H) f32: hoisted x@W_ih + bias
    ytm_ref,                        # scratch (T, Bp, H)  f32: layer output, time-major
    yflat_ref,                      # scratch (T*Bp, H)  bf16: last-layer out for fc
):
    T, B, _ = x_ref.shape
    H = whh0_ref.shape[0]

    def sigmoid(z):
        # One EUP tanh per gate nonlinearity (instead of exp + reciprocal).
        return 0.5 * jnp.tanh(0.5 * z) + 0.5

    # ------------------------------------------------------------------ LSTM
    # The recurrence runs once; its results live in scratch (persists across
    # grid iterations) and in the resident hN/cN output blocks.
    @pl.when(pl.program_id(0) == 0)
    def _run_lstm():
        layers = ((wih0_ref, whh0_ref, b0_ref),
                  (wih1_ref, whh1_ref, b1_ref),
                  (wih2_ref, whh2_ref, b2_ref))

        for l, (wih_ref, whh_ref, b_ref) in enumerate(layers):
            # ---- Hoisted, time-independent input projection (one big bf16
            #      MXU matmul per layer) with the gate bias folded in.
            x_in = x_ref[...] if l == 0 else ytm_ref[...]          # (T,B,D_in) f32
            d_in = x_in.shape[-1]
            x_flat = x_in.reshape(T * B, d_in).astype(jnp.bfloat16)
            xw = jnp.dot(x_flat, wih_ref[...],
                         preferred_element_type=jnp.float32)       # (T*B, 4H) f32
            xw_ref[...] = (xw + b_ref[...]).reshape(T, B, 4 * H)

            whh = whh_ref[...]                                     # (H,4H) bf16
            h = h0_ref[l]                                          # (B, H) f32
            c = c0_ref[l]                                          # (B, H) f32

            # ---- Fully unrolled time loop (T is small/static). Critical path
            #      carries exactly one bf16 MXU matmul + gate math per step.
            for t in range(T):
                gates = xw_ref[t] + jnp.dot(
                    h.astype(jnp.bfloat16), whh,
                    preferred_element_type=jnp.float32)            # (B, 4H) f32
                i_g = sigmoid(gates[:, 0 * H:1 * H])
                f_g = sigmoid(gates[:, 1 * H:2 * H])
                g_g = jnp.tanh(gates[:, 2 * H:3 * H])
                o_g = sigmoid(gates[:, 3 * H:4 * H])
                c = f_g * c + i_g * g_g
                h = o_g * jnp.tanh(c)
                ytm_ref[t] = h                                     # full (Bp,H) tile store

            hN_ref[l] = h
            cN_ref[l] = c

        # Stash the last layer's output once, flat + bf16, for the fc tiles.
        yflat_ref[...] = ytm_ref[...].reshape(T * B, H).astype(jnp.bfloat16)

    # -------------------------------------------------------------------- fc
    # Every grid step: one V-tile of the final Linear (bf16 MXU, f32 acc),
    # lane-dense full-tile store of the time-major logits.
    tile_v = out_ref.shape[2]
    logits = (jnp.dot(yflat_ref[...], fcw_ref[...],
                      preferred_element_type=jnp.float32)
              + fcb_ref[...])                                      # (T*B, TILE_V) f32
    out_ref[...] = logits.reshape(T, B, tile_v)


# ---------------------------------------------------------------------------
# One-time parameter preparation (padding + bf16 cast), OUTSIDE the jitted fwd.
# ---------------------------------------------------------------------------
def prepare_params(params):
    E = params["w_ih_0"].shape[0]
    V = params["fc_w_t"].shape[1]
    Ep = _round_up(E, 128)
    Vp = _round_up(V, 128)
    prep = {
        "embedding": params["embedding"],                               # f32, gather source
        "w_ih_0": jnp.pad(params["w_ih_0"],
                          ((0, Ep - E), (0, 0))).astype(jnp.bfloat16),  # zero rows: no-op
        "w_ih_1": params["w_ih_1"].astype(jnp.bfloat16),
        "w_ih_2": params["w_ih_2"].astype(jnp.bfloat16),
        "w_hh_0": params["w_hh_0"].astype(jnp.bfloat16),
        "w_hh_1": params["w_hh_1"].astype(jnp.bfloat16),
        "w_hh_2": params["w_hh_2"].astype(jnp.bfloat16),
        "b_0": params["b_0"],
        "b_1": params["b_1"],
        "b_2": params["b_2"],
        "fc_w_t": jnp.pad(params["fc_w_t"],
                          ((0, 0), (0, Vp - V))).astype(jnp.bfloat16),
        "fc_b": jnp.pad(params["fc_b"], ((0, 0), (0, Vp - V))),
    }
    return prep


# ---------------------------------------------------------------------------
# Full model forward (mirrors Model.forward)
# ---------------------------------------------------------------------------
def model_forward(prep, x_ids, hidden, *, n_vocab):
    """x_ids: (B, T) int32 token ids; hidden = (h0, c0), each (num_layers, B, H)."""
    h0, c0 = hidden
    B, T = x_ids.shape
    L, _, H = h0.shape
    V = n_vocab
    Ep = prep["w_ih_0"].shape[0]
    Vp = prep["fc_w_t"].shape[1]

    Bp = _round_up(max(B, 8), 8)          # f32 sublane multiple
    TILE_V = _pick_tile_v(Vp)
    n_vt = Vp // TILE_V

    # Embedding gather (glue) done directly time-major: no (B,T,E)->(T,B,E) transpose.
    emb_tm = jnp.take(prep["embedding"], x_ids.T, axis=0)             # (T, B, E) f32
    E = emb_tm.shape[-1]
    x_tm = jnp.pad(emb_tm, ((0, 0), (0, Bp - B), (0, Ep - E)))        # (T, Bp, Ep)

    h0_p = jnp.pad(h0, ((0, 0), (0, Bp - B), (0, 0)))
    c0_p = jnp.pad(c0, ((0, 0), (0, Bp - B), (0, 0)))

    inputs = (x_tm,
              prep["w_ih_0"], prep["w_hh_0"], prep["b_0"],
              prep["w_ih_1"], prep["w_hh_1"], prep["b_1"],
              prep["w_ih_2"], prep["w_hh_2"], prep["b_2"],
              h0_p, c0_p, prep["fc_w_t"], prep["fc_b"])

    def const_spec(shape):
        n = len(shape)
        return pl.BlockSpec(shape, lambda j, n=n: (0,) * n)           # resident block

    in_specs = [
        const_spec(x_tm.shape),
        const_spec(prep["w_ih_0"].shape), const_spec(prep["w_hh_0"].shape),
        const_spec(prep["b_0"].shape),
        const_spec(prep["w_ih_1"].shape), const_spec(prep["w_hh_1"].shape),
        const_spec(prep["b_1"].shape),
        const_spec(prep["w_ih_2"].shape), const_spec(prep["w_hh_2"].shape),
        const_spec(prep["b_2"].shape),
        const_spec(h0_p.shape), const_spec(c0_p.shape),
        pl.BlockSpec((H, TILE_V), lambda j: (0, j)),                  # fc_w V-tile
        pl.BlockSpec((1, TILE_V), lambda j: (0, j)),                  # fc_b V-tile
    ]
    out_specs = (
        pl.BlockSpec((T, Bp, TILE_V), lambda j: (0, 0, j)),           # logits V-tile
        pl.BlockSpec((L, Bp, H), lambda j: (0, 0, 0)),                # h_n (resident)
        pl.BlockSpec((L, Bp, H), lambda j: (0, 0, 0)),                # c_n (resident)
    )
    out_shapes = (
        jax.ShapeDtypeStruct((T, Bp, Vp), jnp.float32),
        jax.ShapeDtypeStruct((L, Bp, H), jnp.float32),
        jax.ShapeDtypeStruct((L, Bp, H), jnp.float32),
    )

    grid_spec = pltpu.PrefetchScalarGridSpec(
        num_scalar_prefetch=0,
        grid=(n_vt,),
        in_specs=in_specs,
        out_specs=out_specs,
        scratch_shapes=[
            pltpu.VMEM((T, Bp, 4 * H), jnp.float32),    # hoisted x @ W_ih + bias
            pltpu.VMEM((T, Bp, H), jnp.float32),        # time-major layer output
            pltpu.VMEM((T * Bp, H), jnp.bfloat16),      # flat bf16 last-layer out for fc
        ],
    )

    # Advisory cost estimate for XLA scheduling around the custom call.
    flops = (2 * T * Bp * Ep * 4 * H                  # layer-0 input projection
             + 2 * (L - 1) * T * Bp * H * 4 * H       # layer 1..L-1 input projections
             + 2 * L * T * Bp * H * 4 * H             # recurrent h @ W_hh
             + 2 * T * Bp * H * Vp)                   # fc
    transcendentals = 5 * L * T * Bp * H              # 5 tanh (3 sigmoid + 2 tanh) / step
    bytes_accessed = int(sum(int(a.size) * a.dtype.itemsize for a in inputs)
                         + 4 * (T * Bp * Vp + 2 * L * Bp * H))

    logits_tm, h_n, c_n = pl.pallas_call(
        fused_lstm_fc_kernel,
        out_shape=out_shapes,
        grid_spec=grid_spec,
        compiler_params=pltpu.CompilerParams(
            dimension_semantics=("arbitrary",),       # j>0 reads scratch written at j==0
            vmem_limit_bytes=32 * 1024 * 1024),
        cost_estimate=pl.CostEstimate(flops=flops,
                                      transcendentals=transcendentals,
                                      bytes_accessed=bytes_accessed),
    )(*inputs)

    # Time-major -> batch-major for the PyTorch (B, T, n_vocab) contract.
    out = jnp.transpose(logits_tm[:, :B, :V], (1, 0, 2))
    return out, (h_n[:, :B], c_n[:, :B])


# ---------------------------------------------------------------------------
# Deterministic parameter construction (shapes from Model.__init__)
# ---------------------------------------------------------------------------
def init_params(key, n_vocab, embedding_dim, hidden_dim, num_layers):
    params = {}
    keys = jax.random.split(key, 3 + 4 * num_layers)
    k_iter = iter(keys)

    # "glove"-style pretrained embedding matrix (synthetic, deterministic).
    params["embedding"] = jax.random.normal(
        next(k_iter), (n_vocab, embedding_dim), jnp.float32) * 0.1
    params["embedding"] = params["embedding"].at[0].set(0.0)   # padding_idx=0

    k = 1.0 / jnp.sqrt(jnp.float32(hidden_dim))
    for l in range(num_layers):
        d_in = embedding_dim if l == 0 else hidden_dim
        # Stored pre-transposed as (D_in, 4H)/(H, 4H); gate order i,f,g,o.
        params[f"w_ih_{l}"] = jax.random.uniform(
            next(k_iter), (d_in, 4 * hidden_dim), jnp.float32, -k, k)
        params[f"w_hh_{l}"] = jax.random.uniform(
            next(k_iter), (hidden_dim, 4 * hidden_dim), jnp.float32, -k, k)
        b_ih = jax.random.uniform(
            next(k_iter), (4 * hidden_dim,), jnp.float32, -k, k)
        b_hh = jax.random.uniform(
            next(k_iter), (4 * hidden_dim,), jnp.float32, -k, k)
        params[f"b_{l}"] = (b_ih + b_hh).reshape(1, 4 * hidden_dim)

    kf = 1.0 / jnp.sqrt(jnp.float32(hidden_dim))
    # nn.Linear(hidden_dim, n_vocab): weight (V, H); store transposed (H, V).
    params["fc_w_t"] = jax.random.uniform(
        next(k_iter), (hidden_dim, n_vocab), jnp.float32, -kf, kf)
    params["fc_b"] = jax.random.uniform(
        next(k_iter), (1, n_vocab), jnp.float32, -kf, kf)
    return params


def init_hidden(batch_size, hidden_dim=HIDDEN_DIM, num_layers=NUM_LAYERS):
    h0 = jnp.zeros((num_layers, batch_size, hidden_dim), jnp.float32)
    c0 = jnp.zeros((num_layers, batch_size, hidden_dim), jnp.float32)
    return h0, c0


if __name__ == "__main__":
    # Small deterministic example shapes consistent with the module:
    B = 2            # batch
    T = 8            # sequence length
    E = 100          # embedding_dim (module uses glove.6B.100d)
    V = 750          # n_vocab (len(uniq_words); synthetic) -> 3 fc V-tiles of 256
    H = HIDDEN_DIM   # 128, hard-coded in the module

    key = jax.random.PRNGKey(0)
    k_param, k_ids = jax.random.split(key)

    params = init_params(k_param, n_vocab=V, embedding_dim=E,
                         hidden_dim=H, num_layers=NUM_LAYERS)
    prep = prepare_params(params)        # one-time pad + bf16 cast (outside jit)
    x_ids = jax.random.randint(k_ids, (B, T), 0, V, dtype=jnp.int32)
    hidden = init_hidden(B)

    fwd = jax.jit(model_forward, static_argnames=("n_vocab",))
    out, (h_n, c_n) = fwd(prep, x_ids, hidden, n_vocab=V)
    jax.block_until_ready((out, h_n, c_n))

    assert out.shape == (B, T, V)
    assert h_n.shape == (NUM_LAYERS, B, H)
    assert c_n.shape == (NUM_LAYERS, B, H)
    print("KERNEL_OK")
</pallas_src>

<mosaic_0001>
module attributes {stable_mosaic.version = 11 : i64} {
  func.func @fused_lstm_fc_kernel(%arg0: i32, %arg1: memref<8x8x128xf32, #tpu.memory_space<vmem>>, %arg2: memref<128x512xbf16, #tpu.memory_space<vmem>>, %arg3: memref<128x512xbf16, #tpu.memory_space<vmem>>, %arg4: memref<1x512xf32, #tpu.memory_space<vmem>>, %arg5: memref<128x512xbf16, #tpu.memory_space<vmem>>, %arg6: memref<128x512xbf16, #tpu.memory_space<vmem>>, %arg7: memref<1x512xf32, #tpu.memory_space<vmem>>, %arg8: memref<128x512xbf16, #tpu.memory_space<vmem>>, %arg9: memref<128x512xbf16, #tpu.memory_space<vmem>>, %arg10: memref<1x512xf32, #tpu.memory_space<vmem>>, %arg11: memref<3x8x128xf32, #tpu.memory_space<vmem>>, %arg12: memref<3x8x128xf32, #tpu.memory_space<vmem>>, %arg13: memref<128x256xbf16, #tpu.memory_space<vmem>>, %arg14: memref<1x256xf32, #tpu.memory_space<vmem>>, %arg15: memref<8x8x256xf32, #tpu.memory_space<vmem>>, %arg16: memref<3x8x128xf32, #tpu.memory_space<vmem>>, %arg17: memref<3x8x128xf32, #tpu.memory_space<vmem>>, %arg18: memref<8x8x512xf32, #tpu.memory_space<vmem>>, %arg19: memref<8x8x128xf32, #tpu.memory_space<vmem>>, %arg20: memref<64x128xbf16, #tpu.memory_space<vmem>>) attributes {dimension_semantics = [#tpu.dimension_semantics<arbitrary>], iteration_bounds = array<i64: 3>, scalar_prefetch = 0 : i64, scratch_operands = 3 : i64, tpu.core_type = #tpu.core_type<tc>, window_params = [{pipeline_mode = #tpu.pipeline_mode<synchronous>, transform_indices = @transform_0, window_bounds = array<i64: 8, 8, 128>}, {pipeline_mode = #tpu.pipeline_mode<synchronous>, transform_indices = @transform_1, window_bounds = array<i64: 128, 512>}, {pipeline_mode = #tpu.pipeline_mode<synchronous>, transform_indices = @transform_2, window_bounds = array<i64: 128, 512>}, {pipeline_mode = #tpu.pipeline_mode<synchronous>, transform_indices = @transform_3, window_bounds = array<i64: 1, 512>}, {pipeline_mode = #tpu.pipeline_mode<synchronous>, transform_indices = @transform_4, window_bounds = array<i64: 128, 512>}, {pipeline_mode = #tpu.pipeline_mode<synchronous>, transform_indices = @transform_5, window_bounds = array<i64: 128, 512>}, {pipeline_mode = #tpu.pipeline_mode<synchronous>, transform_indices = @transform_6, window_bounds = array<i64: 1, 512>}, {pipeline_mode = #tpu.pipeline_mode<synchronous>, transform_indices = @transform_7, window_bounds = array<i64: 128, 512>}, {pipeline_mode = #tpu.pipeline_mode<synchronous>, transform_indices = @transform_8, window_bounds = array<i64: 128, 512>}, {pipeline_mode = #tpu.pipeline_mode<synchronous>, transform_indices = @transform_9, window_bounds = array<i64: 1, 512>}, {pipeline_mode = #tpu.pipeline_mode<synchronous>, transform_indices = @transform_10, window_bounds = array<i64: 3, 8, 128>}, {pipeline_mode = #tpu.pipeline_mode<synchronous>, transform_indices = @transform_11, window_bounds = array<i64: 3, 8, 128>}, {transform_indices = @transform_12, window_bounds = array<i64: 128, 256>}, {transform_indices = @transform_13, window_bounds = array<i64: 1, 256>}, {transform_indices = @transform_14, window_bounds = array<i64: 8, 8, 256>}, {pipeline_mode = #tpu.pipeline_mode<synchronous>, transform_indices = @transform_15, window_bounds = array<i64: 3, 8, 128>}, {pipeline_mode = #tpu.pipeline_mode<synchronous>, transform_indices = @transform_16, window_bounds = array<i64: 3, 8, 128>}]} {
    %c0_i32 = arith.constant 0 : i32
    %0 = arith.cmpi eq, %arg0, %c0_i32 : i32
    %1 = arith.extui %0 : i1 to i32
    %c0_i32_0 = arith.constant 0 : i32
    %2 = arith.cmpi ne, %1, %c0_i32_0 : i32
    scf.if %2 {
      %c0_9 = arith.constant 0 : index
      %c0_10 = arith.constant 0 : index
      %c0_11 = arith.constant 0 : index
      %11 = vector.load %arg1[%c0_9, %c0_10, %c0_11] : memref<8x8x128xf32, #tpu.memory_space<vmem>>, vector<8x8x128xf32>
      %12 = vector.shape_cast %11 : vector<8x8x128xf32> to vector<64x128xf32>
      %13 = arith.truncf %12 : vector<64x128xf32> to vector<64x128xbf16>
      %c0_12 = arith.constant 0 : index
      %c0_13 = arith.constant 0 : index
      %14 = vector.load %arg2[%c0_12, %c0_13] : memref<128x512xbf16, #tpu.memory_space<vmem>>, vector<128x512xbf16>
      %cst_14 = arith.constant dense<0.000000e+00> : vector<64x512xf32>
      %15 = tpu.matmul %13, %14, %cst_14 {dimension_numbers = #tpu.dot_dimension_numbers<[1], [0], [0], [1], [0, 0, 1, 1], [], []>} : vector<64x128xbf16>, vector<128x512xbf16>, vector<64x512xf32> -> vector<64x512xf32>
      %c0_15 = arith.constant 0 : index
      %c0_16 = arith.constant 0 : index
      %16 = vector.load %arg4[%c0_15, %c0_16] : memref<1x512xf32, #tpu.memory_space<vmem>>, vector<1x512xf32>
      %17 = vector.broadcast %16 : vector<1x512xf32> to vector<64x512xf32>
      %18 = arith.addf %15, %17 : vector<64x512xf32>
      %19 = vector.shape_cast %18 : vector<64x512xf32> to vector<8x8x512xf32>
      %c0_17 = arith.constant 0 : index
      %c0_18 = arith.constant 0 : index
      %c0_19 = arith.constant 0 : index
      %20 = vector.load %arg18[%c0_17, %c0_18, %c0_19] : memref<8x8x512xf32, #tpu.memory_space<vmem>>, vector<8x8x512xf32>
      tpu.vector_store %arg18[%c0_17, %c0_18, %c0_19], %19 {strides = array<i32>} : memref<8x8x512xf32, #tpu.memory_space<vmem>>, vector<8x8x512xf32>,
      %c0_20 = arith.constant 0 : index
      %c0_21 = arith.constant 0 : index
      %21 = vector.load %arg3[%c0_20, %c0_21] : memref<128x512xbf16, #tpu.memory_space<vmem>>, vector<128x512xbf16>
      %c0_22 = arith.constant 0 : index
      %c0_23 = arith.constant 0 : index
      %c0_24 = arith.constant 0 : index
      %22 = vector.load %arg11[%c0_22, %c0_23, %c0_24] : memref<3x8x128xf32, #tpu.memory_space<vmem>>, vector<1x8x128xf32>
      %23 = vector.shape_cast %22 : vector<1x8x128xf32> to vector<8x128xf32>
      %c0_25 = arith.constant 0 : index
      %c0_26 = arith.constant 0 : index
      %c0_27 = arith.constant 0 : index
      %24 = vector.load %arg12[%c0_25, %c0_26, %c0_27] : memref<3x8x128xf32, #tpu.memory_space<vmem>>, vector<1x8x128xf32>
      %25 = vector.shape_cast %24 : vector<1x8x128xf32> to vector<8x128xf32>
      %c0_28 = arith.constant 0 : index
      %c0_29 = arith.constant 0 : index
      %c0_30 = arith.constant 0 : index
      %26 = vector.load %arg18[%c0_28, %c0_29, %c0_30] : memref<8x8x512xf32, #tpu.memory_space<vmem>>, vector<1x8x512xf32>
      %27 = vector.shape_cast %26 : vector<1x8x512xf32> to vector<8x512xf32>
      %28 = arith.truncf %23 : vector<8x128xf32> to vector<8x128xbf16>
      %cst_31 = arith.constant dense<0.000000e+00> : vector<8x512xf32>
      %29 = tpu.matmul %28, %21, %cst_31 {dimension_numbers = #tpu.dot_dimension_numbers<[1], [0], [0], [1], [0, 0, 1, 1], [], []>} : vector<8x128xbf16>, vector<128x512xbf16>, vector<8x512xf32> -> vector<8x512xf32>
      %30 = arith.addf %27, %29 : vector<8x512xf32>
      %31 = vector.extract_strided_slice %30 {offsets = [0, 0], sizes = [8, 128], strides = [1, 1]} : vector<8x512xf32> to vector<8x128xf32>
      %cst_32 = arith.constant 5.000000e-01 : f32
      %32 = vector.broadcast %cst_32 : f32 to vector<8x128xf32>
      %33 = arith.mulf %32, %31 : vector<8x128xf32>
      %34 = math.tanh %33 : vector<8x128xf32>
      %cst_33 = arith.constant 5.000000e-01 : f32
      %35 = vector.broadcast %cst_33 : f32 to vector<8x128xf32>
      %36 = arith.mulf %35, %34 : vector<8x128xf32>
      %cst_34 = arith.constant 5.000000e-01 : f32
      %37 = vector.broadcast %cst_34 : f32 to vector<8x128xf32>
      %38 = arith.addf %36, %37 : vector<8x128xf32>
      %39 = vector.extract_strided_slice %30 {offsets = [0, 128], sizes = [8, 128], strides = [1, 1]} : vector<8x512xf32> to vector<8x128xf32>
      %cst_35 = arith.constant 5.000000e-01 : f32
      %40 = vector.broadcast %cst_35 : f32 to vector<8x128xf32>
      %41 = arith.mulf %40, %39 : vector<8x128xf32>
      %42 = math.tanh %41 : vector<8x128xf32>
      %cst_36 = arith.constant 5.000000e-01 : f32
      %43 = vector.broadcast %cst_36 : f32 to vector<8x128xf32>
      %44 = arith.mulf %43, %42 : vector<8x128xf32>
      %cst_37 = arith.constant 5.000000e-01 : f32
      %45 = vector.broadcast %cst_37 : f32 to vector<8x128xf32>
      %46 = arith.addf %44, %45 : vector<8x128xf32>
      %47 = vector.extract_strided_slice %30 {offsets = [0, 256], sizes = [8, 128], strides = [1, 1]} : vector<8x512xf32> to vector<8x128xf32>
      %48 = math.tanh %47 : vector<8x128xf32>
      %49 = vector.extract_strided_slice %30 {offsets = [0, 384], sizes = [8, 128], strides = [1, 1]} : vector<8x512xf32> to vector<8x128xf32>
      %cst_38 = arith.constant 5.000000e-01 : f32
      %50 = vector.broadcast %cst_38 : f32 to vector<8x128xf32>
      %51 = arith.mulf %50, %49 : vector<8x128xf32>
      %52 = math.tanh %51 : vector<8x128xf32>
      %cst_39 = arith.constant 5.000000e-01 : f32
      %53 = vector.broadcast %cst_39 : f32 to vector<8x128xf32>
      %54 = arith.mulf %53, %52 : vector<8x128xf32>
      %cst_40 = arith.constant 5.000000e-01 : f32
      %55 = vector.broadcast %cst_40 : f32 to vector<8x128xf32>
      %56 = arith.addf %54, %55 : vector<8x128xf32>
      %57 = arith.mulf %46, %25 : vector<8x128xf32>
      %58 = arith.mulf %38, %48 : vector<8x128xf32>
      %59 = arith.addf %57, %58 : vector<8x128xf32>
      %60 = math.tanh %59 : vector<8x128xf32>
      %61 = arith.mulf %56, %60 : vector<8x128xf32>
      %c0_41 = arith.constant 0 : index
      %c0_42 = arith.constant 0 : index
      %c0_43 = arith.constant 0 : index
      %62 = vector.load %arg19[%c0_41, %c0_42, %c0_43] : memref<8x8x128xf32, #tpu.memory_space<vmem>>, vector<1x8x128xf32>
      %63 = vector.shape_cast %62 : vector<1x8x128xf32> to vector<8x128xf32>
      %64 = vector.shape_cast %61 : vector<8x128xf32> to vector<1x8x128xf32>
      tpu.vector_store %arg19[%c0_41, %c0_42, %c0_43], %64 {strides = array<i32>} : memref<8x8x128xf32, #tpu.memory_space<vmem>>, vector<1x8x128xf32>,
      %c1 = arith.constant 1 : index
      %c0_44 = arith.constant 0 : index
      %c0_45 = arith.constant 0 : index
      %65 = vector.load %arg18[%c1, %c0_44, %c0_45] : memref<8x8x512xf32, #tpu.memory_space<vmem>>, vector<1x8x512xf32>
      %66 = vector.shape_cast %65 : vector<1x8x512xf32> to vector<8x512xf32>
      %67 = arith.truncf %61 : vector<8x128xf32> to vector<8x128xbf16>
      %cst_46 = arith.constant dense<0.000000e+00> : vector<8x512xf32>
      %68 = tpu.matmul %67, %21, %cst_46 {dimension_numbers = #tpu.dot_dimension_numbers<[1], [0], [0], [1], [0, 0, 1, 1], [], []>} : vector<8x128xbf16>, vector<128x512xbf16>, vector<8x512xf32> -> vector<8x512xf32>
      %69 = arith.addf %66, %68 : vector<8x512xf32>
      %70 = vector.extract_strided_slice %69 {offsets = [0, 0], sizes = [8, 128], strides = [1, 1]} : vector<8x512xf32> to vector<8x128xf32>
      %cst_47 = arith.constant 5.000000e-01 : f32
      %71 = vector.broadcast %cst_47 : f32 to vector<8x128xf32>
      %72 = arith.mulf %71, %70 : vector<8x128xf32>
      %73 = math.tanh %72 : vector<8x128xf32>
      %cst_48 = arith.constant 5.000000e-01 : f32
      %74 = vector.broadcast %cst_48 : f32 to vector<8x128xf32>
      %75 = arith.mulf %74, %73 : vector<8x128xf32>
      %cst_49 = arith.constant 5.000000e-01 : f32
      %76 = vector.broadcast %cst_49 : f32 to vector<8x128xf32>
      %77 = arith.addf %75, %76 : vector<8x128xf32>
      %78 = vector.extract_strided_slice %69 {offsets = [0, 128], sizes = [8, 128], strides = [1, 1]} : vector<8x512xf32> to vector<8x128xf32>
      %cst_50 = arith.constant 5.000000e-01 : f32
      %79 = vector.broadcast %cst_50 : f32 to vector<8x128xf32>
      %80 = arith.mulf %79, %78 : vector<8x128xf32>
      %81 = math.tanh %80 : vector<8x128xf32>
      %cst_51 = arith.constant 5.000000e-01 : f32
      %82 = vector.broadcast %cst_51 : f32 to vector<8x128xf32>
      %83 = arith.mulf %82, %81 : vector<8x128xf32>
      %cst_52 = arith.constant 5.000000e-01 : f32
      %84 = vector.broadcast %cst_52 : f32 to vector<8x128xf32>
      %85 = arith.addf %83, %84 : vector<8x128xf32>
      %86 = vector.extract_strided_slice %69 {offsets = [0, 256], sizes = [8, 128], strides = [1, 1]} : vector<8x512xf32> to vector<8x128xf32>
      %87 = math.tanh %86 : vector<8x128xf32>
      %88 = vector.extract_strided_slice %69 {offsets = [0, 384], sizes = [8, 128], strides = [1, 1]} : vector<8x512xf32> to vector<8x128xf32>
      %cst_53 = arith.constant 5.000000e-01 : f32
      %89 = vector.broadcast %cst_53 : f32 to vector<8x128xf32>
      %90 = arith.mulf %89, %88 : vector<8x128xf32>
      %91 = math.tanh %90 : vector<8x128xf32>
      %cst_54 = arith.constant 5.000000e-01 : f32
      %92 = vector.broadcast %cst_54 : f32 to vector<8x128xf32>
      %93 = arith.mulf %92, %91 : vector<8x128xf32>
      %cst_55 = arith.constant 5.000000e-01 : f32
      %94 = vector.broadcast %cst_55 : f32 to vector<8x128xf32>
      %95 = arith.addf %93, %94 : vector<8x128xf32>
      %96 = arith.mulf %85, %59 : vector<8x128xf32>
      %97 = arith.mulf %77, %87 : vector<8x128xf32>
      %98 = arith.addf %96, %97 : vector<8x128xf32>
      %99 = math.tanh %98 : vector<8x128xf32>
      %100 = arith.mulf %95, %99 : vector<8x128xf32>
      %c1_56 = arith.constant 1 : index
      %c0_57 = arith.constant 0 : index
      %c0_58 = arith.constant 0 : index
      %101 = vector.load %arg19[%c1_56, %c0_57, %c0_58] : memref<8x8x128xf32, #tpu.memory_space<vmem>>, vector<1x8x128xf32>
      %102 = vector.shape_cast %101 : vector<1x8x128xf32> to vector<8x128xf32>
      %103 = vector.shape_cast %100 : vector<8x128xf32> to vector<1x8x128xf32>
      tpu.vector_store %arg19[%c1_56, %c0_57, %c0_58], %103 {strides = array<i32>} : memref<8x8x128xf32, #tpu.memory_space<vmem>>, vector<1x8x128xf32>,
      %c2 = arith.constant 2 : index
      %c0_59 = arith.constant 0 : index
      %c0_60 = arith.constant 0 : index
      %104 = vector.load %arg18[%c2, %c0_59, %c0_60] : memref<8x8x512xf32, #tpu.memory_space<vmem>>, vector<1x8x512xf32>
      %105 = vector.shape_cast %104 : vector<1x8x512xf32> to vector<8x512xf32>
      %106 = arith.truncf %100 : vector<8x128xf32> to vector<8x128xbf16>
      %cst_61 = arith.constant dense<0.000000e+00> : vector<8x512xf32>
      %107 = tpu.matmul %106, %21, %cst_61 {dimension_numbers = #tpu.dot_dimension_numbers<[1], [0], [0], [1], [0, 0, 1, 1], [], []>} : vector<8x128xbf16>, vector<128x512xbf16>, vector<8x512xf32> -> vector<8x512xf32>
      %108 = arith.addf %105, %107 : vector<8x512xf32>
      %109 = vector.extract_strided_slice %108 {offsets = [0, 0], sizes = [8, 128], strides = [1, 1]} : vector<8x512xf32> to vector<8x128xf32>
      %cst_62 = arith.constant 5.000000e-01 : f32
      %110 = vector.broadcast %cst_62 : f32 to vector<8x128xf32>
      %111 = arith.mulf %110, %109 : vector<8x128xf32>
      %112 = math.tanh %111 : vector<8x128xf32>
      %cst_63 = arith.constant 5.000000e-01 : f32
      %113 = vector.broadcast %cst_63 : f32 to vector<8x128xf32>
      %114 = arith.mulf %113, %112 : vector<8x128xf32>
      %cst_64 = arith.constant 5.000000e-01 : f32
      %115 = vector.broadcast %cst_64 : f32 to vector<8x128xf32>
      %116 = arith.addf %114, %115 : vector<8x128xf32>
      %117 = vector.extract_strided_slice %108 {offsets = [0, 128], sizes = [8, 128], strides = [1, 1]} : vector<8x512xf32> to vector<8x128xf32>
      %cst_65 = arith.constant 5.000000e-01 : f32
      %118 = vector.broadcast %cst_65 : f32 to vector<8x128xf32>
      %119 = arith.mulf %118, %117 : vector<8x128xf32>
      %120 = math.tanh %119 : vector<8x128xf32>
      %cst_66 = arith.constant 5.000000e-01 : f32
      %121 = vector.broadcast %cst_66 : f32 to vector<8x128xf32>
      %122 = arith.mulf %121, %120 : vector<8x128xf32>
      %cst_67 = arith.constant 5.000000e-01 : f32
      %123 = vector.broadcast %cst_67 : f32 to vector<8x128xf32>
      %124 = arith.addf %122, %123 : vector<8x128xf32>
      %125 = vector.extract_strided_slice %108 {offsets = [0, 256], sizes = [8, 128], strides = [1, 1]} : vector<8x512xf32> to vector<8x128xf32>
      %126 = math.tanh %125 : vector<8x128xf32>
      %127 = vector.extract_strided_slice %108 {offsets = [0, 384], sizes = [8, 128], strides = [1, 1]} : vector<8x512xf32> to vector<8x128xf32>
      %cst_68 = arith.constant 5.000000e-01 : f32
      %128 = vector.broadcast %cst_68 : f32 to vector<8x128xf32>
      %129 = arith.mulf %128, %127 : vector<8x128xf32>
      %130 = math.tanh %129 : vector<8x128xf32>
      %cst_69 = arith.constant 5.000000e-01 : f32
      %131 = vector.broadcast %cst_69 : f32 to vector<8x128xf32>
      %132 = arith.mulf %131, %130 : vector<8x128xf32>
      %cst_70 = arith.constant 5.000000e-01 : f32
      %133 = vector.broadcast %cst_70 : f32 to vector<8x128xf32>
      %134 = arith.addf %132, %133 : vector<8x128xf32>
      %135 = arith.mulf %124, %98 : vector<8x128xf32>
      %136 = arith.mulf %116, %126 : vector<8x128xf32>
      %137 = arith.addf %135, %136 : vector<8x128xf32>
      %138 = math.tanh %137 : vector<8x128xf32>
      %139 = arith.mulf %134, %138 : vector<8x128xf32>
      %c2_71 = arith.constant 2 : index
      %c0_72 = arith.constant 0 : index
      %c0_73 = arith.constant 0 : index
      %140 = vector.load %arg19[%c2_71, %c0_72, %c0_73] : memref<8x8x128xf32, #tpu.memory_space<vmem>>, vector<1x8x128xf32>
      %141 = vector.shape_cast %140 : vector<1x8x128xf32> to vector<8x128xf32>
      %142 = vector.shape_cast %139 : vector<8x128xf32> to vector<1x8x128xf32>
      tpu.vector_store %arg19[%c2_71, %c0_72, %c0_73], %142 {strides = array<i32>} : memref<8x8x128xf32, #tpu.memory_space<vmem>>, vector<1x8x128xf32>,
      %c3 = arith.constant 3 : index
      %c0_74 = arith.constant 0 : index
      %c0_75 = arith.constant 0 : index
      %143 = vector.load %arg18[%c3, %c0_74, %c0_75] : memref<8x8x512xf32, #tpu.memory_space<vmem>>, vector<1x8x512xf32>
      %144 = vector.shape_cast %143 : vector<1x8x512xf32> to vector<8x512xf32>
      %145 = arith.truncf %139 : vector<8x128xf32> to vector<8x128xbf16>
      %cst_76 = arith.constant dense<0.000000e+00> : vector<8x512xf32>
      %146 = tpu.matmul %145, %21, %cst_76 {dimension_numbers = #tpu.dot_dimension_numbers<[1], [0], [0], [1], [0, 0, 1, 1], [], []>} : vector<8x128xbf16>, vector<128x512xbf16>, vector<8x512xf32> -> vector<8x512xf32>
      %147 = arith.addf %144, %146 : vector<8x512xf32>
      %148 = vector.extract_strided_slice %147 {offsets = [0, 0], sizes = [8, 128], strides = [1, 1]} : vector<8x512xf32> to vector<8x128xf32>
      %cst_77 = arith.constant 5.000000e-01 : f32
      %149 = vector.broadcast %cst_77 : f32 to vector<8x128xf32>
      %150 = arith.mulf %149, %148 : vector<8x128xf32>
      %151 = math.tanh %150 : vector<8x128xf32>
      %cst_78 = arith.constant 5.000000e-01 : f32
      %152 = vector.broadcast %cst_78 : f32 to vector<8x128xf32>
      %153 = arith.mulf %152, %151 : vector<8x128xf32>
      %cst_79 = arith.constant 5.000000e-01 : f32
      %154 = vector.broadcast %cst_79 : f32 to vector<8x128xf32>
      %155 = arith.addf %153, %154 : vector<8x128xf32>
      %156 = vector.extract_strided_slice %147 {offsets = [0, 128], sizes = [8, 128], strides = [1, 1]} : vector<8x512xf32> to vector<8x128xf32>
      %cst_80 = arith.constant 5.000000e-01 : f32
      %157 = vector.broadcast %cst_80 : f32 to vector<8x128xf32>
      %158 = arith.mulf %157, %156 : vector<8x128xf32>
      %159 = math.tanh %158 : vector<8x128xf32>
      %cst_81 = arith.constant 5.000000e-01 : f32
      %160 = vector.broadcast %cst_81 : f32 to vector<8x128xf32>
      %161 = arith.mulf %160, %159 : vector<8x128xf32>
      %cst_82 = arith.constant 5.000000e-01 : f32
      %162 = vector.broadcast %cst_82 : f32 to vector<8x128xf32>
      %163 = arith.addf %161, %162 : vector<8x128xf32>
      %164 = vector.extract_strided_slice %147 {offsets = [0, 256], sizes = [8, 128], strides = [1, 1]} : vector<8x512xf32> to vector<8x128xf32>
      %165 = math.tanh %164 : vector<8x128xf32>
      %166 = vector.extract_strided_slice %147 {offsets = [0, 384], sizes = [8, 128], strides = [1, 1]} : vector<8x512xf32> to vector<8x128xf32>
      %cst_83 = arith.constant 5.000000e-01 : f32
      %167 = vector.broadcast %cst_83 : f32 to vector<8x128xf32>
      %168 = arith.mulf %167, %166 : vector<8x128xf32>
      %169 = math.tanh %168 : vector<8x128xf32>
      %cst_84 = arith.constant 5.000000e-01 : f32
      %170 = vector.broadcast %cst_84 : f32 to vector<8x128xf32>
      %171 = arith.mulf %170, %169 : vector<8x128xf32>
      %cst_85 = arith.constant 5.000000e-01 : f32
      %172 = vector.broadcast %cst_85 : f32 to vector<8x128xf32>
      %173 = arith.addf %171, %172 : vector<8x128xf32>
      %174 = arith.mulf %163, %137 : vector<8x128xf32>
      %175 = arith.mulf %155, %165 : vector<8x128xf32>
      %176 = arith.addf %174, %175 : vector<8x128xf32>
      %177 = math.tanh %176 : vector<8x128xf32>
      %178 = arith.mulf %173, %177 : vector<8x128xf32>
      %c3_86 = arith.constant 3 : index
      %c0_87 = arith.constant 0 : index
      %c0_88 = arith.constant 0 : index
      %179 = vector.load %arg19[%c3_86, %c0_87, %c0_88] : memref<8x8x128xf32, #tpu.memory_space<vmem>>, vector<1x8x128xf32>
      %180 = vector.shape_cast %179 : vector<1x8x128xf32> to vector<8x128xf32>
      %181 = vector.shape_cast %178 : vector<8x128xf32> to vector<1x8x128xf32>
      tpu.vector_store %arg19[%c3_86, %c0_87, %c0_88], %181 {strides = array<i32>} : memref<8x8x128xf32, #tpu.memory_space<vmem>>, vector<1x8x128xf32>,
      %c4 = arith.constant 4 : index
      %c0_89 = arith.constant 0 : index
      %c0_90 = arith.constant 0 : index
      %182 = vector.load %arg18[%c4, %c0_89, %c0_90] : memref<8x8x512xf32, #tpu.memory_space<vmem>>, vector<1x8x512xf32>
      %183 = vector.shape_cast %182 : vector<1x8x512xf32> to vector<8x512xf32>
      %184 = arith.truncf %178 : vector<8x128xf32> to vector<8x128xbf16>
      %cst_91 = arith.constant dense<0.000000e+00> : vector<8x512xf32>
      %185 = tpu.matmul %184, %21, %cst_91 {dimension_numbers = #tpu.dot_dimension_numbers<[1], [0], [0], [1], [0, 0, 1, 1], [], []>} : vector<8x128xbf16>, vector<128x512xbf16>, vector<8x512xf32> -> vector<8x512xf32>
      %186 = arith.addf %183, %185 : vector<8x512xf32>
      %187 = vector.extract_strided_slice %186 {offsets = [0, 0], sizes = [8, 128], strides = [1, 1]} : vector<8x512xf32> to vector<8x128xf32>
      %cst_92 = arith.constant 5.000000e-01 : f32
      %188 = vector.broadcast %cst_92 : f32 to vector<8x128xf32>
      %189 = arith.mulf %188, %187 : vector<8x128xf32>
      %190 = math.tanh %189 : vector<8x128xf32>
      %cst_93 = arith.constant 5.000000e-01 : f32
      %191 = vector.broadcast %cst_93 : f32 to vector<8x128xf32>
      %192 = arith.mulf %191, %190 : vector<8x128xf32>
      %cst_94 = arith.constant 5.000000e-01 : f32
      %193 = vector.broadcast %cst_94 : f32 to vector<8x128xf32>
      %194 = arith.addf %192, %193 : vector<8x128xf32>
      %195 = vector.extract_strided_slice %186 {offsets = [0, 128], sizes = [8, 128], strides = [1, 1]} : vector<8x512xf32> to vector<8x128xf32>
      %cst_95 = arith.constant 5.000000e-01 : f32
      %196 = vector.broadcast %cst_95 : f32 to vector<8x128xf32>
      %197 = arith.mulf %196, %195 : vector<8x128xf32>
      %198 = math.tanh %197 : vector<8x128xf32>
      %cst_96 = arith.constant 5.000000e-01 : f32
      %199 = vector.broadcast %cst_96 : f32 to vector<8x128xf32>
      %200 = arith.mulf %199, %198 : vector<8x128xf32>
      %cst_97 = arith.constant 5.000000e-01 : f32
      %201 = vector.broadcast %cst_97 : f32 to vector<8x128xf32>
      %202 = arith.addf %200, %201 : vector<8x128xf32>
      %203 = vector.extract_strided_slice %186 {offsets = [0, 256], sizes = [8, 128], strides = [1, 1]} : vector<8x512xf32> to vector<8x128xf32>
      %204 = math.tanh %203 : vector<8x128xf32>
      %205 = vector.extract_strided_slice %186 {offsets = [0, 384], sizes = [8, 128], strides = [1, 1]} : vector<8x512xf32> to vector<8x128xf32>
      %cst_98 = arith.constant 5.000000e-01 : f32
      %206 = vector.broadcast %cst_98 : f32 to vector<8x128xf32>
      %207 = arith.mulf %206, %205 : vector<8x128xf32>
      %208 = math.tanh %207 : vector<8x128xf32>
      %cst_99 = arith.constant 5.000000e-01 : f32
      %209 = vector.broadcast %cst_99 : f32 to vector<8x128xf32>
      %210 = arith.mulf %209, %208 : vector<8x128xf32>
      %cst_100 = arith.constant 5.000000e-01 : f32
      %211 = vector.broadcast %cst_100 : f32 to vector<8x128xf32>
      %212 = arith.addf %210, %211 : vector<8x128xf32>
      %213 = arith.mulf %202, %176 : vector<8x128xf32>
      %214 = arith.mulf %194, %204 : vector<8x128xf32>
      %215 = arith.addf %213, %214 : vector<8x128xf32>
      %216 = math.tanh %215 : vector<8x128xf32>
      %217 = arith.mulf %212, %216 : vector<8x128xf32>
      %c4_101 = arith.constant 4 : index
      %c0_102 = arith.constant 0 : index
      %c0_103 = arith.constant 0 : index
      %218 = vector.load %arg19[%c4_101, %c0_102, %c0_103] : memref<8x8x128xf32, #tpu.memory_space<vmem>>, vector<1x8x128xf32>
      %219 = vector.shape_cast %218 : vector<1x8x128xf32> to vector<8x128xf32>
      %220 = vector.shape_cast %217 : vector<8x128xf32> to vector<1x8x128xf32>
      tpu.vector_store %arg19[%c4_101, %c0_102, %c0_103], %220 {strides = array<i32>} : memref<8x8x128xf32, #tpu.memory_space<vmem>>, vector<1x8x128xf32>,
      %c5 = arith.constant 5 : index
      %c0_104 = arith.constant 0 : index
      %c0_105 = arith.constant 0 : index
      %221 = vector.load %arg18[%c5, %c0_104, %c0_105] : memref<8x8x512xf32, #tpu.memory_space<vmem>>, vector<1x8x512xf32>
      %222 = vector.shape_cast %221 : vector<1x8x512xf32> to vector<8x512xf32>
      %223 = arith.truncf %217 : vector<8x128xf32> to vector<8x128xbf16>
      %cst_106 = arith.constant dense<0.000000e+00> : vector<8x512xf32>
      %224 = tpu.matmul %223, %21, %cst_106 {dimension_numbers = #tpu.dot_dimension_numbers<[1], [0], [0], [1], [0, 0, 1, 1], [], []>} : vector<8x128xbf16>, vector<128x512xbf16>, vector<8x512xf32> -> vector<8x512xf32>
      %225 = arith.addf %222, %224 : vector<8x512xf32>
      %226 = vector.extract_strided_slice %225 {offsets = [0, 0], sizes = [8, 128], strides = [1, 1]} : vector<8x512xf32> to vector<8x128xf32>
      %cst_107 = arith.constant 5.000000e-01 : f32
      %227 = vector.broadcast %cst_107 : f32 to vector<8x128xf32>
      %228 = arith.mulf %227, %226 : vector<8x128xf32>
      %229 = math.tanh %228 : vector<8x128xf32>
      %cst_108 = arith.constant 5.000000e-01 : f32
      %230 = vector.broadcast %cst_108 : f32 to vector<8x128xf32>
      %231 = arith.mulf %230, %229 : vector<8x128xf32>
      %cst_109 = arith.constant 5.000000e-01 : f32
      %232 = vector.broadcast %cst_109 : f32 to vector<8x128xf32>
      %233 = arith.addf %231, %232 : vector<8x128xf32>
      %234 = vector.extract_strided_slice %225 {offsets = [0, 128], sizes = [8, 128], strides = [1, 1]} : vector<8x512xf32> to vector<8x128xf32>
      %cst_110 = arith.constant 5.000000e-01 : f32
      %235 = vector.broadcast %cst_110 : f32 to vector<8x128xf32>
      %236 = arith.mulf %235, %234 : vector<8x128xf32>
      %237 = math.tanh %236 : vector<8x128xf32>
      %cst_111 = arith.constant 5.000000e-01 : f32
      %238 = vector.broadcast %cst_111 : f32 to vector<8x128xf32>
      %239 = arith.mulf %238, %237 : vector<8x128xf32>
      %cst_112 = arith.constant 5.000000e-01 : f32
      %240 = vector.broadcast %cst_112 : f32 to vector<8x128xf32>
      %241 = arith.addf %239, %240 : vector<8x128xf32>
      %242 = vector.extract_strided_slice %225 {offsets = [0, 256], sizes = [8, 128], strides = [1, 1]} : vector<8x512xf32> to vector<8x128xf32>
      %243 = math.tanh %242 : vector<8x128xf32>
      %244 = vector.extract_strided_slice %225 {offsets = [0, 384], sizes = [8, 128], strides = [1, 1]} : vector<8x512xf32> to vector<8x128xf32>
      %cst_113 = arith.constant 5.000000e-01 : f32
      %245 = vector.broadcast %cst_113 : f32 to vector<8x128xf32>
      %246 = arith.mulf %245, %244 : vector<8x128xf32>
      %247 = math.tanh %246 : vector<8x128xf32>
      %cst_114 = arith.constant 5.000000e-01 : f32
      %248 = vector.broadcast %cst_114 : f32 to vector<8x128xf32>
      %249 = arith.mulf %248, %247 : vector<8x128xf32>
      %cst_115 = arith.constant 5.000000e-01 : f32
      %250 = vector.broadcast %cst_115 : f32 to vector<8x128xf32>
      %251 = arith.addf %249, %250 : vector<8x128xf32>
      %252 = arith.mulf %241, %215 : vector<8x128xf32>
      %253 = arith.mulf %233, %243 : vector<8x128xf32>
      %254 = arith.addf %252, %253 : vector<8x128xf32>
      %255 = math.tanh %254 : vector<8x128xf32>
      %256 = arith.mulf %251, %255 : vector<8x128xf32>
      %c5_116 = arith.constant 5 : index
      %c0_117 = arith.constant 0 : index
      %c0_118 = arith.constant 0 : index
      %257 = vector.load %arg19[%c5_116, %c0_117, %c0_118] : memref<8x8x128xf32, #tpu.memory_space<vmem>>, vector<1x8x128xf32>
      %258 = vector.shape_cast %257 : vector<1x8x128xf32> to vector<8x128xf32>
      %259 = vector.shape_cast %256 : vector<8x128xf32> to vector<1x8x128xf32>
      tpu.vector_store %arg19[%c5_116, %c0_117, %c0_118], %259 {strides = array<i32>} : memref<8x8x128xf32, #tpu.memory_space<vmem>>, vector<1x8x128xf32>,
      %c6 = arith.constant 6 : index
      %c0_119 = arith.constant 0 : index
      %c0_120 = arith.constant 0 : index
      %260 = vector.load %arg18[%c6, %c0_119, %c0_120] : memref<8x8x512xf32, #tpu.memory_space<vmem>>, vector<1x8x512xf32>
      %261 = vector.shape_cast %260 : vector<1x8x512xf32> to vector<8x512xf32>
      %262 = arith.truncf %256 : vector<8x128xf32> to vector<8x128xbf16>
      %cst_121 = arith.constant dense<0.000000e+00> : vector<8x512xf32>
      %263 = tpu.matmul %262, %21, %cst_121 {dimension_numbers = #tpu.dot_dimension_numbers<[1], [0], [0], [1], [0, 0, 1, 1], [], []>} : vector<8x128xbf16>, vector<128x512xbf16>, vector<8x512xf32> -> vector<8x512xf32>
      %264 = arith.addf %261, %263 : vector<8x512xf32>
      %265 = vector.extract_strided_slice %264 {offsets = [0, 0], sizes = [8, 128], strides = [1, 1]} : vector<8x512xf32> to vector<8x128xf32>
      %cst_122 = arith.constant 5.000000e-01 : f32
      %266 = vector.broadcast %cst_122 : f32 to vector<8x128xf32>
      %267 = arith.mulf %266, %265 : vector<8x128xf32>
      %268 = math.tanh %267 : vector<8x128xf32>
      %cst_123 = arith.constant 5.000000e-01 : f32
      %269 = vector.broadcast %cst_123 : f32 to vector<8x128xf32>
      %270 = arith.mulf %269, %268 : vector<8x128xf32>
      %cst_124 = arith.constant 5.000000e-01 : f32
      %271 = vector.broadcast %cst_124 : f32 to vector<8x128xf32>
      %272 = arith.addf %270, %271 : vector<8x128xf32>
      %273 = vector.extract_strided_slice %264 {offsets = [0, 128], sizes = [8, 128], strides = [1, 1]} : vector<8x512xf32> to vector<8x128xf32>
      %cst_125 = arith.constant 5.000000e-01 : f32
      %274 = vector.broadcast %cst_125 : f32 to vector<8x128xf32>
      %275 = arith.mulf %274, %273 : vector<8x128xf32>
      %276 = math.tanh %275 : vector<8x128xf32>
      %cst_126 = arith.constant 5.000000e-01 : f32
      %277 = vector.broadcast %cst_126 : f32 to vector<8x128xf32>
      %278 = arith.mulf %277, %276 : vector<8x128xf32>
      %cst_127 = arith.constant 5.000000e-01 : f32
      %279 = vector.broadcast %cst_127 : f32 to vector<8x128xf32>
      %280 = arith.addf %278, %279 : vector<8x128xf32>
      %281 = vector.extract_strided_slice %264 {offsets = [0, 256], sizes = [8, 128], strides = [1, 1]} : vector<8x512xf32> to vector<8x128xf32>
      %282 = math.tanh %281 : vector<8x128xf32>
      %283 = vector.extract_strided_slice %264 {offsets = [0, 384], sizes = [8, 128], strides = [1, 1]} : vector<8x512xf32> to vector<8x128xf32>
      %cst_128 = arith.constant 5.000000e-01 : f32
      %284 = vector.broadcast %cst_128 : f32 to vector<8x128xf32>
      %285 = arith.mulf %284, %283 : vector<8x128xf32>
      %286 = math.tanh %285 : vector<8x128xf32>
      %cst_129 = arith.constant 5.000000e-01 : f32
      %287 = vector.broadcast %cst_129 : f32 to vector<8x128xf32>
      %288 = arith.mulf %287, %286 : vector<8x128xf32>
      %cst_130 = arith.constant 5.000000e-01 : f32
      %289 = vector.broadcast %cst_130 : f32 to vector<8x128xf32>
      %290 = arith.addf %288, %289 : vector<8x128xf32>
      %291 = arith.mulf %280, %254 : vector<8x128xf32>
      %292 = arith.mulf %272, %282 : vector<8x128xf32>
      %293 = arith.addf %291, %292 : vector<8x128xf32>
      %294 = math.tanh %293 : vector<8x128xf32>
      %295 = arith.mulf %290, %294 : vector<8x128xf32>
      %c6_131 = arith.constant 6 : index
      %c0_132 = arith.constant 0 : index
      %c0_133 = arith.constant 0 : index
      %296 = vector.load %arg19[%c6_131, %c0_132, %c0_133] : memref<8x8x128xf32, #tpu.memory_space<vmem>>, vector<1x8x128xf32>
      %297 = vector.shape_cast %296 : vector<1x8x128xf32> to vector<8x128xf32>
      %298 = vector.shape_cast %295 : vector<8x128xf32> to vector<1x8x128xf32>
      tpu.vector_store %arg19[%c6_131, %c0_132, %c0_133], %298 {strides = array<i32>} : memref<8x8x128xf32, #tpu.memory_space<vmem>>, vector<1x8x128xf32>,
      %c7 = arith.constant 7 : index
      %c0_134 = arith.constant 0 : index
      %c0_135 = arith.constant 0 : index
      %299 = vector.load %arg18[%c7, %c0_134, %c0_135] : memref<8x8x512xf32, #tpu.memory_space<vmem>>, vector<1x8x512xf32>
      %300 = vector.shape_cast %299 : vector<1x8x512xf32> to vector<8x512xf32>
      %301 = arith.truncf %295 : vector<8x128xf32> to vector<8x128xbf16>
      %cst_136 = arith.constant dense<0.000000e+00> : vector<8x512xf32>
      %302 = tpu.matmul %301, %21, %cst_136 {dimension_numbers = #tpu.dot_dimension_numbers<[1], [0], [0], [1], [0, 0, 1, 1], [], []>} : vector<8x128xbf16>, vector<128x512xbf16>, vector<8x512xf32> -> vector<8x512xf32>
      %303 = arith.addf %300, %302 : vector<8x512xf32>
      %304 = vector.extract_strided_slice %303 {offsets = [0, 0], sizes = [8, 128], strides = [1, 1]} : vector<8x512xf32> to vector<8x128xf32>
      %cst_137 = arith.constant 5.000000e-01 : f32
      %305 = vector.broadcast %cst_137 : f32 to vector<8x128xf32>
      %306 = arith.mulf %305, %304 : vector<8x128xf32>
      %307 = math.tanh %306 : vector<8x128xf32>
      %cst_138 = arith.constant 5.000000e-01 : f32
      %308 = vector.broadcast %cst_138 : f32 to vector<8x128xf32>
      %309 = arith.mulf %308, %307 : vector<8x128xf32>
      %cst_139 = arith.constant 5.000000e-01 : f32
      %310 = vector.broadcast %cst_139 : f32 to vector<8x128xf32>
      %311 = arith.addf %309, %310 : vector<8x128xf32>
      %312 = vector.extract_strided_slice %303 {offsets = [0, 128], sizes = [8, 128], strides = [1, 1]} : vector<8x512xf32> to vector<8x128xf32>
      %cst_140 = arith.constant 5.000000e-01 : f32
      %313 = vector.broadcast %cst_140 : f32 to vector<8x128xf32>
      %314 = arith.mulf %313, %312 : vector<8x128xf32>
      %315 = math.tanh %314 : vector<8x128xf32>
      %cst_141 = arith.constant 5.000000e-01 : f32
      %316 = vector.broadcast %cst_141 : f32 to vector<8x128xf32>
      %317 = arith.mulf %316, %315 : vector<8x128xf32>
      %cst_142 = arith.constant 5.000000e-01 : f32
      %318 = vector.broadcast %cst_142 : f32 to vector<8x128xf32>
      %319 = arith.addf %317, %318 : vector<8x128xf32>
      %320 = vector.extract_strided_slice %303 {offsets = [0, 256], sizes = [8, 128], strides = [1, 1]} : vector<8x512xf32> to vector<8x128xf32>
      %321 = math.tanh %320 : vector<8x128xf32>
      %322 = vector.extract_strided_slice %303 {offsets = [0, 384], sizes = [8, 128], strides = [1, 1]} : vector<8x512xf32> to vector<8x128xf32>
      %cst_143 = arith.constant 5.000000e-01 : f32
      %323 = vector.broadcast %cst_143 : f32 to vector<8x128xf32>
      %324 = arith.mulf %323, %322 : vector<8x128xf32>
      %325 = math.tanh %324 : vector<8x128xf32>
      %cst_144 = arith.constant 5.000000e-01 : f32
      %326 = vector.broadcast %cst_144 : f32 to vector<8x128xf32>
      %327 = arith.mulf %326, %325 : vector<8x128xf32>
      %cst_145 = arith.constant 5.000000e-01 : f32
      %328 = vector.broadcast %cst_145 : f32 to vector<8x128xf32>
      %329 = arith.addf %327, %328 : vector<8x128xf32>
      %330 = arith.mulf %319, %293 : vector<8x128xf32>
      %331 = arith.mulf %311, %321 : vector<8x128xf32>
      %332 = arith.addf %330, %331 : vector<8x128xf32>
      %333 = math.tanh %332 : vector<8x128xf32>
      %334 = arith.mulf %329, %333 : vector<8x128xf32>
      %c7_146 = arith.constant 7 : index
      %c0_147 = arith.constant 0 : index
      %c0_148 = arith.constant 0 : index
      %335 = vector.load %arg19[%c7_146, %c0_147, %c0_148] : memref<8x8x128xf32, #tpu.memory_space<vmem>>, vector<1x8x128xf32>
      %336 = vector.shape_cast %335 : vector<1x8x128xf32> to vector<8x128xf32>
      %337 = vector.shape_cast %334 : vector<8x128xf32> to vector<1x8x128xf32>
      tpu.vector_store %arg19[%c7_146, %c0_147, %c0_148], %337 {strides = array<i32>} : memref<8x8x128xf32, #tpu.memory_space<vmem>>, vector<1x8x128xf32>,
      %c0_149 = arith.constant 0 : index
      %c0_150 = arith.constant 0 : index
      %c0_151 = arith.constant 0 : index
      %338 = vector.load %arg16[%c0_149, %c0_150, %c0_151] : memref<3x8x128xf32, #tpu.memory_space<vmem>>, vector<1x8x128xf32>
      %339 = vector.shape_cast %338 : vector<1x8x128xf32> to vector<8x128xf32>
      %340 = vector.shape_cast %334 : vector<8x128xf32> to vector<1x8x128xf32>
      tpu.vector_store %arg16[%c0_149, %c0_150, %c0_151], %340 {strides = array<i32>} : memref<3x8x128xf32, #tpu.memory_space<vmem>>, vector<1x8x128xf32>,
      %c0_152 = arith.constant 0 : index
      %c0_153 = arith.constant 0 : index
      %c0_154 = arith.constant 0 : index
      %341 = vector.load %arg17[%c0_152, %c0_153, %c0_154] : memref<3x8x128xf32, #tpu.memory_space<vmem>>, vector<1x8x128xf32>
      %342 = vector.shape_cast %341 : vector<1x8x128xf32> to vector<8x128xf32>
      %343 = vector.shape_cast %332 : vector<8x128xf32> to vector<1x8x128xf32>
      tpu.vector_store %arg17[%c0_152, %c0_153, %c0_154], %343 {strides = array<i32>} : memref<3x8x128xf32, #tpu.memory_space<vmem>>, vector<1x8x128xf32>,
      %c0_155 = arith.constant 0 : index
      %c0_156 = arith.constant 0 : index
      %c0_157 = arith.constant 0 : index
      %344 = vector.load %arg19[%c0_155, %c0_156, %c0_157] : memref<8x8x128xf32, #tpu.memory_space<vmem>>, vector<8x8x128xf32>
      %345 = vector.shape_cast %344 : vector<8x8x128xf32> to vector<64x128xf32>
      %346 = arith.truncf %345 : vector<64x128xf32> to vector<64x128xbf16>
      %c0_158 = arith.constant 0 : index
      %c0_159 = arith.constant 0 : index
      %347 = vector.load %arg5[%c0_158, %c0_159] : memref<128x512xbf16, #tpu.memory_space<vmem>>, vector<128x512xbf16>
      %cst_160 = arith.constant dense<0.000000e+00> : vector<64x512xf32>
      %348 = tpu.matmul %346, %347, %cst_160 {dimension_numbers = #tpu.dot_dimension_numbers<[1], [0], [0], [1], [0, 0, 1, 1], [], []>} : vector<64x128xbf16>, vector<128x512xbf16>, vector<64x512xf32> -> vector<64x512xf32>
      %c0_161 = arith.constant 0 : index
      %c0_162 = arith.constant 0 : index
      %349 = vector.load %arg7[%c0_161, %c0_162] : memref<1x512xf32, #tpu.memory_space<vmem>>, vector<1x512xf32>
      %350 = vector.broadcast %349 : vector<1x512xf32> to vector<64x512xf32>
      %351 = arith.addf %348, %350 : vector<64x512xf32>
      %352 = vector.shape_cast %351 : vector<64x512xf32> to vector<8x8x512xf32>
      %c0_163 = arith.constant 0 : index
      %c0_164 = arith.constant 0 : index
      %c0_165 = arith.constant 0 : index
      %353 = vector.load %arg18[%c0_163, %c0_164, %c0_165] : memref<8x8x512xf32, #tpu.memory_space<vmem>>, vector<8x8x512xf32>
      tpu.vector_store %arg18[%c0_163, %c0_164, %c0_165], %352 {strides = array<i32>} : memref<8x8x512xf32, #tpu.memory_space<vmem>>, vector<8x8x512xf32>,
      %c0_166 = arith.constant 0 : index
      %c0_167 = arith.constant 0 : index
      %354 = vector.load %arg6[%c0_166, %c0_167] : memref<128x512xbf16, #tpu.memory_space<vmem>>, vector<128x512xbf16>
      %c1_168 = arith.constant 1 : index
      %c0_169 = arith.constant 0 : index
      %c0_170 = arith.constant 0 : index
      %355 = vector.load %arg11[%c1_168, %c0_169, %c0_170] : memref<3x8x128xf32, #tpu.memory_space<vmem>>, vector<1x8x128xf32>
      %356 = vector.shape_cast %355 : vector<1x8x128xf32> to vector<8x128xf32>
      %c1_171 = arith.constant 1 : index
      %c0_172 = arith.constant 0 : index
      %c0_173 = arith.constant 0 : index
      %357 = vector.load %arg12[%c1_171, %c0_172, %c0_173] : memref<3x8x128xf32, #tpu.memory_space<vmem>>, vector<1x8x128xf32>
      %358 = vector.shape_cast %357 : vector<1x8x128xf32> to vector<8x128xf32>
      %c0_174 = arith.constant 0 : index
      %c0_175 = arith.constant 0 : index
      %c0_176 = arith.constant 0 : index
      %359 = vector.load %arg18[%c0_174, %c0_175, %c0_176] : memref<8x8x512xf32, #tpu.memory_space<vmem>>, vector<1x8x512xf32>
      %360 = vector.shape_cast %359 : vector<1x8x512xf32> to vector<8x512xf32>
      %361 = arith.truncf %356 : vector<8x128xf32> to vector<8x128xbf16>
      %cst_177 = arith.constant dense<0.000000e+00> : vector<8x512xf32>
      %362 = tpu.matmul %361, %354, %cst_177 {dimension_numbers = #tpu.dot_dimension_numbers<[1], [0], [0], [1], [0, 0, 1, 1], [], []>} : vector<8x128xbf16>, vector<128x512xbf16>, vector<8x512xf32> -> vector<8x512xf32>
      %363 = arith.addf %360, %362 : vector<8x512xf32>
      %364 = vector.extract_strided_slice %363 {offsets = [0, 0], sizes = [8, 128], strides = [1, 1]} : vector<8x512xf32> to vector<8x128xf32>
      %cst_178 = arith.constant 5.000000e-01 : f32
      %365 = vector.broadcast %cst_178 : f32 to vector<8x128xf32>
      %366 = arith.mulf %365, %364 : vector<8x128xf32>
      %367 = math.tanh %366 : vector<8x128xf32>
      %cst_179 = arith.constant 5.000000e-01 : f32
      %368 = vector.broadcast %cst_179 : f32 to vector<8x128xf32>
      %369 = arith.mulf %368, %367 : vector<8x128xf32>
      %cst_180 = arith.constant 5.000000e-01 : f32
      %370 = vector.broadcast %cst_180 : f32 to vector<8x128xf32>
      %371 = arith.addf %369, %370 : vector<8x128xf32>
      %372 = vector.extract_strided_slice %363 {offsets = [0, 128], sizes = [8, 128], strides = [1, 1]} : vector<8x512xf32> to vector<8x128xf32>
      %cst_181 = arith.constant 5.000000e-01 : f32
      %373 = vector.broadcast %cst_181 : f32 to vector<8x128xf32>
      %374 = arith.mulf %373, %372 : vector<8x128xf32>
      %375 = math.tanh %374 : vector<8x128xf32>
      %cst_182 = arith.constant 5.000000e-01 : f32
      %376 = vector.broadcast %cst_182 : f32 to vector<8x128xf32>
      %377 = arith.mulf %376, %375 : vector<8x128xf32>
      %cst_183 = arith.constant 5.000000e-01 : f32
      %378 = vector.broadcast %cst_183 : f32 to vector<8x128xf32>
      %379 = arith.addf %377, %378 : vector<8x128xf32>
      %380 = vector.extract_strided_slice %363 {offsets = [0, 256], sizes = [8, 128], strides = [1, 1]} : vector<8x512xf32> to vector<8x128xf32>
      %381 = math.tanh %380 : vector<8x128xf32>
      %382 = vector.extract_strided_slice %363 {offsets = [0, 384], sizes = [8, 128], strides = [1, 1]} : vector<8x512xf32> to vector<8x128xf32>
      %cst_184 = arith.constant 5.000000e-01 : f32
      %383 = vector.broadcast %cst_184 : f32 to vector<8x128xf32>
      %384 = arith.mulf %383, %382 : vector<8x128xf32>
      %385 = math.tanh %384 : vector<8x128xf32>
      %cst_185 = arith.constant 5.000000e-01 : f32
      %386 = vector.broadcast %cst_185 : f32 to vector<8x128xf32>
      %387 = arith.mulf %386, %385 : vector<8x128xf32>
      %cst_186 = arith.constant 5.000000e-01 : f32
      %388 = vector.broadcast %cst_186 : f32 to vector<8x128xf32>
      %389 = arith.addf %387, %388 : vector<8x128xf32>
      %390 = arith.mulf %379, %358 : vector<8x128xf32>
      %391 = arith.mulf %371, %381 : vector<8x128xf32>
      %392 = arith.addf %390, %391 : vector<8x128xf32>
      %393 = math.tanh %392 : vector<8x128xf32>
      %394 = arith.mulf %389, %393 : vector<8x128xf32>
      %c0_187 = arith.constant 0 : index
      %c0_188 = arith.constant 0 : index
      %c0_189 = arith.constant 0 : index
      %395 = vector.load %arg19[%c0_187, %c0_188, %c0_189] : memref<8x8x128xf32, #tpu.memory_space<vmem>>, vector<1x8x128xf32>
      %396 = vector.shape_cast %395 : vector<1x8x128xf32> to vector<8x128xf32>
      %397 = vector.shape_cast %394 : vector<8x128xf32> to vector<1x8x128xf32>
      tpu.vector_store %arg19[%c0_187, %c0_188, %c0_189], %397 {strides = array<i32>} : memref<8x8x128xf32, #tpu.memory_space<vmem>>, vector<1x8x128xf32>,
      %c1_190 = arith.constant 1 : index
      %c0_191 = arith.constant 0 : index
      %c0_192 = arith.constant 0 : index
      %398 = vector.load %arg18[%c1_190, %c0_191, %c0_192] : memref<8x8x512xf32, #tpu.memory_space<vmem>>, vector<1x8x512xf32>
      %399 = vector.shape_cast %398 : vector<1x8x512xf32> to vector<8x512xf32>
      %400 = arith.truncf %394 : vector<8x128xf32> to vector<8x128xbf16>
      %cst_193 = arith.constant dense<0.000000e+00> : vector<8x512xf32>
      %401 = tpu.matmul %400, %354, %cst_193 {dimension_numbers = #tpu.dot_dimension_numbers<[1], [0], [0], [1], [0, 0, 1, 1], [], []>} : vector<8x128xbf16>, vector<128x512xbf16>, vector<8x512xf32> -> vector<8x512xf32>
      %402 = arith.addf %399, %401 : vector<8x512xf32>
      %403 = vector.extract_strided_slice %402 {offsets = [0, 0], sizes = [8, 128], strides = [1, 1]} : vector<8x512xf32> to vector<8x128xf32>
      %cst_194 = arith.constant 5.000000e-01 : f32
      %404 = vector.broadcast %cst_194 : f32 to vector<8x128xf32>
      %405 = arith.mulf %404, %403 : vector<8x128xf32>
      %406 = math.tanh %405 : vector<8x128xf32>
      %cst_195 = arith.constant 5.000000e-01 : f32
      %407 = vector.broadcast %cst_195 : f32 to vector<8x128xf32>
      %408 = arith.mulf %407, %406 : vector<8x128xf32>
      %cst_196 = arith.constant 5.000000e-01 : f32
      %409 = vector.broadcast %cst_196 : f32 to vector<8x128xf32>
      %410 = arith.addf %408, %409 : vector<8x128xf32>
      %411 = vector.extract_strided_slice %402 {offsets = [0, 128], sizes = [8, 128], strides = [1, 1]} : vector<8x512xf32> to vector<8x128xf32>
      %cst_197 = arith.constant 5.000000e-01 : f32
      %412 = vector.broadcast %cst_197 : f32 to vector<8x128xf32>
      %413 = arith.mulf %412, %411 : vector<8x128xf32>
      %414 = math.tanh %413 : vector<8x128xf32>
      %cst_198 = arith.constant 5.000000e-01 : f32
      %415 = vector.broadcast %cst_198 : f32 to vector<8x128xf32>
      %416 = arith.mulf %415, %414 : vector<8x128xf32>
      %cst_199 = arith.constant 5.000000e-01 : f32
      %417 = vector.broadcast %cst_199 : f32 to vector<8x128xf32>
      %418 = arith.addf %416, %417 : vector<8x128xf32>
      %419 = vector.extract_strided_slice %402 {offsets = [0, 256], sizes = [8, 128], strides = [1, 1]} : vector<8x512xf32> to vector<8x128xf32>
      %420 = math.tanh %419 : vector<8x128xf32>
      %421 = vector.extract_strided_slice %402 {offsets = [0, 384], sizes = [8, 128], strides = [1, 1]} : vector<8x512xf32> to vector<8x128xf32>
      %cst_200 = arith.constant 5.000000e-01 : f32
      %422 = vector.broadcast %cst_200 : f32 to vector<8x128xf32>
      %423 = arith.mulf %422, %421 : vector<8x128xf32>
      %424 = math.tanh %423 : vector<8x128xf32>
      %cst_201 = arith.constant 5.000000e-01 : f32
      %425 = vector.broadcast %cst_201 : f32 to vector<8x128xf32>
      %426 = arith.mulf %425, %424 : vector<8x128xf32>
      %cst_202 = arith.constant 5.000000e-01 : f32
      %427 = vector.broadcast %cst_202 : f32 to vector<8x128xf32>
      %428 = arith.addf %426, %427 : vector<8x128xf32>
      %429 = arith.mulf %418, %392 : vector<8x128xf32>
      %430 = arith.mulf %410, %420 : vector<8x128xf32>
      %431 = arith.addf %429, %430 : vector<8x128xf32>
      %432 = math.tanh %431 : vector<8x128xf32>
      %433 = arith.mulf %428, %432 : vector<8x128xf32>
      %c1_203 = arith.constant 1 : index
      %c0_204 = arith.constant 0 : index
      %c0_205 = arith.constant 0 : index
      %434 = vector.load %arg19[%c1_203, %c0_204, %c0_205] : memref<8x8x128xf32, #tpu.memory_space<vmem>>, vector<1x8x128xf32>
      %435 = vector.shape_cast %434 : vector<1x8x128xf32> to vector<8x128xf32>
      %436 = vector.shape_cast %433 : vector<8x128xf32> to vector<1x8x128xf32>
      tpu.vector_store %arg19[%c1_203, %c0_204, %c0_205], %436 {strides = array<i32>} : memref<8x8x128xf32, #tpu.memory_space<vmem>>, vector<1x8x128xf32>,
      %c2_206 = arith.constant 2 : index
      %c0_207 = arith.constant 0 : index
      %c0_208 = arith.constant 0 : index
      %437 = vector.load %arg18[%c2_206, %c0_207, %c0_208] : memref<8x8x512xf32, #tpu.memory_space<vmem>>, vector<1x8x512xf32>
      %438 = vector.shape_cast %437 : vector<1x8x512xf32> to vector<8x512xf32>
      %439 = arith.truncf %433 : vector<8x128xf32> to vector<8x128xbf16>
      %cst_209 = arith.constant dense<0.000000e+00> : vector<8x512xf32>
      %440 = tpu.matmul %439, %354, %cst_209 {dimension_numbers = #tpu.dot_dimension_numbers<[1], [0], [0], [1], [0, 0, 1, 1], [], []>} : vector<8x128xbf16>, vector<128x512xbf16>, vector<8x512xf32> -> vector<8x512xf32>
      %441 = arith.addf %438, %440 : vector<8x512xf32>
      %442 = vector.extract_strided_slice %441 {offsets = [0, 0], sizes = [8, 128], strides = [1, 1]} : vector<8x512xf32> to vector<8x128xf32>
      %cst_210 = arith.constant 5.000000e-01 : f32
      %443 = vector.broadcast %cst_210 : f32 to vector<8x128xf32>
      %444 = arith.mulf %443, %442 : vector<8x128xf32>
      %445 = math.tanh %444 : vector<8x128xf32>
      %cst_211 = arith.constant 5.000000e-01 : f32
      %446 = vector.broadcast %cst_211 : f32 to vector<8x128xf32>
      %447 = arith.mulf %446, %445 : vector<8x128xf32>
      %cst_212 = arith.constant 5.000000e-01 : f32
      %448 = vector.broadcast %cst_212 : f32 to vector<8x128xf32>
      %449 = arith.addf %447, %448 : vector<8x128xf32>
      %450 = vector.extract_strided_slice %441 {offsets = [0, 128], sizes = [8, 128], strides = [1, 1]} : vector<8x512xf32> to vector<8x128xf32>
      %cst_213 = arith.constant 5.000000e-01 : f32
      %451 = vector.broadcast %cst_213 : f32 to vector<8x128xf32>
      %452 = arith.mulf %451, %450 : vector<8x128xf32>
      %453 = math.tanh %452 : vector<8x128xf32>
      %cst_214 = arith.constant 5.000000e-01 : f32
      %454 = vector.broadcast %cst_214 : f32 to vector<8x128xf32>
      %455 = arith.mulf %454, %453 : vector<8x128xf32>
      %cst_215 = arith.constant 5.000000e-01 : f32
      %456 = vector.broadcast %cst_215 : f32 to vector<8x128xf32>
      %457 = arith.addf %455, %456 : vector<8x128xf32>
      %458 = vector.extract_strided_slice %441 {offsets = [0, 256], sizes = [8, 128], strides = [1, 1]} : vector<8x512xf32> to vector<8x128xf32>
      %459 = math.tanh %458 : vector<8x128xf32>
      %460 = vector.extract_strided_slice %441 {offsets = [0, 384], sizes = [8, 128], strides = [1, 1]} : vector<8x512xf32> to vector<8x128xf32>
      %cst_216 = arith.constant 5.000000e-01 : f32
      %461 = vector.broadcast %cst_216 : f32 to vector<8x128xf32>
      %462 = arith.mulf %461, %460 : vector<8x128xf32>
      %463 = math.tanh %462 : vector<8x128xf32>
      %cst_217 = arith.constant 5.000000e-01 : f32
      %464 = vector.broadcast %cst_217 : f32 to vector<8x128xf32>
      %465 = arith.mulf %464, %463 : vector<8x128xf32>
      %cst_218 = arith.constant 5.000000e-01 : f32
      %466 = vector.broadcast %cst_218 : f32 to vector<8x128xf32>
      %467 = arith.addf %465, %466 : vector<8x128xf32>
      %468 = arith.mulf %457, %431 : vector<8x128xf32>
      %469 = arith.mulf %449, %459 : vector<8x128xf32>
      %470 = arith.addf %468, %469 : vector<8x128xf32>
      %471 = math.tanh %470 : vector<8x128xf32>
      %472 = arith.mulf %467, %471 : vector<8x128xf32>
      %c2_219 = arith.constant 2 : index
      %c0_220 = arith.constant 0 : index
      %c0_221 = arith.constant 0 : index
      %473 = vector.load %arg19[%c2_219, %c0_220, %c0_221] : memref<8x8x128xf32, #tpu.memory_space<vmem>>, vector<1x8x128xf32>
      %474 = vector.shape_cast %473 : vector<1x8x128xf32> to vector<8x128xf32>
      %475 = vector.shape_cast %472 : vector<8x128xf32> to vector<1x8x128xf32>
      tpu.vector_store %arg19[%c2_219, %c0_220, %c0_221], %475 {strides = array<i32>} : memref<8x8x128xf32, #tpu.memory_space<vmem>>, vector<1x8x128xf32>,
      %c3_222 = arith.constant 3 : index
      %c0_223 = arith.constant 0 : index
      %c0_224 = arith.constant 0 : index
      %476 = vector.load %arg18[%c3_222, %c0_223, %c0_224] : memref<8x8x512xf32, #tpu.memory_space<vmem>>, vector<1x8x512xf32>
      %477 = vector.shape_cast %476 : vector<1x8x512xf32> to vector<8x512xf32>
      %478 = arith.truncf %472 : vector<8x128xf32> to vector<8x128xbf16>
      %cst_225 = arith.constant dense<0.000000e+00> : vector<8x512xf32>
      %479 = tpu.matmul %478, %354, %cst_225 {dimension_numbers = #tpu.dot_dimension_numbers<[1], [0], [0], [1], [0, 0, 1, 1], [], []>} : vector<8x128xbf16>, vector<128x512xbf16>, vector<8x512xf32> -> vector<8x512xf32>
      %480 = arith.addf %477, %479 : vector<8x512xf32>
      %481 = vector.extract_strided_slice %480 {offsets = [0, 0], sizes = [8, 128], strides = [1, 1]} : vector<8x512xf32> to vector<8x128xf32>
      %cst_226 = arith.constant 5.000000e-01 : f32
      %482 = vector.broadcast %cst_226 : f32 to vector<8x128xf32>
      %483 = arith.mulf %482, %481 : vector<8x128xf32>
      %484 = math.tanh %483 : vector<8x128xf32>
      %cst_227 = arith.constant 5.000000e-01 : f32
      %485 = vector.broadcast %cst_227 : f32 to vector<8x128xf32>
      %486 = arith.mulf %485, %484 : vector<8x128xf32>
      %cst_228 = arith.constant 5.000000e-01 : f32
      %487 = vector.broadcast %cst_228 : f32 to vector<8x128xf32>
      %488 = arith.addf %486, %487 : vector<8x128xf32>
      %489 = vector.extract_strided_slice %480 {offsets = [0, 128], sizes = [8, 128], strides = [1, 1]} : vector<8x512xf32> to vector<8x128xf32>
      %cst_229 = arith.constant 5.000000e-01 : f32
      %490 = vector.broadcast %cst_229 : f32 to vector<8x128xf32>
      %491 = arith.mulf %490, %489 : vector<8x128xf32>
      %492 = math.tanh %491 : vector<8x128xf32>
      %cst_230 = arith.constant 5.000000e-01 : f32
      %493 = vector.broadcast %cst_230 : f32 to vector<8x128xf32>
      %494 = arith.mulf %493, %492 : vector<8x128xf32>
      %cst_231 = arith.constant 5.000000e-01 : f32
      %495 = vector.broadcast %cst_231 : f32 to vector<8x128xf32>
      %496 = arith.addf %494, %495 : vector<8x128xf32>
      %497 = vector.extract_strided_slice %480 {offsets = [0, 256], sizes = [8, 128], strides = [1, 1]} : vector<8x512xf32> to vector<8x128xf32>
      %498 = math.tanh %497 : vector<8x128xf32>
      %499 = vector.extract_strided_slice %480 {offsets = [0, 384], sizes = [8, 128], strides = [1, 1]} : vector<8x512xf32> to vector<8x128xf32>
      %cst_232 = arith.constant 5.000000e-01 : f32
      %500 = vector.broadcast %cst_232 : f32 to vector<8x128xf32>
      %501 = arith.mulf %500, %499 : vector<8x128xf32>
      %502 = math.tanh %501 : vector<8x128xf32>
      %cst_233 = arith.constant 5.000000e-01 : f32
      %503 = vector.broadcast %cst_233 : f32 to vector<8x128xf32>
      %504 = arith.mulf %503, %502 : vector<8x128xf32>
      %cst_234 = arith.constant 5.000000e-01 : f32
      %505 = vector.broadcast %cst_234 : f32 to vector<8x128xf32>
      %506 = arith.addf %504, %505 : vector<8x128xf32>
      %507 = arith.mulf %496, %470 : vector<8x128xf32>
      %508 = arith.mulf %488, %498 : vector<8x128xf32>
      %509 = arith.addf %507, %508 : vector<8x128xf32>
      %510 = math.tanh %509 : vector<8x128xf32>
      %511 = arith.mulf %506, %510 : vector<8x128xf32>
      %c3_235 = arith.constant 3 : index
      %c0_236 = arith.constant 0 : index
      %c0_237 = arith.constant 0 : index
      %512 = vector.load %arg19[%c3_235, %c0_236, %c0_237] : memref<8x8x128xf32, #tpu.memory_space<vmem>>, vector<1x8x128xf32>
      %513 = vector.shape_cast %512 : vector<1x8x128xf32> to vector<8x128xf32>
      %514 = vector.shape_cast %511 : vector<8x128xf32> to vector<1x8x128xf32>
      tpu.vector_store %arg19[%c3_235, %c0_236, %c0_237], %514 {strides = array<i32>} : memref<8x8x128xf32, #tpu.memory_space<vmem>>, vector<1x8x128xf32>,
      %c4_238 = arith.constant 4 : index
      %c0_239 = arith.constant 0 : index
      %c0_240 = arith.constant 0 : index
      %515 = vector.load %arg18[%c4_238, %c0_239, %c0_240] : memref<8x8x512xf32, #tpu.memory_space<vmem>>, vector<1x8x512xf32>
      %516 = vector.shape_cast %515 : vector<1x8x512xf32> to vector<8x512xf32>
      %517 = arith.truncf %511 : vector<8x128xf32> to vector<8x128xbf16>
      %cst_241 = arith.constant dense<0.000000e+00> : vector<8x512xf32>
      %518 = tpu.matmul %517, %354, %cst_241 {dimension_numbers = #tpu.dot_dimension_numbers<[1], [0], [0], [1], [0, 0, 1, 1], [], []>} : vector<8x128xbf16>, vector<128x512xbf16>, vector<8x512xf32> -> vector<8x512xf32>
      %519 = arith.addf %516, %518 : vector<8x512xf32>
      %520 = vector.extract_strided_slice %519 {offsets = [0, 0], sizes = [8, 128], strides = [1, 1]} : vector<8x512xf32> to vector<8x128xf32>
      %cst_242 = arith.constant 5.000000e-01 : f32
      %521 = vector.broadcast %cst_242 : f32 to vector<8x128xf32>
      %522 = arith.mulf %521, %520 : vector<8x128xf32>
      %523 = math.tanh %522 : vector<8x128xf32>
      %cst_243 = arith.constant 5.000000e-01 : f32
      %524 = vector.broadcast %cst_243 : f32 to vector<8x128xf32>
      %525 = arith.mulf %524, %523 : vector<8x128xf32>
      %cst_244 = arith.constant 5.000000e-01 : f32
      %526 = vector.broadcast %cst_244 : f32 to vector<8x128xf32>
      %527 = arith.addf %525, %526 : vector<8x128xf32>
      %528 = vector.extract_strided_slice %519 {offsets = [0, 128], sizes = [8, 128], strides = [1, 1]} : vector<8x512xf32> to vector<8x128xf32>
      %cst_245 = arith.constant 5.000000e-01 : f32
      %529 = vector.broadcast %cst_245 : f32 to vector<8x128xf32>
      %530 = arith.mulf %529, %528 : vector<8x128xf32>
      %531 = math.tanh %530 : vector<8x128xf32>
      %cst_246 = arith.constant 5.000000e-01 : f32
      %532 = vector.broadcast %cst_246 : f32 to vector<8x128xf32>
      %533 = arith.mulf %532, %531 : vector<8x128xf32>
      %cst_247 = arith.constant 5.000000e-01 : f32
      %534 = vector.broadcast %cst_247 : f32 to vector<8x128xf32>
      %535 = arith.addf %533, %534 : vector<8x128xf32>
      %536 = vector.extract_strided_slice %519 {offsets = [0, 256], sizes = [8, 128], strides = [1, 1]} : vector<8x512xf32> to vector<8x128xf32>
      %537 = math.tanh %536 : vector<8x128xf32>
      %538 = vector.extract_strided_slice %519 {offsets = [0, 384], sizes = [8, 128], strides = [1, 1]} : vector<8x512xf32> to vector<8x128xf32>
      %cst_248 = arith.constant 5.000000e-01 : f32
      %539 = vector.broadcast %cst_248 : f32 to vector<8x128xf32>
      %540 = arith.mulf %539, %538 : vector<8x128xf32>
      %541 = math.tanh %540 : vector<8x128xf32>
      %cst_249 = arith.constant 5.000000e-01 : f32
      %542 = vector.broadcast %cst_249 : f32 to vector<8x128xf32>
      %543 = arith.mulf %542, %541 : vector<8x128xf32>
      %cst_250 = arith.constant 5.000000e-01 : f32
      %544 = vector.broadcast %cst_250 : f32 to vector<8x128xf32>
      %545 = arith.addf %543, %544 : vector<8x128xf32>
      %546 = arith.mulf %535, %509 : vector<8x128xf32>
      %547 = arith.mulf %527, %537 : vector<8x128xf32>
      %548 = arith.addf %546, %547 : vector<8x128xf32>
      %549 = math.tanh %548 : vector<8x128xf32>
      %550 = arith.mulf %545, %549 : vector<8x128xf32>
      %c4_251 = arith.constant 4 : index
      %c0_252 = arith.constant 0 : index
      %c0_253 = arith.constant 0 : index
      %551 = vector.load %arg19[%c4_251, %c0_252, %c0_253] : memref<8x8x128xf32, #tpu.memory_space<vmem>>, vector<1x8x128xf32>
      %552 = vector.shape_cast %551 : vector<1x8x128xf32> to vector<8x128xf32>
      %553 = vector.shape_cast %550 : vector<8x128xf32> to vector<1x8x128xf32>
      tpu.vector_store %arg19[%c4_251, %c0_252, %c0_253], %553 {strides = array<i32>} : memref<8x8x128xf32, #tpu.memory_space<vmem>>, vector<1x8x128xf32>,
      %c5_254 = arith.constant 5 : index
      %c0_255 = arith.constant 0 : index
      %c0_256 = arith.constant 0 : index
      %554 = vector.load %arg18[%c5_254, %c0_255, %c0_256] : memref<8x8x512xf32, #tpu.memory_space<vmem>>, vector<1x8x512xf32>
      %555 = vector.shape_cast %554 : vector<1x8x512xf32> to vector<8x512xf32>
      %556 = arith.truncf %550 : vector<8x128xf32> to vector<8x128xbf16>
      %cst_257 = arith.constant dense<0.000000e+00> : vector<8x512xf32>
      %557 = tpu.matmul %556, %354, %cst_257 {dimension_numbers = #tpu.dot_dimension_numbers<[1], [0], [0], [1], [0, 0, 1, 1], [], []>} : vector<8x128xbf16>, vector<128x512xbf16>, vector<8x512xf32> -> vector<8x512xf32>
      %558 = arith.addf %555, %557 : vector<8x512xf32>
      %559 = vector.extract_strided_slice %558 {offsets = [0, 0], sizes = [8, 128], strides = [1, 1]} : vector<8x512xf32> to vector<8x128xf32>
      %cst_258 = arith.constant 5.000000e-01 : f32
      %560 = vector.broadcast %cst_258 : f32 to vector<8x128xf32>
      %561 = arith.mulf %560, %559 : vector<8x128xf32>
      %562 = math.tanh %561 : vector<8x128xf32>
      %cst_259 = arith.constant 5.000000e-01 : f32
      %563 = vector.broadcast %cst_259 : f32 to vector<8x128xf32>
      %564 = arith.mulf %563, %562 : vector<8x128xf32>
      %cst_260 = arith.constant 5.000000e-01 : f32
      %565 = vector.broadcast %cst_260 : f32 to vector<8x128xf32>
      %566 = arith.addf %564, %565 : vector<8x128xf32>
      %567 = vector.extract_strided_slice %558 {offsets = [0, 128], sizes = [8, 128], strides = [1, 1]} : vector<8x512xf32> to vector<8x128xf32>
      %cst_261 = arith.constant 5.000000e-01 : f32
      %568 = vector.broadcast %cst_261 : f32 to vector<8x128xf32>
      %569 = arith.mulf %568, %567 : vector<8x128xf32>
      %570 = math.tanh %569 : vector<8x128xf32>
      %cst_262 = arith.constant 5.000000e-01 : f32
      %571 = vector.broadcast %cst_262 : f32 to vector<8x128xf32>
      %572 = arith.mulf %571, %570 : vector<8x128xf32>
      %cst_263 = arith.constant 5.000000e-01 : f32
      %573 = vector.broadcast %cst_263 : f32 to vector<8x128xf32>
      %574 = arith.addf %572, %573 : vector<8x128xf32>
      %575 = vector.extract_strided_slice %558 {offsets = [0, 256], sizes = [8, 128], strides = [1, 1]} : vector<8x512xf32> to vector<8x128xf32>
      %576 = math.tanh %575 : vector<8x128xf32>
      %577 = vector.extract_strided_slice %558 {offsets = [0, 384], sizes = [8, 128], strides = [1, 1]} : vector<8x512xf32> to vector<8x128xf32>
      %cst_264 = arith.constant 5.000000e-01 : f32
      %578 = vector.broadcast %cst_264 : f32 to vector<8x128xf32>
      %579 = arith.mulf %578, %577 : vector<8x128xf32>
      %580 = math.tanh %579 : vector<8x128xf32>
      %cst_265 = arith.constant 5.000000e-01 : f32
      %581 = vector.broadcast %cst_265 : f32 to vector<8x128xf32>
      %582 = arith.mulf %581, %580 : vector<8x128xf32>
      %cst_266 = arith.constant 5.000000e-01 : f32
      %583 = vector.broadcast %cst_266 : f32 to vector<8x128xf32>
      %584 = arith.addf %582, %583 : vector<8x128xf32>
      %585 = arith.mulf %574, %548 : vector<8x128xf32>
      %586 = arith.mulf %566, %576 : vector<8x128xf32>
      %587 = arith.addf %585, %586 : vector<8x128xf32>
      %588 = math.tanh %587 : vector<8x128xf32>
      %589 = arith.mulf %584, %588 : vector<8x128xf32>
      %c5_267 = arith.constant 5 : index
      %c0_268 = arith.constant 0 : index
      %c0_269 = arith.constant 0 : index
      %590 = vector.load %arg19[%c5_267, %c0_268, %c0_269] : memref<8x8x128xf32, #tpu.memory_space<vmem>>, vector<1x8x128xf32>
      %591 = vector.shape_cast %590 : vector<1x8x128xf32> to vector<8x128xf32>
      %592 = vector.shape_cast %589 : vector<8x128xf32> to vector<1x8x128xf32>
      tpu.vector_store %arg19[%c5_267, %c0_268, %c0_269], %592 {strides = array<i32>} : memref<8x8x128xf32, #tpu.memory_space<vmem>>, vector<1x8x128xf32>,
      %c6_270 = arith.constant 6 : index
      %c0_271 = arith.constant 0 : index
      %c0_272 = arith.constant 0 : index
      %593 = vector.load %arg18[%c6_270, %c0_271, %c0_272] : memref<8x8x512xf32, #tpu.memory_space<vmem>>, vector<1x8x512xf32>
      %594 = vector.shape_cast %593 : vector<1x8x512xf32> to vector<8x512xf32>
      %595 = arith.truncf %589 : vector<8x128xf32> to vector<8x128xbf16>
      %cst_273 = arith.constant dense<0.000000e+00> : vector<8x512xf32>
      %596 = tpu.matmul %595, %354, %cst_273 {dimension_numbers = #tpu.dot_dimension_numbers<[1], [0], [0], [1], [0, 0, 1, 1], [], []>} : vector<8x128xbf16>, vector<128x512xbf16>, vector<8x512xf32> -> vector<8x512xf32>
      %597 = arith.addf %594, %596 : vector<8x512xf32>
      %598 = vector.extract_strided_slice %597 {offsets = [0, 0], sizes = [8, 128], strides = [1, 1]} : vector<8x512xf32> to vector<8x128xf32>
      %cst_274 = arith.constant 5.000000e-01 : f32
      %599 = vector.broadcast %cst_274 : f32 to vector<8x128xf32>
      %600 = arith.mulf %599, %598 : vector<8x128xf32>
      %601 = math.tanh %600 : vector<8x128xf32>
      %cst_275 = arith.constant 5.000000e-01 : f32
      %602 = vector.broadcast %cst_275 : f32 to vector<8x128xf32>
      %603 = arith.mulf %602, %601 : vector<8x128xf32>
      %cst_276 = arith.constant 5.000000e-01 : f32
      %604 = vector.broadcast %cst_276 : f32 to vector<8x128xf32>
      %605 = arith.addf %603, %604 : vector<8x128xf32>
      %606 = vector.extract_strided_slice %597 {offsets = [0, 128], sizes = [8, 128], strides = [1, 1]} : vector<8x512xf32> to vector<8x128xf32>
      %cst_277 = arith.constant 5.000000e-01 : f32
      %607 = vector.broadcast %cst_277 : f32 to vector<8x128xf32>
      %608 = arith.mulf %607, %606 : vector<8x128xf32>
      %609 = math.tanh %608 : vector<8x128xf32>
      %cst_278 = arith.constant 5.000000e-01 : f32
      %610 = vector.broadcast %cst_278 : f32 to vector<8x128xf32>
      %611 = arith.mulf %610, %609 : vector<8x128xf32>
      %cst_279 = arith.constant 5.000000e-01 : f32
      %612 = vector.broadcast %cst_279 : f32 to vector<8x128xf32>
      %613 = arith.addf %611, %612 : vector<8x128xf32>
      %614 = vector.extract_strided_slice %597 {offsets = [0, 256], sizes = [8, 128], strides = [1, 1]} : vector<8x512xf32> to vector<8x128xf32>
      %615 = math.tanh %614 : vector<8x128xf32>
      %616 = vector.extract_strided_slice %597 {offsets = [0, 384], sizes = [8, 128], strides = [1, 1]} : vector<8x512xf32> to vector<8x128xf32>
      %cst_280 = arith.constant 5.000000e-01 : f32
      %617 = vector.broadcast %cst_280 : f32 to vector<8x128xf32>
      %618 = arith.mulf %617, %616 : vector<8x128xf32>
      %619 = math.tanh %618 : vector<8x128xf32>
      %cst_281 = arith.constant 5.000000e-01 : f32
      %620 = vector.broadcast %cst_281 : f32 to vector<8x128xf32>
      %621 = arith.mulf %620, %619 : vector<8x128xf32>
      %cst_282 = arith.constant 5.000000e-01 : f32
      %622 = vector.broadcast %cst_282 : f32 to vector<8x128xf32>
      %623 = arith.addf %621, %622 : vector<8x128xf32>
      %624 = arith.mulf %613, %587 : vector<8x128xf32>
      %625 = arith.mulf %605, %615 : vector<8x128xf32>
      %626 = arith.addf %624, %625 : vector<8x128xf32>
      %627 = math.tanh %626 : vector<8x128xf32>
      %628 = arith.mulf %623, %627 : vector<8x128xf32>
      %c6_283 = arith.constant 6 : index
      %c0_284 = arith.constant 0 : index
      %c0_285 = arith.constant 0 : index
      %629 = vector.load %arg19[%c6_283, %c0_284, %c0_285] : memref<8x8x128xf32, #tpu.memory_space<vmem>>, vector<1x8x128xf32>
      %630 = vector.shape_cast %629 : vector<1x8x128xf32> to vector<8x128xf32>
      %631 = vector.shape_cast %628 : vector<8x128xf32> to vector<1x8x128xf32>
      tpu.vector_store %arg19[%c6_283, %c0_284, %c0_285], %631 {strides = array<i32>} : memref<8x8x128xf32, #tpu.memory_space<vmem>>, vector<1x8x128xf32>,
      %c7_286 = arith.constant 7 : index
      %c0_287 = arith.constant 0 : index
      %c0_288 = arith.constant 0 : index
      %632 = vector.load %arg18[%c7_286, %c0_287, %c0_288] : memref<8x8x512xf32, #tpu.memory_space<vmem>>, vector<1x8x512xf32>
      %633 = vector.shape_cast %632 : vector<1x8x512xf32> to vector<8x512xf32>
      %634 = arith.truncf %628 : vector<8x128xf32> to vector<8x128xbf16>
      %cst_289 = arith.constant dense<0.000000e+00> : vector<8x512xf32>
      %635 = tpu.matmul %634, %354, %cst_289 {dimension_numbers = #tpu.dot_dimension_numbers<[1], [0], [0], [1], [0, 0, 1, 1], [], []>} : vector<8x128xbf16>, vector<128x512xbf16>, vector<8x512xf32> -> vector<8x512xf32>
      %636 = arith.addf %633, %635 : vector<8x512xf32>
      %637 = vector.extract_strided_slice %636 {offsets = [0, 0], sizes = [8, 128], strides = [1, 1]} : vector<8x512xf32> to vector<8x128xf32>
      %cst_290 = arith.constant 5.000000e-01 : f32
      %638 = vector.broadcast %cst_290 : f32 to vector<8x128xf32>
      %639 = arith.mulf %638, %637 : vector<8x128xf32>
      %640 = math.tanh %639 : vector<8x128xf32>
      %cst_291 = arith.constant 5.000000e-01 : f32
      %641 = vector.broadcast %cst_291 : f32 to vector<8x128xf32>
      %642 = arith.mulf %641, %640 : vector<8x128xf32>
      %cst_292 = arith.constant 5.000000e-01 : f32
      %643 = vector.broadcast %cst_292 : f32 to vector<8x128xf32>
      %644 = arith.addf %642, %643 : vector<8x128xf32>
      %645 = vector.extract_strided_slice %636 {offsets = [0, 128], sizes = [8, 128], strides = [1, 1]} : vector<8x512xf32> to vector<8x128xf32>
      %cst_293 = arith.constant 5.000000e-01 : f32
      %646 = vector.broadcast %cst_293 : f32 to vector<8x128xf32>
      %647 = arith.mulf %646, %645 : vector<8x128xf32>
      %648 = math.tanh %647 : vector<8x128xf32>
      %cst_294 = arith.constant 5.000000e-01 : f32
      %649 = vector.broadcast %cst_294 : f32 to vector<8x128xf32>
      %650 = arith.mulf %649, %648 : vector<8x128xf32>
      %cst_295 = arith.constant 5.000000e-01 : f32
      %651 = vector.broadcast %cst_295 : f32 to vector<8x128xf32>
      %652 = arith.addf %650, %651 : vector<8x128xf32>
      %653 = vector.extract_strided_slice %636 {offsets = [0, 256], sizes = [8, 128], strides = [1, 1]} : vector<8x512xf32> to vector<8x128xf32>
      %654 = math.tanh %653 : vector<8x128xf32>
      %655 = vector.extract_strided_slice %636 {offsets = [0, 384], sizes = [8, 128], strides = [1, 1]} : vector<8x512xf32> to vector<8x128xf32>
      %cst_296 = arith.constant 5.000000e-01 : f32
      %656 = vector.broadcast %cst_296 : f32 to vector<8x128xf32>
      %657 = arith.mulf %656, %655 : vector<8x128xf32>
      %658 = math.tanh %657 : vector<8x128xf32>
      %cst_297 = arith.constant 5.000000e-01 : f32
      %659 = vector.broadcast %cst_297 : f32 to vector<8x128xf32>
      %660 = arith.mulf %659, %658 : vector<8x128xf32>
      %cst_298 = arith.constant 5.000000e-01 : f32
      %661 = vector.broadcast %cst_298 : f32 to vector<8x128xf32>
      %662 = arith.addf %660, %661 : vector<8x128xf32>
      %663 = arith.mulf %652, %626 : vector<8x128xf32>
      %664 = arith.mulf %644, %654 : vector<8x128xf32>
      %665 = arith.addf %663, %664 : vector<8x128xf32>
      %666 = math.tanh %665 : vector<8x128xf32>
      %667 = arith.mulf %662, %666 : vector<8x128xf32>
      %c7_299 = arith.constant 7 : index
      %c0_300 = arith.constant 0 : index
      %c0_301 = arith.constant 0 : index
      %668 = vector.load %arg19[%c7_299, %c0_300, %c0_301] : memref<8x8x128xf32, #tpu.memory_space<vmem>>, vector<1x8x128xf32>
      %669 = vector.shape_cast %668 : vector<1x8x128xf32> to vector<8x128xf32>
      %670 = vector.shape_cast %667 : vector<8x128xf32> to vector<1x8x128xf32>
      tpu.vector_store %arg19[%c7_299, %c0_300, %c0_301], %670 {strides = array<i32>} : memref<8x8x128xf32, #tpu.memory_space<vmem>>, vector<1x8x128xf32>,
      %c1_302 = arith.constant 1 : index
      %c0_303 = arith.constant 0 : index
      %c0_304 = arith.constant 0 : index
      %671 = vector.load %arg16[%c1_302, %c0_303, %c0_304] : memref<3x8x128xf32, #tpu.memory_space<vmem>>, vector<1x8x128xf32>
      %672 = vector.shape_cast %671 : vector<1x8x128xf32> to vector<8x128xf32>
      %673 = vector.shape_cast %667 : vector<8x128xf32> to vector<1x8x128xf32>
      tpu.vector_store %arg16[%c1_302, %c0_303, %c0_304], %673 {strides = array<i32>} : memref<3x8x128xf32, #tpu.memory_space<vmem>>, vector<1x8x128xf32>,
      %c1_305 = arith.constant 1 : index
      %c0_306 = arith.constant 0 : index
      %c0_307 = arith.constant 0 : index
      %674 = vector.load %arg17[%c1_305, %c0_306, %c0_307] : memref<3x8x128xf32, #tpu.memory_space<vmem>>, vector<1x8x128xf32>
      %675 = vector.shape_cast %674 : vector<1x8x128xf32> to vector<8x128xf32>
      %676 = vector.shape_cast %665 : vector<8x128xf32> to vector<1x8x128xf32>
      tpu.vector_store %arg17[%c1_305, %c0_306, %c0_307], %676 {strides = array<i32>} : memref<3x8x128xf32, #tpu.memory_space<vmem>>, vector<1x8x128xf32>,
      %c0_308 = arith.constant 0 : index
      %c0_309 = arith.constant 0 : index
      %c0_310 = arith.constant 0 : index
      %677 = vector.load %arg19[%c0_308, %c0_309, %c0_310] : memref<8x8x128xf32, #tpu.memory_space<vmem>>, vector<8x8x128xf32>
      %678 = vector.shape_cast %677 : vector<8x8x128xf32> to vector<64x128xf32>
      %679 = arith.truncf %678 : vector<64x128xf32> to vector<64x128xbf16>
      %c0_311 = arith.constant 0 : index
      %c0_312 = arith.constant 0 : index
      %680 = vector.load %arg8[%c0_311, %c0_312] : memref<128x512xbf16, #tpu.memory_space<vmem>>, vector<128x512xbf16>
      %cst_313 = arith.constant dense<0.000000e+00> : vector<64x512xf32>
      %681 = tpu.matmul %679, %680, %cst_313 {dimension_numbers = #tpu.dot_dimension_numbers<[1], [0], [0], [1], [0, 0, 1, 1], [], []>} : vector<64x128xbf16>, vector<128x512xbf16>, vector<64x512xf32> -> vector<64x512xf32>
      %c0_314 = arith.constant 0 : index
      %c0_315 = arith.constant 0 : index
      %682 = vector.load %arg10[%c0_314, %c0_315] : memref<1x512xf32, #tpu.memory_space<vmem>>, vector<1x512xf32>
      %683 = vector.broadcast %682 : vector<1x512xf32> to vector<64x512xf32>
      %684 = arith.addf %681, %683 : vector<64x512xf32>
      %685 = vector.shape_cast %684 : vector<64x512xf32> to vector<8x8x512xf32>
      %c0_316 = arith.constant 0 : index
      %c0_317 = arith.constant 0 : index
      %c0_318 = arith.constant 0 : index
      %686 = vector.load %arg18[%c0_316, %c0_317, %c0_318] : memref<8x8x512xf32, #tpu.memory_space<vmem>>, vector<8x8x512xf32>
      tpu.vector_store %arg18[%c0_316, %c0_317, %c0_318], %685 {strides = array<i32>} : memref<8x8x512xf32, #tpu.memory_space<vmem>>, vector<8x8x512xf32>,
      %c0_319 = arith.constant 0 : index
      %c0_320 = arith.constant 0 : index
      %687 = vector.load %arg9[%c0_319, %c0_320] : memref<128x512xbf16, #tpu.memory_space<vmem>>, vector<128x512xbf16>
      %c2_321 = arith.constant 2 : index
      %c0_322 = arith.constant 0 : index
      %c0_323 = arith.constant 0 : index
      %688 = vector.load %arg11[%c2_321, %c0_322, %c0_323] : memref<3x8x128xf32, #tpu.memory_space<vmem>>, vector<1x8x128xf32>
      %689 = vector.shape_cast %688 : vector<1x8x128xf32> to vector<8x128xf32>
      %c2_324 = arith.constant 2 : index
      %c0_325 = arith.constant 0 : index
      %c0_326 = arith.constant 0 : index
      %690 = vector.load %arg12[%c2_324, %c0_325, %c0_326] : memref<3x8x128xf32, #tpu.memory_space<vmem>>, vector<1x8x128xf32>
      %691 = vector.shape_cast %690 : vector<1x8x128xf32> to vector<8x128xf32>
      %c0_327 = arith.constant 0 : index
      %c0_328 = arith.constant 0 : index
      %c0_329 = arith.constant 0 : index
      %692 = vector.load %arg18[%c0_327, %c0_328, %c0_329] : memref<8x8x512xf32, #tpu.memory_space<vmem>>, vector<1x8x512xf32>
      %693 = vector.shape_cast %692 : vector<1x8x512xf32> to vector<8x512xf32>
      %694 = arith.truncf %689 : vector<8x128xf32> to vector<8x128xbf16>
      %cst_330 = arith.constant dense<0.000000e+00> : vector<8x512xf32>
      %695 = tpu.matmul %694, %687, %cst_330 {dimension_numbers = #tpu.dot_dimension_numbers<[1], [0], [0], [1], [0, 0, 1, 1], [], []>} : vector<8x128xbf16>, vector<128x512xbf16>, vector<8x512xf32> -> vector<8x512xf32>
      %696 = arith.addf %693, %695 : vector<8x512xf32>
      %697 = vector.extract_strided_slice %696 {offsets = [0, 0], sizes = [8, 128], strides = [1, 1]} : vector<8x512xf32> to vector<8x128xf32>
      %cst_331 = arith.constant 5.000000e-01 : f32
      %698 = vector.broadcast %cst_331 : f32 to vector<8x128xf32>
      %699 = arith.mulf %698, %697 : vector<8x128xf32>
      %700 = math.tanh %699 : vector<8x128xf32>
      %cst_332 = arith.constant 5.000000e-01 : f32
      %701 = vector.broadcast %cst_332 : f32 to vector<8x128xf32>
      %702 = arith.mulf %701, %700 : vector<8x128xf32>
      %cst_333 = arith.constant 5.000000e-01 : f32
      %703 = vector.broadcast %cst_333 : f32 to vector<8x128xf32>
      %704 = arith.addf %702, %703 : vector<8x128xf32>
      %705 = vector.extract_strided_slice %696 {offsets = [0, 128], sizes = [8, 128], strides = [1, 1]} : vector<8x512xf32> to vector<8x128xf32>
      %cst_334 = arith.constant 5.000000e-01 : f32
      %706 = vector.broadcast %cst_334 : f32 to vector<8x128xf32>
      %707 = arith.mulf %706, %705 : vector<8x128xf32>
      %708 = math.tanh %707 : vector<8x128xf32>
      %cst_335 = arith.constant 5.000000e-01 : f32
      %709 = vector.broadcast %cst_335 : f32 to vector<8x128xf32>
      %710 = arith.mulf %709, %708 : vector<8x128xf32>
      %cst_336 = arith.constant 5.000000e-01 : f32
      %711 = vector.broadcast %cst_336 : f32 to vector<8x128xf32>
      %712 = arith.addf %710, %711 : vector<8x128xf32>
      %713 = vector.extract_strided_slice %696 {offsets = [0, 256], sizes = [8, 128], strides = [1, 1]} : vector<8x512xf32> to vector<8x128xf32>
      %714 = math.tanh %713 : vector<8x128xf32>
      %715 = vector.extract_strided_slice %696 {offsets = [0, 384], sizes = [8, 128], strides = [1, 1]} : vector<8x512xf32> to vector<8x128xf32>
      %cst_337 = arith.constant 5.000000e-01 : f32
      %716 = vector.broadcast %cst_337 : f32 to vector<8x128xf32>
      %717 = arith.mulf %716, %715 : vector<8x128xf32>
      %718 = math.tanh %717 : vector<8x128xf32>
      %cst_338 = arith.constant 5.000000e-01 : f32
      %719 = vector.broadcast %cst_338 : f32 to vector<8x128xf32>
      %720 = arith.mulf %719, %718 : vector<8x128xf32>
      %cst_339 = arith.constant 5.000000e-01 : f32
      %721 = vector.broadcast %cst_339 : f32 to vector<8x128xf32>
      %722 = arith.addf %720, %721 : vector<8x128xf32>
      %723 = arith.mulf %712, %691 : vector<8x128xf32>
      %724 = arith.mulf %704, %714 : vector<8x128xf32>
      %725 = arith.addf %723, %724 : vector<8x128xf32>
      %726 = math.tanh %725 : vector<8x128xf32>
      %727 = arith.mulf %722, %726 : vector<8x128xf32>
      %c0_340 = arith.constant 0 : index
      %c0_341 = arith.constant 0 : index
      %c0_342 = arith.constant 0 : index
      %728 = vector.load %arg19[%c0_340, %c0_341, %c0_342] : memref<8x8x128xf32, #tpu.memory_space<vmem>>, vector<1x8x128xf32>
      %729 = vector.shape_cast %728 : vector<1x8x128xf32> to vector<8x128xf32>
      %730 = vector.shape_cast %727 : vector<8x128xf32> to vector<1x8x128xf32>
      tpu.vector_store %arg19[%c0_340, %c0_341, %c0_342], %730 {strides = array<i32>} : memref<8x8x128xf32, #tpu.memory_space<vmem>>, vector<1x8x128xf32>,
      %c1_343 = arith.constant 1 : index
      %c0_344 = arith.constant 0 : index
      %c0_345 = arith.constant 0 : index
      %731 = vector.load %arg18[%c1_343, %c0_344, %c0_345] : memref<8x8x512xf32, #tpu.memory_space<vmem>>, vector<1x8x512xf32>
      %732 = vector.shape_cast %731 : vector<1x8x512xf32> to vector<8x512xf32>
      %733 = arith.truncf %727 : vector<8x128xf32> to vector<8x128xbf16>
      %cst_346 = arith.constant dense<0.000000e+00> : vector<8x512xf32>
      %734 = tpu.matmul %733, %687, %cst_346 {dimension_numbers = #tpu.dot_dimension_numbers<[1], [0], [0], [1], [0, 0, 1, 1], [], []>} : vector<8x128xbf16>, vector<128x512xbf16>, vector<8x512xf32> -> vector<8x512xf32>
      %735 = arith.addf %732, %734 : vector<8x512xf32>
      %736 = vector.extract_strided_slice %735 {offsets = [0, 0], sizes = [8, 128], strides = [1, 1]} : vector<8x512xf32> to vector<8x128xf32>
      %cst_347 = arith.constant 5.000000e-01 : f32
      %737 = vector.broadcast %cst_347 : f32 to vector<8x128xf32>
      %738 = arith.mulf %737, %736 : vector<8x128xf32>
      %739 = math.tanh %738 : vector<8x128xf32>
      %cst_348 = arith.constant 5.000000e-01 : f32
      %740 = vector.broadcast %cst_348 : f32 to vector<8x128xf32>
      %741 = arith.mulf %740, %739 : vector<8x128xf32>
      %cst_349 = arith.constant 5.000000e-01 : f32
      %742 = vector.broadcast %cst_349 : f32 to vector<8x128xf32>
      %743 = arith.addf %741, %742 : vector<8x128xf32>
      %744 = vector.extract_strided_slice %735 {offsets = [0, 128], sizes = [8, 128], strides = [1, 1]} : vector<8x512xf32> to vector<8x128xf32>
      %cst_350 = arith.constant 5.000000e-01 : f32
      %745 = vector.broadcast %cst_350 : f32 to vector<8x128xf32>
      %746 = arith.mulf %745, %744 : vector<8x128xf32>
      %747 = math.tanh %746 : vector<8x128xf32>
      %cst_351 = arith.constant 5.000000e-01 : f32
      %748 = vector.broadcast %cst_351 : f32 to vector<8x128xf32>
      %749 = arith.mulf %748, %747 : vector<8x128xf32>
      %cst_352 = arith.constant 5.000000e-01 : f32
      %750 = vector.broadcast %cst_352 : f32 to vector<8x128xf32>
      %751 = arith.addf %749, %750 : vector<8x128xf32>
      %752 = vector.extract_strided_slice %735 {offsets = [0, 256], sizes = [8, 128], strides = [1, 1]} : vector<8x512xf32> to vector<8x128xf32>
      %753 = math.tanh %752 : vector<8x128xf32>
      %754 = vector.extract_strided_slice %735 {offsets = [0, 384], sizes = [8, 128], strides = [1, 1]} : vector<8x512xf32> to vector<8x128xf32>
      %cst_353 = arith.constant 5.000000e-01 : f32
      %755 = vector.broadcast %cst_353 : f32 to vector<8x128xf32>
      %756 = arith.mulf %755, %754 : vector<8x128xf32>
      %757 = math.tanh %756 : vector<8x128xf32>
      %cst_354 = arith.constant 5.000000e-01 : f32
      %758 = vector.broadcast %cst_354 : f32 to vector<8x128xf32>
      %759 = arith.mulf %758, %757 : vector<8x128xf32>
      %cst_355 = arith.constant 5.000000e-01 : f32
      %760 = vector.broadcast %cst_355 : f32 to vector<8x128xf32>
      %761 = arith.addf %759, %760 : vector<8x128xf32>
      %762 = arith.mulf %751, %725 : vector<8x128xf32>
      %763 = arith.mulf %743, %753 : vector<8x128xf32>
      %764 = arith.addf %762, %763 : vector<8x128xf32>
      %765 = math.tanh %764 : vector<8x128xf32>
      %766 = arith.mulf %761, %765 : vector<8x128xf32>
      %c1_356 = arith.constant 1 : index
      %c0_357 = arith.constant 0 : index
      %c0_358 = arith.constant 0 : index
      %767 = vector.load %arg19[%c1_356, %c0_357, %c0_358] : memref<8x8x128xf32, #tpu.memory_space<vmem>>, vector<1x8x128xf32>
      %768 = vector.shape_cast %767 : vector<1x8x128xf32> to vector<8x128xf32>
      %769 = vector.shape_cast %766 : vector<8x128xf32> to vector<1x8x128xf32>
      tpu.vector_store %arg19[%c1_356, %c0_357, %c0_358], %769 {strides = array<i32>} : memref<8x8x128xf32, #tpu.memory_space<vmem>>, vector<1x8x128xf32>,
      %c2_359 = arith.constant 2 : index
      %c0_360 = arith.constant 0 : index
      %c0_361 = arith.constant 0 : index
      %770 = vector.load %arg18[%c2_359, %c0_360, %c0_361] : memref<8x8x512xf32, #tpu.memory_space<vmem>>, vector<1x8x512xf32>
      %771 = vector.shape_cast %770 : vector<1x8x512xf32> to vector<8x512xf32>
      %772 = arith.truncf %766 : vector<8x128xf32> to vector<8x128xbf16>
      %cst_362 = arith.constant dense<0.000000e+00> : vector<8x512xf32>
      %773 = tpu.matmul %772, %687, %cst_362 {dimension_numbers = #tpu.dot_dimension_numbers<[1], [0], [0], [1], [0, 0, 1, 1], [], []>} : vector<8x128xbf16>, vector<128x512xbf16>, vector<8x512xf32> -> vector<8x512xf32>
      %774 = arith.addf %771, %773 : vector<8x512xf32>
      %775 = vector.extract_strided_slice %774 {offsets = [0, 0], sizes = [8, 128], strides = [1, 1]} : vector<8x512xf32> to vector<8x128xf32>
      %cst_363 = arith.constant 5.000000e-01 : f32
      %776 = vector.broadcast %cst_363 : f32 to vector<8x128xf32>
      %777 = arith.mulf %776, %775 : vector<8x128xf32>
      %778 = math.tanh %777 : vector<8x128xf32>
      %cst_364 = arith.constant 5.000000e-01 : f32
      %779 = vector.broadcast %cst_364 : f32 to vector<8x128xf32>
      %780 = arith.mulf %779, %778 : vector<8x128xf32>
      %cst_365 = arith.constant 5.000000e-01 : f32
      %781 = vector.broadcast %cst_365 : f32 to vector<8x128xf32>
      %782 = arith.addf %780, %781 : vector<8x128xf32>
      %783 = vector.extract_strided_slice %774 {offsets = [0, 128], sizes = [8, 128], strides = [1, 1]} : vector<8x512xf32> to vector<8x128xf32>
      %cst_366 = arith.constant 5.000000e-01 : f32
      %784 = vector.broadcast %cst_366 : f32 to vector<8x128xf32>
      %785 = arith.mulf %784, %783 : vector<8x128xf32>
      %786 = math.tanh %785 : vector<8x128xf32>
      %cst_367 = arith.constant 5.000000e-01 : f32
      %787 = vector.broadcast %cst_367 : f32 to vector<8x128xf32>
      %788 = arith.mulf %787, %786 : vector<8x128xf32>
      %cst_368 = arith.constant 5.000000e-01 : f32
      %789 = vector.broadcast %cst_368 : f32 to vector<8x128xf32>
      %790 = arith.addf %788, %789 : vector<8x128xf32>
      %791 = vector.extract_strided_slice %774 {offsets = [0, 256], sizes = [8, 128], strides = [1, 1]} : vector<8x512xf32> to vector<8x128xf32>
      %792 = math.tanh %791 : vector<8x128xf32>
      %793 = vector.extract_strided_slice %774 {offsets = [0, 384], sizes = [8, 128], strides = [1, 1]} : vector<8x512xf32> to vector<8x128xf32>
      %cst_369 = arith.constant 5.000000e-01 : f32
      %794 = vector.broadcast %cst_369 : f32 to vector<8x128xf32>
      %795 = arith.mulf %794, %793 : vector<8x128xf32>
      %796 = math.tanh %795 : vector<8x128xf32>
      %cst_370 = arith.constant 5.000000e-01 : f32
      %797 = vector.broadcast %cst_370 : f32 to vector<8x128xf32>
      %798 = arith.mulf %797, %796 : vector<8x128xf32>
      %cst_371 = arith.constant 5.000000e-01 : f32
      %799 = vector.broadcast %cst_371 : f32 to vector<8x128xf32>
      %800 = arith.addf %798, %799 : vector<8x128xf32>
      %801 = arith.mulf %790, %764 : vector<8x128xf32>
      %802 = arith.mulf %782, %792 : vector<8x128xf32>
      %803 = arith.addf %801, %802 : vector<8x128xf32>
      %804 = math.tanh %803 : vector<8x128xf32>
      %805 = arith.mulf %800, %804 : vector<8x128xf32>
      %c2_372 = arith.constant 2 : index
      %c0_373 = arith.constant 0 : index
      %c0_374 = arith.constant 0 : index
      %806 = vector.load %arg19[%c2_372, %c0_373, %c0_374] : memref<8x8x128xf32, #tpu.memory_space<vmem>>, vector<1x8x128xf32>
      %807 = vector.shape_cast %806 : vector<1x8x128xf32> to vector<8x128xf32>
      %808 = vector.shape_cast %805 : vector<8x128xf32> to vector<1x8x128xf32>
      tpu.vector_store %arg19[%c2_372, %c0_373, %c0_374], %808 {strides = array<i32>} : memref<8x8x128xf32, #tpu.memory_space<vmem>>, vector<1x8x128xf32>,
      %c3_375 = arith.constant 3 : index
      %c0_376 = arith.constant 0 : index
      %c0_377 = arith.constant 0 : index
      %809 = vector.load %arg18[%c3_375, %c0_376, %c0_377] : memref<8x8x512xf32, #tpu.memory_space<vmem>>, vector<1x8x512xf32>
      %810 = vector.shape_cast %809 : vector<1x8x512xf32> to vector<8x512xf32>
      %811 = arith.truncf %805 : vector<8x128xf32> to vector<8x128xbf16>
      %cst_378 = arith.constant dense<0.000000e+00> : vector<8x512xf32>
      %812 = tpu.matmul %811, %687, %cst_378 {dimension_numbers = #tpu.dot_dimension_numbers<[1], [0], [0], [1], [0, 0, 1, 1], [], []>} : vector<8x128xbf16>, vector<128x512xbf16>, vector<8x512xf32> -> vector<8x512xf32>
      %813 = arith.addf %810, %812 : vector<8x512xf32>
      %814 = vector.extract_strided_slice %813 {offsets = [0, 0], sizes = [8, 128], strides = [1, 1]} : vector<8x512xf32> to vector<8x128xf32>
      %cst_379 = arith.constant 5.000000e-01 : f32
      %815 = vector.broadcast %cst_379 : f32 to vector<8x128xf32>
      %816 = arith.mulf %815, %814 : vector<8x128xf32>
      %817 = math.tanh %816 : vector<8x128xf32>
      %cst_380 = arith.constant 5.000000e-01 : f32
      %818 = vector.broadcast %cst_380 : f32 to vector<8x128xf32>
      %819 = arith.mulf %818, %817 : vector<8x128xf32>
      %cst_381 = arith.constant 5.000000e-01 : f32
      %820 = vector.broadcast %cst_381 : f32 to vector<8x128xf32>
      %821 = arith.addf %819, %820 : vector<8x128xf32>
      %822 = vector.extract_strided_slice %813 {offsets = [0, 128], sizes = [8, 128], strides = [1, 1]} : vector<8x512xf32> to vector<8x128xf32>
      %cst_382 = arith.constant 5.000000e-01 : f32
      %823 = vector.broadcast %cst_382 : f32 to vector<8x128xf32>
      %824 = arith.mulf %823, %822 : vector<8x128xf32>
      %825 = math.tanh %824 : vector<8x128xf32>
      %cst_383 = arith.constant 5.000000e-01 : f32
      %826 = vector.broadcast %cst_383 : f32 to vector<8x128xf32>
      %827 = arith.mulf %826, %825 : vector<8x128xf32>
      %cst_384 = arith.constant 5.000000e-01 : f32
      %828 = vector.broadcast %cst_384 : f32 to vector<8x128xf32>
      %829 = arith.addf %827, %828 : vector<8x128xf32>
      %830 = vector.extract_strided_slice %813 {offsets = [0, 256], sizes = [8, 128], strides = [1, 1]} : vector<8x512xf32> to vector<8x128xf32>
      %831 = math.tanh %830 : vector<8x128xf32>
      %832 = vector.extract_strided_slice %813 {offsets = [0, 384], sizes = [8, 128], strides = [1, 1]} : vector<8x512xf32> to vector<8x128xf32>
      %cst_385 = arith.constant 5.000000e-01 : f32
      %833 = vector.broadcast %cst_385 : f32 to vector<8x128xf32>
      %834 = arith.mulf %833, %832 : vector<8x128xf32>
      %835 = math.tanh %834 : vector<8x128xf32>
      %cst_386 = arith.constant 5.000000e-01 : f32
      %836 = vector.broadcast %cst_386 : f32 to vector<8x128xf32>
      %837 = arith.mulf %836, %835 : vector<8x128xf32>
      %cst_387 = arith.constant 5.000000e-01 : f32
      %838 = vector.broadcast %cst_387 : f32 to vector<8x128xf32>
      %839 = arith.addf %837, %838 : vector<8x128xf32>
      %840 = arith.mulf %829, %803 : vector<8x128xf32>
      %841 = arith.mulf %821, %831 : vector<8x128xf32>
      %842 = arith.addf %840, %841 : vector<8x128xf32>
      %843 = math.tanh %842 : vector<8x128xf32>
      %844 = arith.mulf %839, %843 : vector<8x128xf32>
      %c3_388 = arith.constant 3 : index
      %c0_389 = arith.constant 0 : index
      %c0_390 = arith.constant 0 : index
      %845 = vector.load %arg19[%c3_388, %c0_389, %c0_390] : memref<8x8x128xf32, #tpu.memory_space<vmem>>, vector<1x8x128xf32>
      %846 = vector.shape_cast %845 : vector<1x8x128xf32> to vector<8x128xf32>
      %847 = vector.shape_cast %844 : vector<8x128xf32> to vector<1x8x128xf32>
      tpu.vector_store %arg19[%c3_388, %c0_389, %c0_390], %847 {strides = array<i32>} : memref<8x8x128xf32, #tpu.memory_space<vmem>>, vector<1x8x128xf32>,
      %c4_391 = arith.constant 4 : index
      %c0_392 = arith.constant 0 : index
      %c0_393 = arith.constant 0 : index
      %848 = vector.load %arg18[%c4_391, %c0_392, %c0_393] : memref<8x8x512xf32, #tpu.memory_space<vmem>>, vector<1x8x512xf32>
      %849 = vector.shape_cast %848 : vector<1x8x512xf32> to vector<8x512xf32>
      %850 = arith.truncf %844 : vector<8x128xf32> to vector<8x128xbf16>
      %cst_394 = arith.constant dense<0.000000e+00> : vector<8x512xf32>
      %851 = tpu.matmul %850, %687, %cst_394 {dimension_numbers = #tpu.dot_dimension_numbers<[1], [0], [0], [1], [0, 0, 1, 1], [], []>} : vector<8x128xbf16>, vector<128x512xbf16>, vector<8x512xf32> -> vector<8x512xf32>
      %852 = arith.addf %849, %851 : vector<8x512xf32>
      %853 = vector.extract_strided_slice %852 {offsets = [0, 0], sizes = [8, 128], strides = [1, 1]} : vector<8x512xf32> to vector<8x128xf32>
      %cst_395 = arith.constant 5.000000e-01 : f32
      %854 = vector.broadcast %cst_395 : f32 to vector<8x128xf32>
      %855 = arith.mulf %854, %853 : vector<8x128xf32>
      %856 = math.tanh %855 : vector<8x128xf32>
      %cst_396 = arith.constant 5.000000e-01 : f32
      %857 = vector.broadcast %cst_396 : f32 to vector<8x128xf32>
      %858 = arith.mulf %857, %856 : vector<8x128xf32>
      %cst_397 = arith.constant 5.000000e-01 : f32
      %859 = vector.broadcast %cst_397 : f32 to vector<8x128xf32>
      %860 = arith.addf %858, %859 : vector<8x128xf32>
      %861 = vector.extract_strided_slice %852 {offsets = [0, 128], sizes = [8, 128], strides = [1, 1]} : vector<8x512xf32> to vector<8x128xf32>
      %cst_398 = arith.constant 5.000000e-01 : f32
      %862 = vector.broadcast %cst_398 : f32 to vector<8x128xf32>
      %863 = arith.mulf %862, %861 : vector<8x128xf32>
      %864 = math.tanh %863 : vector<8x128xf32>
      %cst_399 = arith.constant 5.000000e-01 : f32
      %865 = vector.broadcast %cst_399 : f32 to vector<8x128xf32>
      %866 = arith.mulf %865, %864 : vector<8x128xf32>
      %cst_400 = arith.constant 5.000000e-01 : f32
      %867 = vector.broadcast %cst_400 : f32 to vector<8x128xf32>
      %868 = arith.addf %866, %867 : vector<8x128xf32>
      %869 = vector.extract_strided_slice %852 {offsets = [0, 256], sizes = [8, 128], strides = [1, 1]} : vector<8x512xf32> to vector<8x128xf32>
      %870 = math.tanh %869 : vector<8x128xf32>
      %871 = vector.extract_strided_slice %852 {offsets = [0, 384], sizes = [8, 128], strides = [1, 1]} : vector<8x512xf32> to vector<8x128xf32>
      %cst_401 = arith.constant 5.000000e-01 : f32
      %872 = vector.broadcast %cst_401 : f32 to vector<8x128xf32>
      %873 = arith.mulf %872, %871 : vector<8x128xf32>
      %874 = math.tanh %873 : vector<8x128xf32>
      %cst_402 = arith.constant 5.000000e-01 : f32
      %875 = vector.broadcast %cst_402 : f32 to vector<8x128xf32>
      %876 = arith.mulf %875, %874 : vector<8x128xf32>
      %cst_403 = arith.constant 5.000000e-01 : f32
      %877 = vector.broadcast %cst_403 : f32 to vector<8x128xf32>
      %878 = arith.addf %876, %877 : vector<8x128xf32>
      %879 = arith.mulf %868, %842 : vector<8x128xf32>
      %880 = arith.mulf %860, %870 : vector<8x128xf32>
      %881 = arith.addf %879, %880 : vector<8x128xf32>
      %882 = math.tanh %881 : vector<8x128xf32>
      %883 = arith.mulf %878, %882 : vector<8x128xf32>
      %c4_404 = arith.constant 4 : index
      %c0_405 = arith.constant 0 : index
      %c0_406 = arith.constant 0 : index
      %884 = vector.load %arg19[%c4_404, %c0_405, %c0_406] : memref<8x8x128xf32, #tpu.memory_space<vmem>>, vector<1x8x128xf32>
      %885 = vector.shape_cast %884 : vector<1x8x128xf32> to vector<8x128xf32>
      %886 = vector.shape_cast %883 : vector<8x128xf32> to vector<1x8x128xf32>
      tpu.vector_store %arg19[%c4_404, %c0_405, %c0_406], %886 {strides = array<i32>} : memref<8x8x128xf32, #tpu.memory_space<vmem>>, vector<1x8x128xf32>,
      %c5_407 = arith.constant 5 : index
      %c0_408 = arith.constant 0 : index
      %c0_409 = arith.constant 0 : index
      %887 = vector.load %arg18[%c5_407, %c0_408, %c0_409] : memref<8x8x512xf32, #tpu.memory_space<vmem>>, vector<1x8x512xf32>
      %888 = vector.shape_cast %887 : vector<1x8x512xf32> to vector<8x512xf32>
      %889 = arith.truncf %883 : vector<8x128xf32> to vector<8x128xbf16>
      %cst_410 = arith.constant dense<0.000000e+00> : vector<8x512xf32>
      %890 = tpu.matmul %889, %687, %cst_410 {dimension_numbers = #tpu.dot_dimension_numbers<[1], [0], [0], [1], [0, 0, 1, 1], [], []>} : vector<8x128xbf16>, vector<128x512xbf16>, vector<8x512xf32> -> vector<8x512xf32>
      %891 = arith.addf %888, %890 : vector<8x512xf32>
      %892 = vector.extract_strided_slice %891 {offsets = [0, 0], sizes = [8, 128], strides = [1, 1]} : vector<8x512xf32> to vector<8x128xf32>
      %cst_411 = arith.constant 5.000000e-01 : f32
      %893 = vector.broadcast %cst_411 : f32 to vector<8x128xf32>
      %894 = arith.mulf %893, %892 : vector<8x128xf32>
      %895 = math.tanh %894 : vector<8x128xf32>
      %cst_412 = arith.constant 5.000000e-01 : f32
      %896 = vector.broadcast %cst_412 : f32 to vector<8x128xf32>
      %897 = arith.mulf %896, %895 : vector<8x128xf32>
      %cst_413 = arith.constant 5.000000e-01 : f32
      %898 = vector.broadcast %cst_413 : f32 to vector<8x128xf32>
      %899 = arith.addf %897, %898 : vector<8x128xf32>
      %900 = vector.extract_strided_slice %891 {offsets = [0, 128], sizes = [8, 128], strides = [1, 1]} : vector<8x512xf32> to vector<8x128xf32>
      %cst_414 = arith.constant 5.000000e-01 : f32
      %901 = vector.broadcast %cst_414 : f32 to vector<8x128xf32>
      %902 = arith.mulf %901, %900 : vector<8x128xf32>
      %903 = math.tanh %902 : vector<8x128xf32>
      %cst_415 = arith.constant 5.000000e-01 : f32
      %904 = vector.broadcast %cst_415 : f32 to vector<8x128xf32>
      %905 = arith.mulf %904, %903 : vector<8x128xf32>
      %cst_416 = arith.constant 5.000000e-01 : f32
      %906 = vector.broadcast %cst_416 : f32 to vector<8x128xf32>
      %907 = arith.addf %905, %906 : vector<8x128xf32>
      %908 = vector.extract_strided_slice %891 {offsets = [0, 256], sizes = [8, 128], strides = [1, 1]} : vector<8x512xf32> to vector<8x128xf32>
      %909 = math.tanh %908 : vector<8x128xf32>
      %910 = vector.extract_strided_slice %891 {offsets = [0, 384], sizes = [8, 128], strides = [1, 1]} : vector<8x512xf32> to vector<8x128xf32>
      %cst_417 = arith.constant 5.000000e-01 : f32
      %911 = vector.broadcast %cst_417 : f32 to vector<8x128xf32>
      %912 = arith.mulf %911, %910 : vector<8x128xf32>
      %913 = math.tanh %912 : vector<8x128xf32>
      %cst_418 = arith.constant 5.000000e-01 : f32
      %914 = vector.broadcast %cst_418 : f32 to vector<8x128xf32>
      %915 = arith.mulf %914, %913 : vector<8x128xf32>
      %cst_419 = arith.constant 5.000000e-01 : f32
      %916 = vector.broadcast %cst_419 : f32 to vector<8x128xf32>
      %917 = arith.addf %915, %916 : vector<8x128xf32>
      %918 = arith.mulf %907, %881 : vector<8x128xf32>
      %919 = arith.mulf %899, %909 : vector<8x128xf32>
      %920 = arith.addf %918, %919 : vector<8x128xf32>
      %921 = math.tanh %920 : vector<8x128xf32>
      %922 = arith.mulf %917, %921 : vector<8x128xf32>
      %c5_420 = arith.constant 5 : index
      %c0_421 = arith.constant 0 : index
      %c0_422 = arith.constant 0 : index
      %923 = vector.load %arg19[%c5_420, %c0_421, %c0_422] : memref<8x8x128xf32, #tpu.memory_space<vmem>>, vector<1x8x128xf32>
      %924 = vector.shape_cast %923 : vector<1x8x128xf32> to vector<8x128xf32>
      %925 = vector.shape_cast %922 : vector<8x128xf32> to vector<1x8x128xf32>
      tpu.vector_store %arg19[%c5_420, %c0_421, %c0_422], %925 {strides = array<i32>} : memref<8x8x128xf32, #tpu.memory_space<vmem>>, vector<1x8x128xf32>,
      %c6_423 = arith.constant 6 : index
      %c0_424 = arith.constant 0 : index
      %c0_425 = arith.constant 0 : index
      %926 = vector.load %arg18[%c6_423, %c0_424, %c0_425] : memref<8x8x512xf32, #tpu.memory_space<vmem>>, vector<1x8x512xf32>
      %927 = vector.shape_cast %926 : vector<1x8x512xf32> to vector<8x512xf32>
      %928 = arith.truncf %922 : vector<8x128xf32> to vector<8x128xbf16>
      %cst_426 = arith.constant dense<0.000000e+00> : vector<8x512xf32>
      %929 = tpu.matmul %928, %687, %cst_426 {dimension_numbers = #tpu.dot_dimension_numbers<[1], [0], [0], [1], [0, 0, 1, 1], [], []>} : vector<8x128xbf16>, vector<128x512xbf16>, vector<8x512xf32> -> vector<8x512xf32>
      %930 = arith.addf %927, %929 : vector<8x512xf32>
      %931 = vector.extract_strided_slice %930 {offsets = [0, 0], sizes = [8, 128], strides = [1, 1]} : vector<8x512xf32> to vector<8x128xf32>
      %cst_427 = arith.constant 5.000000e-01 : f32
      %932 = vector.broadcast %cst_427 : f32 to vector<8x128xf32>
      %933 = arith.mulf %932, %931 : vector<8x128xf32>
      %934 = math.tanh %933 : vector<8x128xf32>
      %cst_428 = arith.constant 5.000000e-01 : f32
      %935 = vector.broadcast %cst_428 : f32 to vector<8x128xf32>
      %936 = arith.mulf %935, %934 : vector<8x128xf32>
      %cst_429 = arith.constant 5.000000e-01 : f32
      %937 = vector.broadcast %cst_429 : f32 to vector<8x128xf32>
      %938 = arith.addf %936, %937 : vector<8x128xf32>
      %939 = vector.extract_strided_slice %930 {offsets = [0, 128], sizes = [8, 128], strides = [1, 1]} : vector<8x512xf32> to vector<8x128xf32>
      %cst_430 = arith.constant 5.000000e-01 : f32
      %940 = vector.broadcast %cst_430 : f32 to vector<8x128xf32>
      %941 = arith.mulf %940, %939 : vector<8x128xf32>
      %942 = math.tanh %941 : vector<8x128xf32>
      %cst_431 = arith.constant 5.000000e-01 : f32
      %943 = vector.broadcast %cst_431 : f32 to vector<8x128xf32>
      %944 = arith.mulf %943, %942 : vector<8x128xf32>
      %cst_432 = arith.constant 5.000000e-01 : f32
      %945 = vector.broadcast %cst_432 : f32 to vector<8x128xf32>
      %946 = arith.addf %944, %945 : vector<8x128xf32>
      %947 = vector.extract_strided_slice %930 {offsets = [0, 256], sizes = [8, 128], strides = [1, 1]} : vector<8x512xf32> to vector<8x128xf32>
      %948 = math.tanh %947 : vector<8x128xf32>
      %949 = vector.extract_strided_slice %930 {offsets = [0, 384], sizes = [8, 128], strides = [1, 1]} : vector<8x512xf32> to vector<8x128xf32>
      %cst_433 = arith.constant 5.000000e-01 : f32
      %950 = vector.broadcast %cst_433 : f32 to vector<8x128xf32>
      %951 = arith.mulf %950, %949 : vector<8x128xf32>
      %952 = math.tanh %951 : vector<8x128xf32>
      %cst_434 = arith.constant 5.000000e-01 : f32
      %953 = vector.broadcast %cst_434 : f32 to vector<8x128xf32>
      %954 = arith.mulf %953, %952 : vector<8x128xf32>
      %cst_435 = arith.constant 5.000000e-01 : f32
      %955 = vector.broadcast %cst_435 : f32 to vector<8x128xf32>
      %956 = arith.addf %954, %955 : vector<8x128xf32>
      %957 = arith.mulf %946, %920 : vector<8x128xf32>
      %958 = arith.mulf %938, %948 : vector<8x128xf32>
      %959 = arith.addf %957, %958 : vector<8x128xf32>
      %960 = math.tanh %959 : vector<8x128xf32>
      %961 = arith.mulf %956, %960 : vector<8x128xf32>
      %c6_436 = arith.constant 6 : index
      %c0_437 = arith.constant 0 : index
      %c0_438 = arith.constant 0 : index
      %962 = vector.load %arg19[%c6_436, %c0_437, %c0_438] : memref<8x8x128xf32, #tpu.memory_space<vmem>>, vector<1x8x128xf32>
      %963 = vector.shape_cast %962 : vector<1x8x128xf32> to vector<8x128xf32>
      %964 = vector.shape_cast %961 : vector<8x128xf32> to vector<1x8x128xf32>
      tpu.vector_store %arg19[%c6_436, %c0_437, %c0_438], %964 {strides = array<i32>} : memref<8x8x128xf32, #tpu.memory_space<vmem>>, vector<1x8x128xf32>,
      %c7_439 = arith.constant 7 : index
      %c0_440 = arith.constant 0 : index
      %c0_441 = arith.constant 0 : index
      %965 = vector.load %arg18[%c7_439, %c0_440, %c0_441] : memref<8x8x512xf32, #tpu.memory_space<vmem>>, vector<1x8x512xf32>
      %966 = vector.shape_cast %965 : vector<1x8x512xf32> to vector<8x512xf32>
      %967 = arith.truncf %961 : vector<8x128xf32> to vector<8x128xbf16>
      %cst_442 = arith.constant dense<0.000000e+00> : vector<8x512xf32>
      %968 = tpu.matmul %967, %687, %cst_442 {dimension_numbers = #tpu.dot_dimension_numbers<[1], [0], [0], [1], [0, 0, 1, 1], [], []>} : vector<8x128xbf16>, vector<128x512xbf16>, vector<8x512xf32> -> vector<8x512xf32>
      %969 = arith.addf %966, %968 : vector<8x512xf32>
      %970 = vector.extract_strided_slice %969 {offsets = [0, 0], sizes = [8, 128], strides = [1, 1]} : vector<8x512xf32> to vector<8x128xf32>
      %cst_443 = arith.constant 5.000000e-01 : f32
      %971 = vector.broadcast %cst_443 : f32 to vector<8x128xf32>
      %972 = arith.mulf %971, %970 : vector<8x128xf32>
      %973 = math.tanh %972 : vector<8x128xf32>
      %cst_444 = arith.constant 5.000000e-01 : f32
      %974 = vector.broadcast %cst_444 : f32 to vector<8x128xf32>
      %975 = arith.mulf %974, %973 : vector<8x128xf32>
      %cst_445 = arith.constant 5.000000e-01 : f32
      %976 = vector.broadcast %cst_445 : f32 to vector<8x128xf32>
      %977 = arith.addf %975, %976 : vector<8x128xf32>
      %978 = vector.extract_strided_slice %969 {offsets = [0, 128], sizes = [8, 128], strides = [1, 1]} : vector<8x512xf32> to vector<8x128xf32>
      %cst_446 = arith.constant 5.000000e-01 : f32
      %979 = vector.broadcast %cst_446 : f32 to vector<8x128xf32>
      %980 = arith.mulf %979, %978 : vector<8x128xf32>
      %981 = math.tanh %980 : vector<8x128xf32>
      %cst_447 = arith.constant 5.000000e-01 : f32
      %982 = vector.broadcast %cst_447 : f32 to vector<8x128xf32>
      %983 = arith.mulf %982, %981 : vector<8x128xf32>
      %cst_448 = arith.constant 5.000000e-01 : f32
      %984 = vector.broadcast %cst_448 : f32 to vector<8x128xf32>
      %985 = arith.addf %983, %984 : vector<8x128xf32>
      %986 = vector.extract_strided_slice %969 {offsets = [0, 256], sizes = [8, 128], strides = [1, 1]} : vector<8x512xf32> to vector<8x128xf32>
      %987 = math.tanh %986 : vector<8x128xf32>
      %988 = vector.extract_strided_slice %969 {offsets = [0, 384], sizes = [8, 128], strides = [1, 1]} : vector<8x512xf32> to vector<8x128xf32>
      %cst_449 = arith.constant 5.000000e-01 : f32
      %989 = vector.broadcast %cst_449 : f32 to vector<8x128xf32>
      %990 = arith.mulf %989, %988 : vector<8x128xf32>
      %991 = math.tanh %990 : vector<8x128xf32>
      %cst_450 = arith.constant 5.000000e-01 : f32
      %992 = vector.broadcast %cst_450 : f32 to vector<8x128xf32>
      %993 = arith.mulf %992, %991 : vector<8x128xf32>
      %cst_451 = arith.constant 5.000000e-01 : f32
      %994 = vector.broadcast %cst_451 : f32 to vector<8x128xf32>
      %995 = arith.addf %993, %994 : vector<8x128xf32>
      %996 = arith.mulf %985, %959 : vector<8x128xf32>
      %997 = arith.mulf %977, %987 : vector<8x128xf32>
      %998 = arith.addf %996, %997 : vector<8x128xf32>
      %999 = math.tanh %998 : vector<8x128xf32>
      %1000 = arith.mulf %995, %999 : vector<8x128xf32>
      %c7_452 = arith.constant 7 : index
      %c0_453 = arith.constant 0 : index
      %c0_454 = arith.constant 0 : index
      %1001 = vector.load %arg19[%c7_452, %c0_453, %c0_454] : memref<8x8x128xf32, #tpu.memory_space<vmem>>, vector<1x8x128xf32>
      %1002 = vector.shape_cast %1001 : vector<1x8x128xf32> to vector<8x128xf32>
      %1003 = vector.shape_cast %1000 : vector<8x128xf32> to vector<1x8x128xf32>
      tpu.vector_store %arg19[%c7_452, %c0_453, %c0_454], %1003 {strides = array<i32>} : memref<8x8x128xf32, #tpu.memory_space<vmem>>, vector<1x8x128xf32>,
      %c2_455 = arith.constant 2 : index
      %c0_456 = arith.constant 0 : index
      %c0_457 = arith.constant 0 : index
      %1004 = vector.load %arg16[%c2_455, %c0_456, %c0_457] : memref<3x8x128xf32, #tpu.memory_space<vmem>>, vector<1x8x128xf32>
      %1005 = vector.shape_cast %1004 : vector<1x8x128xf32> to vector<8x128xf32>
      %1006 = vector.shape_cast %1000 : vector<8x128xf32> to vector<1x8x128xf32>
      tpu.vector_store %arg16[%c2_455, %c0_456, %c0_457], %1006 {strides = array<i32>} : memref<3x8x128xf32, #tpu.memory_space<vmem>>, vector<1x8x128xf32>,
      %c2_458 = arith.constant 2 : index
      %c0_459 = arith.constant 0 : index
      %c0_460 = arith.constant 0 : index
      %1007 = vector.load %arg17[%c2_458, %c0_459, %c0_460] : memref<3x8x128xf32, #tpu.memory_space<vmem>>, vector<1x8x128xf32>
      %1008 = vector.shape_cast %1007 : vector<1x8x128xf32> to vector<8x128xf32>
      %1009 = vector.shape_cast %998 : vector<8x128xf32> to vector<1x8x128xf32>
      tpu.vector_store %arg17[%c2_458, %c0_459, %c0_460], %1009 {strides = array<i32>} : memref<3x8x128xf32, #tpu.memory_space<vmem>>, vector<1x8x128xf32>,
      %c0_461 = arith.constant 0 : index
      %c0_462 = arith.constant 0 : index
      %c0_463 = arith.constant 0 : index
      %1010 = vector.load %arg19[%c0_461, %c0_462, %c0_463] : memref<8x8x128xf32, #tpu.memory_space<vmem>>, vector<8x8x128xf32>
      %1011 = vector.shape_cast %1010 : vector<8x8x128xf32> to vector<64x128xf32>
      %1012 = arith.truncf %1011 : vector<64x128xf32> to vector<64x128xbf16>
      %c0_464 = arith.constant 0 : index
      %c0_465 = arith.constant 0 : index
      %1013 = vector.load %arg20[%c0_464, %c0_465] : memref<64x128xbf16, #tpu.memory_space<vmem>>, vector<64x128xbf16>
      tpu.vector_store %arg20[%c0_464, %c0_465], %1012 {strides = array<i32>} : memref<64x128xbf16, #tpu.memory_space<vmem>>, vector<64x128xbf16>,
    } else {
    }
    %c0 = arith.constant 0 : index
    %c0_1 = arith.constant 0 : index
    %3 = vector.load %arg20[%c0, %c0_1] : memref<64x128xbf16, #tpu.memory_space<vmem>>, vector<64x128xbf16>
    %c0_2 = arith.constant 0 : index
    %c0_3 = arith.constant 0 : index
    %4 = vector.load %arg13[%c0_2, %c0_3] : memref<128x256xbf16, #tpu.memory_space<vmem>>, vector<128x256xbf16>
    %cst = arith.constant dense<0.000000e+00> : vector<64x256xf32>
    %5 = tpu.matmul %3, %4, %cst {dimension_numbers = #tpu.dot_dimension_numbers<[1], [0], [0], [1], [0, 0, 1, 1], [], []>} : vector<64x128xbf16>, vector<128x256xbf16>, vector<64x256xf32> -> vector<64x256xf32>
    %c0_4 = arith.constant 0 : index
    %c0_5 = arith.constant 0 : index
    %6 = vector.load %arg14[%c0_4, %c0_5] : memref<1x256xf32, #tpu.memory_space<vmem>>, vector<1x256xf32>
    %7 = vector.broadcast %6 : vector<1x256xf32> to vector<64x256xf32>
    %8 = arith.addf %5, %7 : vector<64x256xf32>
    %9 = vector.shape_cast %8 : vector<64x256xf32> to vector<8x8x256xf32>
    %c0_6 = arith.constant 0 : index
    %c0_7 = arith.constant 0 : index
    %c0_8 = arith.constant 0 : index
    %10 = vector.load %arg15[%c0_6, %c0_7, %c0_8] : memref<8x8x256xf32, #tpu.memory_space<vmem>>, vector<8x8x256xf32>
    tpu.vector_store %arg15[%c0_6, %c0_7, %c0_8], %9 {strides = array<i32>} : memref<8x8x256xf32, #tpu.memory_space<vmem>>, vector<8x8x256xf32>,
    return
  }
  func.func @transform_0(%arg0: i32) -> (i32, i32, i32) {
    %c0_i32 = arith.constant 0 : i32
    %c0_i32_0 = arith.constant 0 : i32
    %c0_i32_1 = arith.constant 0 : i32
    %c0_i32_2 = arith.constant 0 : i32
    return %c0_i32, %c0_i32_0, %c0_i32_1 : i32, i32, i32
  }
  func.func @transform_1(%arg0: i32) -> (i32, i32) {
    %c0_i32 = arith.constant 0 : i32
    %c0_i32_0 = arith.constant 0 : i32
    %c0_i32_1 = arith.constant 0 : i32
    return %c0_i32, %c0_i32_0 : i32, i32
  }
  func.func @transform_2(%arg0: i32) -> (i32, i32) {
    %c0_i32 = arith.constant 0 : i32
    %c0_i32_0 = arith.constant 0 : i32
    %c0_i32_1 = arith.constant 0 : i32
    return %c0_i32, %c0_i32_0 : i32, i32
  }
  func.func @transform_3(%arg0: i32) -> (i32, i32) {
    %c0_i32 = arith.constant 0 : i32
    %c0_i32_0 = arith.constant 0 : i32
    %c0_i32_1 = arith.constant 0 : i32
    return %c0_i32, %c0_i32_0 : i32, i32
  }
  func.func @transform_4(%arg0: i32) -> (i32, i32) {
    %c0_i32 = arith.constant 0 : i32
    %c0_i32_0 = arith.constant 0 : i32
    %c0_i32_1 = arith.constant 0 : i32
    return %c0_i32, %c0_i32_0 : i32, i32
  }
  func.func @transform_5(%arg0: i32) -> (i32, i32) {
    %c0_i32 = arith.constant 0 : i32
    %c0_i32_0 = arith.constant 0 : i32
    %c0_i32_1 = arith.constant 0 : i32
    return %c0_i32, %c0_i32_0 : i32, i32
  }
  func.func @transform_6(%arg0: i32) -> (i32, i32) {
    %c0_i32 = arith.constant 0 : i32
    %c0_i32_0 = arith.constant 0 : i32
    %c0_i32_1 = arith.constant 0 : i32
    return %c0_i32, %c0_i32_0 : i32, i32
  }
  func.func @transform_7(%arg0: i32) -> (i32, i32) {
    %c0_i32 = arith.constant 0 : i32
    %c0_i32_0 = arith.constant 0 : i32
    %c0_i32_1 = arith.constant 0 : i32
    return %c0_i32, %c0_i32_0 : i32, i32
  }
  func.func @transform_8(%arg0: i32) -> (i32, i32) {
    %c0_i32 = arith.constant 0 : i32
    %c0_i32_0 = arith.constant 0 : i32
    %c0_i32_1 = arith.constant 0 : i32
    return %c0_i32, %c0_i32_0 : i32, i32
  }
  func.func @transform_9(%arg0: i32) -> (i32, i32) {
    %c0_i32 = arith.constant 0 : i32
    %c0_i32_0 = arith.constant 0 : i32
    %c0_i32_1 = arith.constant 0 : i32
    return %c0_i32, %c0_i32_0 : i32, i32
  }
  func.func @transform_10(%arg0: i32) -> (i32, i32, i32) {
    %c0_i32 = arith.constant 0 : i32
    %c0_i32_0 = arith.constant 0 : i32
    %c0_i32_1 = arith.constant 0 : i32
    %c0_i32_2 = arith.constant 0 : i32
    return %c0_i32, %c0_i32_0, %c0_i32_1 : i32, i32, i32
  }
  func.func @transform_11(%arg0: i32) -> (i32, i32, i32) {
    %c0_i32 = arith.constant 0 : i32
    %c0_i32_0 = arith.constant 0 : i32
    %c0_i32_1 = arith.constant 0 : i32
    %c0_i32_2 = arith.constant 0 : i32
    return %c0_i32, %c0_i32_0, %c0_i32_1 : i32, i32, i32
  }
  func.func @transform_12(%arg0: i32) -> (i32, i32) {
    %c0_i32 = arith.constant 0 : i32
    %c0_i32_0 = arith.constant 0 : i32
    return %c0_i32, %arg0 : i32, i32
  }
  func.func @transform_13(%arg0: i32) -> (i32, i32) {
    %c0_i32 = arith.constant 0 : i32
    %c0_i32_0 = arith.constant 0 : i32
    return %c0_i32, %arg0 : i32, i32
  }
  func.func @transform_14(%arg0: i32) -> (i32, i32, i32) {
    %c0_i32 = arith.constant 0 : i32
    %c0_i32_0 = arith.constant 0 : i32
    %c0_i32_1 = arith.constant 0 : i32
    return %c0_i32, %c0_i32_0, %arg0 : i32, i32, i32
  }
  func.func @transform_15(%arg0: i32) -> (i32, i32, i32) {
    %c0_i32 = arith.constant 0 : i32
    %c0_i32_0 = arith.constant 0 : i32
    %c0_i32_1 = arith.constant 0 : i32
    %c0_i32_2 = arith.constant 0 : i32
    return %c0_i32, %c0_i32_0, %c0_i32_1 : i32, i32, i32
  }
  func.func @transform_16(%arg0: i32) -> (i32, i32, i32) {
    %c0_i32 = arith.constant 0 : i32
    %c0_i32_0 = arith.constant 0 : i32
    %c0_i32_1 = arith.constant 0 : i32
    %c0_i32_2 = arith.constant 0 : i32
    return %c0_i32, %c0_i32_0, %c0_i32_1 : i32, i32, i32
  }
}

</mosaic_0001>

<bundles_post_ra>
// kernel: model_forward.1
= control target key start
LH: loop header
LB: loop body
LE: loop exit
PB: predicated region body
PF: predicated region fallthrough
CT: control target
= control target key end

     0   :  { %s9303_s0 = inlined_call_operand.vmem [shape: f32[8,8,128], index: 0, kind: input, shape index: {}]   ;;  %s9304_s1 = inlined_call_operand.vmem [shape: bf16[128,512], index: 1, kind: input, shape index: {}]   ;;  %s9305_s2 = inlined_call_operand.vmem [shape: bf16[128,512], index: 2, kind: input, shape index: {}]   ;;  %s9306_s3 = inlined_call_operand.vmem [shape: f32[1,512], index: 3, kind: input, shape index: {}]   ;;  %s9307_s4 = inlined_call_operand.vmem [shape: bf16[128,512], index: 4, kind: input, shape index: {}]   ;;  %s9308_s5 = inlined_call_operand.vmem [shape: bf16[128,512], index: 5, kind: input, shape index: {}]   ;;  %s9309_s6 = inlined_call_operand.vmem [shape: f32[1,512], index: 6, kind: input, shape index: {}]   ;;  %s9310_s7 = inlined_call_operand.vmem [shape: bf16[128,512], index: 7, kind: input, shape index: {}]   ;;  %s9311_s8 = inlined_call_operand.hbm [shape: bf16[128,512], index: 8, kind: input, shape index: {}]   ;;  %s9312_s9 = inlined_call_operand.vmem [shape: f32[1,512], index: 9, kind: input, shape index: {}]   ;;  %s9313_s10 = inlined_call_operand.vmem [shape: f32[3,8,128], index: 10, kind: input, shape index: {}]   ;;  %s9314_s11 = inlined_call_operand.vmem [shape: f32[3,8,128], index: 11, kind: input, shape index: {}]   ;;  %s9315_s12 = inlined_call_operand.vmem [shape: bf16[128,768], index: 12, kind: input, shape index: {}]   ;;  %s9316_s13 = inlined_call_operand.vmem [shape: f32[1,768], index: 13, kind: input, shape index: {}]   ;;  %s9317_s14 = inlined_call_operand.vmem [shape: f32[8,8,768], index: 14, kind: output, shape index: {0}]   ;;  %s9318_s15 = inlined_call_operand.vmem [shape: f32[3,8,128], index: 15, kind: output, shape index: {1}]   ;;  %s9319_s16 = inlined_call_operand.vmem [shape: f32[3,8,128], index: 16, kind: output, shape index: {2}]  }
   0x1   :  { %9334 = sst [smem:[#allocation39_spill]] %s9303_s0 }
   0x2   :  { %9335 = sst [smem:[#allocation40_spill]] %s9312_s9 }
   0x3   :  { %9336 = sst [smem:[#allocation41_spill]] %s9317_s14 }
   0x4   :  { %22 = vsyncpa [#allocation6], 0  ;;  %s6664_s21 = smov 0   ;;  %s6666_s22 = smov 0  }
   0x5   :  { %s6668_s23 = smov 0  }
   0x6 LB: > { %s6680_s24 = sadd.s32 4294967295, %s6572_s23   ;;  %s6683_s25 = sadd.s32 1, %s6572_s23   ;;  %s6572_s23 = sphi %s6668_s23, %s9489_s23   ;;  %s6568_s22 = sphi %s6666_s22, %s9492_s22   ;;  %s6564_s21 = sphi %s6664_s21, %s9491_s21  }
   0x7   : > { %9337 = sst [smem:[#allocation10_spill]] %s6683_s25  ;;  %s284_s26 = ssub.s32 %s6572_s23, %s6683_s25 }
   0x8   : > { %s287_s27 = sadd.s32 1, %s6568_s22  ;;  %p285_p0 = scmp.eq.s32.totalorder %s284_s26, 0 }
   0x9   : > { %p294_p1 = scmp.ne.s32.totalorder %s6568_s22, %s6564_s21  ;;  %p295_p2 = scmp.eq.s32.totalorder %s6572_s23, 0 }
   0xa   : > { %p350_p3 = scmp.eq.s32.totalorder %s6680_s24, 2  ;;  %p5535_p6 = scmp.ge.s32.totalorder %s6572_s23, 1 }
   0xb   : > { %s6693_s28 = scalar_select %p285_p0, %s6568_s22, %s287_s27  }
   0xc   : > { %p6695_p4 = por %p295_p2, %p294_p1  ;;  %p6699_p5 = por %p350_p3, %p294_p1 }
   0xd   : > { %9338 = sst [smem:[#allocation11_spill]] %s6693_s28  ;;  %p405_p7 = scmp.lt.s32.totalorder %s6572_s23, 4 }
   0xe   : > { %s9340_s30 = scalar_select %p6699_p5, 1, 0 }
   0xf   : > { %p5837_p9 = scmp.eq.s32.totalorder %s6680_s24, 0  ;;  %p6707_p10 = pnand %p5535_p6, %p405_p7 }
  0x10   : > { %9341 = sst [smem:[#allocation12_spill]] %s9340_s30  ;;  %s6574_s17 = smov [#allocation5]  }
  0x11   : > { %s441_s18 = sshll.u32 %s6574_s17, 4  ;;  %p5833_p11 = pneg %p6707_p10  ;;  %s442_s18 = int_to_ptr.vmem [resolvable:$true] %s441_s18 }
  0x12   : > { %s6531_s19 = scalar_lea.vmem %s442_s18, 4096  ;;  %p6539_p3 = scmp.lt.s32.totalorder %s442_s18, %s442_s18 }
  0x13   : > { %p5834_p12 = pnand %p5837_p9, %p5833_p11  ;;  %p6532_p0 = scmp.ne.s32.totalorder %s442_s18, %s6531_s19 }
  0x14   : > { %p6540_p8 = scmp.lt.s32.totalorder %s6531_s19, %s6531_s19 }
  0x15   : > { %p6522_p13 = pneg %p5834_p12 }
  0x16   : > { %p6541_p5 = por %p6540_p8, %p6539_p3 }
  0x17   : > { %p6534_p1 = pnand %p6532_p0, %p6522_p13 }
  0x19   : > { %p6535_p2 = pneg %p6534_p1 }
  0x1b   : > { %p6542_p6 = pnand %p6541_p5, %p6535_p2 }
  0x1d   : > { %6545 = shalt.err (!%p6542_p6)
}
  0x1e   : > { %s6575_s20 = smov 256   ;;  %s6576_s26 = smov 16  }
  0x1f   : > { %5836 = dma.hbm_to_vmem [thread:$0]  (!%p5834_p12), %s9311_s8, 4096, %s442_s18, [#allocation6], %s6575_s20, %s6575_s20, %s6576_s26  }
  0x20   : > { %p5537_p7 = scmp.ge.s32.totalorder %s6572_s23, 3 }
  0x22   : > { %460 = sbr.rel (%p5537_p7) target bundleno = 51 (0x33), region = 64 }
  0x27   : > { %463 = sbr.rel (!%p6695_p4) target bundleno = 51 (0x33), region = 68  ;;  %s465_s17 = sand.u32 (%p6695_p4), 1, %s6568_s22  }
  0x28   : > { %s5780_s25 = sshll.u32 (%p6695_p4), %s6572_s23, 3  ;;  %s5538_s19 = sshll.u32 (%p6695_p4), %s465_s17, 7 }
  0x29   : > { %s6726_s9 = scalar_lea.vmem (%p6695_p4), %s9315_s12, %s5780_s25  ;;  %s467_s28 = scalar_lea.vmem (%p6695_p4), [#allocation7], %s5538_s19 }
  0x2a   : > { %v529_v0 = vld [vmem:[%s6726_s9] sm:$0xff] (%p6695_p4)  ;;  %v531_v1 = vld [vmem:[%s6726_s9 + $0x18] sm:$0xff] (%p6695_p4)  ;;  %v533_v2 = vld [vmem:[%s6726_s9 + $0x30] sm:$0xff] (%p6695_p4) }
  0x2b   : > { %530 = vst [vmem:[%s467_s28] sm:$0xff] (%p6695_p4), %v529_v0  ;;  %532 = vst [vmem:[%s467_s28 + $0x8] sm:$0xff] (%p6695_p4), %v531_v1  ;;  %v535_v3 = vld [vmem:[%s6726_s9 + $0x48] sm:$0xff] (%p6695_p4)  ;;  %v537_v4 = vld [vmem:[%s6726_s9 + $0x60] sm:$0xff] (%p6695_p4) }
  0x2c   : > { %534 = vst [vmem:[%s467_s28 + $0x10] sm:$0xff] %v533_v2  ;;  %v539_v5 = vld [vmem:[%s6726_s9 + $0x78] sm:$0xff]  ;;  %536 = vst [vmem:[%s467_s28 + $0x18] sm:$0xff] %v535_v3  ;;  %v541_v6 = vld [vmem:[%s6726_s9 + $0x90] sm:$0xff] }
  0x2d   : > { %538 = vst [vmem:[%s467_s28 + $0x20] sm:$0xff] %v537_v4  ;;  %540 = vst [vmem:[%s467_s28 + $0x28] sm:$0xff] %v539_v5  ;;  %v543_v7 = vld [vmem:[%s6726_s9 + $0xa8] sm:$0xff]  ;;  %v545_v8 = vld [vmem:[%s6726_s9 + $0xc0] sm:$0xff] }
  0x2e   : > { %542 = vst [vmem:[%s467_s28 + $0x30] sm:$0xff] %v541_v6  ;;  %544 = vst [vmem:[%s467_s28 + $0x38] sm:$0xff] %v543_v7  ;;  %v547_v9 = vld [vmem:[%s6726_s9 + $0xd8] sm:$0xff]  ;;  %v549_v10 = vld [vmem:[%s6726_s9 + $0xf0] sm:$0xff] }
  0x2f   : > { %546 = vst [vmem:[%s467_s28 + $0x40] sm:$0xff] %v545_v8  ;;  %v551_v11 = vld [vmem:[%s6726_s9 + $0x108] sm:$0xff]  ;;  %548 = vst [vmem:[%s467_s28 + $0x48] sm:$0xff] %v547_v9  ;;  %v553_v12 = vld [vmem:[%s6726_s9 + $0x120] sm:$0xff] }
  0x30   : > { %550 = vst [vmem:[%s467_s28 + $0x50] sm:$0xff] %v549_v10  ;;  %552 = vst [vmem:[%s467_s28 + $0x58] sm:$0xff] %v551_v11  ;;  %v555_v13 = vld [vmem:[%s6726_s9 + $0x138] sm:$0xff]  ;;  %v557_v14 = vld [vmem:[%s6726_s9 + $0x150] sm:$0xff] }
  0x31   : > { %554 = vst [vmem:[%s467_s28 + $0x60] sm:$0xff] %v553_v12  ;;  %556 = vst [vmem:[%s467_s28 + $0x68] sm:$0xff] %v555_v13  ;;  %v559_v15 = vld [vmem:[%s6726_s9 + $0x168] sm:$0xff] }
  0x32   : > { %558 = vst [vmem:[%s467_s28 + $0x70] sm:$0xff] %v557_v14  ;;  %560 = vst [vmem:[%s467_s28 + $0x78] sm:$0xff] %v559_v15 }
  0x33 PF: > { %577 = sbr.rel (%p6707_p10) target bundleno = 6139 (0x17fb), region = 110 }
  0x38   : > { %6559 = dma.done.wait (%p5837_p9), [#allocation6], 4096  }
  0x39   : > { %6561 = vsyncadd (%p5837_p9), [#allocation6], 4294963200  ;;  %s584_s14 = sand.u32 1, %s6564_s21   ;;  %s5545_s23 = sshll.u32 %s6680_s24, 1 }
  0x3a   : > { %s5543_s25 = sshll.u32 %s584_s14, 7  ;;  %p638_p4 = scmp.lt.s32.totalorder %s5545_s23, 5 }
  0x3b   : > { %s6758_s0 = scalar_lea.vmem [#allocation7], %s5543_s25  ;;  %s6760_s18 = scalar_lea.vmem [#allocation8], %s5543_s25 }
  0x3c   : > { %s9494_s23 = smov (!%p638_p4, %s5545_s23), 5  ;;  %p9343_p5 = scmp.ne.s32.totalorder %s6680_s24, 0 }
  0x3d   : > { %s640_s30 = scalar_lea.vmem %s9316_s13, %s9494_s23 }
  0x3e   : > { %647 = sbr.rel (%p9343_p5) target bundleno = 5886 (0x16fe), region = 122 }
  0x43   : > { %v5868_v16 = vld [vmem:[%s9304_s1 + $0xe4] ss:$16 sps:$4 sm:$0xff]   ;;  %v5870_v17 = vld [vmem:[%s9304_s1 + $0xec] ss:$16 sps:$4 sm:$0xff]   ;;  %v9324_v18 = vmov 0   ;;  %s9344_s20 = sld [smem:[#allocation39_spill]] }
  0x44   : > { %906 = vmatprep.mubr.bf16.mxu0 %v9324_v18  ;;  %979 = vmatprep.mubr.bf16.mxu1 %v9324_v18  ;;  %v5872_v19 = vld [vmem:[%s9304_s1 + $0xe0] ss:$16 sps:$4 sm:$0xff]   ;;  %v5873_v20 = vld [vmem:[%s9304_s1 + $0xe8] ss:$16 sps:$4 sm:$0xff]   ;;  %v5874_v21 = vld [vmem:[%s9304_s1 + $0xc4] ss:$16 sps:$4 sm:$0xff]  }
  0x45   : > { %874 = vmatprep.subr.bf16.mxu0 %v5868_v16  ;;  %947 = vmatprep.subr.bf16.mxu1 %v5870_v17  ;;  %v5876_v22 = vld [vmem:[%s9304_s1 + $0xcc] ss:$16 sps:$4 sm:$0xff]   ;;  %v5878_v23 = vld [vmem:[%s9304_s1 + $0xc0] ss:$16 sps:$4 sm:$0xff]   ;;  %v5879_v24 = vld [vmem:[%s9304_s1 + $0xc8] ss:$16 sps:$4 sm:$0xff]  }
  0x46   : > { %875 = vmatpush1.bf16.msra.mxu0 %v5872_v19  ;;  %948 = vmatpush1.bf16.msra.mxu1 %v5873_v20  ;;  %v5880_v25 = vld [vmem:[%s9304_s1 + $0xa4] ss:$16 sps:$4 sm:$0xff]   ;;  %v5882_v26 = vld [vmem:[%s9304_s1 + $0xac] ss:$16 sps:$4 sm:$0xff]   ;;  %v5884_v27 = vld [vmem:[%s9304_s1 + $0xa0] ss:$16 sps:$4 sm:$0xff]  }
  0x47   : > { %876 = vmatprep.subr.bf16.mxu0 %v5874_v21  ;;  %949 = vmatprep.subr.bf16.mxu1 %v5876_v22  ;;  %v5885_v28 = vld [vmem:[%s9304_s1 + $0xa8] ss:$16 sps:$4 sm:$0xff]   ;;  %v5886_v29 = vld [vmem:[%s9304_s1 + $0x84] ss:$16 sps:$4 sm:$0xff]   ;;  %v5888_v30 = vld [vmem:[%s9304_s1 + $0x8c] ss:$16 sps:$4 sm:$0xff]  }
  0x48   : > { %v5890_v31 = vld [vmem:[%s9304_s1 + $0x80] ss:$16 sps:$4 sm:$0xff]   ;;  %v5891_v32 = vld [vmem:[%s9304_s1 + $0x88] ss:$16 sps:$4 sm:$0xff]   ;;  %v5892_v33 = vld [vmem:[%s9304_s1 + $0x64] ss:$16 sps:$4 sm:$0xff]  }
  0x49   : > { %v5894_v34 = vld [vmem:[%s9304_s1 + $0x6c] ss:$16 sps:$4 sm:$0xff]   ;;  %v5896_v35 = vld [vmem:[%s9304_s1 + $0x60] ss:$16 sps:$4 sm:$0xff]   ;;  %v5897_v36 = vld [vmem:[%s9304_s1 + $0x68] ss:$16 sps:$4 sm:$0xff]  }
  0x4a   : > { %877 = vmatpush1.bf16.msra.mxu0 %v5878_v23  ;;  %950 = vmatpush1.bf16.msra.mxu1 %v5879_v24  ;;  %v5898_v37 = vld [vmem:[%s9304_s1 + $0x44] ss:$16 sps:$4 sm:$0xff]   ;;  %v5900_v38 = vld [vmem:[%s9304_s1 + $0x4c] ss:$16 sps:$4 sm:$0xff]   ;;  %v5902_v39 = vld [vmem:[%s9304_s1 + $0x40] ss:$16 sps:$4 sm:$0xff]  }
  0x4b   : > { %878 = vmatprep.subr.bf16.mxu0 %v5880_v25  ;;  %951 = vmatprep.subr.bf16.mxu1 %v5882_v26  ;;  %v5903_v40 = vld [vmem:[%s9304_s1 + $0x48] ss:$16 sps:$4 sm:$0xff]   ;;  %v5904_v41 = vld [vmem:[%s9304_s1 + $0x24] ss:$16 sps:$4 sm:$0xff]   ;;  %v5906_v42 = vld [vmem:[%s9304_s1 + $0x2c] ss:$16 sps:$4 sm:$0xff]  }
  0x4c   : > { %v5908_v43 = vld [vmem:[%s9304_s1 + $0x20] ss:$16 sps:$4 sm:$0xff]   ;;  %v5909_v44 = vld [vmem:[%s9304_s1 + $0x28] ss:$16 sps:$4 sm:$0xff]   ;;  %v5910_v45 = vld [vmem:[%s9304_s1 + $0x4] ss:$16 sps:$4 sm:$0xff]  }
  0x4d   : > { %v5912_v46 = vld [vmem:[%s9304_s1 + $0xc] ss:$16 sps:$4 sm:$0xff]   ;;  %v5914_v47 = vld [vmem:[%s9304_s1] ss:$16 sps:$4 sm:$0xff]   ;;  %v5915_v48 = vld [vmem:[%s9304_s1 + $0x8] ss:$16 sps:$4 sm:$0xff]  }
  0x4e   : > { %879 = vmatpush1.bf16.msra.mxu0 %v5884_v27  ;;  %952 = vmatpush1.bf16.msra.mxu1 %v5885_v28  ;;  %v648_v49 = vld [vmem:[%s9344_s20] sm:$0xff]  ;;  %v649_v50 = vld [vmem:[%s9344_s20 + $0x8] sm:$0xff]  ;;  %v650_v60 = vld [vmem:[%s9344_s20 + $0x10] sm:$0xff]  ;;  %s9452_s27 = sld [smem:[#allocation40_spill]] }
  0x4f   : > { %880 = vmatprep.subr.bf16.mxu0 %v5886_v29  ;;  %953 = vmatprep.subr.bf16.mxu1 %v5888_v30  ;;  %v6871_v51 = vld [vmem:[%s9305_s2 + $0xe4] ss:$16 sps:$4 sm:$0xff]   ;;  %v6876_v52 = vld [vmem:[%s9305_s2 + $0xec] ss:$16 sps:$4 sm:$0xff]   ;;  %v656_v53 = vpack.c.bf16 %v649_v50, %v648_v49  ;;  %v6881_v54 = vld [vmem:[%s9305_s2 + $0xe0] ss:$16 sps:$4 sm:$0xff]  }
  0x50   : > { %v6886_v55 = vld [vmem:[%s9305_s2 + $0xe8] ss:$16 sps:$4 sm:$0xff]   ;;  %v6893_v56 = vld [vmem:[%s9305_s2 + $0xc4] ss:$16 sps:$4 sm:$0xff]   ;;  %v6898_v57 = vld [vmem:[%s9305_s2 + $0xcc] ss:$16 sps:$4 sm:$0xff]  }
  0x51   : > { %v6903_v58 = vld [vmem:[%s9305_s2 + $0xc0] ss:$16 sps:$4 sm:$0xff]   ;;  %v6908_v59 = vld [vmem:[%s9305_s2 + $0xc8] ss:$16 sps:$4 sm:$0xff]   ;;  %v6921_v62 = vld [vmem:[%s9305_s2 + $0xa4] ss:$16 sps:$4 sm:$0xff]  }
  0x52   : > { %881 = vmatpush1.bf16.msra.mxu0 %v5890_v31  ;;  %954 = vmatpush1.bf16.msra.mxu1 %v5891_v32  ;;  %v651_v61 = vld [vmem:[%s9344_s20 + $0x18] sm:$0xff]  ;;  %v6935_v1 = vld [vmem:[%s9305_s2 + $0xa0] ss:$16 sps:$4 sm:$0xff]   ;;  %v6947_v3 = vld [vmem:[%s9305_s2 + $0x84] ss:$16 sps:$4 sm:$0xff]   ;;  %v694_v32 = vlaneseq }
  0x53   : > { %882 = vmatprep.subr.bf16.mxu0 %v5892_v33  ;;  %955 = vmatprep.subr.bf16.mxu1 %v5894_v34  ;;  %v6928_v63 = vld [vmem:[%s9305_s2 + $0xac] ss:$16 sps:$4 sm:$0xff]   ;;  %v657_v0 = vpack.c.bf16 %v651_v61, %v650_v60  ;;  %v6940_v2 = vld [vmem:[%s9305_s2 + $0xa8] ss:$16 sps:$4 sm:$0xff]   ;;  %v6959_v5 = vld [vmem:[%s9305_s2 + $0x80] ss:$16 sps:$4 sm:$0xff]  }
  0x54   : > { %v6954_v4 = vld [vmem:[%s9305_s2 + $0x8c] ss:$16 sps:$4 sm:$0xff]   ;;  %v6964_v6 = vld [vmem:[%s9305_s2 + $0x88] ss:$16 sps:$4 sm:$0xff]   ;;  %v652_v7 = vld [vmem:[%s9344_s20 + $0x20] sm:$0xff]  ;;  %v695_v33 = vshrl.u32 %v694_v32, 7 }
  0x55   : > { %v653_v8 = vld [vmem:[%s9344_s20 + $0x28] sm:$0xff]  ;;  %v6979_v9 = vld [vmem:[%s9305_s2 + $0x64] ss:$16 sps:$4 sm:$0xff]   ;;  %v6991_v11 = vld [vmem:[%s9305_s2 + $0x60] ss:$16 sps:$4 sm:$0xff]  }
  0x56   : > { %883 = vmatpush1.bf16.msra.mxu0 %v5896_v35  ;;  %956 = vmatpush1.bf16.msra.mxu1 %v5897_v36  ;;  %v6984_v10 = vld [vmem:[%s9305_s2 + $0x6c] ss:$16 sps:$4 sm:$0xff]   ;;  %v6996_v12 = vld [vmem:[%s9305_s2 + $0x68] ss:$16 sps:$4 sm:$0xff]   ;;  %v658_v13 = vpack.c.bf16 %v653_v8, %v652_v7  ;;  %v7001_v14 = vld [vmem:[%s9305_s2 + $0x44] ss:$16 sps:$4 sm:$0xff]  }
  0x57   : > { %884 = vmatprep.subr.bf16.mxu0 %v5898_v37  ;;  %957 = vmatprep.subr.bf16.mxu1 %v5900_v38  ;;  %v7006_v15 = vld [vmem:[%s9305_s2 + $0x4c] ss:$16 sps:$4 sm:$0xff]   ;;  %v7015_v16 = vld [vmem:[%s9305_s2 + $0x40] ss:$16 sps:$4 sm:$0xff]   ;;  %v7020_v17 = vld [vmem:[%s9305_s2 + $0x48] ss:$16 sps:$4 sm:$0xff]  }
  0x58   : > { %v654_v19 = vld [vmem:[%s9344_s20 + $0x30] sm:$0xff]  ;;  %v655_v20 = vld [vmem:[%s9344_s20 + $0x38] sm:$0xff]  ;;  %v1084_v30 = vld [vmem:[%s9313_s10] sm:$0xff]  ;;  %v7125_v34 = vsub.s32 2, %v695_v33  ;;  %v7127_v35 = vsub.s32 0, %v695_v33 }
  0x59   : > { %v7031_v21 = vld [vmem:[%s9305_s2 + $0x24] ss:$16 sps:$4 sm:$0xff]   ;;  %v7036_v22 = vld [vmem:[%s9305_s2 + $0x2c] ss:$16 sps:$4 sm:$0xff]   ;;  %v7047_v23 = vld [vmem:[%s9305_s2 + $0x20] ss:$16 sps:$4 sm:$0xff]   ;;  %v659_v25 = vpack.c.bf16 %v655_v20, %v654_v19  ;;  %v1090_v31 = vpack.c.bf16 %v1084_v30, %v1084_v30 }
  0x5a   : > { %885 = vmatpush1.bf16.msra.mxu0 %v5902_v39  ;;  %958 = vmatpush1.bf16.msra.mxu1 %v5903_v40  ;;  %v7052_v24 = vld [vmem:[%s9305_s2 + $0x28] ss:$16 sps:$4 sm:$0xff]   ;;  %v7057_v26 = vld [vmem:[%s9305_s2 + $0x4] ss:$16 sps:$4 sm:$0xff]   ;;  %v7062_v27 = vld [vmem:[%s9305_s2 + $0xc] ss:$16 sps:$4 sm:$0xff]  }
  0x5b   : > { %886 = vmatprep.subr.bf16.mxu0 %v5904_v41  ;;  %959 = vmatprep.subr.bf16.mxu1 %v5906_v42  ;;  %v7071_v28 = vld [vmem:[%s9305_s2] ss:$16 sps:$4 sm:$0xff]   ;;  %v7076_v29 = vld [vmem:[%s9305_s2 + $0x8] ss:$16 sps:$4 sm:$0xff]   ;;  %9345 = vst [vmem:[#allocation13_spill] sm:$0xff] %v7125_v34  ;;  %9346 = vst [vmem:[#allocation14_spill] sm:$0xff] %v7127_v35 }
  0x5c   : > { %v692_v36 = vld [vmem:[%s9306_s3] sm:$0xf] }
  0x5d   : > { %v7135_v39 = vrot.slane %v692_v36, %v7125_v34  ;;  %v697_v42 = vrot.slane %v692_v36, %v7127_v35 }
  0x5e   : > { %887 = vmatpush1.bf16.msra.mxu0 %v5908_v43  ;;  %960 = vmatpush1.bf16.msra.mxu1 %v5909_v44 }
  0x5f   : > { %888 = vmatprep.subr.bf16.mxu0 %v5910_v45  ;;  %961 = vmatprep.subr.bf16.mxu1 %v5912_v46  ;;  %v7140_v45 = vsub.s32 1, %v695_v33  ;;  %v7142_v46 = vsub.s32 3, %v695_v33 }
  0x61   : > { %9347 = vst [vmem:[#allocation15_spill] sm:$0xff] %v7140_v45  ;;  %9348 = vst [vmem:[#allocation16_spill] sm:$0xff] %v7142_v46  ;;  %v7154_v61 = vrot.slane %v692_v36, %v7140_v45 }
  0x62   : > { %889 = vmatpush1.bf16.msra.mxu0 %v5914_v47  ;;  %962 = vmatpush1.bf16.msra.mxu1 %v5915_v48 }
  0x63   : > { %1251 = vmatprep.subr.bf16.mxu0 %v6871_v51  ;;  %1292 = vmatprep.subr.bf16.mxu1 %v6876_v52 }
  0x65   : > { %907 = vmatmul.mubr.bf16.vlgmr.msra.gmra.mxu0 %v656_v53  ;;  %980 = vmatmul.mubr.bf16.vlgmr.msra.gmra.mxu1 %v656_v53 }
  0x66   : > { %1252 = vmatpush1.bf16.msra.mxu0 %v6881_v54  ;;  %1293 = vmatpush1.bf16.msra.mxu1 %v6886_v55 }
  0x67   : > { %1253 = vmatprep.subr.bf16.mxu0 %v6893_v56  ;;  %1294 = vmatprep.subr.bf16.mxu1 %v6898_v57 }
  0x68   : > { %916 = vmatprep.mubr.bf16.mxu0 %v9324_v18  ;;  %989 = vmatprep.mubr.bf16.mxu1 %v9324_v18 }
  0x6a   : > { %1254 = vmatpush1.bf16.msra.mxu0 %v6903_v58  ;;  %1295 = vmatpush1.bf16.msra.mxu1 %v6908_v59 }
  0x6b   : > { %1255 = vmatprep.subr.bf16.mxu0 %v6921_v62  ;;  %1296 = vmatprep.subr.bf16.mxu1 %v6928_v63 }
  0x6d   : > { %917 = vmatmul.mubr.bf16.gmra.mxu0 %v657_v0  ;;  %990 = vmatmul.mubr.bf16.gmra.mxu1 %v657_v0  ;;  %v7157_v0 = vrot.slane %v692_v36, %v7142_v46 }
  0x6e   : > { %1256 = vmatpush1.bf16.msra.mxu0 %v6935_v1  ;;  %1297 = vmatpush1.bf16.msra.mxu1 %v6940_v2 }
  0x6f   : > { %1257 = vmatprep.subr.bf16.mxu0 %v6947_v3  ;;  %1298 = vmatprep.subr.bf16.mxu1 %v6954_v4 }
  0x70   : > { %926 = vmatprep.mubr.bf16.mxu0 %v9324_v18  ;;  %999 = vmatprep.mubr.bf16.mxu1 %v9324_v18 }
  0x72   : > { %1258 = vmatpush1.bf16.msra.mxu0 %v6959_v5  ;;  %1299 = vmatpush1.bf16.msra.mxu1 %v6964_v6 }
  0x73   : > { %1259 = vmatprep.subr.bf16.mxu0 %v6979_v9  ;;  %1300 = vmatprep.subr.bf16.mxu1 %v6984_v10 }
  0x75   : > { %927 = vmatmul.mubr.bf16.gmra.mxu0 %v658_v13  ;;  %1000 = vmatmul.mubr.bf16.gmra.mxu1 %v658_v13 }
  0x76   : > { %1260 = vmatpush1.bf16.msra.mxu0 %v6991_v11  ;;  %1301 = vmatpush1.bf16.msra.mxu1 %v6996_v12 }
  0x77   : > { %1261 = vmatprep.subr.bf16.mxu0 %v7001_v14  ;;  %1302 = vmatprep.subr.bf16.mxu1 %v7006_v15 }
  0x78   : > { %936 = vmatprep.mubr.bf16.mxu0 %v9324_v18  ;;  %1009 = vmatprep.mubr.bf16.mxu1 %v9324_v18 }
  0x7a   : > { %1262 = vmatpush1.bf16.msra.mxu0 %v7015_v16  ;;  %1303 = vmatpush1.bf16.msra.mxu1 %v7020_v17 }
  0x7b   : > { %1263 = vmatprep.subr.bf16.mxu0 %v7031_v21  ;;  %1304 = vmatprep.subr.bf16.mxu1 %v7036_v22 }
  0x7d   : > { %937 = vmatmul.mubr.bf16.gmra.mxu0 %v659_v25  ;;  %1010 = vmatmul.mubr.bf16.gmra.mxu1 %v659_v25 }
  0x7e   : > { %1264 = vmatpush1.bf16.msra.mxu0 %v7047_v23  ;;  %1305 = vmatpush1.bf16.msra.mxu1 %v7052_v24 }
  0x7f   : > { %1265 = vmatprep.subr.bf16.mxu0 %v7057_v26  ;;  %1306 = vmatprep.subr.bf16.mxu1 %v7062_v27 }
  0x80   : > { %1283 = vmatprep.mubr.bf16.mxu0 %v9324_v18  ;;  %1324 = vmatprep.mubr.bf16.mxu1 %v9324_v18 }
  0x82   : > { %1266 = vmatpush1.bf16.msra.mxu0 %v7071_v28  ;;  %1307 = vmatpush1.bf16.msra.mxu1 %v7076_v29 }
  0x83   : > { %1362 = vmatprep.subr.bf16.mxu0 %v6871_v51  ;;  %1403 = vmatprep.subr.bf16.mxu1 %v6876_v52 }
  0x85   : > { %1284 = vmatmul.mubr.bf16.vlgmr.msra.gmra.mxu0 %v1090_v31  ;;  %1325 = vmatmul.mubr.bf16.vlgmr.msra.gmra.mxu1 %v1090_v31 }
  0x86   : > { %1363 = vmatpush1.bf16.msra.mxu0 %v6881_v54  ;;  %1404 = vmatpush1.bf16.msra.mxu1 %v6886_v55 }
  0x87   : > { %1364 = vmatprep.subr.bf16.mxu0 %v6893_v56  ;;  %1405 = vmatprep.subr.bf16.mxu1 %v6898_v57 }
  0x88   : > { %1394 = vmatprep.mubr.bf16.mxu0 %v9324_v18  ;;  %1435 = vmatprep.mubr.bf16.mxu1 %v9324_v18 }
  0x8a   : > { %1365 = vmatpush1.bf16.msra.mxu0 %v6903_v58  ;;  %1406 = vmatpush1.bf16.msra.mxu1 %v6908_v59 }
  0x8b   : > { %1366 = vmatprep.subr.bf16.mxu0 %v6921_v62  ;;  %1407 = vmatprep.subr.bf16.mxu1 %v6928_v63 }
  0x8e   : > { %1367 = vmatpush1.bf16.msra.mxu0 %v6935_v1  ;;  %1408 = vmatpush1.bf16.msra.mxu1 %v6940_v2 }
  0x8f   : > { %1368 = vmatprep.subr.bf16.mxu0 %v6947_v3  ;;  %1409 = vmatprep.subr.bf16.mxu1 %v6954_v4 }
  0x92   : > { %1369 = vmatpush1.bf16.msra.mxu0 %v6959_v5  ;;  %1410 = vmatpush1.bf16.msra.mxu1 %v6964_v6 }
  0x93   : > { %1370 = vmatprep.subr.bf16.mxu0 %v6979_v9  ;;  %1411 = vmatprep.subr.bf16.mxu1 %v6984_v10 }
  0x96   : > { %1371 = vmatpush1.bf16.msra.mxu0 %v6991_v11  ;;  %1412 = vmatpush1.bf16.msra.mxu1 %v6996_v12 }
  0x97   : > { %1372 = vmatprep.subr.bf16.mxu0 %v7001_v14  ;;  %1413 = vmatprep.subr.bf16.mxu1 %v7006_v15 }
  0x9a   : > { %1373 = vmatpush1.bf16.msra.mxu0 %v7015_v16  ;;  %1414 = vmatpush1.bf16.msra.mxu1 %v7020_v17 }
  0x9b   : > { %1374 = vmatprep.subr.bf16.mxu0 %v7031_v21  ;;  %1415 = vmatprep.subr.bf16.mxu1 %v7036_v22 }
  0x9e   : > { %1375 = vmatpush1.bf16.msra.mxu0 %v7047_v23  ;;  %1416 = vmatpush1.bf16.msra.mxu1 %v7052_v24 }
  0x9f   : > { %1376 = vmatprep.subr.bf16.mxu0 %v7057_v26  ;;  %1417 = vmatprep.subr.bf16.mxu1 %v7062_v27 }
  0xa2   : > { %1377 = vmatpush1.bf16.msra.mxu0 %v7071_v28  ;;  %1418 = vmatpush1.bf16.msra.mxu1 %v7076_v29 }
  0xa3   : > { %1474 = vmatprep.subr.bf16.mxu0 %v6871_v51  ;;  %1515 = vmatprep.subr.bf16.mxu1 %v6876_v52 }
 0x125   : > { %v908_v37 = vpop.f32.mrf.mxu0  ;;  %v7132_v38 = vpop.f32.mrf.mxu1 }
 0x127   : > { %v910_v40 = vpop.f32.mrf.mxu0  ;;  %v7137_v41 = vpop.f32.mrf.mxu1 }
 0x129   : > { %v912_v43 = vpop.f32.mrf.mxu0  ;;  %v985_v44 = vpop.f32.mrf.mxu1 }
 0x12a   : > { %v7144_v47 = vadd.f32 %v912_v43, %v697_v42  ;;  %v7147_v48 = vadd.f32 %v985_v44, %v7135_v39 }
 0x12b   : > { %v7149_v49 = vpop.f32.mrf.mxu0  ;;  %v7151_v50 = vpop.f32.mrf.mxu1 }
 0x12d   : > { %v918_v53 = vpop.f32.mrf.mxu0  ;;  %v991_v60 = vpop.f32.mrf.mxu1 }
 0x12e   : > { %v7159_v7 = vadd.f32 %v918_v53, %v697_v42  ;;  %v7162_v8 = vadd.f32 %v991_v60, %v7135_v39 }
 0x12f   : > { %v920_v13 = vpop.f32.mrf.mxu0  ;;  %v993_v19 = vpop.f32.mrf.mxu1 }
 0x130   : > { %v7165_v20 = vadd.f32 %v920_v13, %v7154_v61  ;;  %v7168_v25 = vadd.f32 %v993_v19, %v7157_v0 }
 0x131   : > { %v922_v30 = vpop.f32.mrf.mxu0  ;;  %v995_v31 = vpop.f32.mrf.mxu1 }
 0x132   : > { %v7170_v32 = vadd.f32 %v922_v30, %v697_v42  ;;  %v7173_v33 = vadd.f32 %v995_v31, %v7135_v39 }
 0x133   : > { %v7175_v36 = vpop.f32.mrf.mxu0  ;;  %v7177_v43 = vpop.f32.mrf.mxu1 }
 0x134   : > { %9349 = vst [vmem:[#allocation17_spill] sm:$0xff] %v7170_v32  ;;  %9350 = vst [vmem:[#allocation18_spill] sm:$0xff] %v7173_v33 }
 0x135   : > { %9351 = vst [vmem:[#allocation19_spill] sm:$0xff] %v7175_v36  ;;  %9352 = vst [vmem:[#allocation20_spill] sm:$0xff] %v7177_v43  ;;  %v928_v44 = vpop.f32.mrf.mxu0  ;;  %v1001_v53 = vpop.f32.mrf.mxu1 }
 0x136   : > { %v7179_v60 = vadd.f32 %v928_v44, %v697_v42  ;;  %v7182_v13 = vadd.f32 %v1001_v53, %v7135_v39 }
 0x137   : > { %v930_v19 = vpop.f32.mrf.mxu0  ;;  %v1003_v18 = vpop.f32.mrf.mxu1 }
 0x138   : > { %9353 = vst [vmem:[#allocation21_spill] sm:$0xff] %v7179_v60  ;;  %9354 = vst [vmem:[#allocation22_spill] sm:$0xff] %v7182_v13  ;;  %v7185_v46 = vadd.f32 %v930_v19, %v7154_v61  ;;  %v7188_v30 = vadd.f32 %v1003_v18, %v7157_v0 }
 0x139   : > { %v932_v31 = vpop.f32.mrf.mxu0  ;;  %v1005_v34 = vpop.f32.mrf.mxu1 }
 0x13a   : > { %9355 = vst [vmem:[#allocation23_spill] sm:$0xff] %v7185_v46  ;;  %9356 = vst [vmem:[#allocation24_spill] sm:$0xff] %v7188_v30  ;;  %v7190_v45 = vadd.f32 %v932_v31, %v697_v42  ;;  %v7193_v35 = vadd.f32 %v1005_v34, %v7135_v39 }
 0x13b   : > { %v7195_v44 = vpop.f32.mrf.mxu0  ;;  %v7197_v60 = vpop.f32.mrf.mxu1 }
 0x13c   : > { %9357 = vst [vmem:[#allocation25_spill] sm:$0xff] %v7190_v45  ;;  %9358 = vst [vmem:[#allocation26_spill] sm:$0xff] %v7193_v35 }
 0x13d   : > { %9359 = vst [vmem:[#allocation27_spill] sm:$0xff] %v7195_v44  ;;  %9360 = vst [vmem:[#allocation28_spill] sm:$0xff] %v7197_v60  ;;  %v938_v53 = vpop.f32.mrf.mxu0  ;;  %v1011_v13 = vpop.f32.mrf.mxu1 }
 0x13e   : > { %v7199_v43 = vadd.f32 %v938_v53, %v697_v42  ;;  %v7202_v19 = vadd.f32 %v1011_v13, %v7135_v39  ;;  %v909_v13 = vadd.f32 %v908_v37, %v697_v42  ;;  %v984_v37 = vadd.f32 %v7137_v41, %v7157_v0 }
 0x13f   : > { %v940_v18 = vpop.f32.mrf.mxu0  ;;  %v1013_v30 = vpop.f32.mrf.mxu1 }
 0x140   : > { %9361 = vst [vmem:[#allocation29_spill] sm:$0xff] %v7199_v43  ;;  %9362 = vst [vmem:[#allocation30_spill] sm:$0xff] %v7202_v19  ;;  %v7205_v46 = vadd.f32 %v940_v18, %v7154_v61  ;;  %v7208_v31 = vadd.f32 %v1013_v30, %v7157_v0  ;;  %v911_v18 = vadd.f32 %v910_v40, %v7154_v61 }
 0x141   : > { %v942_v34 = vpop.f32.mrf.mxu0  ;;  %v1015_v35 = vpop.f32.mrf.mxu1 }
 0x142   : > { %9363 = vst [vmem:[#allocation31_spill] sm:$0xff] %v7205_v46  ;;  %9364 = vst [vmem:[#allocation32_spill] sm:$0xff] %v7208_v31  ;;  %v7210_v45 = vadd.f32 %v942_v34, %v697_v42  ;;  %v7213_v60 = vadd.f32 %v1015_v35, %v7135_v39  ;;  %v982_v35 = vadd.f32 %v7132_v38, %v7135_v39  ;;  %v1085_v38 = vld [vmem:[%s9314_s11] sm:$0xff] }
 0x143   : > { %v7215_v53 = vpop.f32.mrf.mxu0  ;;  %v7217_v43 = vpop.f32.mrf.mxu1 }
 0x144   : > { %9365 = vst [vmem:[#allocation33_spill] sm:$0xff] %v7210_v45  ;;  %9366 = vst [vmem:[#allocation34_spill] sm:$0xff] %v7213_v60 }
 0x145   : > { %9367 = vst [vmem:[#allocation35_spill] sm:$0xff] %v7215_v53  ;;  %9368 = vst [vmem:[#allocation36_spill] sm:$0xff] %v7217_v43  ;;  %v1285_v19 = vpop.f32.mrf.mxu0  ;;  %v1326_v44 = vpop.f32.mrf.mxu1 }
 0x146   : > { %v1333_v46 = vadd.f32 %v1285_v19, %v909_v13  ;;  %v1335_v43 = vadd.f32 %v1326_v44, %v982_v35 }
 0x147   : > { %v1287_v33 = vpop.f32.mrf.mxu0  ;;  %v1328_v30 = vpop.f32.mrf.mxu1 }
 0x148   : > { %v1337_v31 = vmul.f32 0.5, %v1333_v46  ;;  %v1334_v32 = vadd.f32 %v1287_v33, %v911_v18  ;;  %v1336_v40 = vadd.f32 %v1328_v30, %v984_v37 }
 0x149   : > { %v1289_v36 = vpop.f32.mrf.mxu0  ;;  %v1330_v34 = vpop.f32.mrf.mxu1 }
 0x14a   : > { %6156 = vtanh.f32 %v1337_v31  ;;  %v1341_v60 = vmul.f32 0.5, %v1334_v32  ;;  %v1346_v42 = vmul.f32 0.5, %v1336_v40  ;;  %v9369_v34 = vmov 0  }
 0x14b   : > { %v1290_v45 = vpop.f32.mrf.mxu0  ;;  %v1331_v53 = vpop.f32.mrf.mxu1  ;;  %v915_v40 = vadd.f32 %v7149_v49, %v7154_v61 }
 0x14c   : > { %6158 = vtanh.f32 %v1341_v60 }
 0x14d   : > { %6160 = vtanh.f32 %v1335_v43 }
 0x14e   : > { %6162 = vtanh.f32 %v1346_v42 }
 0x157   : > { %v6157_v19 = vpop.eup %6156 }
 0x158   : > { %v1339_v46 = vmul.f32 0.5, %v6157_v19 }
 0x159   : > { %v6159_v33 = vpop.eup %6158 }
 0x15a   : > { %v1340_v36 = vadd.f32 0.5, %v1339_v46  ;;  %v1343_v13 = vmul.f32 0.5, %v6159_v33  ;;  %v6161_v45 = vpop.eup %6160 }
 0x15b   : > { %v6163_v41 = vpop.eup %6162 }
 0x15c   : > { %v1344_v39 = vadd.f32 0.5, %v1343_v13  ;;  %v1351_v60 = vmul.f32 %v6161_v45, %v1340_v36  ;;  %v1348_v43 = vmul.f32 0.5, %v6163_v41  ;;  %v988_v41 = vadd.f32 %v7151_v50, %v7157_v0 }
 0x15e   : > { %v1350_v32 = vmul.f32 %v1344_v39, %v1085_v38  ;;  %v1349_v31 = vadd.f32 0.5, %v1348_v43 }
 0x160   : > { %v7227_v44 = vadd.f32 %v1351_v60, %v1350_v32 }
 0x162   : > { %6164 = vtanh.f32 %v7227_v44 }
 0x16f   : > { %v6165_v53 = vpop.eup %6164 }
 0x170   : > { %v7230_v18 = vmul.f32 %v6165_v53, %v1349_v31 }
 0x172   : > { %v1361_v30 = vpack.c.bf16 %v7230_v18, %v7230_v18 }
 0x174   : > { %1395 = vmatmul.mubr.bf16.vlgmr.msra.gmra.mxu0 %v1361_v30  ;;  %1436 = vmatmul.mubr.bf16.vlgmr.msra.gmra.mxu1 %v1361_v30 }
 0x175   : > { %1475 = vmatpush1.bf16.msra.mxu0 %v6881_v54  ;;  %1516 = vmatpush1.bf16.msra.mxu1 %v6886_v55 }
 0x176   : > { %1476 = vmatprep.subr.bf16.mxu0 %v6893_v56  ;;  %1517 = vmatprep.subr.bf16.mxu1 %v6898_v57 }
 0x177   : > { %1506 = vmatprep.mubr.bf16.mxu0 %v9369_v34  ;;  %1547 = vmatprep.mubr.bf16.mxu1 %v9369_v34 }
 0x179   : > { %1477 = vmatpush1.bf16.msra.mxu0 %v6903_v58  ;;  %1518 = vmatpush1.bf16.msra.mxu1 %v6908_v59 }
 0x17a   : > { %1478 = vmatprep.subr.bf16.mxu0 %v6921_v62  ;;  %1519 = vmatprep.subr.bf16.mxu1 %v6928_v63 }
 0x17d   : > { %1479 = vmatpush1.bf16.msra.mxu0 %v6935_v1  ;;  %1520 = vmatpush1.bf16.msra.mxu1 %v6940_v2 }
 0x17e   : > { %1480 = vmatprep.subr.bf16.mxu0 %v6947_v3  ;;  %1521 = vmatprep.subr.bf16.mxu1 %v6954_v4 }
 0x181   : > { %1481 = vmatpush1.bf16.msra.mxu0 %v6959_v5  ;;  %1522 = vmatpush1.bf16.msra.mxu1 %v6964_v6 }
 0x182   : > { %1482 = vmatprep.subr.bf16.mxu0 %v6979_v9  ;;  %1523 = vmatprep.subr.bf16.mxu1 %v6984_v10 }
 0x185   : > { %1483 = vmatpush1.bf16.msra.mxu0 %v6991_v11  ;;  %1524 = vmatpush1.bf16.msra.mxu1 %v6996_v12 }
 0x186   : > { %1484 = vmatprep.subr.bf16.mxu0 %v7001_v14  ;;  %1525 = vmatprep.subr.bf16.mxu1 %v7006_v15 }
 0x189   : > { %1485 = vmatpush1.bf16.msra.mxu0 %v7015_v16  ;;  %1526 = vmatpush1.bf16.msra.mxu1 %v7020_v17 }
 0x18a   : > { %1486 = vmatprep.subr.bf16.mxu0 %v7031_v21  ;;  %1527 = vmatprep.subr.bf16.mxu1 %v7036_v22 }
 0x18d   : > { %1487 = vmatpush1.bf16.msra.mxu0 %v7047_v23  ;;  %1528 = vmatpush1.bf16.msra.mxu1 %v7052_v24 }
 0x18e   : > { %1488 = vmatprep.subr.bf16.mxu0 %v7057_v26  ;;  %1529 = vmatprep.subr.bf16.mxu1 %v7062_v27 }
 0x191   : > { %1489 = vmatpush1.bf16.msra.mxu0 %v7071_v28  ;;  %1530 = vmatpush1.bf16.msra.mxu1 %v7076_v29 }
 0x192   : > { %1586 = vmatprep.subr.bf16.mxu0 %v6871_v51  ;;  %1627 = vmatprep.subr.bf16.mxu1 %v6876_v52 }
 0x234   : > { %v1396_v35 = vpop.f32.mrf.mxu0  ;;  %v1437_v37 = vpop.f32.mrf.mxu1 }
 0x235   : > { %v1444_v42 = vadd.f32 %v1396_v35, %v7144_v47  ;;  %v1446_v39 = vadd.f32 %v1437_v37, %v7147_v48 }
 0x236   : > { %v1398_v19 = vpop.f32.mrf.mxu0  ;;  %v1439_v46 = vpop.f32.mrf.mxu1 }
 0x237   : > { %v1448_v33 = vmul.f32 0.5, %v1444_v42  ;;  %v1445_v36 = vadd.f32 %v1398_v19, %v915_v40  ;;  %v1447_v49 = vadd.f32 %v1439_v46, %v988_v41 }
 0x238   : > { %v1400_v13 = vpop.f32.mrf.mxu0  ;;  %v1441_v38 = vpop.f32.mrf.mxu1 }
 0x239   : > { %6166 = vtanh.f32 %v1448_v33  ;;  %v1452_v45 = vmul.f32 0.5, %v1445_v36  ;;  %v1457_v43 = vmul.f32 0.5, %v1447_v49 }
 0x23a   : > { %v1401_v32 = vpop.f32.mrf.mxu0  ;;  %v1442_v60 = vpop.f32.mrf.mxu1 }
 0x23b   : > { %6168 = vtanh.f32 %v1452_v45 }
 0x23c   : > { %6170 = vtanh.f32 %v1446_v39 }
 0x23d   : > { %6172 = vtanh.f32 %v1457_v43 }
 0x246   : > { %v6167_v47 = vpop.eup %6166 }
 0x247   : > { %v1450_v31 = vmul.f32 0.5, %v6167_v47 }
 0x248   : > { %v6169_v53 = vpop.eup %6168 }
 0x249   : > { %v1451_v30 = vadd.f32 0.5, %v1450_v31  ;;  %v1454_v35 = vmul.f32 0.5, %v6169_v53  ;;  %v6171_v40 = vpop.eup %6170 }
 0x24a   : > { %v6173_v33 = vpop.eup %6172 }
 0x24b   : > { %v1455_v42 = vadd.f32 0.5, %v1454_v35  ;;  %v1462_v19 = vmul.f32 %v6171_v40, %v1451_v30  ;;  %v1459_v36 = vmul.f32 0.5, %v6173_v33 }
 0x24d   : > { %v1461_v48 = vmul.f32 %v1455_v42, %v7227_v44  ;;  %v1460_v50 = vadd.f32 0.5, %v1459_v36  ;;  %v7331_v36 = vld [vmem:[%s9305_s2 + $0xe0] ss:$16 sps:$4 sm:$0xff]  }
 0x24f   : > { %v7275_v37 = vadd.f32 %v1462_v19, %v1461_v48 }
 0x251   : > { %6174 = vtanh.f32 %v7275_v37 }
 0x25e   : > { %v6175_v46 = vpop.eup %6174 }
 0x25f   : > { %v7278_v13 = vmul.f32 %v6175_v46, %v1460_v50  ;;  %v7343_v50 = vld [vmem:[%s9305_s2 + $0xc4] ss:$16 sps:$4 sm:$0xff]   ;;  %v7349_v46 = vld [vmem:[%s9305_s2 + $0xcc] ss:$16 sps:$4 sm:$0xff]  }
 0x261   : > { %v1473_v38 = vpack.c.bf16 %v7278_v13, %v7278_v13 }
 0x263   : > { %1507 = vmatmul.mubr.bf16.vlgmr.msra.gmra.mxu0 %v1473_v38  ;;  %1548 = vmatmul.mubr.bf16.vlgmr.msra.gmra.mxu1 %v1473_v38  ;;  %v7357_v38 = vld [vmem:[%s9305_s2 + $0xc0] ss:$16 sps:$4 sm:$0xff]  }
 0x264   : > { %1587 = vmatpush1.bf16.msra.mxu0 %v6881_v54  ;;  %1628 = vmatpush1.bf16.msra.mxu1 %v6886_v55 }
 0x265   : > { %1588 = vmatprep.subr.bf16.mxu0 %v6893_v56  ;;  %1629 = vmatprep.subr.bf16.mxu1 %v6898_v57 }
 0x266   : > { %1618 = vmatprep.mubr.bf16.mxu0 %v9369_v34  ;;  %1659 = vmatprep.mubr.bf16.mxu1 %v9369_v34 }
 0x268   : > { %1589 = vmatpush1.bf16.msra.mxu0 %v6903_v58  ;;  %1630 = vmatpush1.bf16.msra.mxu1 %v6908_v59 }
 0x269   : > { %1590 = vmatprep.subr.bf16.mxu0 %v6921_v62  ;;  %1631 = vmatprep.subr.bf16.mxu1 %v6928_v63 }
 0x26c   : > { %1591 = vmatpush1.bf16.msra.mxu0 %v6935_v1  ;;  %1632 = vmatpush1.bf16.msra.mxu1 %v6940_v2 }
 0x26d   : > { %1592 = vmatprep.subr.bf16.mxu0 %v6947_v3  ;;  %1633 = vmatprep.subr.bf16.mxu1 %v6954_v4 }
 0x270   : > { %1593 = vmatpush1.bf16.msra.mxu0 %v6959_v5  ;;  %1634 = vmatpush1.bf16.msra.mxu1 %v6964_v6 }
 0x271   : > { %1594 = vmatprep.subr.bf16.mxu0 %v6979_v9  ;;  %1635 = vmatprep.subr.bf16.mxu1 %v6984_v10 }
 0x274   : > { %1595 = vmatpush1.bf16.msra.mxu0 %v6991_v11  ;;  %1636 = vmatpush1.bf16.msra.mxu1 %v6996_v12 }
 0x275   : > { %1596 = vmatprep.subr.bf16.mxu0 %v7001_v14  ;;  %1637 = vmatprep.subr.bf16.mxu1 %v7006_v15 }
 0x278   : > { %1597 = vmatpush1.bf16.msra.mxu0 %v7015_v16  ;;  %1638 = vmatpush1.bf16.msra.mxu1 %v7020_v17 }
 0x279   : > { %1598 = vmatprep.subr.bf16.mxu0 %v7031_v21  ;;  %1639 = vmatprep.subr.bf16.mxu1 %v7036_v22 }
 0x27c   : > { %1599 = vmatpush1.bf16.msra.mxu0 %v7047_v23  ;;  %1640 = vmatpush1.bf16.msra.mxu1 %v7052_v24 }
 0x27d   : > { %1600 = vmatprep.subr.bf16.mxu0 %v7057_v26  ;;  %1641 = vmatprep.subr.bf16.mxu1 %v7062_v27 }
 0x280   : > { %1601 = vmatpush1.bf16.msra.mxu0 %v7071_v28  ;;  %1642 = vmatpush1.bf16.msra.mxu1 %v7076_v29 }
 0x281   : > { %1698 = vmatprep.subr.bf16.mxu0 %v6871_v51  ;;  %1739 = vmatprep.subr.bf16.mxu1 %v6876_v52 }
 0x323   : > { %v1508_v54 = vpop.f32.mrf.mxu0  ;;  %v1549_v55 = vpop.f32.mrf.mxu1 }
 0x324   : > { %v1556_v56 = vadd.f32 %v1508_v54, %v7159_v7  ;;  %v1558_v45 = vadd.f32 %v1549_v55, %v7162_v8  ;;  %v7363_v54 = vld [vmem:[%s9305_s2 + $0xc8] ss:$16 sps:$4 sm:$0xff]   ;;  %v7369_v55 = vld [vmem:[%s9305_s2 + $0xa4] ss:$16 sps:$4 sm:$0xff]  }
 0x325   : > { %v1510_v57 = vpop.f32.mrf.mxu0  ;;  %v1551_v58 = vpop.f32.mrf.mxu1 }
 0x326   : > { %v1560_v59 = vmul.f32 0.5, %v1556_v56  ;;  %v1557_v62 = vadd.f32 %v1510_v57, %v7165_v20  ;;  %v1559_v51 = vadd.f32 %v1551_v58, %v7168_v25 }
 0x327   : > { %v1512_v44 = vpop.f32.mrf.mxu0  ;;  %v1553_v39 = vpop.f32.mrf.mxu1 }
 0x328   : > { %6176 = vtanh.f32 %v1560_v59  ;;  %v1564_v32 = vmul.f32 0.5, %v1557_v62  ;;  %v1569_v52 = vmul.f32 0.5, %v1559_v51 }
 0x329   : > { %v1513_v60 = vpop.f32.mrf.mxu0  ;;  %v1554_v41 = vpop.f32.mrf.mxu1 }
 0x32a   : > { %6178 = vtanh.f32 %v1564_v32 }
 0x32b   : > { %6180 = vtanh.f32 %v1558_v45 }
 0x32c   : > { %6182 = vtanh.f32 %v1569_v52 }
 0x335   : > { %v6177_v49 = vpop.eup %6176 }
 0x336   : > { %v1562_v7 = vmul.f32 0.5, %v6177_v49 }
 0x337   : > { %v6179_v43 = vpop.eup %6178 }
 0x338   : > { %v1563_v47 = vadd.f32 0.5, %v1562_v7  ;;  %v1566_v31 = vmul.f32 0.5, %v6179_v43  ;;  %v6181_v20 = vpop.eup %6180 }
 0x339   : > { %v6183_v40 = vpop.eup %6182 }
 0x33a   : > { %v1567_v53 = vadd.f32 0.5, %v1566_v31  ;;  %v1574_v30 = vmul.f32 %v6181_v20, %v1563_v47  ;;  %v1571_v42 = vmul.f32 0.5, %v6183_v40  ;;  %v7433_v20 = vld [vmem:[%s9305_s2 + $0xac] ss:$16 sps:$4 sm:$0xff]   ;;  %v7463_v40 = vld [vmem:[%s9305_s2 + $0x80] ss:$16 sps:$4 sm:$0xff]  }
 0x33c   : > { %v1573_v35 = vmul.f32 %v1567_v53, %v7275_v37  ;;  %v1572_v19 = vadd.f32 0.5, %v1571_v42  ;;  %v7337_v37 = vld [vmem:[%s9305_s2 + $0xe8] ss:$16 sps:$4 sm:$0xff]   ;;  %v7439_v53 = vld [vmem:[%s9305_s2 + $0xa0] ss:$16 sps:$4 sm:$0xff]  }
 0x33d   : > { %v7469_v42 = vld [vmem:[%s9305_s2 + $0x88] ss:$16 sps:$4 sm:$0xff]  }
 0x33e   : > { %v7321_v8 = vadd.f32 %v1574_v30, %v1573_v35  ;;  %v7445_v30 = vld [vmem:[%s9305_s2 + $0xa8] ss:$16 sps:$4 sm:$0xff]   ;;  %v7451_v35 = vld [vmem:[%s9305_s2 + $0x84] ss:$16 sps:$4 sm:$0xff]  }
 0x340   : > { %6184 = vtanh.f32 %v7321_v8 }
 0x34d   : > { %v6185_v25 = vpop.eup %6184 }
 0x34e   : > { %v7324_v48 = vmul.f32 %v6185_v25, %v1572_v19  ;;  %v7475_v19 = vld [vmem:[%s9305_s2 + $0x64] ss:$16 sps:$4 sm:$0xff]   ;;  %v7481_v25 = vld [vmem:[%s9305_s2 + $0x6c] ss:$16 sps:$4 sm:$0xff]  }
 0x350   : > { %v1585_v33 = vpack.c.bf16 %v7324_v48, %v7324_v48 }
 0x352   : > { %1619 = vmatmul.mubr.bf16.vlgmr.msra.gmra.mxu0 %v1585_v33  ;;  %1660 = vmatmul.mubr.bf16.vlgmr.msra.gmra.mxu1 %v1585_v33  ;;  %v7487_v33 = vld [vmem:[%s9305_s2 + $0x60] ss:$16 sps:$4 sm:$0xff]  }
 0x353   : > { %1699 = vmatpush1.bf16.msra.mxu0 %v7331_v36  ;;  %1740 = vmatpush1.bf16.msra.mxu1 %v7337_v37 }
 0x354   : > { %1700 = vmatprep.subr.bf16.mxu0 %v7343_v50  ;;  %1741 = vmatprep.subr.bf16.mxu1 %v7349_v46 }
 0x355   : > { %1730 = vmatprep.mubr.bf16.mxu0 %v9369_v34  ;;  %1771 = vmatprep.mubr.bf16.mxu1 %v9369_v34 }
 0x357   : > { %1701 = vmatpush1.bf16.msra.mxu0 %v7357_v38  ;;  %1742 = vmatpush1.bf16.msra.mxu1 %v7363_v54 }
 0x358   : > { %1702 = vmatprep.subr.bf16.mxu0 %v7369_v55  ;;  %1743 = vmatprep.subr.bf16.mxu1 %v6928_v63  ;;  %v7398_v63 = vld [vmem:[%s9305_s2 + $0xe4] ss:$16 sps:$4 sm:$0xff]  }
 0x35b   : > { %1703 = vmatpush1.bf16.msra.mxu0 %v6935_v1  ;;  %1744 = vmatpush1.bf16.msra.mxu1 %v6940_v2  ;;  %v7404_v1 = vld [vmem:[%s9305_s2 + $0xec] ss:$16 sps:$4 sm:$0xff]  }
 0x35c   : > { %1704 = vmatprep.subr.bf16.mxu0 %v6947_v3  ;;  %1745 = vmatprep.subr.bf16.mxu1 %v6954_v4  ;;  %v9370_v4 = vld [vmem:[#allocation19_spill] sm:$0xff] }
 0x35f   : > { %1705 = vmatpush1.bf16.msra.mxu0 %v6959_v5  ;;  %1746 = vmatpush1.bf16.msra.mxu1 %v6964_v6  ;;  %v925_v5 = vadd.f32 %v9370_v4, %v7154_v61  ;;  %v9371_v6 = vld [vmem:[#allocation17_spill] sm:$0xff]  ;;  %v7505_v4 = vld [vmem:[%s9305_s2 + $0x4c] ss:$16 sps:$4 sm:$0xff]  }
 0x360   : > { %1706 = vmatprep.subr.bf16.mxu0 %v6979_v9  ;;  %1747 = vmatprep.subr.bf16.mxu1 %v6984_v10 }
 0x363   : > { %1707 = vmatpush1.bf16.msra.mxu0 %v6991_v11  ;;  %1748 = vmatpush1.bf16.msra.mxu1 %v6996_v12 }
 0x364   : > { %1708 = vmatprep.subr.bf16.mxu0 %v7001_v14  ;;  %1749 = vmatprep.subr.bf16.mxu1 %v7006_v15 }
 0x367   : > { %1709 = vmatpush1.bf16.msra.mxu0 %v7015_v16  ;;  %1750 = vmatpush1.bf16.msra.mxu1 %v7020_v17  ;;  %v9372_v17 = vld [vmem:[#allocation18_spill] sm:$0xff] }
 0x368   : > { %1710 = vmatprep.subr.bf16.mxu0 %v7031_v21  ;;  %1751 = vmatprep.subr.bf16.mxu1 %v7036_v22 }
 0x36b   : > { %1711 = vmatpush1.bf16.msra.mxu0 %v7047_v23  ;;  %1752 = vmatpush1.bf16.msra.mxu1 %v7052_v24 }
 0x36c   : > { %1712 = vmatprep.subr.bf16.mxu0 %v7057_v26  ;;  %1753 = vmatprep.subr.bf16.mxu1 %v7062_v27  ;;  %v9373_v26 = vld [vmem:[#allocation20_spill] sm:$0xff] }
 0x36d   : > { %v998_v27 = vadd.f32 %v9373_v26, %v7157_v0 }
 0x36f   : > { %1713 = vmatpush1.bf16.msra.mxu0 %v7071_v28  ;;  %1754 = vmatpush1.bf16.msra.mxu1 %v7076_v29 }
 0x370   : > { %1810 = vmatprep.subr.bf16.mxu0 %v7398_v63  ;;  %1851 = vmatprep.subr.bf16.mxu1 %v7404_v1 }
 0x412   : > { %v1620_v2 = vpop.f32.mrf.mxu0  ;;  %v1661_v3 = vpop.f32.mrf.mxu1 }
 0x413   : > { %v1668_v9 = vadd.f32 %v1620_v2, %v9371_v6  ;;  %v1670_v21 = vadd.f32 %v1661_v3, %v9372_v17  ;;  %v7493_v2 = vld [vmem:[%s9305_s2 + $0x68] ss:$16 sps:$4 sm:$0xff]   ;;  %v7499_v3 = vld [vmem:[%s9305_s2 + $0x44] ss:$16 sps:$4 sm:$0xff]  }
 0x414   : > { %v1622_v10 = vpop.f32.mrf.mxu0  ;;  %v1663_v11 = vpop.f32.mrf.mxu1  ;;  %v7517_v6 = vld [vmem:[%s9305_s2 + $0x48] ss:$16 sps:$4 sm:$0xff]  }
 0x415   : > { %v1672_v12 = vmul.f32 0.5, %v1668_v9  ;;  %v1669_v14 = vadd.f32 %v1622_v10, %v925_v5  ;;  %v1671_v56 = vadd.f32 %v1663_v11, %v998_v27  ;;  %v7511_v5 = vld [vmem:[%s9305_s2 + $0x40] ss:$16 sps:$4 sm:$0xff]   ;;  %v7523_v9 = vld [vmem:[%s9305_s2 + $0x24] ss:$16 sps:$4 sm:$0xff]  }
 0x416   : > { %v1624_v15 = vpop.f32.mrf.mxu0  ;;  %v1665_v16 = vpop.f32.mrf.mxu1  ;;  %v7529_v10 = vld [vmem:[%s9305_s2 + $0x2c] ss:$16 sps:$4 sm:$0xff]   ;;  %v7535_v11 = vld [vmem:[%s9305_s2 + $0x20] ss:$16 sps:$4 sm:$0xff]  }
 0x417   : > { %6186 = vtanh.f32 %v1672_v12  ;;  %v1676_v22 = vmul.f32 0.5, %v1669_v14  ;;  %v1681_v57 = vmul.f32 0.5, %v1671_v56  ;;  %v7541_v12 = vld [vmem:[%s9305_s2 + $0x28] ss:$16 sps:$4 sm:$0xff]   ;;  %v7547_v14 = vld [vmem:[%s9305_s2 + $0x4] ss:$16 sps:$4 sm:$0xff]  }
 0x418   : > { %v1625_v23 = vpop.f32.mrf.mxu0  ;;  %v1666_v24 = vpop.f32.mrf.mxu1  ;;  %v7553_v15 = vld [vmem:[%s9305_s2 + $0xc] ss:$16 sps:$4 sm:$0xff]   ;;  %v9375_v27 = vld [vmem:[#allocation23_spill] sm:$0xff] }
 0x419   : > { %6188 = vtanh.f32 %v1676_v22 }
 0x41a   : > { %6190 = vtanh.f32 %v1670_v21  ;;  %v9374_v21 = vld [vmem:[#allocation21_spill] sm:$0xff] }
 0x41b   : > { %6192 = vtanh.f32 %v1681_v57 }
 0x424   : > { %v6187_v58 = vpop.eup %6186 }
 0x425   : > { %v1674_v59 = vmul.f32 0.5, %v6187_v58 }
 0x426   : > { %v6189_v62 = vpop.eup %6188 }
 0x427   : > { %v1675_v44 = vadd.f32 0.5, %v1674_v59  ;;  %v1678_v39 = vmul.f32 0.5, %v6189_v62  ;;  %v6191_v45 = vpop.eup %6190  ;;  %v9376_v59 = vld [vmem:[#allocation22_spill] sm:$0xff] }
 0x428   : > { %v6193_v52 = vpop.eup %6192 }
 0x429   : > { %v1679_v32 = vadd.f32 0.5, %v1678_v39  ;;  %v1686_v60 = vmul.f32 %v6191_v45, %v1675_v44  ;;  %v1683_v49 = vmul.f32 0.5, %v6193_v52  ;;  %v9377_v39 = vld [vmem:[#allocation24_spill] sm:$0xff] }
 0x42b   : > { %v1685_v41 = vmul.f32 %v1679_v32, %v7321_v8  ;;  %v1684_v7 = vadd.f32 0.5, %v1683_v49  ;;  %v7457_v8 = vld [vmem:[%s9305_s2 + $0x8c] ss:$16 sps:$4 sm:$0xff]  }
 0x42d   : > { %v7414_v51 = vadd.f32 %v1686_v60, %v1685_v41 }
 0x42f   : > { %6194 = vtanh.f32 %v7414_v51 }
 0x43c   : > { %v6195_v43 = vpop.eup %6194 }
 0x43d   : > { %v7417_v47 = vmul.f32 %v6195_v43, %v1684_v7 }
 0x43f   : > { %v1697_v31 = vpack.c.bf16 %v7417_v47, %v7417_v47 }
 0x441   : > { %1731 = vmatmul.mubr.bf16.vlgmr.msra.gmra.mxu0 %v1697_v31  ;;  %1772 = vmatmul.mubr.bf16.vlgmr.msra.gmra.mxu1 %v1697_v31 }
 0x442   : > { %1811 = vmatpush1.bf16.msra.mxu0 %v7331_v36  ;;  %1852 = vmatpush1.bf16.msra.mxu1 %v7337_v37 }
 0x443   : > { %1812 = vmatprep.subr.bf16.mxu0 %v7343_v50  ;;  %1853 = vmatprep.subr.bf16.mxu1 %v7349_v46 }
 0x444   : > { %1842 = vmatprep.mubr.bf16.mxu0 %v9369_v34  ;;  %1883 = vmatprep.mubr.bf16.mxu1 %v9369_v34 }
 0x446   : > { %1813 = vmatpush1.bf16.msra.mxu0 %v7357_v38  ;;  %1854 = vmatpush1.bf16.msra.mxu1 %v7363_v54 }
 0x447   : > { %1814 = vmatprep.subr.bf16.mxu0 %v7369_v55  ;;  %1855 = vmatprep.subr.bf16.mxu1 %v7433_v20 }
 0x44a   : > { %1815 = vmatpush1.bf16.msra.mxu0 %v7439_v53  ;;  %1856 = vmatpush1.bf16.msra.mxu1 %v7445_v30 }
 0x44b   : > { %1816 = vmatprep.subr.bf16.mxu0 %v7451_v35  ;;  %1857 = vmatprep.subr.bf16.mxu1 %v7457_v8 }
 0x44e   : > { %1817 = vmatpush1.bf16.msra.mxu0 %v7463_v40  ;;  %1858 = vmatpush1.bf16.msra.mxu1 %v7469_v42 }
 0x44f   : > { %1818 = vmatprep.subr.bf16.mxu0 %v7475_v19  ;;  %1859 = vmatprep.subr.bf16.mxu1 %v7481_v25 }
 0x452   : > { %1819 = vmatpush1.bf16.msra.mxu0 %v7487_v33  ;;  %1860 = vmatpush1.bf16.msra.mxu1 %v7493_v2 }
 0x453   : > { %1820 = vmatprep.subr.bf16.mxu0 %v7499_v3  ;;  %1861 = vmatprep.subr.bf16.mxu1 %v7505_v4 }
 0x456   : > { %1821 = vmatpush1.bf16.msra.mxu0 %v7511_v5  ;;  %1862 = vmatpush1.bf16.msra.mxu1 %v7517_v6 }
 0x457   : > { %1822 = vmatprep.subr.bf16.mxu0 %v7523_v9  ;;  %1863 = vmatprep.subr.bf16.mxu1 %v7529_v10 }
 0x45a   : > { %1823 = vmatpush1.bf16.msra.mxu0 %v7535_v11  ;;  %1864 = vmatpush1.bf16.msra.mxu1 %v7541_v12 }
 0x45b   : > { %1824 = vmatprep.subr.bf16.mxu0 %v7547_v14  ;;  %1865 = vmatprep.subr.bf16.mxu1 %v7553_v15 }
 0x45e   : > { %1825 = vmatpush1.bf16.msra.mxu0 %v7071_v28  ;;  %1866 = vmatpush1.bf16.msra.mxu1 %v7076_v29 }
 0x45f   : > { %1922 = vmatprep.subr.bf16.mxu0 %v7398_v63  ;;  %1963 = vmatprep.subr.bf16.mxu1 %v7404_v1 }
 0x501   : > { %v1732_v16 = vpop.f32.mrf.mxu0  ;;  %v1773_v17 = vpop.f32.mrf.mxu1 }
 0x502   : > { %v1780_v22 = vadd.f32 %v1732_v16, %v9374_v21  ;;  %v1782_v28 = vadd.f32 %v1773_v17, %v9376_v59 }
 0x503   : > { %v1734_v23 = vpop.f32.mrf.mxu0  ;;  %v1775_v24 = vpop.f32.mrf.mxu1 }
 0x504   : > { %v1784_v26 = vmul.f32 0.5, %v1780_v22  ;;  %v1781_v56 = vadd.f32 %v1734_v23, %v9375_v27  ;;  %v1783_v45 = vadd.f32 %v1775_v24, %v9377_v39 }
 0x505   : > { %v1736_v57 = vpop.f32.mrf.mxu0  ;;  %v1777_v58 = vpop.f32.mrf.mxu1 }
 0x506   : > { %6196 = vtanh.f32 %v1784_v26  ;;  %v1788_v62 = vmul.f32 0.5, %v1781_v56  ;;  %v1793_v32 = vmul.f32 0.5, %v1783_v45  ;;  %v7611_v57 = vld [vmem:[%s9305_s2 + $0x8] ss:$16 sps:$4 sm:$0xff]  }
 0x507   : > { %v1737_v29 = vpop.f32.mrf.mxu0  ;;  %v1778_v44 = vpop.f32.mrf.mxu1 }
 0x508   : > { %6198 = vtanh.f32 %v1788_v62  ;;  %v9379_v29 = vld [vmem:[#allocation25_spill] sm:$0xff] }
 0x509   : > { %6200 = vtanh.f32 %v1782_v28  ;;  %v9378_v28 = vld [vmem:[#allocation27_spill] sm:$0xff] }
 0x50a   : > { %6202 = vtanh.f32 %v1793_v32  ;;  %v935_v62 = vadd.f32 %v9378_v28, %v7154_v61 }
 0x513   : > { %v6197_v60 = vpop.eup %6196 }
 0x514   : > { %v1786_v41 = vmul.f32 0.5, %v6197_v60 }
 0x515   : > { %v6199_v52 = vpop.eup %6198 }
 0x516   : > { %v1787_v49 = vadd.f32 0.5, %v1786_v41  ;;  %v1790_v7 = vmul.f32 0.5, %v6199_v52  ;;  %v6201_v43 = vpop.eup %6200 }
 0x517   : > { %v6203_v22 = vpop.eup %6202 }
 0x518   : > { %v1791_v31 = vadd.f32 0.5, %v1790_v7  ;;  %v1798_v16 = vmul.f32 %v6201_v43, %v1787_v49  ;;  %v1795_v23 = vmul.f32 0.5, %v6203_v22  ;;  %v9380_v49 = vld [vmem:[#allocation26_spill] sm:$0xff] }
 0x51a   : > { %v1797_v21 = vmul.f32 %v1791_v31, %v7414_v51  ;;  %v1796_v26 = vadd.f32 0.5, %v1795_v23  ;;  %v7605_v51 = vld [vmem:[%s9305_s2] ss:$16 sps:$4 sm:$0xff]  }
 0x51c   : > { %v7565_v17 = vadd.f32 %v1798_v16, %v1797_v21 }
 0x51e   : > { %6204 = vtanh.f32 %v7565_v17 }
 0x52b   : > { %v6205_v24 = vpop.eup %6204 }
 0x52c   : > { %v7568_v27 = vmul.f32 %v6205_v24, %v1796_v26 }
 0x52e   : > { %v1809_v56 = vpack.c.bf16 %v7568_v27, %v7568_v27 }
 0x530   : > { %1843 = vmatmul.mubr.bf16.vlgmr.msra.gmra.mxu0 %v1809_v56  ;;  %1884 = vmatmul.mubr.bf16.vlgmr.msra.gmra.mxu1 %v1809_v56 }
 0x531   : > { %1923 = vmatpush1.bf16.msra.mxu0 %v7331_v36  ;;  %1964 = vmatpush1.bf16.msra.mxu1 %v7337_v37 }
 0x532   : > { %1924 = vmatprep.subr.bf16.mxu0 %v7343_v50  ;;  %1965 = vmatprep.subr.bf16.mxu1 %v7349_v46 }
 0x533   : > { %1954 = vmatprep.mubr.bf16.mxu0 %v9369_v34  ;;  %1995 = vmatprep.mubr.bf16.mxu1 %v9369_v34 }
 0x535   : > { %1925 = vmatpush1.bf16.msra.mxu0 %v7357_v38  ;;  %1966 = vmatpush1.bf16.msra.mxu1 %v7363_v54 }
 0x536   : > { %1926 = vmatprep.subr.bf16.mxu0 %v7369_v55  ;;  %1967 = vmatprep.subr.bf16.mxu1 %v7433_v20 }
 0x539   : > { %1927 = vmatpush1.bf16.msra.mxu0 %v7439_v53  ;;  %1968 = vmatpush1.bf16.msra.mxu1 %v7445_v30 }
 0x53a   : > { %1928 = vmatprep.subr.bf16.mxu0 %v7451_v35  ;;  %1969 = vmatprep.subr.bf16.mxu1 %v7457_v8 }
 0x53d   : > { %1929 = vmatpush1.bf16.msra.mxu0 %v7463_v40  ;;  %1970 = vmatpush1.bf16.msra.mxu1 %v7469_v42 }
 0x53e   : > { %1930 = vmatprep.subr.bf16.mxu0 %v7475_v19  ;;  %1971 = vmatprep.subr.bf16.mxu1 %v7481_v25 }
 0x541   : > { %1931 = vmatpush1.bf16.msra.mxu0 %v7487_v33  ;;  %1972 = vmatpush1.bf16.msra.mxu1 %v7493_v2 }
 0x542   : > { %1932 = vmatprep.subr.bf16.mxu0 %v7499_v3  ;;  %1973 = vmatprep.subr.bf16.mxu1 %v7505_v4 }
 0x545   : > { %1933 = vmatpush1.bf16.msra.mxu0 %v7511_v5  ;;  %1974 = vmatpush1.bf16.msra.mxu1 %v7517_v6 }
 0x546   : > { %1934 = vmatprep.subr.bf16.mxu0 %v7523_v9  ;;  %1975 = vmatprep.subr.bf16.mxu1 %v7529_v10 }
 0x549   : > { %1935 = vmatpush1.bf16.msra.mxu0 %v7535_v11  ;;  %1976 = vmatpush1.bf16.msra.mxu1 %v7541_v12 }
 0x54a   : > { %1936 = vmatprep.subr.bf16.mxu0 %v7547_v14  ;;  %1977 = vmatprep.subr.bf16.mxu1 %v7553_v15 }
 0x54d   : > { %1937 = vmatpush1.bf16.msra.mxu0 %v7605_v51  ;;  %1978 = vmatpush1.bf16.msra.mxu1 %v7611_v57 }
 0x54e   : > { %2034 = vmatprep.subr.bf16.mxu0 %v7398_v63  ;;  %2075 = vmatprep.subr.bf16.mxu1 %v7404_v1  ;;  %v9381_v1 = vld [vmem:[#allocation28_spill] sm:$0xff] }
 0x54f   : > { %v1008_v16 = vadd.f32 %v9381_v1, %v7157_v0  ;;  %v5964_v1 = vld [vmem:[%s9307_s4 + $0xe0] ss:$16 sps:$4 sm:$0xff]  }
 0x5f0   : > { %v1844_v58 = vpop.f32.mrf.mxu0  ;;  %v1885_v59 = vpop.f32.mrf.mxu1 }
 0x5f1   : > { %v1892_v44 = vadd.f32 %v1844_v58, %v9379_v29  ;;  %v1894_v7 = vadd.f32 %v1885_v59, %v9380_v49 }
 0x5f2   : > { %v1846_v39 = vpop.f32.mrf.mxu0  ;;  %v1887_v45 = vpop.f32.mrf.mxu1 }
 0x5f3   : > { %v1896_v32 = vmul.f32 0.5, %v1892_v44  ;;  %v1893_v60 = vadd.f32 %v1846_v39, %v935_v62  ;;  %v1895_v21 = vadd.f32 %v1887_v45, %v1008_v16  ;;  %v5967_v16 = vld [vmem:[%s9307_s4 + $0xe8] ss:$16 sps:$4 sm:$0xff]  }
 0x5f4   : > { %v1848_v41 = vpop.f32.mrf.mxu0  ;;  %v1889_v52 = vpop.f32.mrf.mxu1 }
 0x5f5   : > { %6206 = vtanh.f32 %v1896_v32  ;;  %v1900_v43 = vmul.f32 0.5, %v1893_v60  ;;  %v1905_v22 = vmul.f32 0.5, %v1895_v21 }
 0x5f6   : > { %v1849_v63 = vpop.f32.mrf.mxu0  ;;  %v1890_v31 = vpop.f32.mrf.mxu1 }
 0x5f7   : > { %6208 = vtanh.f32 %v1900_v43 }
 0x5f8   : > { %6210 = vtanh.f32 %v1894_v7 }
 0x5f9   : > { %6212 = vtanh.f32 %v1905_v22  ;;  %v5972_v22 = vld [vmem:[%s9307_s4 + $0xc4] ss:$16 sps:$4 sm:$0xff]  }
 0x602   : > { %v6207_v23 = vpop.eup %6206 }
 0x603   : > { %v1898_v26 = vmul.f32 0.5, %v6207_v23  ;;  %v5975_v23 = vld [vmem:[%s9307_s4 + $0xcc] ss:$16 sps:$4 sm:$0xff]  }
 0x604   : > { %v6209_v24 = vpop.eup %6208 }
 0x605   : > { %v1899_v56 = vadd.f32 0.5, %v1898_v26  ;;  %v1902_v58 = vmul.f32 0.5, %v6209_v24  ;;  %v6211_v28 = vpop.eup %6210  ;;  %v5970_v26 = vld [vmem:[%s9307_s4 + $0xc0] ss:$16 sps:$4 sm:$0xff]   ;;  %v5973_v24 = vld [vmem:[%s9307_s4 + $0xc8] ss:$16 sps:$4 sm:$0xff]  }
 0x606   : > { %v6213_v39 = vpop.eup %6212 }
 0x607   : > { %v1903_v62 = vadd.f32 0.5, %v1902_v58  ;;  %v1910_v29 = vmul.f32 %v6211_v28, %v1899_v56  ;;  %v1907_v32 = vmul.f32 0.5, %v6213_v39  ;;  %v5978_v56 = vld [vmem:[%s9307_s4 + $0xa4] ss:$16 sps:$4 sm:$0xff]   ;;  %v5981_v58 = vld [vmem:[%s9307_s4 + $0xac] ss:$16 sps:$4 sm:$0xff]  }
 0x608   : > { %v5976_v28 = vld [vmem:[%s9307_s4 + $0xa0] ss:$16 sps:$4 sm:$0xff]   ;;  %v5985_v39 = vld [vmem:[%s9307_s4 + $0x88] ss:$16 sps:$4 sm:$0xff]  }
 0x609   : > { %v1909_v59 = vmul.f32 %v1903_v62, %v7565_v17  ;;  %v1908_v60 = vadd.f32 0.5, %v1907_v32  ;;  %v5979_v62 = vld [vmem:[%s9307_s4 + $0xa8] ss:$16 sps:$4 sm:$0xff]   ;;  %v5990_v32 = vld [vmem:[%s9307_s4 + $0x64] ss:$16 sps:$4 sm:$0xff]  }
 0x60b   : > { %v7623_v44 = vadd.f32 %v1910_v29, %v1909_v59  ;;  %v5984_v29 = vld [vmem:[%s9307_s4 + $0x84] ss:$16 sps:$4 sm:$0xff]   ;;  %v5987_v59 = vld [vmem:[%s9307_s4 + $0x8c] ss:$16 sps:$4 sm:$0xff]  }
 0x60d   : > { %6214 = vtanh.f32 %v7623_v44 }
 0x61a   : > { %v6215_v45 = vpop.eup %6214 }
 0x61b   : > { %v7626_v41 = vmul.f32 %v6215_v45, %v1908_v60  ;;  %v5993_v60 = vld [vmem:[%s9307_s4 + $0x6c] ss:$16 sps:$4 sm:$0xff]   ;;  %v5988_v45 = vld [vmem:[%s9307_s4 + $0x60] ss:$16 sps:$4 sm:$0xff]  }
 0x61d   : > { %v1921_v52 = vpack.c.bf16 %v7626_v41, %v7626_v41 }
 0x61f   : > { %1955 = vmatmul.mubr.bf16.vlgmr.msra.gmra.mxu0 %v1921_v52  ;;  %1996 = vmatmul.mubr.bf16.vlgmr.msra.gmra.mxu1 %v1921_v52  ;;  %v5991_v52 = vld [vmem:[%s9307_s4 + $0x68] ss:$16 sps:$4 sm:$0xff]  }
 0x620   : > { %2035 = vmatpush1.bf16.msra.mxu0 %v7331_v36  ;;  %2076 = vmatpush1.bf16.msra.mxu1 %v7337_v37  ;;  %v5966_v36 = vld [vmem:[%s9307_s4 + $0xe4] ss:$16 sps:$4 sm:$0xff]   ;;  %v5969_v37 = vld [vmem:[%s9307_s4 + $0xec] ss:$16 sps:$4 sm:$0xff]  }
 0x621   : > { %2036 = vmatprep.subr.bf16.mxu0 %v7343_v50  ;;  %2077 = vmatprep.subr.bf16.mxu1 %v7349_v46 }
 0x622   : > { %2066 = vmatprep.mubr.bf16.mxu0 %v9369_v34  ;;  %2107 = vmatprep.mubr.bf16.mxu1 %v9369_v34 }
 0x624   : > { %2037 = vmatpush1.bf16.msra.mxu0 %v7357_v38  ;;  %2078 = vmatpush1.bf16.msra.mxu1 %v7363_v54  ;;  %v9382_v38 = vld [vmem:[#allocation29_spill] sm:$0xff] }
 0x625   : > { %2038 = vmatprep.subr.bf16.mxu0 %v7369_v55  ;;  %2079 = vmatprep.subr.bf16.mxu1 %v7433_v20 }
 0x628   : > { %2039 = vmatpush1.bf16.msra.mxu0 %v7439_v53  ;;  %2080 = vmatpush1.bf16.msra.mxu1 %v7445_v30  ;;  %v9383_v30 = vld [vmem:[#allocation31_spill] sm:$0xff] }
 0x629   : > { %2040 = vmatprep.subr.bf16.mxu0 %v7451_v35  ;;  %2081 = vmatprep.subr.bf16.mxu1 %v7457_v8 }
 0x62c   : > { %2041 = vmatpush1.bf16.msra.mxu0 %v7463_v40  ;;  %2082 = vmatpush1.bf16.msra.mxu1 %v7469_v42  ;;  %v9384_v42 = vld [vmem:[#allocation30_spill] sm:$0xff] }
 0x62d   : > { %2042 = vmatprep.subr.bf16.mxu0 %v7475_v19  ;;  %2083 = vmatprep.subr.bf16.mxu1 %v7481_v25 }
 0x630   : > { %2043 = vmatpush1.bf16.msra.mxu0 %v7487_v33  ;;  %2084 = vmatpush1.bf16.msra.mxu1 %v7493_v2 }
 0x631   : > { %2044 = vmatprep.subr.bf16.mxu0 %v7499_v3  ;;  %2085 = vmatprep.subr.bf16.mxu1 %v7505_v4  ;;  %v9385_v3 = vld [vmem:[#allocation32_spill] sm:$0xff] }
 0x634   : > { %2045 = vmatpush1.bf16.msra.mxu0 %v7511_v5  ;;  %2086 = vmatpush1.bf16.msra.mxu1 %v7517_v6 }
 0x635   : > { %2046 = vmatprep.subr.bf16.mxu0 %v7523_v9  ;;  %2087 = vmatprep.subr.bf16.mxu1 %v7529_v10 }
 0x638   : > { %2047 = vmatpush1.bf16.msra.mxu0 %v7535_v11  ;;  %2088 = vmatpush1.bf16.msra.mxu1 %v7541_v12 }
 0x639   : > { %2048 = vmatprep.subr.bf16.mxu0 %v7547_v14  ;;  %2089 = vmatprep.subr.bf16.mxu1 %v7553_v15 }
 0x63c   : > { %2049 = vmatpush1.bf16.msra.mxu0 %v7605_v51  ;;  %2090 = vmatpush1.bf16.msra.mxu1 %v7611_v57 }
 0x63d   : > { %2368 = vmatprep.subr.bf16.mxu0 %v5966_v36  ;;  %2441 = vmatprep.subr.bf16.mxu1 %v5969_v37  ;;  %v5996_v36 = vld [vmem:[%s9307_s4 + $0x44] ss:$16 sps:$4 sm:$0xff]   ;;  %v5999_v37 = vld [vmem:[%s9307_s4 + $0x4c] ss:$16 sps:$4 sm:$0xff]  }
 0x6df   : > { %v1956_v50 = vpop.f32.mrf.mxu0  ;;  %v1997_v46 = vpop.f32.mrf.mxu1 }
 0x6e0   : > { %v2004_v54 = vadd.f32 %v1956_v50, %v9382_v38  ;;  %v2006_v19 = vadd.f32 %v1997_v46, %v9384_v42  ;;  %v5994_v50 = vld [vmem:[%s9307_s4 + $0x40] ss:$16 sps:$4 sm:$0xff]   ;;  %v5997_v46 = vld [vmem:[%s9307_s4 + $0x48] ss:$16 sps:$4 sm:$0xff]   ;;  %v6002_v38 = vld [vmem:[%s9307_s4 + $0x24] ss:$16 sps:$4 sm:$0xff]   ;;  %v2151_v42 = vpack.c.bf16 %v7417_v47, %v7324_v48 }
 0x6e1   : > { %v1958_v55 = vpop.f32.mrf.mxu0  ;;  %v1999_v20 = vpop.f32.mrf.mxu1  ;;  %v7797_v48 = vld [vmem:[%s9308_s5 + $0xe0] ss:$16 sps:$4 sm:$0xff]   ;;  %v7802_v47 = vld [vmem:[%s9308_s5 + $0xe8] ss:$16 sps:$4 sm:$0xff]  }
 0x6e2   : > { %v2008_v53 = vmul.f32 0.5, %v2004_v54  ;;  %v2005_v35 = vadd.f32 %v1958_v55, %v9383_v30  ;;  %v2007_v4 = vadd.f32 %v1999_v20, %v9385_v3  ;;  %v6005_v54 = vld [vmem:[%s9307_s4 + $0x2c] ss:$16 sps:$4 sm:$0xff]   ;;  %v6000_v55 = vld [vmem:[%s9307_s4 + $0x20] ss:$16 sps:$4 sm:$0xff]  }
 0x6e3   : > { %v1960_v8 = vpop.f32.mrf.mxu0  ;;  %v2001_v40 = vpop.f32.mrf.mxu1  ;;  %v6003_v20 = vld [vmem:[%s9307_s4 + $0x28] ss:$16 sps:$4 sm:$0xff]   ;;  %v6011_v30 = vld [vmem:[%s9307_s4 + $0xc] ss:$16 sps:$4 sm:$0xff]  }
 0x6e4   : > { %6216 = vtanh.f32 %v2008_v53  ;;  %v2012_v25 = vmul.f32 0.5, %v2005_v35  ;;  %v2017_v5 = vmul.f32 0.5, %v2007_v4  ;;  %v6008_v53 = vld [vmem:[%s9307_s4 + $0x4] ss:$16 sps:$4 sm:$0xff]   ;;  %v6006_v35 = vld [vmem:[%s9307_s4] ss:$16 sps:$4 sm:$0xff]   ;;  %v2150_v40 = vpack.c.bf16 %v7278_v13, %v7230_v18 }
 0x6e5   : > { %v1961_v33 = vpop.f32.mrf.mxu0  ;;  %v2002_v2 = vpop.f32.mrf.mxu1  ;;  %v6009_v8 = vld [vmem:[%s9307_s4 + $0x8] ss:$16 sps:$4 sm:$0xff]   ;;  %v7787_v18 = vld [vmem:[%s9308_s5 + $0xe4] ss:$16 sps:$4 sm:$0xff]   ;;  %v7792_v13 = vld [vmem:[%s9308_s5 + $0xec] ss:$16 sps:$4 sm:$0xff]  }
 0x6e6   : > { %6218 = vtanh.f32 %v2012_v25  ;;  %v7821_v25 = vld [vmem:[%s9308_s5 + $0xc0] ss:$16 sps:$4 sm:$0xff]   ;;  %v7826_v33 = vld [vmem:[%s9308_s5 + $0xc8] ss:$16 sps:$4 sm:$0xff]   ;;  %v7835_v2 = vld [vmem:[%s9308_s5 + $0xa4] ss:$16 sps:$4 sm:$0xff]  }
 0x6e7   : > { %6220 = vtanh.f32 %v2006_v19  ;;  %v2152_v19 = vpack.c.bf16 %v7626_v41, %v7568_v27  ;;  %v7811_v27 = vld [vmem:[%s9308_s5 + $0xc4] ss:$16 sps:$4 sm:$0xff]   ;;  %v7816_v41 = vld [vmem:[%s9308_s5 + $0xcc] ss:$16 sps:$4 sm:$0xff]   ;;  %v7845_v4 = vld [vmem:[%s9308_s5 + $0xa0] ss:$16 sps:$4 sm:$0xff]  }
 0x6e8   : > { %6222 = vtanh.f32 %v2017_v5  ;;  %v7840_v3 = vld [vmem:[%s9308_s5 + $0xac] ss:$16 sps:$4 sm:$0xff]   ;;  %v7850_v5 = vld [vmem:[%s9308_s5 + $0xa8] ss:$16 sps:$4 sm:$0xff]  }
 0x6f1   : > { %v6217_v6 = vpop.eup %6216 }
 0x6f2   : > { %v2010_v9 = vmul.f32 0.5, %v6217_v6  ;;  %v7859_v6 = vld [vmem:[%s9308_s5 + $0x84] ss:$16 sps:$4 sm:$0xff]  }
 0x6f3   : > { %v6219_v10 = vpop.eup %6218 }
 0x6f4   : > { %v2011_v11 = vadd.f32 0.5, %v2010_v9  ;;  %v2014_v12 = vmul.f32 0.5, %v6219_v10  ;;  %v6221_v14 = vpop.eup %6220  ;;  %v7864_v9 = vld [vmem:[%s9308_s5 + $0x8c] ss:$16 sps:$4 sm:$0xff]   ;;  %v7869_v10 = vld [vmem:[%s9308_s5 + $0x80] ss:$16 sps:$4 sm:$0xff]  }
 0x6f5   : > { %v6223_v49 = vpop.eup %6222 }
 0x6f6   : > { %v2015_v15 = vadd.f32 0.5, %v2014_v12  ;;  %v2022_v17 = vmul.f32 %v6221_v14, %v2011_v11  ;;  %v2019_v7 = vmul.f32 0.5, %v6223_v49  ;;  %v7874_v11 = vld [vmem:[%s9308_s5 + $0x88] ss:$16 sps:$4 sm:$0xff]   ;;  %v7883_v12 = vld [vmem:[%s9308_s5 + $0x64] ss:$16 sps:$4 sm:$0xff]  }
 0x6f7   : > { %v7888_v14 = vld [vmem:[%s9308_s5 + $0x6c] ss:$16 sps:$4 sm:$0xff]  }
 0x6f8   : > { %v2021_v51 = vmul.f32 %v2015_v15, %v7623_v44  ;;  %v2020_v43 = vadd.f32 0.5, %v2019_v7  ;;  %v5982_v44 = vld [vmem:[%s9307_s4 + $0x80] ss:$16 sps:$4 sm:$0xff]   ;;  %v7912_v49 = vld [vmem:[%s9308_s5 + $0x4c] ss:$16 sps:$4 sm:$0xff]  }
 0x6f9   : > { %v7893_v15 = vld [vmem:[%s9308_s5 + $0x60] ss:$16 sps:$4 sm:$0xff]  }
 0x6fa   : > { %v7673_v57 = vadd.f32 %v2022_v17, %v2021_v51  ;;  %v7898_v17 = vld [vmem:[%s9308_s5 + $0x68] ss:$16 sps:$4 sm:$0xff]   ;;  %v7907_v51 = vld [vmem:[%s9308_s5 + $0x44] ss:$16 sps:$4 sm:$0xff]   ;;  %v7917_v7 = vld [vmem:[%s9308_s5 + $0x40] ss:$16 sps:$4 sm:$0xff]  }
 0x6fc   : > { %6224 = vtanh.f32 %v7673_v57 }
 0x709   : > { %v6225_v63 = vpop.eup %6224 }
 0x70a   : > { %v7676_v31 = vmul.f32 %v6225_v63, %v2020_v43  ;;  %v7922_v43 = vld [vmem:[%s9308_s5 + $0x48] ss:$16 sps:$4 sm:$0xff]   ;;  %v7931_v63 = vld [vmem:[%s9308_s5 + $0x24] ss:$16 sps:$4 sm:$0xff]  }
 0x70c   : > { %v2033_v21 = vpack.c.bf16 %v7676_v31, %v7676_v31 }
 0x70e   : > { %2067 = vmatmul.mubr.bf16.vlgmr.msra.gmra.mxu0 %v2033_v21  ;;  %2108 = vmatmul.mubr.bf16.vlgmr.msra.gmra.mxu1 %v2033_v21  ;;  %v7946_v21 = vld [vmem:[%s9308_s5 + $0x28] ss:$16 sps:$4 sm:$0xff]  }
 0x70f   : > { %2369 = vmatpush1.bf16.msra.mxu0 %v5964_v1  ;;  %2442 = vmatpush1.bf16.msra.mxu1 %v5967_v16  ;;  %v7936_v1 = vld [vmem:[%s9308_s5 + $0x2c] ss:$16 sps:$4 sm:$0xff]   ;;  %v7941_v16 = vld [vmem:[%s9308_s5 + $0x20] ss:$16 sps:$4 sm:$0xff]  }
 0x710   : > { %2370 = vmatprep.subr.bf16.mxu0 %v5972_v22  ;;  %2443 = vmatprep.subr.bf16.mxu1 %v5975_v23  ;;  %v7955_v22 = vld [vmem:[%s9308_s5 + $0x4] ss:$16 sps:$4 sm:$0xff]   ;;  %v7960_v23 = vld [vmem:[%s9308_s5 + $0xc] ss:$16 sps:$4 sm:$0xff]  }
 0x711   : > { %2400 = vmatprep.mubr.bf16.mxu0 %v9369_v34  ;;  %2473 = vmatprep.mubr.bf16.mxu1 %v9369_v34 }
 0x713   : > { %2371 = vmatpush1.bf16.msra.mxu0 %v5970_v26  ;;  %2444 = vmatpush1.bf16.msra.mxu1 %v5973_v24  ;;  %v7965_v26 = vld [vmem:[%s9308_s5] ss:$16 sps:$4 sm:$0xff]   ;;  %v7970_v24 = vld [vmem:[%s9308_s5 + $0x8] ss:$16 sps:$4 sm:$0xff]  }
 0x714   : > { %2372 = vmatprep.subr.bf16.mxu0 %v5978_v56  ;;  %2445 = vmatprep.subr.bf16.mxu1 %v5981_v58 }
 0x717   : > { %2373 = vmatpush1.bf16.msra.mxu0 %v5976_v28  ;;  %2446 = vmatpush1.bf16.msra.mxu1 %v5979_v62  ;;  %v9386_v28 = vld [vmem:[#allocation35_spill] sm:$0xff] }
 0x718   : > { %2374 = vmatprep.subr.bf16.mxu0 %v5984_v29  ;;  %2447 = vmatprep.subr.bf16.mxu1 %v5987_v59  ;;  %v945_v62 = vadd.f32 %v9386_v28, %v7154_v61  ;;  %v9387_v29 = vld [vmem:[#allocation33_spill] sm:$0xff] }
 0x71b   : > { %2375 = vmatpush1.bf16.msra.mxu0 %v5982_v44  ;;  %2448 = vmatpush1.bf16.msra.mxu1 %v5985_v39 }
 0x71c   : > { %2376 = vmatprep.subr.bf16.mxu0 %v5990_v32  ;;  %2449 = vmatprep.subr.bf16.mxu1 %v5993_v60 }
 0x71f   : > { %2377 = vmatpush1.bf16.msra.mxu0 %v5988_v45  ;;  %2450 = vmatpush1.bf16.msra.mxu1 %v5991_v52 }
 0x720   : > { %2378 = vmatprep.subr.bf16.mxu0 %v5996_v36  ;;  %2451 = vmatprep.subr.bf16.mxu1 %v5999_v37  ;;  %v9388_v36 = vld [vmem:[#allocation34_spill] sm:$0xff] }
 0x723   : > { %2379 = vmatpush1.bf16.msra.mxu0 %v5994_v50  ;;  %2452 = vmatpush1.bf16.msra.mxu1 %v5997_v46 }
 0x724   : > { %2380 = vmatprep.subr.bf16.mxu0 %v6002_v38  ;;  %2453 = vmatprep.subr.bf16.mxu1 %v6005_v54  ;;  %v9389_v54 = vld [vmem:[#allocation36_spill] sm:$0xff] }
 0x727   : > { %2381 = vmatpush1.bf16.msra.mxu0 %v6000_v55  ;;  %2454 = vmatpush1.bf16.msra.mxu1 %v6003_v20  ;;  %v1018_v55 = vadd.f32 %v9389_v54, %v7157_v0 }
 0x728   : > { %2382 = vmatprep.subr.bf16.mxu0 %v6008_v53  ;;  %2455 = vmatprep.subr.bf16.mxu1 %v6011_v30 }
 0x72b   : > { %2383 = vmatpush1.bf16.msra.mxu0 %v6006_v35  ;;  %2456 = vmatpush1.bf16.msra.mxu1 %v6009_v8 }
 0x72c   : > { %2747 = vmatprep.subr.bf16.mxu0 %v7787_v18  ;;  %2788 = vmatprep.subr.bf16.mxu1 %v7792_v13 }
 0x72e   : > { %2401 = vmatmul.mubr.bf16.vlgmr.msra.gmra.mxu0 %v2150_v40  ;;  %2474 = vmatmul.mubr.bf16.vlgmr.msra.gmra.mxu1 %v2150_v40 }
 0x72f   : > { %2410 = vmatprep.mubr.bf16.mxu0 %v9369_v34  ;;  %2483 = vmatprep.mubr.bf16.mxu1 %v9369_v34 }
 0x730   : > { %2748 = vmatpush1.bf16.msra.mxu0 %v7797_v48  ;;  %2789 = vmatpush1.bf16.msra.mxu1 %v7802_v47 }
 0x731   : > { %2749 = vmatprep.subr.bf16.mxu0 %v7811_v27  ;;  %2790 = vmatprep.subr.bf16.mxu1 %v7816_v41 }
 0x734   : > { %2750 = vmatpush1.bf16.msra.mxu0 %v7821_v25  ;;  %2791 = vmatpush1.bf16.msra.mxu1 %v7826_v33 }
 0x735   : > { %2751 = vmatprep.subr.bf16.mxu0 %v7835_v2  ;;  %2792 = vmatprep.subr.bf16.mxu1 %v7840_v3 }
 0x736   : > { %2411 = vmatmul.mubr.bf16.gmra.mxu0 %v2151_v42  ;;  %2484 = vmatmul.mubr.bf16.gmra.mxu1 %v2151_v42 }
 0x737   : > { %2420 = vmatprep.mubr.bf16.mxu0 %v9369_v34  ;;  %2493 = vmatprep.mubr.bf16.mxu1 %v9369_v34 }
 0x738   : > { %2752 = vmatpush1.bf16.msra.mxu0 %v7845_v4  ;;  %2793 = vmatpush1.bf16.msra.mxu1 %v7850_v5 }
 0x739   : > { %2753 = vmatprep.subr.bf16.mxu0 %v7859_v6  ;;  %2794 = vmatprep.subr.bf16.mxu1 %v7864_v9 }
 0x73c   : > { %2754 = vmatpush1.bf16.msra.mxu0 %v7869_v10  ;;  %2795 = vmatpush1.bf16.msra.mxu1 %v7874_v11 }
 0x73d   : > { %2755 = vmatprep.subr.bf16.mxu0 %v7883_v12  ;;  %2796 = vmatprep.subr.bf16.mxu1 %v7888_v14 }
 0x73e   : > { %2421 = vmatmul.mubr.bf16.gmra.mxu0 %v2152_v19  ;;  %2494 = vmatmul.mubr.bf16.gmra.mxu1 %v2152_v19 }
 0x73f   : > { %2430 = vmatprep.mubr.bf16.mxu0 %v9369_v34  ;;  %2503 = vmatprep.mubr.bf16.mxu1 %v9369_v34 }
 0x740   : > { %2756 = vmatpush1.bf16.msra.mxu0 %v7893_v15  ;;  %2797 = vmatpush1.bf16.msra.mxu1 %v7898_v17 }
 0x741   : > { %2757 = vmatprep.subr.bf16.mxu0 %v7907_v51  ;;  %2798 = vmatprep.subr.bf16.mxu1 %v7912_v49 }
 0x744   : > { %2758 = vmatpush1.bf16.msra.mxu0 %v7917_v7  ;;  %2799 = vmatpush1.bf16.msra.mxu1 %v7922_v43 }
 0x745   : > { %2759 = vmatprep.subr.bf16.mxu0 %v7931_v63  ;;  %2800 = vmatprep.subr.bf16.mxu1 %v7936_v1 }
 0x748   : > { %2760 = vmatpush1.bf16.msra.mxu0 %v7941_v16  ;;  %2801 = vmatpush1.bf16.msra.mxu1 %v7946_v21 }
 0x749   : > { %2761 = vmatprep.subr.bf16.mxu0 %v7955_v22  ;;  %2802 = vmatprep.subr.bf16.mxu1 %v7960_v23 }
 0x74c   : > { %2762 = vmatpush1.bf16.msra.mxu0 %v7965_v26  ;;  %2803 = vmatpush1.bf16.msra.mxu1 %v7970_v24 }
 0x74d   : > { %2857 = vmatprep.subr.bf16.mxu0 %v7787_v18  ;;  %2898 = vmatprep.subr.bf16.mxu1 %v7792_v13 }
 0x7ce   : > { %v2068_v56 = vpop.f32.mrf.mxu0  ;;  %v2109_v58 = vpop.f32.mrf.mxu1 }
 0x7cf   : > { %v2116_v59 = vadd.f32 %v2068_v56, %v9387_v29  ;;  %v2118_v37 = vadd.f32 %v2109_v58, %v9388_v36 }
 0x7d0   : > { %v2070_v44 = vpop.f32.mrf.mxu0  ;;  %v2111_v39 = vpop.f32.mrf.mxu1 }
 0x7d1   : > { %v2120_v32 = vmul.f32 0.5, %v2116_v59  ;;  %v2117_v60 = vadd.f32 %v2070_v44, %v945_v62  ;;  %v2119_v61 = vadd.f32 %v2111_v39, %v1018_v55 }
 0x7d2   : > { %v2072_v45 = vpop.f32.mrf.mxu0  ;;  %v2113_v52 = vpop.f32.mrf.mxu1 }
 0x7d3   : > { %6226 = vtanh.f32 %v2120_v32  ;;  %v2124_v50 = vmul.f32 0.5, %v2117_v60  ;;  %v2129_v20 = vmul.f32 0.5, %v2119_v61 }
 0x7d4   : > { %v2073_v46 = vpop.f32.mrf.mxu0  ;;  %v2114_v38 = vpop.f32.mrf.mxu1 }
 0x7d5   : > { %6228 = vtanh.f32 %v2124_v50 }
 0x7d6   : > { %6230 = vtanh.f32 %v2118_v37 }
 0x7d7   : > { %6232 = vtanh.f32 %v2129_v20 }
 0x7e0   : > { %v6227_v53 = vpop.eup %6226 }
 0x7e1   : > { %v2122_v30 = vmul.f32 0.5, %v6227_v53 }
 0x7e2   : > { %v6229_v35 = vpop.eup %6228 }
 0x7e3   : > { %v2123_v8 = vadd.f32 0.5, %v2122_v30  ;;  %v2126_v40 = vmul.f32 0.5, %v6229_v35  ;;  %v6231_v42 = vpop.eup %6230 }
 0x7e4   : > { %v6233_v0 = vpop.eup %6232 }
 0x7e5   : > { %v2127_v19 = vadd.f32 0.5, %v2126_v40  ;;  %v2134_v56 = vmul.f32 %v6231_v42, %v2123_v8  ;;  %v2131_v62 = vmul.f32 0.5, %v6233_v0 }
 0x7e7   : > { %v2133_v58 = vmul.f32 %v2127_v19, %v7673_v57  ;;  %v2132_v29 = vadd.f32 0.5, %v2131_v62  ;;  %v5643_v57 = vld [vmem:[%s9313_s10 + $0x8] sm:$0xff]  ;;  %v2186_v62 = vld [vmem:[%s9309_s6] sm:$0xf] }
 0x7e8   : > { %v2586_v32 = vpack.c.bf16 %v5643_v57, %v5643_v57  ;;  %v9408_v57 = vld [vmem:[#allocation14_spill] sm:$0xff] }
 0x7e9   : > { %v2135_v28 = vadd.f32 %v2134_v56, %v2133_v58 }
 0x7eb   : > { %6234 = vtanh.f32 %v2135_v28  ;;  %2141 = vst [vmem:[%s9319_s16] sm:$0xff] %v2135_v28 }
 0x7ee   : > { %v2475_v60 = vpop.f32.mrf.mxu1 }
 0x7f0   : > { %v2477_v52 = vpop.f32.mrf.mxu1 }
 0x7f2   : > { %v8033_v37 = vpop.f32.mrf.mxu1 }
 0x7f4   : > { %v8037_v46 = vpop.f32.mrf.mxu1 }
 0x7f6   : > { %v8041_v54 = vpop.f32.mrf.mxu1 }
 0x7f7   : > { %9390 = vst [vmem:[#allocation19_spill] sm:$0xff] %v8041_v54 }
 0x7f8   : > { %v6235_v59 = vpop.eup %6234  ;;  %v8045_v61 = vpop.f32.mrf.mxu1 }
 0x7f9   : > { %v2137_v44 = vmul.f32 %v6235_v59, %v2132_v29  ;;  %9391 = vst [vmem:[#allocation17_spill] sm:$0xff] %v8045_v61  ;;  %v9415_v61 = vld [vmem:[#allocation16_spill] sm:$0xff] }
 0x7fa   : > { %v8049_v53 = vpop.f32.mrf.mxu1  ;;  %v8103_v54 = vrot.slane %v2186_v62, %v9415_v61 }
 0x7fb   : > { %2140 = vst [vmem:[%s9318_s15] sm:$0xff] %v2137_v44  ;;  %v2153_v39 = vpack.c.bf16 %v2137_v44, %v7676_v31  ;;  %v2402_v31 = vpop.f32.mrf.mxu0  ;;  %9393 = vst [vmem:[#allocation20_spill] sm:$0xff] %v8049_v53 }
 0x7fc   : > { %v8053_v35 = vpop.f32.mrf.mxu1 }
 0x7fd   : > { %2431 = vmatmul.mubr.bf16.gmra.mxu0 %v2153_v39  ;;  %2504 = vmatmul.mubr.bf16.gmra.mxu1 %v2153_v39  ;;  %v2404_v45 = vpop.f32.mrf.mxu0  ;;  %9395 = vst [vmem:[#allocation23_spill] sm:$0xff] %v8053_v35 }
 0x7fe   : > { %2779 = vmatprep.mubr.bf16.mxu0 %v9369_v34  ;;  %2820 = vmatprep.mubr.bf16.mxu1 %v9369_v34  ;;  %v8057_v40 = vpop.f32.mrf.mxu1 }
 0x7ff   : > { %v8031_v36 = vpop.f32.mrf.mxu0  ;;  %9397 = vst [vmem:[#allocation24_spill] sm:$0xff] %v8057_v40 }
 0x800   : > { %v8061_v19 = vpop.f32.mrf.mxu1 }
 0x801   : > { %v8035_v50 = vpop.f32.mrf.mxu0  ;;  %9399 = vst [vmem:[#allocation25_spill] sm:$0xff] %v8061_v19 }
 0x802   : > { %v8065_v58 = vpop.f32.mrf.mxu1 }
 0x803   : > { %v8039_v38 = vpop.f32.mrf.mxu0  ;;  %9401 = vst [vmem:[#allocation28_spill] sm:$0xff] %v8065_v58 }
 0x804   : > { %v8069_v0 = vpop.f32.mrf.mxu1 }
 0x805   : > { %2780 = vmatmul.mubr.bf16.vlgmr.msra.gmra.mxu0 %v2586_v32  ;;  %2821 = vmatmul.mubr.bf16.vlgmr.msra.gmra.mxu1 %v2586_v32  ;;  %v8043_v55 = vpop.f32.mrf.mxu0  ;;  %9403 = vst [vmem:[#allocation31_spill] sm:$0xff] %v8069_v0  ;;  %v8083_v32 = vrot.slane %v2186_v62, %v9408_v57  ;;  %v9411_v0 = vld [vmem:[#allocation15_spill] sm:$0xff] }
 0x806   : > { %2858 = vmatpush1.bf16.msra.mxu0 %v7797_v48  ;;  %2899 = vmatpush1.bf16.msra.mxu1 %v7802_v47 }
 0x807   : > { %2859 = vmatprep.subr.bf16.mxu0 %v7811_v27  ;;  %2900 = vmatprep.subr.bf16.mxu1 %v7816_v41  ;;  %v8047_v20 = vpop.f32.mrf.mxu0 }
 0x808   : > { %2889 = vmatprep.mubr.bf16.mxu0 %v9369_v34  ;;  %2930 = vmatprep.mubr.bf16.mxu1 %v9369_v34  ;;  %9392 = vst [vmem:[#allocation18_spill] sm:$0xff] %v8047_v20 }
 0x809   : > { %v8051_v30 = vpop.f32.mrf.mxu0 }
 0x80a   : > { %2860 = vmatpush1.bf16.msra.mxu0 %v7821_v25  ;;  %2901 = vmatpush1.bf16.msra.mxu1 %v7826_v33  ;;  %9394 = vst [vmem:[#allocation21_spill] sm:$0xff] %v8051_v30 }
 0x80b   : > { %2861 = vmatprep.subr.bf16.mxu0 %v7835_v2  ;;  %2902 = vmatprep.subr.bf16.mxu1 %v7840_v3  ;;  %v8055_v8 = vpop.f32.mrf.mxu0 }
 0x80c   : > { %9396 = vst [vmem:[#allocation22_spill] sm:$0xff] %v8055_v8 }
 0x80d   : > { %v8059_v42 = vpop.f32.mrf.mxu0 }
 0x80e   : > { %2862 = vmatpush1.bf16.msra.mxu0 %v7845_v4  ;;  %2903 = vmatpush1.bf16.msra.mxu1 %v7850_v5  ;;  %9398 = vst [vmem:[#allocation27_spill] sm:$0xff] %v8059_v42  ;;  %v9414_v42 = vld [vmem:[#allocation13_spill] sm:$0xff] }
 0x80f   : > { %2863 = vmatprep.subr.bf16.mxu0 %v7859_v6  ;;  %2904 = vmatprep.subr.bf16.mxu1 %v7864_v9  ;;  %v8063_v56 = vpop.f32.mrf.mxu0 }
 0x810   : > { %9400 = vst [vmem:[#allocation26_spill] sm:$0xff] %v8063_v56  ;;  %v8090_v56 = vrot.slane %v2186_v62, %v9411_v0 }
 0x811   : > { %v8067_v28 = vpop.f32.mrf.mxu0 }
 0x812   : > { %2864 = vmatpush1.bf16.msra.mxu0 %v7869_v10  ;;  %2905 = vmatpush1.bf16.msra.mxu1 %v7874_v11  ;;  %9402 = vst [vmem:[#allocation29_spill] sm:$0xff] %v8067_v28  ;;  %v2405_v57 = vadd.f32 %v2404_v45, %v8090_v56  ;;  %v2478_v45 = vadd.f32 %v2477_v52, %v8103_v54 }
 0x813   : > { %2865 = vmatprep.subr.bf16.mxu0 %v7883_v12  ;;  %2906 = vmatprep.subr.bf16.mxu1 %v7888_v14 }
 0x816   : > { %2866 = vmatpush1.bf16.msra.mxu0 %v7893_v15  ;;  %2907 = vmatpush1.bf16.msra.mxu1 %v7898_v17 }
 0x817   : > { %2867 = vmatprep.subr.bf16.mxu0 %v7907_v51  ;;  %2908 = vmatprep.subr.bf16.mxu1 %v7912_v49 }
 0x81a   : > { %2868 = vmatpush1.bf16.msra.mxu0 %v7917_v7  ;;  %2909 = vmatpush1.bf16.msra.mxu1 %v7922_v43 }
 0x81b   : > { %2869 = vmatprep.subr.bf16.mxu0 %v7931_v63  ;;  %2910 = vmatprep.subr.bf16.mxu1 %v7936_v1 }
 0x81e   : > { %2870 = vmatpush1.bf16.msra.mxu0 %v7941_v16  ;;  %2911 = vmatpush1.bf16.msra.mxu1 %v7946_v21 }
 0x81f   : > { %2871 = vmatprep.subr.bf16.mxu0 %v7955_v22  ;;  %2912 = vmatprep.subr.bf16.mxu1 %v7960_v23 }
 0x822   : > { %2872 = vmatpush1.bf16.msra.mxu0 %v7965_v26  ;;  %2913 = vmatpush1.bf16.msra.mxu1 %v7970_v24 }
 0x823   : > { %2967 = vmatprep.subr.bf16.mxu0 %v7787_v18  ;;  %3008 = vmatprep.subr.bf16.mxu1 %v7792_v13 }
 0x8bd   : > { %v8074_v29 = vpop.f32.mrf.mxu0  ;;  %v8076_v59 = vpop.f32.mrf.mxu1 }
 0x8be   : > { %9404 = vst [vmem:[#allocation30_spill] sm:$0xff] %v8074_v29  ;;  %9405 = vst [vmem:[#allocation32_spill] sm:$0xff] %v8076_v59  ;;  %v2403_v59 = vadd.f32 %v2402_v31, %v8083_v32 }
 0x8bf   : > { %v8078_v44 = vpop.f32.mrf.mxu0  ;;  %v8080_v39 = vpop.f32.mrf.mxu1 }
 0x8c0   : > { %9406 = vst [vmem:[#allocation35_spill] sm:$0xff] %v8078_v44  ;;  %9407 = vst [vmem:[#allocation33_spill] sm:$0xff] %v8080_v39  ;;  %v8098_v39 = vrot.slane %v2186_v62, %v9414_v42 }
 0x8c1   : > { %v8085_v58 = vpop.f32.mrf.mxu0  ;;  %v8087_v28 = vpop.f32.mrf.mxu1 }
 0x8c2   : > { %9409 = vst [vmem:[#allocation34_spill] sm:$0xff] %v8085_v58  ;;  %9410 = vst [vmem:[#allocation36_spill] sm:$0xff] %v8087_v28 }
 0x8c3   : > { %v8092_v19 = vpop.f32.mrf.mxu0  ;;  %v8094_v40 = vpop.f32.mrf.mxu1 }
 0x8c4   : > { %9412 = vst [vmem:[#allocation37_spill] sm:$0xff] %v8092_v19  ;;  %9413 = vst [vmem:[#allocation38_spill] sm:$0xff] %v8094_v40  ;;  %v2476_v19 = vadd.f32 %v2475_v60, %v8098_v39  ;;  %v5644_v60 = vld [vmem:[%s9314_s11 + $0x8] sm:$0xff] }
 0x8c5   : > { %v2781_v29 = vpop.f32.mrf.mxu0  ;;  %v2822_v44 = vpop.f32.mrf.mxu1 }
 0x8c6   : > { %v2829_v8 = vadd.f32 %v2781_v29, %v2403_v59  ;;  %v2831_v42 = vadd.f32 %v2822_v44, %v2476_v19 }
 0x8c7   : > { %v2783_v58 = vpop.f32.mrf.mxu0  ;;  %v2824_v35 = vpop.f32.mrf.mxu1 }
 0x8c8   : > { %v2833_v28 = vmul.f32 0.5, %v2829_v8  ;;  %v2830_v53 = vadd.f32 %v2783_v58, %v2405_v57  ;;  %v2832_v29 = vadd.f32 %v2824_v35, %v2478_v45  ;;  %v2407_v45 = vadd.f32 %v8031_v36, %v8083_v32 }
 0x8c9   : > { %v2785_v0 = vpop.f32.mrf.mxu0  ;;  %v2826_v30 = vpop.f32.mrf.mxu1 }
 0x8ca   : > { %6236 = vtanh.f32 %v2833_v28  ;;  %v2837_v40 = vmul.f32 0.5, %v2830_v53  ;;  %v2842_v59 = vmul.f32 0.5, %v2832_v29 }
 0x8cb   : > { %v2786_v20 = vpop.f32.mrf.mxu0  ;;  %v2827_v31 = vpop.f32.mrf.mxu1 }
 0x8cc   : > { %6238 = vtanh.f32 %v2837_v40 }
 0x8cd   : > { %6240 = vtanh.f32 %v2831_v42 }
 0x8ce   : > { %6242 = vtanh.f32 %v2842_v59 }
 0x8d7   : > { %v6237_v8 = vpop.eup %6236 }
 0x8d8   : > { %v2835_v58 = vmul.f32 0.5, %v6237_v8  ;;  %v2409_v8 = vadd.f32 %v8035_v50, %v8090_v56  ;;  %v2482_v50 = vadd.f32 %v8037_v46, %v8103_v54 }
 0x8d9   : > { %v6239_v0 = vpop.eup %6238 }
 0x8da   : > { %v2836_v30 = vadd.f32 0.5, %v2835_v58  ;;  %v2839_v57 = vmul.f32 0.5, %v6239_v0  ;;  %v6241_v53 = vpop.eup %6240 }
 0x8db   : > { %v6243_v52 = vpop.eup %6242 }
 0x8dc   : > { %v2840_v20 = vadd.f32 0.5, %v2839_v57  ;;  %v2847_v19 = vmul.f32 %v6241_v53, %v2836_v30  ;;  %v2844_v35 = vmul.f32 0.5, %v6243_v52  ;;  %v2480_v57 = vadd.f32 %v8033_v37, %v8098_v39 }
 0x8de   : > { %v2846_v28 = vmul.f32 %v5644_v60, %v2840_v20  ;;  %v2845_v42 = vadd.f32 0.5, %v2844_v35 }
 0x8e0   : > { %v8109_v40 = vadd.f32 %v2847_v19, %v2846_v28 }
 0x8e2   : > { %6244 = vtanh.f32 %v8109_v40 }
 0x8ef   : > { %v6245_v62 = vpop.eup %6244 }
 0x8f0   : > { %v8112_v44 = vmul.f32 %v6245_v62, %v2845_v42 }
 0x8f2   : > { %v2856_v31 = vpack.c.bf16 %v8112_v44, %v8112_v44 }
 0x8f4   : > { %2890 = vmatmul.mubr.bf16.vlgmr.msra.gmra.mxu0 %v2856_v31  ;;  %2931 = vmatmul.mubr.bf16.vlgmr.msra.gmra.mxu1 %v2856_v31 }
 0x8f5   : > { %2968 = vmatpush1.bf16.msra.mxu0 %v7797_v48  ;;  %3009 = vmatpush1.bf16.msra.mxu1 %v7802_v47 }
 0x8f6   : > { %2969 = vmatprep.subr.bf16.mxu0 %v7811_v27  ;;  %3010 = vmatprep.subr.bf16.mxu1 %v7816_v41 }
 0x8f7   : > { %2999 = vmatprep.mubr.bf16.mxu0 %v9369_v34  ;;  %3040 = vmatprep.mubr.bf16.mxu1 %v9369_v34 }
 0x8f9   : > { %2970 = vmatpush1.bf16.msra.mxu0 %v7821_v25  ;;  %3011 = vmatpush1.bf16.msra.mxu1 %v7826_v33 }
 0x8fa   : > { %2971 = vmatprep.subr.bf16.mxu0 %v7835_v2  ;;  %3012 = vmatprep.subr.bf16.mxu1 %v7840_v3 }
 0x8fd   : > { %2972 = vmatpush1.bf16.msra.mxu0 %v7845_v4  ;;  %3013 = vmatpush1.bf16.msra.mxu1 %v7850_v5 }
 0x8fe   : > { %2973 = vmatprep.subr.bf16.mxu0 %v7859_v6  ;;  %3014 = vmatprep.subr.bf16.mxu1 %v7864_v9 }
 0x901   : > { %2974 = vmatpush1.bf16.msra.mxu0 %v7869_v10  ;;  %3015 = vmatpush1.bf16.msra.mxu1 %v7874_v11 }
 0x902   : > { %2975 = vmatprep.subr.bf16.mxu0 %v7883_v12  ;;  %3016 = vmatprep.subr.bf16.mxu1 %v7888_v14 }
 0x905   : > { %2976 = vmatpush1.bf16.msra.mxu0 %v7893_v15  ;;  %3017 = vmatpush1.bf16.msra.mxu1 %v7898_v17 }
 0x906   : > { %2977 = vmatprep.subr.bf16.mxu0 %v7907_v51  ;;  %3018 = vmatprep.subr.bf16.mxu1 %v7912_v49 }
 0x909   : > { %2978 = vmatpush1.bf16.msra.mxu0 %v7917_v7  ;;  %3019 = vmatpush1.bf16.msra.mxu1 %v7922_v43 }
 0x90a   : > { %2979 = vmatprep.subr.bf16.mxu0 %v7931_v63  ;;  %3020 = vmatprep.subr.bf16.mxu1 %v7936_v1 }
 0x90d   : > { %2980 = vmatpush1.bf16.msra.mxu0 %v7941_v16  ;;  %3021 = vmatpush1.bf16.msra.mxu1 %v7946_v21 }
 0x90e   : > { %2981 = vmatprep.subr.bf16.mxu0 %v7955_v22  ;;  %3022 = vmatprep.subr.bf16.mxu1 %v7960_v23 }
 0x911   : > { %2982 = vmatpush1.bf16.msra.mxu0 %v7965_v26  ;;  %3023 = vmatpush1.bf16.msra.mxu1 %v7970_v24 }
 0x912   : > { %3077 = vmatprep.subr.bf16.mxu0 %v7787_v18  ;;  %3118 = vmatprep.subr.bf16.mxu1 %v7792_v13 }
 0x9b4   : > { %v2891_v29 = vpop.f32.mrf.mxu0  ;;  %v2932_v59 = vpop.f32.mrf.mxu1 }
 0x9b5   : > { %v2939_v58 = vadd.f32 %v2891_v29, %v2407_v45  ;;  %v2941_v19 = vadd.f32 %v2932_v59, %v2480_v57 }
 0x9b6   : > { %v2893_v0 = vpop.f32.mrf.mxu0  ;;  %v2934_v30 = vpop.f32.mrf.mxu1 }
 0x9b7   : > { %v2943_v60 = vmul.f32 0.5, %v2939_v58  ;;  %v2940_v20 = vadd.f32 %v2893_v0, %v2409_v8  ;;  %v2942_v42 = vadd.f32 %v2934_v30, %v2482_v50 }
 0x9b8   : > { %v2895_v53 = vpop.f32.mrf.mxu0  ;;  %v2936_v28 = vpop.f32.mrf.mxu1 }
 0x9b9   : > { %6246 = vtanh.f32 %v2943_v60  ;;  %v2947_v52 = vmul.f32 0.5, %v2940_v20  ;;  %v2952_v62 = vmul.f32 0.5, %v2942_v42 }
 0x9ba   : > { %v2896_v35 = vpop.f32.mrf.mxu0  ;;  %v2937_v36 = vpop.f32.mrf.mxu1 }
 0x9bb   : > { %6248 = vtanh.f32 %v2947_v52  ;;  %v2415_v36 = vadd.f32 %v8043_v55, %v8090_v56 }
 0x9bc   : > { %6250 = vtanh.f32 %v2941_v19 }
 0x9bd   : > { %6252 = vtanh.f32 %v2952_v62 }
 0x9c6   : > { %v6247_v31 = vpop.eup %6246 }
 0x9c7   : > { %v2945_v45 = vmul.f32 0.5, %v6247_v31  ;;  %v9416_v31 = vld [vmem:[#allocation19_spill] sm:$0xff] }
 0x9c8   : > { %v6249_v29 = vpop.eup %6248 }
 0x9c9   : > { %v2946_v37 = vadd.f32 0.5, %v2945_v45  ;;  %v2949_v58 = vmul.f32 0.5, %v6249_v29  ;;  %v6251_v8 = vpop.eup %6250  ;;  %v2486_v45 = vadd.f32 %v9416_v31, %v8098_v39 }
 0x9ca   : > { %v6253_v20 = vpop.eup %6252 }
 0x9cb   : > { %v2950_v0 = vadd.f32 0.5, %v2949_v58  ;;  %v2957_v60 = vmul.f32 %v6251_v8, %v2946_v37  ;;  %v2954_v53 = vmul.f32 0.5, %v6253_v20  ;;  %v9417_v20 = vld [vmem:[#allocation17_spill] sm:$0xff] }
 0x9cc   : > { %v2488_v55 = vadd.f32 %v9417_v20, %v8103_v54  ;;  %v9419_v20 = vld [vmem:[#allocation21_spill] sm:$0xff] }
 0x9cd   : > { %v2956_v59 = vmul.f32 %v2950_v0, %v8109_v40  ;;  %v2955_v46 = vadd.f32 0.5, %v2954_v53  ;;  %v2413_v40 = vadd.f32 %v8039_v38, %v8083_v32 }
 0x9cf   : > { %v8159_v57 = vadd.f32 %v2957_v60, %v2956_v59 }
 0x9d1   : > { %6254 = vtanh.f32 %v8159_v57 }
 0x9de   : > { %v6255_v30 = vpop.eup %6254 }
 0x9df   : > { %v8162_v28 = vmul.f32 %v6255_v30, %v2955_v46 }
 0x9e1   : > { %v2966_v19 = vpack.c.bf16 %v8162_v28, %v8162_v28 }
 0x9e3   : > { %3000 = vmatmul.mubr.bf16.vlgmr.msra.gmra.mxu0 %v2966_v19  ;;  %3041 = vmatmul.mubr.bf16.vlgmr.msra.gmra.mxu1 %v2966_v19 }
 0x9e4   : > { %3078 = vmatpush1.bf16.msra.mxu0 %v7797_v48  ;;  %3119 = vmatpush1.bf16.msra.mxu1 %v7802_v47 }
 0x9e5   : > { %3079 = vmatprep.subr.bf16.mxu0 %v7811_v27  ;;  %3120 = vmatprep.subr.bf16.mxu1 %v7816_v41 }
 0x9e6   : > { %3109 = vmatprep.mubr.bf16.mxu0 %v9369_v34  ;;  %3150 = vmatprep.mubr.bf16.mxu1 %v9369_v34 }
 0x9e8   : > { %3080 = vmatpush1.bf16.msra.mxu0 %v7821_v25  ;;  %3121 = vmatpush1.bf16.msra.mxu1 %v7826_v33 }
 0x9e9   : > { %3081 = vmatprep.subr.bf16.mxu0 %v7835_v2  ;;  %3122 = vmatprep.subr.bf16.mxu1 %v7840_v3 }
 0x9ec   : > { %3082 = vmatpush1.bf16.msra.mxu0 %v7845_v4  ;;  %3123 = vmatpush1.bf16.msra.mxu1 %v7850_v5 }
 0x9ed   : > { %3083 = vmatprep.subr.bf16.mxu0 %v7859_v6  ;;  %3124 = vmatprep.subr.bf16.mxu1 %v7864_v9 }
 0x9f0   : > { %3084 = vmatpush1.bf16.msra.mxu0 %v7869_v10  ;;  %3125 = vmatpush1.bf16.msra.mxu1 %v7874_v11 }
 0x9f1   : > { %3085 = vmatprep.subr.bf16.mxu0 %v7883_v12  ;;  %3126 = vmatprep.subr.bf16.mxu1 %v7888_v14 }
 0x9f4   : > { %3086 = vmatpush1.bf16.msra.mxu0 %v7893_v15  ;;  %3127 = vmatpush1.bf16.msra.mxu1 %v7898_v17 }
 0x9f5   : > { %3087 = vmatprep.subr.bf16.mxu0 %v7907_v51  ;;  %3128 = vmatprep.subr.bf16.mxu1 %v7912_v49 }
 0x9f8   : > { %3088 = vmatpush1.bf16.msra.mxu0 %v7917_v7  ;;  %3129 = vmatpush1.bf16.msra.mxu1 %v7922_v43 }
 0x9f9   : > { %3089 = vmatprep.subr.bf16.mxu0 %v7931_v63  ;;  %3130 = vmatprep.subr.bf16.mxu1 %v7936_v1 }
 0x9fc   : > { %3090 = vmatpush1.bf16.msra.mxu0 %v7941_v16  ;;  %3131 = vmatpush1.bf16.msra.mxu1 %v7946_v21 }
 0x9fd   : > { %3091 = vmatprep.subr.bf16.mxu0 %v7955_v22  ;;  %3132 = vmatprep.subr.bf16.mxu1 %v7960_v23 }
 0xa00   : > { %3092 = vmatpush1.bf16.msra.mxu0 %v7965_v26  ;;  %3133 = vmatpush1.bf16.msra.mxu1 %v7970_v24 }
 0xa01   : > { %3187 = vmatprep.subr.bf16.mxu0 %v7787_v18  ;;  %3228 = vmatprep.subr.bf16.mxu1 %v7792_v13 }
 0xaa3   : > { %v3001_v52 = vpop.f32.mrf.mxu0  ;;  %v3042_v35 = vpop.f32.mrf.mxu1 }
 0xaa4   : > { %v3049_v50 = vadd.f32 %v3001_v52, %v2413_v40  ;;  %v3051_v0 = vadd.f32 %v3042_v35, %v2486_v45 }
 0xaa5   : > { %v3003_v42 = vpop.f32.mrf.mxu0  ;;  %v3044_v62 = vpop.f32.mrf.mxu1 }
 0xaa6   : > { %v3053_v29 = vmul.f32 0.5, %v3049_v50  ;;  %v3050_v37 = vadd.f32 %v3003_v42, %v2415_v36  ;;  %v3052_v53 = vadd.f32 %v3044_v62, %v2488_v55  ;;  %v2419_v55 = vadd.f32 %v9419_v20, %v8090_v56 }
 0xaa7   : > { %v3005_v58 = vpop.f32.mrf.mxu0  ;;  %v3046_v8 = vpop.f32.mrf.mxu1 }
 0xaa8   : > { %6256 = vtanh.f32 %v3053_v29  ;;  %v3057_v60 = vmul.f32 0.5, %v3050_v37  ;;  %v3062_v46 = vmul.f32 0.5, %v3052_v53 }
 0xaa9   : > { %v3006_v59 = vpop.f32.mrf.mxu0  ;;  %v3047_v38 = vpop.f32.mrf.mxu1 }
 0xaaa   : > { %6258 = vtanh.f32 %v3057_v60 }
 0xaab   : > { %6260 = vtanh.f32 %v3051_v0 }
 0xaac   : > { %6262 = vtanh.f32 %v3062_v46 }
 0xab5   : > { %v6257_v30 = vpop.eup %6256 }
 0xab6   : > { %v3055_v19 = vmul.f32 0.5, %v6257_v30 }
 0xab7   : > { %v6259_v40 = vpop.eup %6258 }
 0xab8   : > { %v3056_v52 = vadd.f32 0.5, %v3055_v19  ;;  %v3059_v50 = vmul.f32 0.5, %v6259_v40  ;;  %v6261_v36 = vpop.eup %6260  ;;  %v9420_v19 = vld [vmem:[#allocation20_spill] sm:$0xff] }
 0xab9   : > { %v6263_v29 = vpop.eup %6262  ;;  %v2490_v40 = vadd.f32 %v9420_v19, %v8098_v39 }
 0xaba   : > { %v3060_v42 = vadd.f32 0.5, %v3059_v50  ;;  %v3067_v31 = vmul.f32 %v6261_v36, %v3056_v52  ;;  %v3064_v37 = vmul.f32 0.5, %v6263_v29 }
 0xabc   : > { %v3066_v35 = vmul.f32 %v3060_v42, %v8159_v57  ;;  %v3065_v58 = vadd.f32 0.5, %v3064_v37  ;;  %v9418_v57 = vld [vmem:[#allocation18_spill] sm:$0xff] }
 0xabd   : > { %v2417_v60 = vadd.f32 %v9418_v57, %v8083_v32 }
 0xabe   : > { %v8209_v45 = vadd.f32 %v3067_v31, %v3066_v35 }
 0xac0   : > { %6264 = vtanh.f32 %v8209_v45 }
 0xacd   : > { %v6265_v62 = vpop.eup %6264 }
 0xace   : > { %v8212_v8 = vmul.f32 %v6265_v62, %v3065_v58  ;;  %v9421_v58 = vld [vmem:[#allocation23_spill] sm:$0xff] }
 0xacf   : > { %v2492_v62 = vadd.f32 %v9421_v58, %v8103_v54 }
 0xad0   : > { %v3076_v0 = vpack.c.bf16 %v8212_v8, %v8212_v8 }
 0xad2   : > { %3110 = vmatmul.mubr.bf16.vlgmr.msra.gmra.mxu0 %v3076_v0  ;;  %3151 = vmatmul.mubr.bf16.vlgmr.msra.gmra.mxu1 %v3076_v0 }
 0xad3   : > { %3188 = vmatpush1.bf16.msra.mxu0 %v7797_v48  ;;  %3229 = vmatpush1.bf16.msra.mxu1 %v7802_v47 }
 0xad4   : > { %3189 = vmatprep.subr.bf16.mxu0 %v7811_v27  ;;  %3230 = vmatprep.subr.bf16.mxu1 %v7816_v41 }
 0xad5   : > { %3219 = vmatprep.mubr.bf16.mxu0 %v9369_v34  ;;  %3260 = vmatprep.mubr.bf16.mxu1 %v9369_v34 }
 0xad7   : > { %3190 = vmatpush1.bf16.msra.mxu0 %v7821_v25  ;;  %3231 = vmatpush1.bf16.msra.mxu1 %v7826_v33 }
 0xad8   : > { %3191 = vmatprep.subr.bf16.mxu0 %v7835_v2  ;;  %3232 = vmatprep.subr.bf16.mxu1 %v7840_v3 }
 0xadb   : > { %3192 = vmatpush1.bf16.msra.mxu0 %v7845_v4  ;;  %3233 = vmatpush1.bf16.msra.mxu1 %v7850_v5 }
 0xadc   : > { %3193 = vmatprep.subr.bf16.mxu0 %v7859_v6  ;;  %3234 = vmatprep.subr.bf16.mxu1 %v7864_v9 }
 0xadf   : > { %3194 = vmatpush1.bf16.msra.mxu0 %v7869_v10  ;;  %3235 = vmatpush1.bf16.msra.mxu1 %v7874_v11 }
 0xae0   : > { %3195 = vmatprep.subr.bf16.mxu0 %v7883_v12  ;;  %3236 = vmatprep.subr.bf16.mxu1 %v7888_v14 }
 0xae3   : > { %3196 = vmatpush1.bf16.msra.mxu0 %v7893_v15  ;;  %3237 = vmatpush1.bf16.msra.mxu1 %v7898_v17 }
 0xae4   : > { %3197 = vmatprep.subr.bf16.mxu0 %v7907_v51  ;;  %3238 = vmatprep.subr.bf16.mxu1 %v7912_v49 }
 0xae7   : > { %3198 = vmatpush1.bf16.msra.mxu0 %v7917_v7  ;;  %3239 = vmatpush1.bf16.msra.mxu1 %v7922_v43 }
 0xae8   : > { %3199 = vmatprep.subr.bf16.mxu0 %v7931_v63  ;;  %3240 = vmatprep.subr.bf16.mxu1 %v7936_v1 }
 0xaeb   : > { %3200 = vmatpush1.bf16.msra.mxu0 %v7941_v16  ;;  %3241 = vmatpush1.bf16.msra.mxu1 %v7946_v21 }
 0xaec   : > { %3201 = vmatprep.subr.bf16.mxu0 %v7955_v22  ;;  %3242 = vmatprep.subr.bf16.mxu1 %v7960_v23 }
 0xaef   : > { %3202 = vmatpush1.bf16.msra.mxu0 %v7965_v26  ;;  %3243 = vmatpush1.bf16.msra.mxu1 %v7970_v24 }
 0xaf0   : > { %3297 = vmatprep.subr.bf16.mxu0 %v7787_v18  ;;  %3338 = vmatprep.subr.bf16.mxu1 %v7792_v13 }
 0xb92   : > { %v3111_v59 = vpop.f32.mrf.mxu0  ;;  %v3152_v38 = vpop.f32.mrf.mxu1 }
 0xb93   : > { %v3159_v53 = vadd.f32 %v3111_v59, %v2417_v60  ;;  %v3161_v31 = vadd.f32 %v3152_v38, %v2490_v40 }
 0xb94   : > { %v3113_v46 = vpop.f32.mrf.mxu0  ;;  %v3154_v30 = vpop.f32.mrf.mxu1 }
 0xb95   : > { %v3163_v52 = vmul.f32 0.5, %v3159_v53  ;;  %v3160_v50 = vadd.f32 %v3113_v46, %v2419_v55  ;;  %v3162_v0 = vadd.f32 %v3154_v30, %v2492_v62 }
 0xb96   : > { %v3115_v36 = vpop.f32.mrf.mxu0  ;;  %v3156_v42 = vpop.f32.mrf.mxu1 }
 0xb97   : > { %6266 = vtanh.f32 %v3163_v52  ;;  %v3167_v35 = vmul.f32 0.5, %v3160_v50  ;;  %v3172_v57 = vmul.f32 0.5, %v3162_v0 }
 0xb98   : > { %v3116_v29 = vpop.f32.mrf.mxu0  ;;  %v3157_v37 = vpop.f32.mrf.mxu1 }
 0xb99   : > { %6268 = vtanh.f32 %v3167_v35 }
 0xb9a   : > { %6270 = vtanh.f32 %v3161_v31 }
 0xb9b   : > { %6272 = vtanh.f32 %v3172_v57 }
 0xba4   : > { %v6267_v60 = vpop.eup %6266 }
 0xba5   : > { %v3165_v59 = vmul.f32 0.5, %v6267_v60 }
 0xba6   : > { %v6269_v20 = vpop.eup %6268 }
 0xba7   : > { %v3166_v19 = vadd.f32 0.5, %v3165_v59  ;;  %v3169_v53 = vmul.f32 0.5, %v6269_v20  ;;  %v6271_v55 = vpop.eup %6270 }
 0xba8   : > { %v6273_v50 = vpop.eup %6272 }
 0xba9   : > { %v3170_v46 = vadd.f32 0.5, %v3169_v53  ;;  %v3177_v52 = vmul.f32 %v6271_v55, %v3166_v19  ;;  %v3174_v36 = vmul.f32 0.5, %v6273_v50  ;;  %v8331_v50 = vld [vmem:[%s9308_s5 + $0xc4] ss:$16 sps:$4 sm:$0xff]  }
 0xbab   : > { %v3176_v38 = vmul.f32 %v3170_v46, %v8209_v45  ;;  %v3175_v42 = vadd.f32 0.5, %v3174_v36  ;;  %v8337_v36 = vld [vmem:[%s9308_s5 + $0xcc] ss:$16 sps:$4 sm:$0xff]  }
 0xbad   : > { %v8259_v40 = vadd.f32 %v3177_v52, %v3176_v38  ;;  %v8319_v38 = vld [vmem:[%s9308_s5 + $0xe0] ss:$16 sps:$4 sm:$0xff]  }
 0xbaf   : > { %6274 = vtanh.f32 %v8259_v40 }
 0xbbc   : > { %v6275_v30 = vpop.eup %6274 }
 0xbbd   : > { %v8262_v31 = vmul.f32 %v6275_v30, %v3175_v42  ;;  %v8345_v42 = vld [vmem:[%s9308_s5 + $0xc0] ss:$16 sps:$4 sm:$0xff]   ;;  %v8351_v30 = vld [vmem:[%s9308_s5 + $0xc8] ss:$16 sps:$4 sm:$0xff]  }
 0xbbf   : > { %v3186_v35 = vpack.c.bf16 %v8262_v31, %v8262_v31 }
 0xbc1   : > { %3220 = vmatmul.mubr.bf16.vlgmr.msra.gmra.mxu0 %v3186_v35  ;;  %3261 = vmatmul.mubr.bf16.vlgmr.msra.gmra.mxu1 %v3186_v35  ;;  %v8357_v35 = vld [vmem:[%s9308_s5 + $0xa4] ss:$16 sps:$4 sm:$0xff]  }
 0xbc2   : > { %3298 = vmatpush1.bf16.msra.mxu0 %v7797_v48  ;;  %3339 = vmatpush1.bf16.msra.mxu1 %v7802_v47  ;;  %v9422_v48 = vld [vmem:[#allocation22_spill] sm:$0xff] }
 0xbc3   : > { %3299 = vmatprep.subr.bf16.mxu0 %v7811_v27  ;;  %3340 = vmatprep.subr.bf16.mxu1 %v7816_v41  ;;  %v2423_v47 = vadd.f32 %v9422_v48, %v8083_v32  ;;  %v8363_v48 = vld [vmem:[%s9308_s5 + $0xac] ss:$16 sps:$4 sm:$0xff]  }
 0xbc4   : > { %3329 = vmatprep.mubr.bf16.mxu0 %v9369_v34  ;;  %3370 = vmatprep.mubr.bf16.mxu1 %v9369_v34 }
 0xbc6   : > { %3300 = vmatpush1.bf16.msra.mxu0 %v7821_v25  ;;  %3341 = vmatpush1.bf16.msra.mxu1 %v7826_v33  ;;  %v9423_v25 = vld [vmem:[#allocation27_spill] sm:$0xff] }
 0xbc7   : > { %3301 = vmatprep.subr.bf16.mxu0 %v7835_v2  ;;  %3342 = vmatprep.subr.bf16.mxu1 %v7840_v3  ;;  %v2425_v33 = vadd.f32 %v9423_v25, %v8090_v56  ;;  %v8387_v25 = vld [vmem:[%s9308_s5 + $0x8c] ss:$16 sps:$4 sm:$0xff]  }
 0xbca   : > { %3302 = vmatpush1.bf16.msra.mxu0 %v7845_v4  ;;  %3343 = vmatpush1.bf16.msra.mxu1 %v7850_v5  ;;  %v9424_v5 = vld [vmem:[#allocation24_spill] sm:$0xff] }
 0xbcb   : > { %3303 = vmatprep.subr.bf16.mxu0 %v7859_v6  ;;  %3344 = vmatprep.subr.bf16.mxu1 %v7864_v9  ;;  %v2496_v6 = vadd.f32 %v9424_v5, %v8098_v39  ;;  %v8417_v5 = vld [vmem:[%s9308_s5 + $0x60] ss:$16 sps:$4 sm:$0xff]  }
 0xbce   : > { %3304 = vmatpush1.bf16.msra.mxu0 %v7869_v10  ;;  %3345 = vmatpush1.bf16.msra.mxu1 %v7874_v11 }
 0xbcf   : > { %3305 = vmatprep.subr.bf16.mxu0 %v7883_v12  ;;  %3346 = vmatprep.subr.bf16.mxu1 %v7888_v14 }
 0xbd2   : > { %3306 = vmatpush1.bf16.msra.mxu0 %v7893_v15  ;;  %3347 = vmatpush1.bf16.msra.mxu1 %v7898_v17  ;;  %v9425_v17 = vld [vmem:[#allocation25_spill] sm:$0xff] }
 0xbd3   : > { %3307 = vmatprep.subr.bf16.mxu0 %v7907_v51  ;;  %3348 = vmatprep.subr.bf16.mxu1 %v7912_v49  ;;  %v2498_v51 = vadd.f32 %v9425_v17, %v8103_v54 }
 0xbd6   : > { %3308 = vmatpush1.bf16.msra.mxu0 %v7917_v7  ;;  %3349 = vmatpush1.bf16.msra.mxu1 %v7922_v43 }
 0xbd7   : > { %3309 = vmatprep.subr.bf16.mxu0 %v7931_v63  ;;  %3350 = vmatprep.subr.bf16.mxu1 %v7936_v1 }
 0xbda   : > { %3310 = vmatpush1.bf16.msra.mxu0 %v7941_v16  ;;  %3351 = vmatpush1.bf16.msra.mxu1 %v7946_v21 }
 0xbdb   : > { %3311 = vmatprep.subr.bf16.mxu0 %v7955_v22  ;;  %3352 = vmatprep.subr.bf16.mxu1 %v7960_v23 }
 0xbde   : > { %3312 = vmatpush1.bf16.msra.mxu0 %v7965_v26  ;;  %3353 = vmatpush1.bf16.msra.mxu1 %v7970_v24 }
 0xbdf   : > { %3407 = vmatprep.subr.bf16.mxu0 %v7787_v18  ;;  %3448 = vmatprep.subr.bf16.mxu1 %v7792_v13 }
 0xc81   : > { %v3221_v27 = vpop.f32.mrf.mxu0  ;;  %v3262_v41 = vpop.f32.mrf.mxu1 }
 0xc82   : > { %v3269_v2 = vadd.f32 %v3221_v27, %v2423_v47  ;;  %v3271_v13 = vadd.f32 %v3262_v41, %v2496_v6  ;;  %v8369_v47 = vld [vmem:[%s9308_s5 + $0xa0] ss:$16 sps:$4 sm:$0xff]   ;;  %v8375_v27 = vld [vmem:[%s9308_s5 + $0xa8] ss:$16 sps:$4 sm:$0xff]   ;;  %v8381_v41 = vld [vmem:[%s9308_s5 + $0x84] ss:$16 sps:$4 sm:$0xff]  }
 0xc83   : > { %v3223_v3 = vpop.f32.mrf.mxu0  ;;  %v3264_v4 = vpop.f32.mrf.mxu1  ;;  %v8423_v6 = vld [vmem:[%s9308_s5 + $0x68] ss:$16 sps:$4 sm:$0xff]  }
 0xc84   : > { %v3273_v9 = vmul.f32 0.5, %v3269_v2  ;;  %v3270_v10 = vadd.f32 %v3223_v3, %v2425_v33  ;;  %v3272_v49 = vadd.f32 %v3264_v4, %v2498_v51  ;;  %v8393_v33 = vld [vmem:[%s9308_s5 + $0x80] ss:$16 sps:$4 sm:$0xff]   ;;  %v8399_v2 = vld [vmem:[%s9308_s5 + $0x88] ss:$16 sps:$4 sm:$0xff]  }
 0xc85   : > { %v3225_v11 = vpop.f32.mrf.mxu0  ;;  %v3266_v18 = vpop.f32.mrf.mxu1  ;;  %v8405_v3 = vld [vmem:[%s9308_s5 + $0x64] ss:$16 sps:$4 sm:$0xff]   ;;  %v8411_v4 = vld [vmem:[%s9308_s5 + $0x6c] ss:$16 sps:$4 sm:$0xff]  }
 0xc86   : > { %6276 = vtanh.f32 %v3273_v9  ;;  %v3277_v12 = vmul.f32 0.5, %v3270_v10  ;;  %v3282_v7 = vmul.f32 0.5, %v3272_v49  ;;  %v8429_v9 = vld [vmem:[%s9308_s5 + $0x44] ss:$16 sps:$4 sm:$0xff]   ;;  %v8435_v10 = vld [vmem:[%s9308_s5 + $0x4c] ss:$16 sps:$4 sm:$0xff]  }
 0xc87   : > { %v3226_v14 = vpop.f32.mrf.mxu0  ;;  %v3267_v15 = vpop.f32.mrf.mxu1  ;;  %v8441_v11 = vld [vmem:[%s9308_s5 + $0x40] ss:$16 sps:$4 sm:$0xff]   ;;  %v8447_v18 = vld [vmem:[%s9308_s5 + $0x48] ss:$16 sps:$4 sm:$0xff]  }
 0xc88   : > { %6278 = vtanh.f32 %v3277_v12  ;;  %v9428_v15 = vld [vmem:[#allocation28_spill] sm:$0xff] }
 0xc89   : > { %6280 = vtanh.f32 %v3271_v13  ;;  %v6450_v13 = vld [vmem:[%s9308_s5 + $0xe4] ss:$16 sps:$4 sm:$0xff]   ;;  %v2500_v17 = vadd.f32 %v9428_v15, %v8098_v39 }
 0xc8a   : > { %6282 = vtanh.f32 %v3282_v7 }
 0xc93   : > { %v6277_v43 = vpop.eup %6276 }
 0xc94   : > { %v3275_v45 = vmul.f32 0.5, %v6277_v43 }
 0xc95   : > { %v6279_v29 = vpop.eup %6278 }
 0xc96   : > { %v3276_v37 = vadd.f32 0.5, %v3275_v45  ;;  %v3279_v58 = vmul.f32 0.5, %v6279_v29  ;;  %v6281_v62 = vpop.eup %6280 }
 0xc97   : > { %v6283_v20 = vpop.eup %6282 }
 0xc98   : > { %v3280_v0 = vadd.f32 0.5, %v3279_v58  ;;  %v3287_v57 = vmul.f32 %v6281_v62, %v3276_v37  ;;  %v3284_v19 = vmul.f32 0.5, %v6283_v20  ;;  %v9429_v62 = vld [vmem:[#allocation31_spill] sm:$0xff] }
 0xc9a   : > { %v3286_v60 = vmul.f32 %v3280_v0, %v8259_v40  ;;  %v3285_v53 = vadd.f32 0.5, %v3284_v19  ;;  %v8325_v40 = vld [vmem:[%s9308_s5 + $0xe8] ss:$16 sps:$4 sm:$0xff]   ;;  %v2502_v0 = vadd.f32 %v9429_v62, %v8103_v54 }
 0xc9c   : > { %v8309_v59 = vadd.f32 %v3287_v57, %v3286_v60 }
 0xc9e   : > { %6284 = vtanh.f32 %v8309_v59 }
 0xcab   : > { %v6285_v55 = vpop.eup %6284 }
 0xcac   : > { %v8312_v46 = vmul.f32 %v6285_v55, %v3285_v53 }
 0xcae   : > { %v3296_v52 = vpack.c.bf16 %v8312_v46, %v8312_v46 }
 0xcb0   : > { %3330 = vmatmul.mubr.bf16.vlgmr.msra.gmra.mxu0 %v3296_v52  ;;  %3371 = vmatmul.mubr.bf16.vlgmr.msra.gmra.mxu1 %v3296_v52 }
 0xcb1   : > { %3408 = vmatpush1.bf16.msra.mxu0 %v8319_v38  ;;  %3449 = vmatpush1.bf16.msra.mxu1 %v8325_v40 }
 0xcb2   : > { %3409 = vmatprep.subr.bf16.mxu0 %v8331_v50  ;;  %3450 = vmatprep.subr.bf16.mxu1 %v8337_v36 }
 0xcb3   : > { %3439 = vmatprep.mubr.bf16.mxu0 %v9369_v34  ;;  %3480 = vmatprep.mubr.bf16.mxu1 %v9369_v34 }
 0xcb5   : > { %3410 = vmatpush1.bf16.msra.mxu0 %v8345_v42  ;;  %3451 = vmatpush1.bf16.msra.mxu1 %v8351_v30 }
 0xcb6   : > { %3411 = vmatprep.subr.bf16.mxu0 %v8357_v35  ;;  %3452 = vmatprep.subr.bf16.mxu1 %v8363_v48 }
 0xcb9   : > { %3412 = vmatpush1.bf16.msra.mxu0 %v8369_v47  ;;  %3453 = vmatpush1.bf16.msra.mxu1 %v8375_v27 }
 0xcba   : > { %3413 = vmatprep.subr.bf16.mxu0 %v8381_v41  ;;  %3454 = vmatprep.subr.bf16.mxu1 %v8387_v25 }
 0xcbd   : > { %3414 = vmatpush1.bf16.msra.mxu0 %v8393_v33  ;;  %3455 = vmatpush1.bf16.msra.mxu1 %v8399_v2 }
 0xcbe   : > { %3415 = vmatprep.subr.bf16.mxu0 %v8405_v3  ;;  %3456 = vmatprep.subr.bf16.mxu1 %v8411_v4 }
 0xcc1   : > { %3416 = vmatpush1.bf16.msra.mxu0 %v8417_v5  ;;  %3457 = vmatpush1.bf16.msra.mxu1 %v8423_v6 }
 0xcc2   : > { %3417 = vmatprep.subr.bf16.mxu0 %v8429_v9  ;;  %3458 = vmatprep.subr.bf16.mxu1 %v8435_v10 }
 0xcc5   : > { %3418 = vmatpush1.bf16.msra.mxu0 %v8441_v11  ;;  %3459 = vmatpush1.bf16.msra.mxu1 %v8447_v18 }
 0xcc6   : > { %3419 = vmatprep.subr.bf16.mxu0 %v7931_v63  ;;  %3460 = vmatprep.subr.bf16.mxu1 %v7936_v1  ;;  %v6451_v63 = vld [vmem:[%s9308_s5 + $0xec] ss:$16 sps:$4 sm:$0xff]  }
 0xcc7   : > { %v9426_v1 = vld [vmem:[#allocation26_spill] sm:$0xff] }
 0xcc9   : > { %3420 = vmatpush1.bf16.msra.mxu0 %v7941_v16  ;;  %3461 = vmatpush1.bf16.msra.mxu1 %v7946_v21  ;;  %v2427_v16 = vadd.f32 %v9426_v1, %v8083_v32 }
 0xcca   : > { %3421 = vmatprep.subr.bf16.mxu0 %v7955_v22  ;;  %3462 = vmatprep.subr.bf16.mxu1 %v7960_v23  ;;  %v9427_v23 = vld [vmem:[#allocation29_spill] sm:$0xff] }
 0xccd   : > { %3422 = vmatpush1.bf16.msra.mxu0 %v7965_v26  ;;  %3463 = vmatpush1.bf16.msra.mxu1 %v7970_v24  ;;  %v2429_v26 = vadd.f32 %v9427_v23, %v8090_v56 }
 0xcce   : > { %3517 = vmatprep.subr.bf16.mxu0 %v6450_v13  ;;  %3558 = vmatprep.subr.bf16.mxu1 %v6451_v63 }
 0xd70   : > { %v3331_v21 = vpop.f32.mrf.mxu0  ;;  %v3372_v22 = vpop.f32.mrf.mxu1 }
 0xd71   : > { %v3379_v12 = vadd.f32 %v3331_v21, %v2427_v16  ;;  %v3381_v45 = vadd.f32 %v3372_v22, %v2500_v17 }
 0xd72   : > { %v3333_v24 = vpop.f32.mrf.mxu0  ;;  %v3374_v14 = vpop.f32.mrf.mxu1 }
 0xd73   : > { %v3383_v51 = vmul.f32 0.5, %v3379_v12  ;;  %v3380_v49 = vadd.f32 %v3333_v24, %v2429_v26  ;;  %v3382_v57 = vadd.f32 %v3374_v14, %v2502_v0 }
 0xd74   : > { %v3335_v7 = vpop.f32.mrf.mxu0  ;;  %v3376_v43 = vpop.f32.mrf.mxu1 }
 0xd75   : > { %6286 = vtanh.f32 %v3383_v51  ;;  %v3387_v29 = vmul.f32 0.5, %v3380_v49  ;;  %v3392_v60 = vmul.f32 0.5, %v3382_v57 }
 0xd76   : > { %v3336_v37 = vpop.f32.mrf.mxu0  ;;  %v3377_v58 = vpop.f32.mrf.mxu1 }
 0xd77   : > { %6288 = vtanh.f32 %v3387_v29 }
 0xd78   : > { %6290 = vtanh.f32 %v3381_v45  ;;  %v9433_v45 = vld [vmem:[#allocation33_spill] sm:$0xff] }
 0xd79   : > { %6292 = vtanh.f32 %v3392_v60  ;;  %v2508_v29 = vadd.f32 %v9433_v45, %v8103_v54 }
 0xd82   : > { %v6287_v20 = vpop.eup %6286 }
 0xd83   : > { %v3385_v19 = vmul.f32 0.5, %v6287_v20 }
 0xd84   : > { %v6289_v53 = vpop.eup %6288 }
 0xd85   : > { %v3386_v55 = vadd.f32 0.5, %v3385_v19  ;;  %v3389_v52 = vmul.f32 0.5, %v6289_v53  ;;  %v6291_v13 = vpop.eup %6290 }
 0xd86   : > { %v6293_v22 = vpop.eup %6292 }
 0xd87   : > { %v3390_v63 = vadd.f32 0.5, %v3389_v52  ;;  %v3397_v1 = vmul.f32 %v6291_v13, %v3386_v55  ;;  %v3394_v23 = vmul.f32 0.5, %v6293_v22 }
 0xd89   : > { %v3396_v16 = vmul.f32 %v3390_v63, %v8309_v59  ;;  %v3395_v26 = vadd.f32 0.5, %v3394_v23  ;;  %v6452_v59 = vld [vmem:[%s9308_s5 + $0x24] ss:$16 sps:$4 sm:$0xff]  }
 0xd8b   : > { %v8473_v21 = vadd.f32 %v3397_v1, %v3396_v16 }
 0xd8d   : > { %6294 = vtanh.f32 %v8473_v21 }
 0xd9a   : > { %v6295_v12 = vpop.eup %6294 }
 0xd9b   : > { %v8476_v24 = vmul.f32 %v6295_v12, %v3395_v26  ;;  %v6060_v26 = vld [vmem:[%s9310_s7 + $0xe0] ss:$16 sps:$4 sm:$0xff]   ;;  %v6063_v12 = vld [vmem:[%s9310_s7 + $0xe8] ss:$16 sps:$4 sm:$0xff]  }
 0xd9d   : > { %v3406_v14 = vpack.c.bf16 %v8476_v24, %v8476_v24  ;;  %v3636_v45 = vpack.c.bf16 %v8476_v24, %v8312_v46  ;;  %v8666_v46 = vld [vmem:[#allocation5 + $0xc4] ss:$16 sps:$4 sm:$0xff]   ;;  %v8668_v24 = vld [vmem:[#allocation5 + $0xcc] ss:$16 sps:$4 sm:$0xff]  }
 0xd9f   : > { %3440 = vmatmul.mubr.bf16.vlgmr.msra.gmra.mxu0 %v3406_v14  ;;  %3481 = vmatmul.mubr.bf16.vlgmr.msra.gmra.mxu1 %v3406_v14  ;;  %v6068_v14 = vld [vmem:[%s9310_s7 + $0xc4] ss:$16 sps:$4 sm:$0xff]  }
 0xda0   : > { %3518 = vmatpush1.bf16.msra.mxu0 %v8319_v38  ;;  %3559 = vmatpush1.bf16.msra.mxu1 %v8325_v40  ;;  %v6453_v38 = vld [vmem:[%s9308_s5 + $0x2c] ss:$16 sps:$4 sm:$0xff]   ;;  %v6454_v40 = vld [vmem:[%s9308_s5 + $0x20] ss:$16 sps:$4 sm:$0xff]  }
 0xda1   : > { %3519 = vmatprep.subr.bf16.mxu0 %v8331_v50  ;;  %3560 = vmatprep.subr.bf16.mxu1 %v8337_v36  ;;  %v6455_v50 = vld [vmem:[%s9308_s5 + $0x28] ss:$16 sps:$4 sm:$0xff]   ;;  %v6456_v36 = vld [vmem:[%s9308_s5 + $0x4] ss:$16 sps:$4 sm:$0xff]  }
 0xda2   : > { %3549 = vmatprep.mubr.bf16.mxu0 %v9369_v34  ;;  %3590 = vmatprep.mubr.bf16.mxu1 %v9369_v34 }
 0xda4   : > { %3520 = vmatpush1.bf16.msra.mxu0 %v8345_v42  ;;  %3561 = vmatpush1.bf16.msra.mxu1 %v8351_v30  ;;  %v6457_v42 = vld [vmem:[%s9308_s5 + $0xc] ss:$16 sps:$4 sm:$0xff]   ;;  %v6458_v30 = vld [vmem:[%s9308_s5] ss:$16 sps:$4 sm:$0xff]  }
 0xda5   : > { %3521 = vmatprep.subr.bf16.mxu0 %v8357_v35  ;;  %3562 = vmatprep.subr.bf16.mxu1 %v8363_v48  ;;  %v6459_v35 = vld [vmem:[%s9308_s5 + $0x8] ss:$16 sps:$4 sm:$0xff]   ;;  %v6062_v48 = vld [vmem:[%s9310_s7 + $0xe4] ss:$16 sps:$4 sm:$0xff]  }
 0xda8   : > { %3522 = vmatpush1.bf16.msra.mxu0 %v8369_v47  ;;  %3563 = vmatpush1.bf16.msra.mxu1 %v8375_v27  ;;  %v6065_v47 = vld [vmem:[%s9310_s7 + $0xec] ss:$16 sps:$4 sm:$0xff]  }
 0xda9   : > { %3523 = vmatprep.subr.bf16.mxu0 %v8381_v41  ;;  %3564 = vmatprep.subr.bf16.mxu1 %v8387_v25  ;;  %v9430_v27 = vld [vmem:[#allocation30_spill] sm:$0xff] }
 0xdaa   : > { %v2433_v41 = vadd.f32 %v9430_v27, %v8083_v32  ;;  %v6081_v27 = vld [vmem:[%s9310_s7 + $0x88] ss:$16 sps:$4 sm:$0xff]  }
 0xdac   : > { %3524 = vmatpush1.bf16.msra.mxu0 %v8393_v33  ;;  %3565 = vmatpush1.bf16.msra.mxu1 %v8399_v2  ;;  %v9431_v2 = vld [vmem:[#allocation35_spill] sm:$0xff] }
 0xdad   : > { %3525 = vmatprep.subr.bf16.mxu0 %v8405_v3  ;;  %3566 = vmatprep.subr.bf16.mxu1 %v8411_v4  ;;  %v2435_v3 = vadd.f32 %v9431_v2, %v8090_v56  ;;  %v6087_v2 = vld [vmem:[%s9310_s7 + $0x68] ss:$16 sps:$4 sm:$0xff]  }
 0xdb0   : > { %3526 = vmatpush1.bf16.msra.mxu0 %v8417_v5  ;;  %3567 = vmatpush1.bf16.msra.mxu1 %v8423_v6 }
 0xdb1   : > { %3527 = vmatprep.subr.bf16.mxu0 %v8429_v9  ;;  %3568 = vmatprep.subr.bf16.mxu1 %v8435_v10  ;;  %v9432_v9 = vld [vmem:[#allocation32_spill] sm:$0xff] }
 0xdb2   : > { %v2506_v10 = vadd.f32 %v9432_v9, %v8098_v39  ;;  %v6098_v9 = vld [vmem:[%s9310_s7 + $0x24] ss:$16 sps:$4 sm:$0xff]  }
 0xdb4   : > { %3528 = vmatpush1.bf16.msra.mxu0 %v8441_v11  ;;  %3569 = vmatpush1.bf16.msra.mxu1 %v8447_v18 }
 0xdb5   : > { %3529 = vmatprep.subr.bf16.mxu0 %v6452_v59  ;;  %3570 = vmatprep.subr.bf16.mxu1 %v6453_v38  ;;  %v6071_v59 = vld [vmem:[%s9310_s7 + $0xcc] ss:$16 sps:$4 sm:$0xff]   ;;  %v6066_v38 = vld [vmem:[%s9310_s7 + $0xc0] ss:$16 sps:$4 sm:$0xff]  }
 0xdb8   : > { %3530 = vmatpush1.bf16.msra.mxu0 %v6454_v40  ;;  %3571 = vmatpush1.bf16.msra.mxu1 %v6455_v50  ;;  %v6069_v40 = vld [vmem:[%s9310_s7 + $0xc8] ss:$16 sps:$4 sm:$0xff]   ;;  %v6074_v50 = vld [vmem:[%s9310_s7 + $0xa4] ss:$16 sps:$4 sm:$0xff]  }
 0xdb9   : > { %3531 = vmatprep.subr.bf16.mxu0 %v6456_v36  ;;  %3572 = vmatprep.subr.bf16.mxu1 %v6457_v42  ;;  %v6077_v36 = vld [vmem:[%s9310_s7 + $0xac] ss:$16 sps:$4 sm:$0xff]   ;;  %v6072_v42 = vld [vmem:[%s9310_s7 + $0xa0] ss:$16 sps:$4 sm:$0xff]  }
 0xdbc   : > { %3532 = vmatpush1.bf16.msra.mxu0 %v6458_v30  ;;  %3573 = vmatpush1.bf16.msra.mxu1 %v6459_v35  ;;  %v6075_v30 = vld [vmem:[%s9310_s7 + $0xa8] ss:$16 sps:$4 sm:$0xff]   ;;  %v6080_v35 = vld [vmem:[%s9310_s7 + $0x84] ss:$16 sps:$4 sm:$0xff]  }
 0xdbd   : > { %3852 = vmatprep.subr.bf16.mxu0 %v6062_v48  ;;  %3925 = vmatprep.subr.bf16.mxu1 %v6065_v47  ;;  %v6083_v48 = vld [vmem:[%s9310_s7 + $0x8c] ss:$16 sps:$4 sm:$0xff]   ;;  %v6078_v47 = vld [vmem:[%s9310_s7 + $0x80] ss:$16 sps:$4 sm:$0xff]  }
 0xe5f   : > { %v3441_v25 = vpop.f32.mrf.mxu0  ;;  %v3482_v33 = vpop.f32.mrf.mxu1 }
 0xe60   : > { %v3489_v4 = vadd.f32 %v3441_v25, %v2433_v41  ;;  %v3491_v51 = vadd.f32 %v3482_v33, %v2506_v10  ;;  %v6086_v41 = vld [vmem:[%s9310_s7 + $0x64] ss:$16 sps:$4 sm:$0xff]   ;;  %v6089_v25 = vld [vmem:[%s9310_s7 + $0x6c] ss:$16 sps:$4 sm:$0xff]   ;;  %v6084_v33 = vld [vmem:[%s9310_s7 + $0x60] ss:$16 sps:$4 sm:$0xff]  }
 0xe61   : > { %v3443_v5 = vpop.f32.mrf.mxu0  ;;  %v3484_v6 = vpop.f32.mrf.mxu1  ;;  %v6101_v10 = vld [vmem:[%s9310_s7 + $0x2c] ss:$16 sps:$4 sm:$0xff]  }
 0xe62   : > { %v3493_v11 = vmul.f32 0.5, %v3489_v4  ;;  %v3490_v18 = vadd.f32 %v3443_v5, %v2435_v3  ;;  %v3492_v37 = vadd.f32 %v3484_v6, %v2508_v29  ;;  %v6092_v3 = vld [vmem:[%s9310_s7 + $0x44] ss:$16 sps:$4 sm:$0xff]   ;;  %v6095_v4 = vld [vmem:[%s9310_s7 + $0x4c] ss:$16 sps:$4 sm:$0xff]  }
 0xe63   : > { %v3445_v15 = vpop.f32.mrf.mxu0  ;;  %v3486_v17 = vpop.f32.mrf.mxu1  ;;  %v6090_v5 = vld [vmem:[%s9310_s7 + $0x40] ss:$16 sps:$4 sm:$0xff]   ;;  %v6093_v6 = vld [vmem:[%s9310_s7 + $0x48] ss:$16 sps:$4 sm:$0xff]  }
 0xe64   : > { %6296 = vtanh.f32 %v3493_v11  ;;  %v3497_v49 = vmul.f32 0.5, %v3490_v18  ;;  %v3502_v58 = vmul.f32 0.5, %v3492_v37  ;;  %v6096_v11 = vld [vmem:[%s9310_s7 + $0x20] ss:$16 sps:$4 sm:$0xff]   ;;  %v6099_v18 = vld [vmem:[%s9310_s7 + $0x28] ss:$16 sps:$4 sm:$0xff]  }
 0xe65   : > { %v3446_v7 = vpop.f32.mrf.mxu0  ;;  %v3487_v43 = vpop.f32.mrf.mxu1  ;;  %v6104_v15 = vld [vmem:[%s9310_s7 + $0x4] ss:$16 sps:$4 sm:$0xff]   ;;  %v6107_v17 = vld [vmem:[%s9310_s7 + $0xc] ss:$16 sps:$4 sm:$0xff]   ;;  %v8670_v29 = vld [vmem:[#allocation5 + $0xc0] ss:$16 sps:$4 sm:$0xff]  }
 0xe66   : > { %6298 = vtanh.f32 %v3497_v49  ;;  %v6105_v49 = vld [vmem:[%s9310_s7 + $0x8] ss:$16 sps:$4 sm:$0xff]   ;;  %v3634_v7 = vpack.c.bf16 %v8162_v28, %v8112_v44  ;;  %v3635_v43 = vpack.c.bf16 %v8262_v31, %v8212_v8  ;;  %v8654_v44 = vld [vmem:[#allocation5 + $0xe4] ss:$16 sps:$4 sm:$0xff]   ;;  %v8656_v28 = vld [vmem:[#allocation5 + $0xec] ss:$16 sps:$4 sm:$0xff]  }
 0xe67   : > { %6300 = vtanh.f32 %v3491_v51  ;;  %v6102_v51 = vld [vmem:[%s9310_s7] ss:$16 sps:$4 sm:$0xff]   ;;  %v8660_v31 = vld [vmem:[#allocation5 + $0xe8] ss:$16 sps:$4 sm:$0xff]  }
 0xe68   : > { %6302 = vtanh.f32 %v3502_v58  ;;  %v8658_v8 = vld [vmem:[#allocation5 + $0xe0] ss:$16 sps:$4 sm:$0xff]   ;;  %v8672_v37 = vld [vmem:[#allocation5 + $0xc8] ss:$16 sps:$4 sm:$0xff]   ;;  %v8678_v58 = vld [vmem:[#allocation5 + $0xa4] ss:$16 sps:$4 sm:$0xff]  }
 0xe71   : > { %v6297_v62 = vpop.eup %6296 }
 0xe72   : > { %v3495_v0 = vmul.f32 0.5, %v6297_v62  ;;  %v8680_v62 = vld [vmem:[#allocation5 + $0xac] ss:$16 sps:$4 sm:$0xff]  }
 0xe73   : > { %v6299_v57 = vpop.eup %6298 }
 0xe74   : > { %v3496_v60 = vadd.f32 0.5, %v3495_v0  ;;  %v3499_v20 = vmul.f32 0.5, %v6299_v57  ;;  %v6301_v19 = vpop.eup %6300  ;;  %v8682_v0 = vld [vmem:[#allocation5 + $0xa0] ss:$16 sps:$4 sm:$0xff]   ;;  %v8684_v57 = vld [vmem:[#allocation5 + $0xa8] ss:$16 sps:$4 sm:$0xff]  }
 0xe75   : > { %v6303_v63 = vpop.eup %6302 }
 0xe76   : > { %v3500_v53 = vadd.f32 0.5, %v3499_v20  ;;  %v3507_v55 = vmul.f32 %v6301_v19, %v3496_v60  ;;  %v3504_v1 = vmul.f32 0.5, %v6303_v63  ;;  %v8690_v60 = vld [vmem:[#allocation5 + $0x84] ss:$16 sps:$4 sm:$0xff]   ;;  %v8692_v20 = vld [vmem:[#allocation5 + $0x8c] ss:$16 sps:$4 sm:$0xff]  }
 0xe77   : > { %v8694_v19 = vld [vmem:[#allocation5 + $0x80] ss:$16 sps:$4 sm:$0xff]  }
 0xe78   : > { %v3506_v52 = vmul.f32 %v3500_v53, %v8473_v21  ;;  %v3505_v16 = vadd.f32 0.5, %v3504_v1  ;;  %v8696_v53 = vld [vmem:[#allocation5 + $0x88] ss:$16 sps:$4 sm:$0xff]   ;;  %v8706_v63 = vld [vmem:[#allocation5 + $0x60] ss:$16 sps:$4 sm:$0xff]  }
 0xe79   : > { %v8708_v1 = vld [vmem:[#allocation5 + $0x68] ss:$16 sps:$4 sm:$0xff]  }
 0xe7a   : > { %v8543_v13 = vadd.f32 %v3507_v55, %v3506_v52  ;;  %v8702_v55 = vld [vmem:[#allocation5 + $0x64] ss:$16 sps:$4 sm:$0xff]   ;;  %v8704_v52 = vld [vmem:[#allocation5 + $0x6c] ss:$16 sps:$4 sm:$0xff]  }
 0xe7c   : > { %6304 = vtanh.f32 %v8543_v13 }
 0xe89   : > { %v6305_v22 = vpop.eup %6304 }
 0xe8a   : > { %v8546_v23 = vmul.f32 %v6305_v22, %v3505_v16  ;;  %v8714_v16 = vld [vmem:[#allocation5 + $0x44] ss:$16 sps:$4 sm:$0xff]   ;;  %v8716_v22 = vld [vmem:[#allocation5 + $0x4c] ss:$16 sps:$4 sm:$0xff]  }
 0xe8c   : > { %v3516_v21 = vpack.c.bf16 %v8546_v23, %v8546_v23 }
 0xe8e   : > { %3550 = vmatmul.mubr.bf16.vlgmr.msra.gmra.mxu0 %v3516_v21  ;;  %3591 = vmatmul.mubr.bf16.vlgmr.msra.gmra.mxu1 %v3516_v21  ;;  %v8726_v21 = vld [vmem:[#allocation5 + $0x24] ss:$16 sps:$4 sm:$0xff]  }
 0xe8f   : > { %3853 = vmatpush1.bf16.msra.mxu0 %v6060_v26  ;;  %3926 = vmatpush1.bf16.msra.mxu1 %v6063_v12  ;;  %v8718_v26 = vld [vmem:[#allocation5 + $0x40] ss:$16 sps:$4 sm:$0xff]   ;;  %v8720_v12 = vld [vmem:[#allocation5 + $0x48] ss:$16 sps:$4 sm:$0xff]  }
 0xe90   : > { %3854 = vmatprep.subr.bf16.mxu0 %v6068_v14  ;;  %3927 = vmatprep.subr.bf16.mxu1 %v6071_v59  ;;  %v8728_v14 = vld [vmem:[#allocation5 + $0x2c] ss:$16 sps:$4 sm:$0xff]   ;;  %v8730_v59 = vld [vmem:[#allocation5 + $0x20] ss:$16 sps:$4 sm:$0xff]  }
 0xe91   : > { %3884 = vmatprep.mubr.bf16.mxu0 %v9369_v34  ;;  %3957 = vmatprep.mubr.bf16.mxu1 %v9369_v34 }
 0xe93   : > { %3855 = vmatpush1.bf16.msra.mxu0 %v6066_v38  ;;  %3928 = vmatpush1.bf16.msra.mxu1 %v6069_v40  ;;  %v8732_v38 = vld [vmem:[#allocation5 + $0x28] ss:$16 sps:$4 sm:$0xff]   ;;  %v8738_v40 = vld [vmem:[#allocation5 + $0x4] ss:$16 sps:$4 sm:$0xff]  }
 0xe94   : > { %3856 = vmatprep.subr.bf16.mxu0 %v6074_v50  ;;  %3929 = vmatprep.subr.bf16.mxu1 %v6077_v36  ;;  %v8740_v50 = vld [vmem:[#allocation5 + $0xc] ss:$16 sps:$4 sm:$0xff]   ;;  %v8742_v36 = vld [vmem:[#allocation5] ss:$16 sps:$4 sm:$0xff]  }
 0xe97   : > { %3857 = vmatpush1.bf16.msra.mxu0 %v6072_v42  ;;  %3930 = vmatpush1.bf16.msra.mxu1 %v6075_v30  ;;  %v8744_v42 = vld [vmem:[#allocation5 + $0x8] ss:$16 sps:$4 sm:$0xff]  }
 0xe98   : > { %3858 = vmatprep.subr.bf16.mxu0 %v6080_v35  ;;  %3931 = vmatprep.subr.bf16.mxu1 %v6083_v48  ;;  %v9434_v30 = vld [vmem:[#allocation34_spill] sm:$0xff] }
 0xe99   : > { %v2437_v35 = vadd.f32 %v9434_v30, %v8083_v32 }
 0xe9b   : > { %3859 = vmatpush1.bf16.msra.mxu0 %v6078_v47  ;;  %3932 = vmatpush1.bf16.msra.mxu1 %v6081_v27  ;;  %v9435_v27 = vld [vmem:[#allocation37_spill] sm:$0xff] }
 0xe9c   : > { %3860 = vmatprep.subr.bf16.mxu0 %v6086_v41  ;;  %3933 = vmatprep.subr.bf16.mxu1 %v6089_v25  ;;  %v2439_v41 = vadd.f32 %v9435_v27, %v8090_v56 }
 0xe9f   : > { %3861 = vmatpush1.bf16.msra.mxu0 %v6084_v33  ;;  %3934 = vmatpush1.bf16.msra.mxu1 %v6087_v2 }
 0xea0   : > { %3862 = vmatprep.subr.bf16.mxu0 %v6092_v3  ;;  %3935 = vmatprep.subr.bf16.mxu1 %v6095_v4  ;;  %v9436_v3 = vld [vmem:[#allocation36_spill] sm:$0xff] }
 0xea1   : > { %v2510_v4 = vadd.f32 %v9436_v3, %v8098_v39 }
 0xea3   : > { %3863 = vmatpush1.bf16.msra.mxu0 %v6090_v5  ;;  %3936 = vmatpush1.bf16.msra.mxu1 %v6093_v6 }
 0xea4   : > { %3864 = vmatprep.subr.bf16.mxu0 %v6098_v9  ;;  %3937 = vmatprep.subr.bf16.mxu1 %v6101_v10 }
 0xea7   : > { %3865 = vmatpush1.bf16.msra.mxu0 %v6096_v11  ;;  %3938 = vmatpush1.bf16.msra.mxu1 %v6099_v18 }
 0xea8   : > { %3866 = vmatprep.subr.bf16.mxu0 %v6104_v15  ;;  %3939 = vmatprep.subr.bf16.mxu1 %v6107_v17  ;;  %v9437_v17 = vld [vmem:[#allocation38_spill] sm:$0xff] }
 0xea9   : > { %v2512_v56 = vadd.f32 %v9437_v17, %v8103_v54 }
 0xeab   : > { %3867 = vmatpush1.bf16.msra.mxu0 %v6102_v51  ;;  %3940 = vmatpush1.bf16.msra.mxu1 %v6105_v49 }
 0xeac   : > { %4231 = vmatprep.subr.bf16.mxu0 %v8654_v44  ;;  %4272 = vmatprep.subr.bf16.mxu1 %v8656_v28 }
 0xeae   : > { %3885 = vmatmul.mubr.bf16.vlgmr.msra.gmra.mxu0 %v3634_v7  ;;  %3958 = vmatmul.mubr.bf16.vlgmr.msra.gmra.mxu1 %v3634_v7 }
 0xeaf   : > { %3894 = vmatprep.mubr.bf16.mxu0 %v9369_v34  ;;  %3967 = vmatprep.mubr.bf16.mxu1 %v9369_v34 }
 0xeb0   : > { %4232 = vmatpush1.bf16.msra.mxu0 %v8658_v8  ;;  %4273 = vmatpush1.bf16.msra.mxu1 %v8660_v31 }
 0xeb1   : > { %4233 = vmatprep.subr.bf16.mxu0 %v8666_v46  ;;  %4274 = vmatprep.subr.bf16.mxu1 %v8668_v24 }
 0xeb4   : > { %4234 = vmatpush1.bf16.msra.mxu0 %v8670_v29  ;;  %4275 = vmatpush1.bf16.msra.mxu1 %v8672_v37 }
 0xeb5   : > { %4235 = vmatprep.subr.bf16.mxu0 %v8678_v58  ;;  %4276 = vmatprep.subr.bf16.mxu1 %v8680_v62 }
 0xeb6   : > { %3895 = vmatmul.mubr.bf16.gmra.mxu0 %v3635_v43  ;;  %3968 = vmatmul.mubr.bf16.gmra.mxu1 %v3635_v43 }
 0xeb7   : > { %3904 = vmatprep.mubr.bf16.mxu0 %v9369_v34  ;;  %3977 = vmatprep.mubr.bf16.mxu1 %v9369_v34 }
 0xeb8   : > { %4236 = vmatpush1.bf16.msra.mxu0 %v8682_v0  ;;  %4277 = vmatpush1.bf16.msra.mxu1 %v8684_v57 }
 0xeb9   : > { %4237 = vmatprep.subr.bf16.mxu0 %v8690_v60  ;;  %4278 = vmatprep.subr.bf16.mxu1 %v8692_v20 }
 0xebc   : > { %4238 = vmatpush1.bf16.msra.mxu0 %v8694_v19  ;;  %4279 = vmatpush1.bf16.msra.mxu1 %v8696_v53 }
 0xebd   : > { %4239 = vmatprep.subr.bf16.mxu0 %v8702_v55  ;;  %4280 = vmatprep.subr.bf16.mxu1 %v8704_v52 }
 0xebe   : > { %3905 = vmatmul.mubr.bf16.gmra.mxu0 %v3636_v45  ;;  %3978 = vmatmul.mubr.bf16.gmra.mxu1 %v3636_v45 }
 0xebf   : > { %3914 = vmatprep.mubr.bf16.mxu0 %v9369_v34  ;;  %3987 = vmatprep.mubr.bf16.mxu1 %v9369_v34 }
 0xec0   : > { %4240 = vmatpush1.bf16.msra.mxu0 %v8706_v63  ;;  %4281 = vmatpush1.bf16.msra.mxu1 %v8708_v1 }
 0xec1   : > { %4241 = vmatprep.subr.bf16.mxu0 %v8714_v16  ;;  %4282 = vmatprep.subr.bf16.mxu1 %v8716_v22 }
 0xec4   : > { %4242 = vmatpush1.bf16.msra.mxu0 %v8718_v26  ;;  %4283 = vmatpush1.bf16.msra.mxu1 %v8720_v12 }
 0xec5   : > { %4243 = vmatprep.subr.bf16.mxu0 %v8726_v21  ;;  %4284 = vmatprep.subr.bf16.mxu1 %v8728_v14 }
 0xec8   : > { %4244 = vmatpush1.bf16.msra.mxu0 %v8730_v59  ;;  %4285 = vmatpush1.bf16.msra.mxu1 %v8732_v38 }
 0xec9   : > { %4245 = vmatprep.subr.bf16.mxu0 %v8738_v40  ;;  %4286 = vmatprep.subr.bf16.mxu1 %v8740_v50 }
 0xecc   : > { %4246 = vmatpush1.bf16.msra.mxu0 %v8742_v36  ;;  %4287 = vmatpush1.bf16.msra.mxu1 %v8744_v42 }
 0xecd   : > { %4341 = vmatprep.subr.bf16.mxu0 %v8654_v44  ;;  %4382 = vmatprep.subr.bf16.mxu1 %v8656_v28 }
 0xf4e   : > { %v3551_v48 = vpop.f32.mrf.mxu0  ;;  %v3592_v47 = vpop.f32.mrf.mxu1 }
 0xf4f   : > { %v3599_v25 = vadd.f32 %v3551_v48, %v2437_v35  ;;  %v3601_v11 = vadd.f32 %v3592_v47, %v2510_v4 }
 0xf50   : > { %v3553_v33 = vpop.f32.mrf.mxu0  ;;  %v3594_v2 = vpop.f32.mrf.mxu1 }
 0xf51   : > { %v3603_v5 = vmul.f32 0.5, %v3599_v25  ;;  %v3600_v6 = vadd.f32 %v3553_v33, %v2439_v41  ;;  %v3602_v51 = vadd.f32 %v3594_v2, %v2512_v56 }
 0xf52   : > { %v3555_v9 = vpop.f32.mrf.mxu0  ;;  %v3596_v10 = vpop.f32.mrf.mxu1 }
 0xf53   : > { %6306 = vtanh.f32 %v3603_v5  ;;  %v3607_v18 = vmul.f32 0.5, %v3600_v6  ;;  %v3612_v49 = vmul.f32 0.5, %v3602_v51 }
 0xf54   : > { %v3556_v15 = vpop.f32.mrf.mxu0  ;;  %v3597_v32 = vpop.f32.mrf.mxu1 }
 0xf55   : > { %6308 = vtanh.f32 %v3607_v18 }
 0xf56   : > { %6310 = vtanh.f32 %v3601_v11 }
 0xf57   : > { %6312 = vtanh.f32 %v3612_v49 }
 0xf60   : > { %v6307_v7 = vpop.eup %6306 }
 0xf61   : > { %v3605_v43 = vmul.f32 0.5, %v6307_v7 }
 0xf62   : > { %v6309_v45 = vpop.eup %6308 }
 0xf63   : > { %v3606_v39 = vadd.f32 0.5, %v3605_v43  ;;  %v3609_v30 = vmul.f32 0.5, %v6309_v45  ;;  %v6311_v35 = vpop.eup %6310 }
 0xf64   : > { %v6313_v54 = vpop.eup %6312 }
 0xf65   : > { %v3610_v48 = vadd.f32 0.5, %v3609_v30  ;;  %v3617_v27 = vmul.f32 %v6311_v35, %v3606_v39  ;;  %v3614_v25 = vmul.f32 0.5, %v6313_v54 }
 0xf67   : > { %v3616_v47 = vmul.f32 %v3610_v48, %v8543_v13  ;;  %v3615_v33 = vadd.f32 0.5, %v3614_v25  ;;  %v5711_v13 = vld [vmem:[%s9313_s10 + $0x10] sm:$0xff] }
 0xf68   : > { %v4070_v5 = vpack.c.bf16 %v5711_v13, %v5711_v13 }
 0xf69   : > { %v3618_v41 = vadd.f32 %v3617_v27, %v3616_v47 }
 0xf6b   : > { %6314 = vtanh.f32 %v3618_v41  ;;  %5678 = vst [vmem:[%s9319_s16 + $0x8] sm:$0xff] %v3618_v41 }
 0xf6e   : > { %v3959_v6 = vpop.f32.mrf.mxu1 }
 0xf70   : > { %v3961_v10 = vpop.f32.mrf.mxu1 }
 0xf72   : > { %v8809_v18 = vpop.f32.mrf.mxu1 }
 0xf74   : > { %v8813_v32 = vpop.f32.mrf.mxu1 }
 0xf76   : > { %v8817_v56 = vpop.f32.mrf.mxu1 }
 0xf77   : > { %9438 = vst [vmem:[#allocation16_spill] sm:$0xff] %v8817_v56 }
 0xf78   : > { %v6315_v2 = vpop.eup %6314  ;;  %v8821_v49 = vpop.f32.mrf.mxu1 }
 0xf79   : > { %v3620_v3 = vmul.f32 %v6315_v2, %v3615_v33  ;;  %9439 = vst [vmem:[#allocation19_spill] sm:$0xff] %v8821_v49  ;;  %v3670_v33 = vld [vmem:[%s9452_s27] sm:$0xf] }
 0xf7a   : > { %v8825_v43 = vpop.f32.mrf.mxu1  ;;  %v8879_v56 = vrot.slane %v3670_v33, %v9415_v61 }
 0xf7b   : > { %5677 = vst [vmem:[%s9318_s15 + $0x8] sm:$0xff] %v3620_v3  ;;  %v3637_v4 = vpack.c.bf16 %v3620_v3, %v8546_v23  ;;  %v3886_v23 = vpop.f32.mrf.mxu0  ;;  %9441 = vst [vmem:[#allocation18_spill] sm:$0xff] %v8825_v43 }
 0xf7c   : > { %v8829_v39 = vpop.f32.mrf.mxu1 }
 0xf7d   : > { %3915 = vmatmul.mubr.bf16.gmra.mxu0 %v3637_v4  ;;  %3988 = vmatmul.mubr.bf16.gmra.mxu1 %v3637_v4  ;;  %v3888_v9 = vpop.f32.mrf.mxu0  ;;  %9443 = vst [vmem:[#allocation20_spill] sm:$0xff] %v8829_v39 }
 0xf7e   : > { %4263 = vmatprep.mubr.bf16.mxu0 %v9369_v34  ;;  %4304 = vmatprep.mubr.bf16.mxu1 %v9369_v34  ;;  %v8833_v35 = vpop.f32.mrf.mxu1 }
 0xf7f   : > { %v8807_v11 = vpop.f32.mrf.mxu0  ;;  %9445 = vst [vmem:[#allocation22_spill] sm:$0xff] %v8833_v35 }
 0xf80   : > { %v8837_v27 = vpop.f32.mrf.mxu1 }
 0xf81   : > { %v8811_v15 = vpop.f32.mrf.mxu0  ;;  %9447 = vst [vmem:[#allocation24_spill] sm:$0xff] %v8837_v27 }
 0xf82   : > { %v8841_v41 = vpop.f32.mrf.mxu1 }
 0xf83   : > { %v8815_v17 = vpop.f32.mrf.mxu0  ;;  %9449 = vst [vmem:[#allocation26_spill] sm:$0xff] %v8841_v41 }
 0xf84   : > { %v8845_v25 = vpop.f32.mrf.mxu1 }
 0xf85   : > { %4264 = vmatmul.mubr.bf16.vlgmr.msra.gmra.mxu0 %v4070_v5  ;;  %4305 = vmatmul.mubr.bf16.vlgmr.msra.gmra.mxu1 %v4070_v5  ;;  %v8819_v51 = vpop.f32.mrf.mxu0  ;;  %9451 = vst [vmem:[#allocation28_spill] sm:$0xff] %v8845_v25  ;;  %v9457_v5 = vld [vmem:[#allocation14_spill] sm:$0xff]  ;;  %v9460_v25 = vld [vmem:[#allocation15_spill] sm:$0xff] }
 0xf86   : > { %4342 = vmatpush1.bf16.msra.mxu0 %v8658_v8  ;;  %4383 = vmatpush1.bf16.msra.mxu1 %v8660_v31  ;;  %v8866_v27 = vrot.slane %v3670_v33, %v9460_v25 }
 0xf87   : > { %4343 = vmatprep.subr.bf16.mxu0 %v8666_v46  ;;  %4384 = vmatprep.subr.bf16.mxu1 %v8668_v24  ;;  %v8823_v7 = vpop.f32.mrf.mxu0 }
 0xf88   : > { %4373 = vmatprep.mubr.bf16.mxu0 %v9369_v34  ;;  %4414 = vmatprep.mubr.bf16.mxu1 %v9369_v34  ;;  %9440 = vst [vmem:[#allocation17_spill] sm:$0xff] %v8823_v7 }
 0xf89   : > { %v8827_v45 = vpop.f32.mrf.mxu0 }
 0xf8a   : > { %4344 = vmatpush1.bf16.msra.mxu0 %v8670_v29  ;;  %4385 = vmatpush1.bf16.msra.mxu1 %v8672_v37  ;;  %9442 = vst [vmem:[#allocation21_spill] sm:$0xff] %v8827_v45 }
 0xf8b   : > { %4345 = vmatprep.subr.bf16.mxu0 %v8678_v58  ;;  %4386 = vmatprep.subr.bf16.mxu1 %v8680_v62  ;;  %v8831_v30 = vpop.f32.mrf.mxu0 }
 0xf8c   : > { %9444 = vst [vmem:[#allocation23_spill] sm:$0xff] %v8831_v30  ;;  %v9463_v30 = vld [vmem:[#allocation13_spill] sm:$0xff] }
 0xf8d   : > { %v8835_v48 = vpop.f32.mrf.mxu0 }
 0xf8e   : > { %4346 = vmatpush1.bf16.msra.mxu0 %v8682_v0  ;;  %4387 = vmatpush1.bf16.msra.mxu1 %v8684_v57  ;;  %9446 = vst [vmem:[#allocation27_spill] sm:$0xff] %v8835_v48 }
 0xf8f   : > { %4347 = vmatprep.subr.bf16.mxu0 %v8690_v60  ;;  %4388 = vmatprep.subr.bf16.mxu1 %v8692_v20  ;;  %v8839_v47 = vpop.f32.mrf.mxu0 }
 0xf90   : > { %9448 = vst [vmem:[#allocation25_spill] sm:$0xff] %v8839_v47  ;;  %v8859_v47 = vrot.slane %v3670_v33, %v9457_v5  ;;  %v3889_v5 = vadd.f32 %v3888_v9, %v8866_v27  ;;  %v3962_v9 = vadd.f32 %v3961_v10, %v8879_v56 }
 0xf91   : > { %v8843_v54 = vpop.f32.mrf.mxu0 }
 0xf92   : > { %4348 = vmatpush1.bf16.msra.mxu0 %v8694_v19  ;;  %4389 = vmatpush1.bf16.msra.mxu1 %v8696_v53  ;;  %9450 = vst [vmem:[#allocation29_spill] sm:$0xff] %v8843_v54 }
 0xf93   : > { %4349 = vmatprep.subr.bf16.mxu0 %v8702_v55  ;;  %4390 = vmatprep.subr.bf16.mxu1 %v8704_v52 }
 0xf96   : > { %4350 = vmatpush1.bf16.msra.mxu0 %v8706_v63  ;;  %4391 = vmatpush1.bf16.msra.mxu1 %v8708_v1 }
 0xf97   : > { %4351 = vmatprep.subr.bf16.mxu0 %v8714_v16  ;;  %4392 = vmatprep.subr.bf16.mxu1 %v8716_v22 }
 0xf9a   : > { %4352 = vmatpush1.bf16.msra.mxu0 %v8718_v26  ;;  %4393 = vmatpush1.bf16.msra.mxu1 %v8720_v12 }
 0xf9b   : > { %4353 = vmatprep.subr.bf16.mxu0 %v8726_v21  ;;  %4394 = vmatprep.subr.bf16.mxu1 %v8728_v14 }
 0xf9e   : > { %4354 = vmatpush1.bf16.msra.mxu0 %v8730_v59  ;;  %4395 = vmatpush1.bf16.msra.mxu1 %v8732_v38 }
 0xf9f   : > { %4355 = vmatprep.subr.bf16.mxu0 %v8738_v40  ;;  %4396 = vmatprep.subr.bf16.mxu1 %v8740_v50 }
 0xfa2   : > { %4356 = vmatpush1.bf16.msra.mxu0 %v8742_v36  ;;  %4397 = vmatpush1.bf16.msra.mxu1 %v8744_v42 }
 0xfa3   : > { %4451 = vmatprep.subr.bf16.mxu0 %v8654_v44  ;;  %4492 = vmatprep.subr.bf16.mxu1 %v8656_v28 }
0x103d   : > { %v8850_v2 = vpop.f32.mrf.mxu0  ;;  %v8852_v3 = vpop.f32.mrf.mxu1 }
0x103e   : > { %9453 = vst [vmem:[#allocation31_spill] sm:$0xff] %v8850_v2  ;;  %9454 = vst [vmem:[#allocation30_spill] sm:$0xff] %v8852_v3  ;;  %v3887_v3 = vadd.f32 %v3886_v23, %v8859_v47 }
0x103f   : > { %v8854_v4 = vpop.f32.mrf.mxu0  ;;  %v8856_v13 = vpop.f32.mrf.mxu1 }
0x1040   : > { %9455 = vst [vmem:[#allocation35_spill] sm:$0xff] %v8854_v4  ;;  %9456 = vst [vmem:[#allocation32_spill] sm:$0xff] %v8856_v13  ;;  %v8874_v13 = vrot.slane %v3670_v33, %v9463_v30 }
0x1041   : > { %v8861_v41 = vpop.f32.mrf.mxu0  ;;  %v8863_v54 = vpop.f32.mrf.mxu1 }
0x1042   : > { %9458 = vst [vmem:[#allocation33_spill] sm:$0xff] %v8861_v41  ;;  %9459 = vst [vmem:[#allocation34_spill] sm:$0xff] %v8863_v54 }
0x1043   : > { %v8868_v35 = vpop.f32.mrf.mxu0  ;;  %v8870_v48 = vpop.f32.mrf.mxu1 }
0x1044   : > { %9461 = vst [vmem:[#allocation37_spill] sm:$0xff] %v8868_v35  ;;  %9462 = vst [vmem:[#allocation36_spill] sm:$0xff] %v8870_v48  ;;  %v3960_v35 = vadd.f32 %v3959_v6, %v8874_v13  ;;  %v5712_v6 = vld [vmem:[%s9314_s11 + $0x10] sm:$0xff] }
0x1045   : > { %v4265_v2 = vpop.f32.mrf.mxu0  ;;  %v4306_v4 = vpop.f32.mrf.mxu1 }
0x1046   : > { %v4313_v39 = vadd.f32 %v4265_v2, %v3887_v3  ;;  %v4315_v30 = vadd.f32 %v4306_v4, %v3960_v35 }
0x1047   : > { %v4267_v41 = vpop.f32.mrf.mxu0  ;;  %v4308_v43 = vpop.f32.mrf.mxu1 }
0x1048   : > { %v4317_v54 = vmul.f32 0.5, %v4313_v39  ;;  %v4314_v45 = vadd.f32 %v4267_v41, %v3889_v5  ;;  %v4316_v2 = vadd.f32 %v4308_v43, %v3962_v9 }
0x1049   : > { %v4269_v25 = vpop.f32.mrf.mxu0  ;;  %v4310_v7 = vpop.f32.mrf.mxu1 }
0x104a   : > { %6316 = vtanh.f32 %v4317_v54  ;;  %v4321_v48 = vmul.f32 0.5, %v4314_v45  ;;  %v4326_v3 = vmul.f32 0.5, %v4316_v2 }
0x104b   : > { %v4270_v49 = vpop.f32.mrf.mxu0  ;;  %v4311_v23 = vpop.f32.mrf.mxu1 }
0x104c   : > { %6318 = vtanh.f32 %v4321_v48 }
0x104d   : > { %6320 = vtanh.f32 %v4315_v30  ;;  %v3891_v30 = vadd.f32 %v8807_v11, %v8859_v47 }
0x104e   : > { %6322 = vtanh.f32 %v4326_v3  ;;  %v3893_v3 = vadd.f32 %v8811_v15, %v8866_v27  ;;  %v3966_v15 = vadd.f32 %v8813_v32, %v8879_v56 }
0x1057   : > { %v6317_v39 = vpop.eup %6316 }
0x1058   : > { %v4319_v41 = vmul.f32 0.5, %v6317_v39 }
0x1059   : > { %v6319_v5 = vpop.eup %6318 }
0x105a   : > { %v4320_v7 = vadd.f32 0.5, %v4319_v41  ;;  %v4323_v25 = vmul.f32 0.5, %v6319_v5  ;;  %v6321_v61 = vpop.eup %6320 }
0x105b   : > { %v6323_v10 = vpop.eup %6322 }
0x105c   : > { %v4324_v49 = vadd.f32 0.5, %v4323_v25  ;;  %v4331_v35 = vmul.f32 %v6321_v61, %v4320_v7  ;;  %v4328_v43 = vmul.f32 0.5, %v6323_v10  ;;  %v3964_v7 = vadd.f32 %v8809_v18, %v8874_v13 }
0x105e   : > { %v4330_v45 = vmul.f32 %v5712_v6, %v4324_v49  ;;  %v4329_v54 = vadd.f32 0.5, %v4328_v43 }
0x1060   : > { %v8885_v48 = vadd.f32 %v4331_v35, %v4330_v45 }
0x1062   : > { %6324 = vtanh.f32 %v8885_v48 }
0x106f   : > { %v6325_v33 = vpop.eup %6324 }
0x1070   : > { %v8888_v4 = vmul.f32 %v6325_v33, %v4329_v54 }
0x1072   : > { %v4340_v23 = vpack.c.bf16 %v8888_v4, %v8888_v4 }
0x1074   : > { %4374 = vmatmul.mubr.bf16.vlgmr.msra.gmra.mxu0 %v4340_v23  ;;  %4415 = vmatmul.mubr.bf16.vlgmr.msra.gmra.mxu1 %v4340_v23 }
0x1075   : > { %4452 = vmatpush1.bf16.msra.mxu0 %v8658_v8  ;;  %4493 = vmatpush1.bf16.msra.mxu1 %v8660_v31 }
0x1076   : > { %4453 = vmatprep.subr.bf16.mxu0 %v8666_v46  ;;  %4494 = vmatprep.subr.bf16.mxu1 %v8668_v24 }
0x1077   : > { %4483 = vmatprep.mubr.bf16.mxu0 %v9369_v34  ;;  %4524 = vmatprep.mubr.bf16.mxu1 %v9369_v34 }
0x1079   : > { %4454 = vmatpush1.bf16.msra.mxu0 %v8670_v29  ;;  %4495 = vmatpush1.bf16.msra.mxu1 %v8672_v37 }
0x107a   : > { %4455 = vmatprep.subr.bf16.mxu0 %v8678_v58  ;;  %4496 = vmatprep.subr.bf16.mxu1 %v8680_v62 }
0x107d   : > { %4456 = vmatpush1.bf16.msra.mxu0 %v8682_v0  ;;  %4497 = vmatpush1.bf16.msra.mxu1 %v8684_v57 }
0x107e   : > { %4457 = vmatprep.subr.bf16.mxu0 %v8690_v60  ;;  %4498 = vmatprep.subr.bf16.mxu1 %v8692_v20 }
0x1081   : > { %4458 = vmatpush1.bf16.msra.mxu0 %v8694_v19  ;;  %4499 = vmatpush1.bf16.msra.mxu1 %v8696_v53 }
0x1082   : > { %4459 = vmatprep.subr.bf16.mxu0 %v8702_v55  ;;  %4500 = vmatprep.subr.bf16.mxu1 %v8704_v52 }
0x1085   : > { %4460 = vmatpush1.bf16.msra.mxu0 %v8706_v63  ;;  %4501 = vmatpush1.bf16.msra.mxu1 %v8708_v1 }
0x1086   : > { %4461 = vmatprep.subr.bf16.mxu0 %v8714_v16  ;;  %4502 = vmatprep.subr.bf16.mxu1 %v8716_v22 }
0x1089   : > { %4462 = vmatpush1.bf16.msra.mxu0 %v8718_v26  ;;  %4503 = vmatpush1.bf16.msra.mxu1 %v8720_v12 }
0x108a   : > { %4463 = vmatprep.subr.bf16.mxu0 %v8726_v21  ;;  %4504 = vmatprep.subr.bf16.mxu1 %v8728_v14 }
0x108d   : > { %4464 = vmatpush1.bf16.msra.mxu0 %v8730_v59  ;;  %4505 = vmatpush1.bf16.msra.mxu1 %v8732_v38 }
0x108e   : > { %4465 = vmatprep.subr.bf16.mxu0 %v8738_v40  ;;  %4506 = vmatprep.subr.bf16.mxu1 %v8740_v50 }
0x1091   : > { %4466 = vmatpush1.bf16.msra.mxu0 %v8742_v36  ;;  %4507 = vmatpush1.bf16.msra.mxu1 %v8744_v42 }
0x1092   : > { %4561 = vmatprep.subr.bf16.mxu0 %v8654_v44  ;;  %4602 = vmatprep.subr.bf16.mxu1 %v8656_v28 }
0x1134   : > { %v4375_v9 = vpop.f32.mrf.mxu0  ;;  %v4416_v2 = vpop.f32.mrf.mxu1 }
0x1135   : > { %v4423_v39 = vadd.f32 %v4375_v9, %v3891_v30  ;;  %v4425_v45 = vadd.f32 %v4416_v2, %v3964_v7 }
0x1136   : > { %v4377_v41 = vpop.f32.mrf.mxu0  ;;  %v4418_v5 = vpop.f32.mrf.mxu1 }
0x1137   : > { %v4427_v25 = vmul.f32 0.5, %v4423_v39  ;;  %v4424_v6 = vadd.f32 %v4377_v41, %v3893_v3  ;;  %v4426_v43 = vadd.f32 %v4418_v5, %v3966_v15 }
0x1138   : > { %v4379_v49 = vpop.f32.mrf.mxu0  ;;  %v4420_v61 = vpop.f32.mrf.mxu1 }
0x1139   : > { %6326 = vtanh.f32 %v4427_v25  ;;  %v4431_v35 = vmul.f32 0.5, %v4424_v6  ;;  %v4436_v54 = vmul.f32 0.5, %v4426_v43 }
0x113a   : > { %v4380_v10 = vpop.f32.mrf.mxu0  ;;  %v4421_v11 = vpop.f32.mrf.mxu1 }
0x113b   : > { %6328 = vtanh.f32 %v4431_v35  ;;  %v3899_v10 = vadd.f32 %v8819_v51, %v8866_v27 }
0x113c   : > { %6330 = vtanh.f32 %v4425_v45 }
0x113d   : > { %6332 = vtanh.f32 %v4436_v54  ;;  %v9464_v54 = vld [vmem:[#allocation16_spill] sm:$0xff] }
0x1146   : > { %v6327_v33 = vpop.eup %6326 }
0x1147   : > { %v4429_v23 = vmul.f32 0.5, %v6327_v33  ;;  %v3970_v33 = vadd.f32 %v9464_v54, %v8874_v13 }
0x1148   : > { %v6329_v30 = vpop.eup %6328 }
0x1149   : > { %v4430_v18 = vadd.f32 0.5, %v4429_v23  ;;  %v4433_v9 = vmul.f32 0.5, %v6329_v30  ;;  %v6331_v3 = vpop.eup %6330 }
0x114a   : > { %v6333_v25 = vpop.eup %6332 }
0x114b   : > { %v4434_v39 = vadd.f32 0.5, %v4433_v9  ;;  %v4441_v41 = vmul.f32 %v6331_v3, %v4430_v18  ;;  %v4438_v6 = vmul.f32 0.5, %v6333_v25 }
0x114d   : > { %v4440_v2 = vmul.f32 %v4434_v39, %v8885_v48  ;;  %v4439_v32 = vadd.f32 0.5, %v4438_v6  ;;  %v3897_v48 = vadd.f32 %v8815_v17, %v8859_v47 }
0x114f   : > { %v8935_v7 = vadd.f32 %v4441_v41, %v4440_v2  ;;  %v9465_v2 = vld [vmem:[#allocation19_spill] sm:$0xff] }
0x1150   : > { %v3972_v51 = vadd.f32 %v9465_v2, %v8879_v56 }
0x1151   : > { %6334 = vtanh.f32 %v8935_v7 }
0x115e   : > { %v6335_v5 = vpop.eup %6334 }
0x115f   : > { %v4444_v49 = vmul.f32 %v6335_v5, %v4439_v32 }
0x1161   : > { %v4450_v61 = vpack.c.bf16 %v4444_v49, %v4444_v49  ;;  %v5793_v45 = vpack.c.bf16 %v4444_v49, %v8888_v4 }
0x1163   : > { %5794 = vst [vmem:[#allocation4] sm:$0xff] %v5793_v45   ;;  %4484 = vmatmul.mubr.bf16.vlgmr.msra.gmra.mxu0 %v4450_v61  ;;  %4525 = vmatmul.mubr.bf16.vlgmr.msra.gmra.mxu1 %v4450_v61 }
0x1164   : > { %4562 = vmatpush1.bf16.msra.mxu0 %v8658_v8  ;;  %4603 = vmatpush1.bf16.msra.mxu1 %v8660_v31 }
0x1165   : > { %4563 = vmatprep.subr.bf16.mxu0 %v8666_v46  ;;  %4604 = vmatprep.subr.bf16.mxu1 %v8668_v24 }
0x1166   : > { %4593 = vmatprep.mubr.bf16.mxu0 %v9369_v34  ;;  %4634 = vmatprep.mubr.bf16.mxu1 %v9369_v34 }
0x1168   : > { %4564 = vmatpush1.bf16.msra.mxu0 %v8670_v29  ;;  %4605 = vmatpush1.bf16.msra.mxu1 %v8672_v37 }
0x1169   : > { %4565 = vmatprep.subr.bf16.mxu0 %v8678_v58  ;;  %4606 = vmatprep.subr.bf16.mxu1 %v8680_v62 }
0x116c   : > { %4566 = vmatpush1.bf16.msra.mxu0 %v8682_v0  ;;  %4607 = vmatpush1.bf16.msra.mxu1 %v8684_v57 }
0x116d   : > { %4567 = vmatprep.subr.bf16.mxu0 %v8690_v60  ;;  %4608 = vmatprep.subr.bf16.mxu1 %v8692_v20 }
0x1170   : > { %4568 = vmatpush1.bf16.msra.mxu0 %v8694_v19  ;;  %4609 = vmatpush1.bf16.msra.mxu1 %v8696_v53 }
0x1171   : > { %4569 = vmatprep.subr.bf16.mxu0 %v8702_v55  ;;  %4610 = vmatprep.subr.bf16.mxu1 %v8704_v52 }
0x1174   : > { %4570 = vmatpush1.bf16.msra.mxu0 %v8706_v63  ;;  %4611 = vmatpush1.bf16.msra.mxu1 %v8708_v1 }
0x1175   : > { %4571 = vmatprep.subr.bf16.mxu0 %v8714_v16  ;;  %4612 = vmatprep.subr.bf16.mxu1 %v8716_v22 }
0x1178   : > { %4572 = vmatpush1.bf16.msra.mxu0 %v8718_v26  ;;  %4613 = vmatpush1.bf16.msra.mxu1 %v8720_v12 }
0x1179   : > { %4573 = vmatprep.subr.bf16.mxu0 %v8726_v21  ;;  %4614 = vmatprep.subr.bf16.mxu1 %v8728_v14 }
0x117c   : > { %4574 = vmatpush1.bf16.msra.mxu0 %v8730_v59  ;;  %4615 = vmatpush1.bf16.msra.mxu1 %v8732_v38 }
0x117d   : > { %4575 = vmatprep.subr.bf16.mxu0 %v8738_v40  ;;  %4616 = vmatprep.subr.bf16.mxu1 %v8740_v50 }
0x1180   : > { %4576 = vmatpush1.bf16.msra.mxu0 %v8742_v36  ;;  %4617 = vmatpush1.bf16.msra.mxu1 %v8744_v42 }
0x1181   : > { %4671 = vmatprep.subr.bf16.mxu0 %v8654_v44  ;;  %4712 = vmatprep.subr.bf16.mxu1 %v8656_v28 }
0x1223   : > { %v4485_v4 = vpop.f32.mrf.mxu0  ;;  %v4526_v35 = vpop.f32.mrf.mxu1 }
0x1224   : > { %v4533_v11 = vadd.f32 %v4485_v4, %v3897_v48  ;;  %v4535_v3 = vadd.f32 %v4526_v35, %v3970_v33 }
0x1225   : > { %v4487_v15 = vpop.f32.mrf.mxu0  ;;  %v4528_v43 = vpop.f32.mrf.mxu1 }
0x1226   : > { %v4537_v23 = vmul.f32 0.5, %v4533_v11  ;;  %v4534_v30 = vadd.f32 %v4487_v15, %v3899_v10  ;;  %v4536_v25 = vadd.f32 %v4528_v43, %v3972_v51 }
0x1227   : > { %v4489_v18 = vpop.f32.mrf.mxu0  ;;  %v4530_v9 = vpop.f32.mrf.mxu1 }
0x1228   : > { %6336 = vtanh.f32 %v4537_v23  ;;  %v4541_v39 = vmul.f32 0.5, %v4534_v30  ;;  %v4546_v6 = vmul.f32 0.5, %v4536_v25  ;;  %v9468_v25 = vld [vmem:[#allocation18_spill] sm:$0xff] }
0x1229   : > { %v4490_v41 = vpop.f32.mrf.mxu0  ;;  %v4531_v17 = vpop.f32.mrf.mxu1 }
0x122a   : > { %6338 = vtanh.f32 %v4541_v39  ;;  %v9467_v39 = vld [vmem:[#allocation21_spill] sm:$0xff] }
0x122b   : > { %6340 = vtanh.f32 %v4535_v3  ;;  %v3903_v41 = vadd.f32 %v9467_v39, %v8866_v27 }
0x122c   : > { %6342 = vtanh.f32 %v4546_v6  ;;  %v3974_v6 = vadd.f32 %v9468_v25, %v8874_v13 }
0x1235   : > { %v6337_v32 = vpop.eup %6336 }
0x1236   : > { %v4539_v5 = vmul.f32 0.5, %v6337_v32 }
0x1237   : > { %v6339_v49 = vpop.eup %6338 }
0x1238   : > { %v4540_v61 = vadd.f32 0.5, %v4539_v5  ;;  %v4543_v45 = vmul.f32 0.5, %v6339_v49  ;;  %v6341_v48 = vpop.eup %6340 }
0x1239   : > { %v6343_v15 = vpop.eup %6342 }
0x123a   : > { %v4544_v4 = vadd.f32 0.5, %v4543_v45  ;;  %v4551_v10 = vmul.f32 %v6341_v48, %v4540_v61  ;;  %v4548_v54 = vmul.f32 0.5, %v6343_v15 }
0x123c   : > { %v4550_v35 = vmul.f32 %v4544_v4, %v8935_v7  ;;  %v4549_v33 = vadd.f32 0.5, %v4548_v54  ;;  %v9466_v7 = vld [vmem:[#allocation17_spill] sm:$0xff] }
0x123d   : > { %v3901_v18 = vadd.f32 %v9466_v7, %v8859_v47 }
0x123e   : > { %v8982_v11 = vadd.f32 %v4551_v10, %v4550_v35  ;;  %v9469_v35 = vld [vmem:[#allocation20_spill] sm:$0xff] }
0x123f   : > { %v3976_v15 = vadd.f32 %v9469_v35, %v8879_v56 }
0x1240   : > { %6344 = vtanh.f32 %v8982_v11 }
0x124d   : > { %v6345_v43 = vpop.eup %6344 }
0x124e   : > { %v8985_v23 = vmul.f32 %v6345_v43, %v4549_v33 }
0x1250   : > { %v4560_v30 = vpack.c.bf16 %v8985_v23, %v8985_v23 }
0x1252   : > { %4594 = vmatmul.mubr.bf16.vlgmr.msra.gmra.mxu0 %v4560_v30  ;;  %4635 = vmatmul.mubr.bf16.vlgmr.msra.gmra.mxu1 %v4560_v30 }
0x1253   : > { %4672 = vmatpush1.bf16.msra.mxu0 %v8658_v8  ;;  %4713 = vmatpush1.bf16.msra.mxu1 %v8660_v31 }
0x1254   : > { %4673 = vmatprep.subr.bf16.mxu0 %v8666_v46  ;;  %4714 = vmatprep.subr.bf16.mxu1 %v8668_v24 }
0x1255   : > { %4703 = vmatprep.mubr.bf16.mxu0 %v9369_v34  ;;  %4744 = vmatprep.mubr.bf16.mxu1 %v9369_v34 }
0x1257   : > { %4674 = vmatpush1.bf16.msra.mxu0 %v8670_v29  ;;  %4715 = vmatpush1.bf16.msra.mxu1 %v8672_v37 }
0x1258   : > { %4675 = vmatprep.subr.bf16.mxu0 %v8678_v58  ;;  %4716 = vmatprep.subr.bf16.mxu1 %v8680_v62 }
0x125b   : > { %4676 = vmatpush1.bf16.msra.mxu0 %v8682_v0  ;;  %4717 = vmatpush1.bf16.msra.mxu1 %v8684_v57 }
0x125c   : > { %4677 = vmatprep.subr.bf16.mxu0 %v8690_v60  ;;  %4718 = vmatprep.subr.bf16.mxu1 %v8692_v20 }
0x125f   : > { %4678 = vmatpush1.bf16.msra.mxu0 %v8694_v19  ;;  %4719 = vmatpush1.bf16.msra.mxu1 %v8696_v53 }
0x1260   : > { %4679 = vmatprep.subr.bf16.mxu0 %v8702_v55  ;;  %4720 = vmatprep.subr.bf16.mxu1 %v8704_v52 }
0x1263   : > { %4680 = vmatpush1.bf16.msra.mxu0 %v8706_v63  ;;  %4721 = vmatpush1.bf16.msra.mxu1 %v8708_v1 }
0x1264   : > { %4681 = vmatprep.subr.bf16.mxu0 %v8714_v16  ;;  %4722 = vmatprep.subr.bf16.mxu1 %v8716_v22 }
0x1267   : > { %4682 = vmatpush1.bf16.msra.mxu0 %v8718_v26  ;;  %4723 = vmatpush1.bf16.msra.mxu1 %v8720_v12 }
0x1268   : > { %4683 = vmatprep.subr.bf16.mxu0 %v8726_v21  ;;  %4724 = vmatprep.subr.bf16.mxu1 %v8728_v14 }
0x126b   : > { %4684 = vmatpush1.bf16.msra.mxu0 %v8730_v59  ;;  %4725 = vmatpush1.bf16.msra.mxu1 %v8732_v38 }
0x126c   : > { %4685 = vmatprep.subr.bf16.mxu0 %v8738_v40  ;;  %4726 = vmatprep.subr.bf16.mxu1 %v8740_v50 }
0x126f   : > { %4686 = vmatpush1.bf16.msra.mxu0 %v8742_v36  ;;  %4727 = vmatpush1.bf16.msra.mxu1 %v8744_v42 }
0x1270   : > { %4781 = vmatprep.subr.bf16.mxu0 %v8654_v44  ;;  %4822 = vmatprep.subr.bf16.mxu1 %v8656_v28 }
0x1312   : > { %v4595_v9 = vpop.f32.mrf.mxu0  ;;  %v4636_v3 = vpop.f32.mrf.mxu1 }
0x1313   : > { %v4643_v17 = vadd.f32 %v4595_v9, %v3901_v18  ;;  %v4645_v45 = vadd.f32 %v4636_v3, %v3974_v6 }
0x1314   : > { %v4597_v2 = vpop.f32.mrf.mxu0  ;;  %v4638_v51 = vpop.f32.mrf.mxu1 }
0x1315   : > { %v4647_v32 = vmul.f32 0.5, %v4643_v17  ;;  %v4644_v5 = vadd.f32 %v4597_v2, %v3903_v41  ;;  %v4646_v54 = vadd.f32 %v4638_v51, %v3976_v15 }
0x1316   : > { %v4599_v49 = vpop.f32.mrf.mxu0  ;;  %v4640_v61 = vpop.f32.mrf.mxu1 }
0x1317   : > { %6346 = vtanh.f32 %v4647_v32  ;;  %v4651_v48 = vmul.f32 0.5, %v4644_v5  ;;  %v4656_v33 = vmul.f32 0.5, %v4646_v54 }
0x1318   : > { %v4600_v4 = vpop.f32.mrf.mxu0  ;;  %v4641_v10 = vpop.f32.mrf.mxu1 }
0x1319   : > { %6348 = vtanh.f32 %v4651_v48 }
0x131a   : > { %6350 = vtanh.f32 %v4645_v45 }
0x131b   : > { %6352 = vtanh.f32 %v4656_v33 }
0x1324   : > { %v6347_v43 = vpop.eup %6346 }
0x1325   : > { %v4649_v30 = vmul.f32 0.5, %v6347_v43 }
0x1326   : > { %v6349_v7 = vpop.eup %6348 }
0x1327   : > { %v4650_v18 = vadd.f32 0.5, %v4649_v30  ;;  %v4653_v9 = vmul.f32 0.5, %v6349_v7  ;;  %v6351_v39 = vpop.eup %6350  ;;  %v9086_v30 = vld [vmem:[#allocation5 + $0xe0] ss:$16 sps:$4 sm:$0xff]   ;;  %v9089_v7 = vld [vmem:[#allocation5 + $0xe8] ss:$16 sps:$4 sm:$0xff]  }
0x1328   : > { %v6353_v25 = vpop.eup %6352 }
0x1329   : > { %v4654_v41 = vadd.f32 0.5, %v4653_v9  ;;  %v4661_v17 = vmul.f32 %v6351_v39, %v4650_v18  ;;  %v4658_v6 = vmul.f32 0.5, %v6353_v25  ;;  %v9092_v18 = vld [vmem:[#allocation5 + $0xc4] ss:$16 sps:$4 sm:$0xff]   ;;  %v9095_v9 = vld [vmem:[#allocation5 + $0xcc] ss:$16 sps:$4 sm:$0xff]  }
0x132a   : > { %v9100_v39 = vld [vmem:[#allocation5 + $0xc0] ss:$16 sps:$4 sm:$0xff]   ;;  %v9115_v25 = vld [vmem:[#allocation5 + $0xa8] ss:$16 sps:$4 sm:$0xff]  }
0x132b   : > { %v4660_v3 = vmul.f32 %v4654_v41, %v8982_v11  ;;  %v4659_v32 = vadd.f32 0.5, %v4658_v6  ;;  %v9103_v41 = vld [vmem:[#allocation5 + $0xc8] ss:$16 sps:$4 sm:$0xff]   ;;  %v9118_v6 = vld [vmem:[#allocation5 + $0x84] ss:$16 sps:$4 sm:$0xff]  }
0x132d   : > { %v9032_v2 = vadd.f32 %v4661_v17, %v4660_v3  ;;  %v9106_v17 = vld [vmem:[#allocation5 + $0xa4] ss:$16 sps:$4 sm:$0xff]   ;;  %v9109_v3 = vld [vmem:[#allocation5 + $0xac] ss:$16 sps:$4 sm:$0xff]  }
0x132f   : > { %6354 = vtanh.f32 %v9032_v2 }
0x133c   : > { %v6355_v51 = vpop.eup %6354 }
0x133d   : > { %v4664_v5 = vmul.f32 %v6355_v51, %v4659_v32  ;;  %v9121_v32 = vld [vmem:[#allocation5 + $0x8c] ss:$16 sps:$4 sm:$0xff]   ;;  %v9124_v51 = vld [vmem:[#allocation5 + $0x80] ss:$16 sps:$4 sm:$0xff]  }
0x133f   : > { %v4670_v49 = vpack.c.bf16 %v4664_v5, %v4664_v5  ;;  %v5798_v61 = vpack.c.bf16 %v4664_v5, %v8985_v23  ;;  %v9127_v5 = vld [vmem:[#allocation5 + $0x88] ss:$16 sps:$4 sm:$0xff]  }
0x1341   : > { %5810 = vst [vmem:[#allocation4 + $0x8] sm:$0xff] %v5798_v61   ;;  %4704 = vmatmul.mubr.bf16.vlgmr.msra.gmra.mxu0 %v4670_v49  ;;  %4745 = vmatmul.mubr.bf16.vlgmr.msra.gmra.mxu1 %v4670_v49  ;;  %v9130_v49 = vld [vmem:[#allocation5 + $0x64] ss:$16 sps:$4 sm:$0xff]   ;;  %v9133_v61 = vld [vmem:[#allocation5 + $0x6c] ss:$16 sps:$4 sm:$0xff]  }
0x1342   : > { %4782 = vmatpush1.bf16.msra.mxu0 %v8658_v8  ;;  %4823 = vmatpush1.bf16.msra.mxu1 %v8660_v31  ;;  %v9470_v8 = vld [vmem:[#allocation23_spill] sm:$0xff] }
0x1343   : > { %4783 = vmatprep.subr.bf16.mxu0 %v8666_v46  ;;  %4824 = vmatprep.subr.bf16.mxu1 %v8668_v24  ;;  %v3907_v31 = vadd.f32 %v9470_v8, %v8859_v47  ;;  %v9136_v8 = vld [vmem:[#allocation5 + $0x60] ss:$16 sps:$4 sm:$0xff]  }
0x1344   : > { %4813 = vmatprep.mubr.bf16.mxu0 %v9369_v34  ;;  %4854 = vmatprep.mubr.bf16.mxu1 %v9369_v34 }
0x1346   : > { %4784 = vmatpush1.bf16.msra.mxu0 %v8670_v29  ;;  %4825 = vmatpush1.bf16.msra.mxu1 %v8672_v37  ;;  %v9471_v29 = vld [vmem:[#allocation27_spill] sm:$0xff] }
0x1347   : > { %4785 = vmatprep.subr.bf16.mxu0 %v8678_v58  ;;  %4826 = vmatprep.subr.bf16.mxu1 %v8680_v62  ;;  %v3909_v37 = vadd.f32 %v9471_v29, %v8866_v27  ;;  %v9148_v29 = vld [vmem:[#allocation5 + $0x40] ss:$16 sps:$4 sm:$0xff]  }
0x134a   : > { %4786 = vmatpush1.bf16.msra.mxu0 %v8682_v0  ;;  %4827 = vmatpush1.bf16.msra.mxu1 %v8684_v57  ;;  %v9472_v57 = vld [vmem:[#allocation22_spill] sm:$0xff] }
0x134b   : > { %4787 = vmatprep.subr.bf16.mxu0 %v8690_v60  ;;  %4828 = vmatprep.subr.bf16.mxu1 %v8692_v20  ;;  %v3980_v60 = vadd.f32 %v9472_v57, %v8874_v13  ;;  %v9163_v57 = vld [vmem:[#allocation5 + $0x28] ss:$16 sps:$4 sm:$0xff]  }
0x134e   : > { %4788 = vmatpush1.bf16.msra.mxu0 %v8694_v19  ;;  %4829 = vmatpush1.bf16.msra.mxu1 %v8696_v53 }
0x134f   : > { %4789 = vmatprep.subr.bf16.mxu0 %v8702_v55  ;;  %4830 = vmatprep.subr.bf16.mxu1 %v8704_v52 }
0x1352   : > { %4790 = vmatpush1.bf16.msra.mxu0 %v8706_v63  ;;  %4831 = vmatpush1.bf16.msra.mxu1 %v8708_v1  ;;  %v9473_v1 = vld [vmem:[#allocation24_spill] sm:$0xff] }
0x1353   : > { %4791 = vmatprep.subr.bf16.mxu0 %v8714_v16  ;;  %4832 = vmatprep.subr.bf16.mxu1 %v8716_v22  ;;  %v3982_v16 = vadd.f32 %v9473_v1, %v8879_v56 }
0x1356   : > { %4792 = vmatpush1.bf16.msra.mxu0 %v8718_v26  ;;  %4833 = vmatpush1.bf16.msra.mxu1 %v8720_v12 }
0x1357   : > { %4793 = vmatprep.subr.bf16.mxu0 %v8726_v21  ;;  %4834 = vmatprep.subr.bf16.mxu1 %v8728_v14 }
0x135a   : > { %4794 = vmatpush1.bf16.msra.mxu0 %v8730_v59  ;;  %4835 = vmatpush1.bf16.msra.mxu1 %v8732_v38 }
0x135b   : > { %4795 = vmatprep.subr.bf16.mxu0 %v8738_v40  ;;  %4836 = vmatprep.subr.bf16.mxu1 %v8740_v50 }
0x135e   : > { %4796 = vmatpush1.bf16.msra.mxu0 %v8742_v36  ;;  %4837 = vmatpush1.bf16.msra.mxu1 %v8744_v42 }
0x135f   : > { %4891 = vmatprep.subr.bf16.mxu0 %v8654_v44  ;;  %4932 = vmatprep.subr.bf16.mxu1 %v8656_v28 }
0x1401   : > { %v4705_v46 = vpop.f32.mrf.mxu0  ;;  %v4746_v24 = vpop.f32.mrf.mxu1 }
0x1402   : > { %v4753_v58 = vadd.f32 %v4705_v46, %v3907_v31  ;;  %v4755_v28 = vadd.f32 %v4746_v24, %v3980_v60  ;;  %v9139_v31 = vld [vmem:[#allocation5 + $0x68] ss:$16 sps:$4 sm:$0xff]   ;;  %v9142_v46 = vld [vmem:[#allocation5 + $0x44] ss:$16 sps:$4 sm:$0xff]   ;;  %v9145_v24 = vld [vmem:[#allocation5 + $0x4c] ss:$16 sps:$4 sm:$0xff]  }
0x1403   : > { %v4707_v62 = vpop.f32.mrf.mxu0  ;;  %v4748_v0 = vpop.f32.mrf.mxu1  ;;  %v6486_v60 = vld [vmem:[#allocation5 + $0xe4] ss:$16 sps:$4 sm:$0xff]  }
0x1404   : > { %v4757_v20 = vmul.f32 0.5, %v4753_v58  ;;  %v4754_v19 = vadd.f32 %v4707_v62, %v3909_v37  ;;  %v4756_v22 = vadd.f32 %v4748_v0, %v3982_v16  ;;  %v9151_v37 = vld [vmem:[#allocation5 + $0x48] ss:$16 sps:$4 sm:$0xff]   ;;  %v9154_v58 = vld [vmem:[#allocation5 + $0x24] ss:$16 sps:$4 sm:$0xff]  }
0x1405   : > { %v4709_v53 = vpop.f32.mrf.mxu0  ;;  %v4750_v44 = vpop.f32.mrf.mxu1  ;;  %v9157_v62 = vld [vmem:[#allocation5 + $0x2c] ss:$16 sps:$4 sm:$0xff]   ;;  %v9160_v0 = vld [vmem:[#allocation5 + $0x20] ss:$16 sps:$4 sm:$0xff]  }
0x1406   : > { %6356 = vtanh.f32 %v4757_v20  ;;  %v4761_v55 = vmul.f32 0.5, %v4754_v19  ;;  %v4766_v26 = vmul.f32 0.5, %v4756_v22  ;;  %v6487_v20 = vld [vmem:[#allocation5 + $0xec] ss:$16 sps:$4 sm:$0xff]   ;;  %v9474_v19 = vld [vmem:[#allocation25_spill] sm:$0xff] }
0x1407   : > { %v4710_v52 = vpop.f32.mrf.mxu0  ;;  %v4751_v63 = vpop.f32.mrf.mxu1  ;;  %v3911_v53 = vadd.f32 %v9474_v19, %v8859_v47 }
0x1408   : > { %6358 = vtanh.f32 %v4761_v55  ;;  %v9475_v55 = vld [vmem:[#allocation29_spill] sm:$0xff] }
0x1409   : > { %6360 = vtanh.f32 %v4755_v28  ;;  %v3913_v52 = vadd.f32 %v9475_v55, %v8866_v27 }
0x140a   : > { %6362 = vtanh.f32 %v4766_v26 }
0x1413   : > { %v6357_v12 = vpop.eup %6356 }
0x1414   : > { %v4759_v21 = vmul.f32 0.5, %v6357_v12 }
0x1415   : > { %v6359_v14 = vpop.eup %6358 }
0x1416   : > { %v4760_v59 = vadd.f32 0.5, %v4759_v21  ;;  %v4763_v38 = vmul.f32 0.5, %v6359_v14  ;;  %v6361_v11 = vpop.eup %6360 }
0x1417   : > { %v6363_v10 = vpop.eup %6362 }
0x1418   : > { %v4764_v23 = vadd.f32 0.5, %v4763_v38  ;;  %v4771_v45 = vmul.f32 %v6361_v11, %v4760_v59  ;;  %v4768_v35 = vmul.f32 0.5, %v6363_v10  ;;  %v9477_v38 = vld [vmem:[#allocation28_spill] sm:$0xff] }
0x1419   : > { %v3986_v11 = vadd.f32 %v9477_v38, %v8879_v56 }
0x141a   : > { %v4770_v48 = vmul.f32 %v4764_v23, %v9032_v2  ;;  %v4769_v15 = vadd.f32 0.5, %v4768_v35  ;;  %v9112_v2 = vld [vmem:[#allocation5 + $0xa0] ss:$16 sps:$4 sm:$0xff]  }
0x141c   : > { %v9079_v4 = vadd.f32 %v4771_v45, %v4770_v48 }
0x141e   : > { %6364 = vtanh.f32 %v9079_v4 }
0x142b   : > { %v6365_v54 = vpop.eup %6364 }
0x142c   : > { %v9082_v33 = vmul.f32 %v6365_v54, %v4769_v15 }
0x142e   : > { %v4780_v43 = vpack.c.bf16 %v9082_v33, %v9082_v33 }
0x1430   : > { %4814 = vmatmul.mubr.bf16.vlgmr.msra.gmra.mxu0 %v4780_v43  ;;  %4855 = vmatmul.mubr.bf16.vlgmr.msra.gmra.mxu1 %v4780_v43 }
0x1431   : > { %4892 = vmatpush1.bf16.msra.mxu0 %v9086_v30  ;;  %4933 = vmatpush1.bf16.msra.mxu1 %v9089_v7 }
0x1432   : > { %4893 = vmatprep.subr.bf16.mxu0 %v9092_v18  ;;  %4934 = vmatprep.subr.bf16.mxu1 %v9095_v9 }
0x1433   : > { %4923 = vmatprep.mubr.bf16.mxu0 %v9369_v34  ;;  %4964 = vmatprep.mubr.bf16.mxu1 %v9369_v34 }
0x1435   : > { %4894 = vmatpush1.bf16.msra.mxu0 %v9100_v39  ;;  %4935 = vmatpush1.bf16.msra.mxu1 %v9103_v41 }
0x1436   : > { %4895 = vmatprep.subr.bf16.mxu0 %v9106_v17  ;;  %4936 = vmatprep.subr.bf16.mxu1 %v9109_v3 }
0x1439   : > { %4896 = vmatpush1.bf16.msra.mxu0 %v9112_v2  ;;  %4937 = vmatpush1.bf16.msra.mxu1 %v9115_v25 }
0x143a   : > { %4897 = vmatprep.subr.bf16.mxu0 %v9118_v6  ;;  %4938 = vmatprep.subr.bf16.mxu1 %v9121_v32 }
0x143d   : > { %4898 = vmatpush1.bf16.msra.mxu0 %v9124_v51  ;;  %4939 = vmatpush1.bf16.msra.mxu1 %v9127_v5 }
0x143e   : > { %4899 = vmatprep.subr.bf16.mxu0 %v9130_v49  ;;  %4940 = vmatprep.subr.bf16.mxu1 %v9133_v61 }
0x1441   : > { %4900 = vmatpush1.bf16.msra.mxu0 %v9136_v8  ;;  %4941 = vmatpush1.bf16.msra.mxu1 %v9139_v31 }
0x1442   : > { %4901 = vmatprep.subr.bf16.mxu0 %v9142_v46  ;;  %4942 = vmatprep.subr.bf16.mxu1 %v9145_v24 }
0x1445   : > { %4902 = vmatpush1.bf16.msra.mxu0 %v9148_v29  ;;  %4943 = vmatpush1.bf16.msra.mxu1 %v9151_v37 }
0x1446   : > { %4903 = vmatprep.subr.bf16.mxu0 %v9154_v58  ;;  %4944 = vmatprep.subr.bf16.mxu1 %v9157_v62 }
0x1449   : > { %4904 = vmatpush1.bf16.msra.mxu0 %v9160_v0  ;;  %4945 = vmatpush1.bf16.msra.mxu1 %v9163_v57 }
0x144a   : > { %4905 = vmatprep.subr.bf16.mxu0 %v8738_v40  ;;  %4946 = vmatprep.subr.bf16.mxu1 %v8740_v50  ;;  %v9476_v50 = vld [vmem:[#allocation26_spill] sm:$0xff] }
0x144d   : > { %4906 = vmatpush1.bf16.msra.mxu0 %v8742_v36  ;;  %4947 = vmatpush1.bf16.msra.mxu1 %v8744_v42  ;;  %v3984_v36 = vadd.f32 %v9476_v50, %v8874_v13 }
0x144e   : > { %5001 = vmatprep.subr.bf16.mxu0 %v6486_v60  ;;  %5042 = vmatprep.subr.bf16.mxu1 %v6487_v20 }
0x14f0   : > { %v4815_v44 = vpop.f32.mrf.mxu0  ;;  %v4856_v28 = vpop.f32.mrf.mxu1 }
0x14f1   : > { %v4863_v63 = vadd.f32 %v4815_v44, %v3911_v53  ;;  %v4865_v12 = vadd.f32 %v4856_v28, %v3984_v36 }
0x14f2   : > { %v4817_v40 = vpop.f32.mrf.mxu0  ;;  %v4858_v1 = vpop.f32.mrf.mxu1 }
0x14f3   : > { %v4867_v16 = vmul.f32 0.5, %v4863_v63  ;;  %v4864_v42 = vadd.f32 %v4817_v40, %v3913_v52  ;;  %v4866_v23 = vadd.f32 %v4858_v1, %v3986_v11 }
0x14f4   : > { %v4819_v22 = vpop.f32.mrf.mxu0  ;;  %v4860_v26 = vpop.f32.mrf.mxu1 }
0x14f5   : > { %6366 = vtanh.f32 %v4867_v16  ;;  %v4871_v21 = vmul.f32 0.5, %v4864_v42  ;;  %v4876_v45 = vmul.f32 0.5, %v4866_v23 }
0x14f6   : > { %v4820_v14 = vpop.f32.mrf.mxu0  ;;  %v4861_v59 = vpop.f32.mrf.mxu1 }
0x14f7   : > { %6368 = vtanh.f32 %v4871_v21 }
0x14f8   : > { %6370 = vtanh.f32 %v4865_v12 }
0x14f9   : > { %6372 = vtanh.f32 %v4876_v45 }
0x1502   : > { %v6367_v48 = vpop.eup %6366 }
0x1503   : > { %v4869_v10 = vmul.f32 0.5, %v6367_v48  ;;  %v9482_v48 = vld [vmem:[#allocation33_spill] sm:$0xff] }
0x1504   : > { %v6369_v35 = vpop.eup %6368 }
0x1505   : > { %v4870_v15 = vadd.f32 0.5, %v4869_v10  ;;  %v4873_v54 = vmul.f32 0.5, %v6369_v35  ;;  %v6371_v43 = vpop.eup %6370  ;;  %v3921_v10 = vadd.f32 %v9482_v48, %v8859_v47 }
0x1506   : > { %v6373_v44 = vpop.eup %6372 }
0x1507   : > { %v4874_v60 = vadd.f32 0.5, %v4873_v54  ;;  %v4881_v20 = vmul.f32 %v6371_v43, %v4870_v15  ;;  %v4878_v28 = vmul.f32 0.5, %v6373_v44  ;;  %v9483_v54 = vld [vmem:[#allocation37_spill] sm:$0xff] }
0x1508   : > { %v3923_v43 = vadd.f32 %v9483_v54, %v8866_v27 }
0x1509   : > { %v4880_v19 = vmul.f32 %v4874_v60, %v9079_v4  ;;  %v4879_v55 = vadd.f32 0.5, %v4878_v28  ;;  %v6489_v4 = vld [vmem:[#allocation5 + $0xc] ss:$16 sps:$4 sm:$0xff]  }
0x150b   : > { %v9179_v53 = vadd.f32 %v4881_v20, %v4880_v19 }
0x150d   : > { %6374 = vtanh.f32 %v9179_v53 }
0x151a   : > { %v6375_v52 = vpop.eup %6374 }
0x151b   : > { %v4884_v63 = vmul.f32 %v6375_v52, %v4879_v55 }
0x151d   : > { %v4890_v40 = vpack.c.bf16 %v4884_v63, %v4884_v63  ;;  %v5803_v1 = vpack.c.bf16 %v4884_v63, %v9082_v33  ;;  %v6490_v33 = vld [vmem:[#allocation5] ss:$16 sps:$4 sm:$0xff]  }
0x151f   : > { %5811 = vst [vmem:[#allocation4 + $0x10] sm:$0xff] %v5803_v1   ;;  %4924 = vmatmul.mubr.bf16.vlgmr.msra.gmra.mxu0 %v4890_v40  ;;  %4965 = vmatmul.mubr.bf16.vlgmr.msra.gmra.mxu1 %v4890_v40 }
0x1520   : > { %5002 = vmatpush1.bf16.msra.mxu0 %v9086_v30  ;;  %5043 = vmatpush1.bf16.msra.mxu1 %v9089_v7  ;;  %v6491_v30 = vld [vmem:[#allocation5 + $0x8] ss:$16 sps:$4 sm:$0xff]   ;;  %v9478_v7 = vld [vmem:[#allocation31_spill] sm:$0xff] }
0x1521   : > { %5003 = vmatprep.subr.bf16.mxu0 %v9092_v18  ;;  %5044 = vmatprep.subr.bf16.mxu1 %v9095_v9  ;;  %v3917_v18 = vadd.f32 %v9478_v7, %v8859_v47 }
0x1522   : > { %5033 = vmatprep.mubr.bf16.mxu0 %v9369_v34  ;;  %5074 = vmatprep.mubr.bf16.mxu1 %v9369_v34  ;;  %v6488_v34 = vld [vmem:[#allocation5 + $0x4] ss:$16 sps:$4 sm:$0xff]  }
0x1524   : > { %5004 = vmatpush1.bf16.msra.mxu0 %v9100_v39  ;;  %5045 = vmatpush1.bf16.msra.mxu1 %v9103_v41  ;;  %v9479_v41 = vld [vmem:[#allocation35_spill] sm:$0xff] }
0x1525   : > { %5005 = vmatprep.subr.bf16.mxu0 %v9106_v17  ;;  %5046 = vmatprep.subr.bf16.mxu1 %v9109_v3  ;;  %v3919_v17 = vadd.f32 %v9479_v41, %v8866_v27 }
0x1528   : > { %5006 = vmatpush1.bf16.msra.mxu0 %v9112_v2  ;;  %5047 = vmatpush1.bf16.msra.mxu1 %v9115_v25 }
0x1529   : > { %5007 = vmatprep.subr.bf16.mxu0 %v9118_v6  ;;  %5048 = vmatprep.subr.bf16.mxu1 %v9121_v32  ;;  %v9480_v6 = vld [vmem:[#allocation30_spill] sm:$0xff] }
0x152a   : > { %v3990_v32 = vadd.f32 %v9480_v6, %v8874_v13 }
0x152c   : > { %5008 = vmatpush1.bf16.msra.mxu0 %v9124_v51  ;;  %5049 = vmatpush1.bf16.msra.mxu1 %v9127_v5 }
0x152d   : > { %5009 = vmatprep.subr.bf16.mxu0 %v9130_v49  ;;  %5050 = vmatprep.subr.bf16.mxu1 %v9133_v61 }
0x1530   : > { %5010 = vmatpush1.bf16.msra.mxu0 %v9136_v8  ;;  %5051 = vmatpush1.bf16.msra.mxu1 %v9139_v31 }
0x1531   : > { %5011 = vmatprep.subr.bf16.mxu0 %v9142_v46  ;;  %5052 = vmatprep.subr.bf16.mxu1 %v9145_v24 }
0x1534   : > { %5012 = vmatpush1.bf16.msra.mxu0 %v9148_v29  ;;  %5053 = vmatpush1.bf16.msra.mxu1 %v9151_v37  ;;  %v9481_v29 = vld [vmem:[#allocation32_spill] sm:$0xff] }
0x1535   : > { %5013 = vmatprep.subr.bf16.mxu0 %v9154_v58  ;;  %5054 = vmatprep.subr.bf16.mxu1 %v9157_v62  ;;  %v3992_v37 = vadd.f32 %v9481_v29, %v8879_v56 }
0x1538   : > { %5014 = vmatpush1.bf16.msra.mxu0 %v9160_v0  ;;  %5055 = vmatpush1.bf16.msra.mxu1 %v9163_v57 }
0x1539   : > { %5015 = vmatprep.subr.bf16.mxu0 %v6488_v34  ;;  %5056 = vmatprep.subr.bf16.mxu1 %v6489_v4  ;;  %v9485_v4 = vld [vmem:[#allocation36_spill] sm:$0xff] }
0x153a   : > { %v3996_v27 = vadd.f32 %v9485_v4, %v8879_v56 }
0x153c   : > { %5016 = vmatpush1.bf16.msra.mxu0 %v6490_v33  ;;  %5057 = vmatpush1.bf16.msra.mxu1 %v6491_v30 }
0x15df   : > { %v4925_v9 = vpop.f32.mrf.mxu0  ;;  %v4966_v39 = vpop.f32.mrf.mxu1 }
0x15e0   : > { %v4973_v3 = vadd.f32 %v4925_v9, %v3917_v18  ;;  %v4975_v8 = vadd.f32 %v4966_v39, %v3990_v32 }
0x15e1   : > { %v4927_v2 = vpop.f32.mrf.mxu0  ;;  %v4968_v25 = vpop.f32.mrf.mxu1 }
0x15e2   : > { %v4977_v51 = vmul.f32 0.5, %v4973_v3  ;;  %v4974_v5 = vadd.f32 %v4927_v2, %v3919_v17  ;;  %v4976_v58 = vadd.f32 %v4968_v25, %v3992_v37 }
0x15e3   : > { %v4929_v49 = vpop.f32.mrf.mxu0  ;;  %v4970_v61 = vpop.f32.mrf.mxu1 }
0x15e4   : > { %6376 = vtanh.f32 %v4977_v51  ;;  %v4981_v31 = vmul.f32 0.5, %v4974_v5  ;;  %v4986_v62 = vmul.f32 0.5, %v4976_v58 }
0x15e5   : > { %v4930_v46 = vpop.f32.mrf.mxu0  ;;  %v4971_v24 = vpop.f32.mrf.mxu1 }
0x15e6   : > { %6378 = vtanh.f32 %v4981_v31 }
0x15e7   : > { %6380 = vtanh.f32 %v4975_v8 }
0x15e8   : > { %6382 = vtanh.f32 %v4986_v62 }
0x15f1   : > { %v6377_v0 = vpop.eup %6376 }
0x15f2   : > { %v4979_v57 = vmul.f32 0.5, %v6377_v0 }
0x15f3   : > { %v6379_v50 = vpop.eup %6378 }
0x15f4   : > { %v4980_v36 = vadd.f32 0.5, %v4979_v57  ;;  %v4983_v16 = vmul.f32 0.5, %v6379_v50  ;;  %v6381_v42 = vpop.eup %6380 }
0x15f5   : > { %v6383_v14 = vpop.eup %6382 }
0x15f6   : > { %v4984_v22 = vadd.f32 0.5, %v4983_v16  ;;  %v4991_v26 = vmul.f32 %v6381_v42, %v4980_v36  ;;  %v4988_v59 = vmul.f32 0.5, %v6383_v14 }
0x15f8   : > { %v4990_v12 = vmul.f32 %v4984_v22, %v9179_v53  ;;  %v4989_v38 = vadd.f32 0.5, %v4988_v59  ;;  %v9484_v53 = vld [vmem:[#allocation34_spill] sm:$0xff] }
0x15f9   : > { %v3994_v44 = vadd.f32 %v9484_v53, %v8874_v13 }
0x15fa   : > { %v4992_v21 = vadd.f32 %v4991_v26, %v4990_v12 }
0x15fc   : > { %6384 = vtanh.f32 %v4992_v21 }
0x1609   : > { %v6385_v11 = vpop.eup %6384 }
0x160a   : > { %v4994_v23 = vmul.f32 %v6385_v11, %v4989_v38 }
0x160c   : > { %v5000_v45 = vpack.c.bf16 %v4994_v23, %v4994_v23 }
0x160e   : > { %5034 = vmatmul.mubr.bf16.vlgmr.msra.gmra.mxu0 %v5000_v45  ;;  %5075 = vmatmul.mubr.bf16.vlgmr.msra.gmra.mxu1 %v5000_v45 }
0x16ce   : > { %v5035_v35 = vpop.f32.mrf.mxu0  ;;  %v5076_v15 = vpop.f32.mrf.mxu1 }
0x16cf   : > { %v5083_v60 = vadd.f32 %v5035_v35, %v3921_v10  ;;  %v5085_v40 = vadd.f32 %v5076_v15, %v3994_v44 }
0x16d0   : > { %v5037_v20 = vpop.f32.mrf.mxu0  ;;  %v5078_v19 = vpop.f32.mrf.mxu1 }
0x16d1   : > { %v5087_v28 = vmul.f32 0.5, %v5083_v60  ;;  %v5084_v55 = vadd.f32 %v5037_v20, %v3923_v43  ;;  %v5086_v33 = vadd.f32 %v5078_v19, %v3996_v27 }
0x16d2   : > { %v5039_v52 = vpop.f32.mrf.mxu0  ;;  %v5080_v63 = vpop.f32.mrf.mxu1 }
0x16d3   : > { %6386 = vtanh.f32 %v5087_v28  ;;  %v5091_v1 = vmul.f32 0.5, %v5084_v55  ;;  %v5096_v30 = vmul.f32 0.5, %v5086_v33 }
0x16d4   : > { %v5040_v34 = vpop.f32.mrf.mxu0  ;;  %v5081_v47 = vpop.f32.mrf.mxu1 }
0x16d5   : > { %6388 = vtanh.f32 %v5091_v1 }
0x16d6   : > { %6390 = vtanh.f32 %v5085_v40 }
0x16d7   : > { %6392 = vtanh.f32 %v5096_v30 }
0x16e0   : > { %v6387_v7 = vpop.eup %6386 }
0x16e1   : > { %v5089_v18 = vmul.f32 0.5, %v6387_v7 }
0x16e2   : > { %v6389_v9 = vpop.eup %6388 }
0x16e3   : > { %v5090_v13 = vadd.f32 0.5, %v5089_v18  ;;  %v5093_v39 = vmul.f32 0.5, %v6389_v9  ;;  %v6391_v41 = vpop.eup %6390 }
0x16e4   : > { %v6393_v6 = vpop.eup %6392 }
0x16e5   : > { %v5094_v17 = vadd.f32 0.5, %v5093_v39  ;;  %v5101_v3 = vmul.f32 %v6391_v41, %v5090_v13  ;;  %v5098_v56 = vmul.f32 0.5, %v6393_v6 }
0x16e7   : > { %v5100_v2 = vmul.f32 %v5094_v17, %v4992_v21  ;;  %v5099_v32 = vadd.f32 0.5, %v5098_v56 }
0x16e9   : > { %v5102_v25 = vadd.f32 %v5101_v3, %v5100_v2 }
0x16eb   : > { %6394 = vtanh.f32 %v5102_v25  ;;  %5746 = vst [vmem:[%s9319_s16 + $0x10] sm:$0xff] %v5102_v25 }
0x16f8   : > { %v6395_v51 = vpop.eup %6394 }
0x16f9   : > { %v5104_v5 = vmul.f32 %v6395_v51, %v5099_v32 }
0x16fb   : > { %5745 = vst [vmem:[%s9318_s15 + $0x10] sm:$0xff] %v5104_v5  ;;  %v5808_v49 = vpack.c.bf16 %v5104_v5, %v4994_v23 }
0x16fd   : > { %5812 = vst [vmem:[#allocation4 + $0x18] sm:$0xff] %v5808_v49  }
0x16fe PF: > { %v6492_v61 = vld [vmem:[%s6758_s0 + $0x74] ss:$8 sps:$4 sm:$0xff]   ;;  %v6494_v8 = vld [vmem:[%s6758_s0 + $0x70] ss:$8 sps:$4 sm:$0xff]   ;;  %v6578_v31 = vmov 0   ;;  %v6516_v12 = vld [vmem:[#allocation4] sm:$0xff]   ;;  %v5184_v38 = vlaneseq }
0x16ff   : > { %5330 = vmatprep.mubr.bf16.mxu0 %v6578_v31  ;;  %5350 = vmatprep.mubr.bf16.mxu1 %v6578_v31  ;;  %v6495_v46 = vld [vmem:[%s6758_s0 + $0x64] ss:$8 sps:$4 sm:$0xff]   ;;  %v6497_v24 = vld [vmem:[%s6758_s0 + $0x60] ss:$8 sps:$4 sm:$0xff]   ;;  %v6498_v29 = vld [vmem:[%s6758_s0 + $0x54] ss:$8 sps:$4 sm:$0xff]  }
0x1700   : > { %5298 = vmatprep.subr.bf16.mxu0 %v6492_v61  ;;  %5813 = vmatprep.subr.bf16.mxu1 %v6492_v61  ;;  %v6500_v37 = vld [vmem:[%s6758_s0 + $0x50] ss:$8 sps:$4 sm:$0xff]   ;;  %v6501_v58 = vld [vmem:[%s6758_s0 + $0x44] ss:$8 sps:$4 sm:$0xff]   ;;  %v6503_v62 = vld [vmem:[%s6758_s0 + $0x40] ss:$8 sps:$4 sm:$0xff]  }
0x1701   : > { %5299 = vmatpush1.bf16.msra.mxu0 %v6494_v8  ;;  %5821 = vmatpush1.bf16.msra.mxu1 %v6494_v8  ;;  %v6504_v0 = vld [vmem:[%s6758_s0 + $0x34] ss:$8 sps:$4 sm:$0xff]   ;;  %v6506_v57 = vld [vmem:[%s6758_s0 + $0x30] ss:$8 sps:$4 sm:$0xff]   ;;  %v6507_v50 = vld [vmem:[%s6758_s0 + $0x24] ss:$8 sps:$4 sm:$0xff]  }
0x1702   : > { %5300 = vmatprep.subr.bf16.mxu0 %v6495_v46  ;;  %5814 = vmatprep.subr.bf16.mxu1 %v6495_v46  ;;  %v6509_v36 = vld [vmem:[%s6758_s0 + $0x20] ss:$8 sps:$4 sm:$0xff]   ;;  %v6510_v16 = vld [vmem:[%s6758_s0 + $0x14] ss:$8 sps:$4 sm:$0xff]   ;;  %v6512_v42 = vld [vmem:[%s6758_s0 + $0x10] ss:$8 sps:$4 sm:$0xff]  }
0x1703   : > { %v6513_v22 = vld [vmem:[%s6758_s0 + $0x4] ss:$8 sps:$4 sm:$0xff]   ;;  %v6515_v26 = vld [vmem:[%s6758_s0] ss:$8 sps:$4 sm:$0xff]   ;;  %v6517_v21 = vld [vmem:[#allocation4 + $0x10] sm:$0xff]   ;;  %v5185_v11 = vshrl.u32 %v5184_v38, 7 }
0x1704   : > { %v6518_v14 = vld [vmem:[#allocation4 + $0x8] sm:$0xff]   ;;  %v6519_v59 = vld [vmem:[#allocation4 + $0x18] sm:$0xff]   ;;  %v5182_v45 = vld [vmem:[%s640_s30] sm:$0x3]  ;;  %s9486_s23 = sld [smem:[#allocation12_spill]] }
0x1705   : > { %5301 = vmatpush1.bf16.msra.mxu0 %v6497_v24  ;;  %5822 = vmatpush1.bf16.msra.mxu1 %v6497_v24  ;;  %v5186_v23 = vsub.s32 0, %v5185_v11  ;;  %v5190_v48 = vsub.s32 1, %v5185_v11 }
0x1706   : > { %5302 = vmatprep.subr.bf16.mxu0 %v6498_v29  ;;  %5815 = vmatprep.subr.bf16.mxu1 %v6498_v29 }
0x1707   : > { %v5187_v10 = vrot.slane %v5182_v45, %v5186_v23  ;;  %v5191_v35 = vrot.slane %v5182_v45, %v5190_v48 }
0x1709   : > { %5303 = vmatpush1.bf16.msra.mxu0 %v6500_v37  ;;  %5823 = vmatpush1.bf16.msra.mxu1 %v6500_v37 }
0x170a   : > { %5304 = vmatprep.subr.bf16.mxu0 %v6501_v58  ;;  %5816 = vmatprep.subr.bf16.mxu1 %v6501_v58  ;;  %p9487_p8 = scmp.ne.s32.totalorder %s9486_s23, 0 }
0x170b   : > { %s5789_s30 = sshll.u32 (%p9487_p8), %s6680_s24, 4  ;;  %s9488_s27 = sld [smem:[#allocation41_spill]] (%p9487_p8) }
0x170d   : > { %5305 = vmatpush1.bf16.msra.mxu0 %v6503_v62  ;;  %5824 = vmatpush1.bf16.msra.mxu1 %v6503_v62 }
0x170e   : > { %5306 = vmatprep.subr.bf16.mxu0 %v6504_v0  ;;  %5817 = vmatprep.subr.bf16.mxu1 %v6504_v0 }
0x1711   : > { %5307 = vmatpush1.bf16.msra.mxu0 %v6506_v57  ;;  %5825 = vmatpush1.bf16.msra.mxu1 %v6506_v57  ;;  %s5396_s17 = scalar_lea.vmem (%p9487_p8), %s9488_s27, %s5789_s30 }
0x1712   : > { %5308 = vmatprep.subr.bf16.mxu0 %v6507_v50  ;;  %5818 = vmatprep.subr.bf16.mxu1 %v6507_v50 }
0x1715   : > { %5309 = vmatpush1.bf16.msra.mxu0 %v6509_v36  ;;  %5826 = vmatpush1.bf16.msra.mxu1 %v6509_v36 }
0x1716   : > { %5310 = vmatprep.subr.bf16.mxu0 %v6510_v16  ;;  %5819 = vmatprep.subr.bf16.mxu1 %v6510_v16 }
0x1719   : > { %5311 = vmatpush1.bf16.msra.mxu0 %v6512_v42  ;;  %5827 = vmatpush1.bf16.msra.mxu1 %v6512_v42 }
0x171a   : > { %5312 = vmatprep.subr.bf16.mxu0 %v6513_v22  ;;  %5820 = vmatprep.subr.bf16.mxu1 %v6513_v22 }
0x171d   : > { %5313 = vmatpush1.bf16.msra.mxu0 %v6515_v26  ;;  %5828 = vmatpush1.bf16.msra.mxu1 %v6515_v26 }
0x1720   : > { %5331 = vmatmul.mubr.bf16.vlgmr.msra.gmra.mxu0 %v6516_v12  ;;  %5351 = vmatmul.mubr.bf16.vlgmr.msra.gmra.mxu1 %v6517_v21 }
0x1721   : > { %5340 = vmatprep.mubr.bf16.mxu0 %v6578_v31  ;;  %5360 = vmatprep.mubr.bf16.mxu1 %v6578_v31 }
0x1728   : > { %5341 = vmatmul.mubr.bf16.gmra.mxu0 %v6518_v14  ;;  %5361 = vmatmul.mubr.bf16.gmra.mxu1 %v6519_v59 }
0x17e0   : > { %v5332_v15 = vpop.f32.mrf.mxu0  ;;  %v5352_v54 = vpop.f32.mrf.mxu1 }
0x17e1   : > { %v5333_v43 = vadd.f32 %v5332_v15, %v5187_v10  ;;  %v5353_v60 = vadd.f32 %v5352_v54, %v5187_v10 }
0x17e2   : > { %v5334_v20 = vpop.f32.mrf.mxu0  ;;  %v5354_v19 = vpop.f32.mrf.mxu1 }
0x17e3   : > { %5371 = vst [vmem:[%s6760_s18] sm:$0xff] %v5333_v43  ;;  %5379 = vst [vmem:[%s6760_s18 + $0x40] sm:$0xff] %v5353_v60  ;;  %v5335_v53 = vadd.f32 %v5334_v20, %v5191_v35  ;;  %v5355_v44 = vadd.f32 %v5354_v19, %v5191_v35 }
0x17e4   : > { %v5336_v28 = vpop.f32.mrf.mxu0  ;;  %v5356_v55 = vpop.f32.mrf.mxu1 }
0x17e5   : > { %5372 = vst [vmem:[%s6760_s18 + $0x8] sm:$0xff] %v5335_v53  ;;  %5380 = vst [vmem:[%s6760_s18 + $0x48] sm:$0xff] %v5355_v44  ;;  %v5337_v52 = vadd.f32 %v5336_v28, %v5187_v10  ;;  %v5357_v63 = vadd.f32 %v5356_v55, %v5187_v10 }
0x17e6   : > { %v5338_v40 = vpop.f32.mrf.mxu0  ;;  %v5358_v1 = vpop.f32.mrf.mxu1 }
0x17e7   : > { %5373 = vst [vmem:[%s6760_s18 + $0x10] sm:$0xff] %v5337_v52  ;;  %5381 = vst [vmem:[%s6760_s18 + $0x50] sm:$0xff] %v5357_v63  ;;  %v5339_v34 = vadd.f32 %v5338_v40, %v5191_v35  ;;  %v5359_v47 = vadd.f32 %v5358_v1, %v5191_v35 }
0x17e8   : > { %v5342_v4 = vpop.f32.mrf.mxu0  ;;  %v5362_v27 = vpop.f32.mrf.mxu1 }
0x17e9   : > { %5374 = vst [vmem:[%s6760_s18 + $0x18] sm:$0xff] %v5339_v34  ;;  %5382 = vst [vmem:[%s6760_s18 + $0x58] sm:$0xff] %v5359_v47  ;;  %v5343_v33 = vadd.f32 %v5342_v4, %v5187_v10  ;;  %v5363_v30 = vadd.f32 %v5362_v27, %v5187_v10 }
0x17ea   : > { %v5344_v7 = vpop.f32.mrf.mxu0  ;;  %v5364_v18 = vpop.f32.mrf.mxu1  ;;  %v5409_v32 = vld [vmem:[%s6760_s18] sm:$0xff] (%p9487_p8) }
0x17eb   : > { %5375 = vst [vmem:[%s6760_s18 + $0x20] sm:$0xff] %v5343_v33  ;;  %5383 = vst [vmem:[%s6760_s18 + $0x60] sm:$0xff] %v5363_v30  ;;  %v5345_v9 = vadd.f32 %v5344_v7, %v5191_v35  ;;  %v5365_v13 = vadd.f32 %v5364_v18, %v5191_v35  ;;  %v5425_v24 = vld [vmem:[%s6760_s18 + $0x40] sm:$0xff] (%p9487_p8) }
0x17ec   : > { %v5346_v39 = vpop.f32.mrf.mxu0  ;;  %v5366_v41 = vpop.f32.mrf.mxu1  ;;  %v5411_v51 = vld [vmem:[%s6760_s18 + $0x8] sm:$0xff] (%p9487_p8)  ;;  %5410 = vst [vmem:[%s5396_s17] sm:$0xff] (%p9487_p8), %v5409_v32  ;;  %5426 = vst [vmem:[%s5396_s17 + $0xc0] sm:$0xff] (%p9487_p8), %v5425_v24 }
0x17ed   : > { %5376 = vst [vmem:[%s6760_s18 + $0x28] sm:$0xff] %v5345_v9  ;;  %5384 = vst [vmem:[%s6760_s18 + $0x68] sm:$0xff] %v5365_v13  ;;  %v5347_v17 = vadd.f32 %v5346_v39, %v5187_v10  ;;  %v5367_v3 = vadd.f32 %v5366_v41, %v5187_v10  ;;  %5393 = sbr.rel (!%p9487_p8) target bundleno = 6139 (0x17fb), region = 126  ;;  %v5427_v29 = vld [vmem:[%s6760_s18 + $0x48] sm:$0xff] (%p9487_p8) }
0x17ee   : > { %v5348_v2 = vpop.f32.mrf.mxu0  ;;  %v5368_v25 = vpop.f32.mrf.mxu1  ;;  %v5413_v5 = vld [vmem:[%s6760_s18 + $0x10] sm:$0xff] (%p9487_p8)  ;;  %5412 = vst [vmem:[%s5396_s17 + $0x8] sm:$0xff] (%p9487_p8), %v5411_v51  ;;  %5428 = vst [vmem:[%s5396_s17 + $0xc8] sm:$0xff] (%p9487_p8), %v5427_v29 }
0x17ef   : > { %5377 = vst [vmem:[%s6760_s18 + $0x30] sm:$0xff] %v5347_v17  ;;  %5385 = vst [vmem:[%s6760_s18 + $0x70] sm:$0xff] %v5367_v3  ;;  %v5349_v6 = vadd.f32 %v5348_v2, %v5191_v35  ;;  %v5369_v56 = vadd.f32 %v5368_v25, %v5191_v35  ;;  %v5429_v37 = vld [vmem:[%s6760_s18 + $0x50] sm:$0xff] (%p9487_p8) }
0x17f0   : > { %v5415_v49 = vld [vmem:[%s6760_s18 + $0x18] sm:$0xff] (%p9487_p8)  ;;  %5414 = vst [vmem:[%s5396_s17 + $0x30] sm:$0xff] (%p9487_p8), %v5413_v5  ;;  %5430 = vst [vmem:[%s5396_s17 + $0xf0] sm:$0xff] (%p9487_p8), %v5429_v37 }
0x17f1   : > { %5378 = vst [vmem:[%s6760_s18 + $0x38] sm:$0xff] %v5349_v6  ;;  %5386 = vst [vmem:[%s6760_s18 + $0x78] sm:$0xff] %v5369_v56  ;;  %v5431_v58 = vld [vmem:[%s6760_s18 + $0x58] sm:$0xff] (%p9487_p8) }
0x17f2   : > { %v5417_v61 = vld [vmem:[%s6760_s18 + $0x20] sm:$0xff]  ;;  %5416 = vst [vmem:[%s5396_s17 + $0x38] sm:$0xff] %v5415_v49  ;;  %5432 = vst [vmem:[%s5396_s17 + $0xf8] sm:$0xff] %v5431_v58 }
0x17f3   : > { %5418 = vst [vmem:[%s5396_s17 + $0x60] sm:$0xff] %v5417_v61  ;;  %v5433_v62 = vld [vmem:[%s6760_s18 + $0x60] sm:$0xff] }
0x17f4   : > { %v5419_v8 = vld [vmem:[%s6760_s18 + $0x28] sm:$0xff]  ;;  %5434 = vst [vmem:[%s5396_s17 + $0x120] sm:$0xff] %v5433_v62 }
0x17f5   : > { %5420 = vst [vmem:[%s5396_s17 + $0x68] sm:$0xff] %v5419_v8  ;;  %v5435_v0 = vld [vmem:[%s6760_s18 + $0x68] sm:$0xff] }
0x17f6   : > { %v5421_v31 = vld [vmem:[%s6760_s18 + $0x30] sm:$0xff]  ;;  %5436 = vst [vmem:[%s5396_s17 + $0x128] sm:$0xff] %v5435_v0 }
0x17f7   : > { %5422 = vst [vmem:[%s5396_s17 + $0x90] sm:$0xff] %v5421_v31  ;;  %v5437_v57 = vld [vmem:[%s6760_s18 + $0x70] sm:$0xff] }
0x17f8   : > { %v5423_v46 = vld [vmem:[%s6760_s18 + $0x38] sm:$0xff]  ;;  %5438 = vst [vmem:[%s5396_s17 + $0x150] sm:$0xff] %v5437_v57 }
0x17f9   : > { %5424 = vst [vmem:[%s5396_s17 + $0x98] sm:$0xff] %v5423_v46  ;;  %v5439_v50 = vld [vmem:[%s6760_s18 + $0x78] sm:$0xff] }
0x17fa   : > { %5440 = vst [vmem:[%s5396_s17 + $0x158] sm:$0xff] %v5439_v50 }
0x17fb PF: > { %s9489_s23 = sld [smem:[#allocation10_spill]]  ;;  %s9491_s21 = smov %s6568_s22 }
0x17fc   : > { %s9490_s24 = sld [smem:[#allocation11_spill]] }
0x1801   : > { %p25_p9 = scmp.ge.s32.totalorder %s9489_s23, 5  }
0x1802   : > { %s9492_s22 = smov %s9490_s24 }
0x1803   :  { %27 = sbr.rel (!%p25_p9) target bundleno = 6 (0x6), region = 222 }
0x1808   :  { %5468 = vsyncpa [#allocation6], 1 }
0x1809   :  { %5470 = vsyncpa [#allocation6 + $0x1], 1 }

</bundles_post_ra>
